<compile_context>
chip_gen: v6e
topology: v6e:2x2x1
jax: 0.10.0
libtpu: 0.0.40
codegen_flags: <defaults>
</compile_context>

<pallas_src>
import functools

import jax
import jax.numpy as jnp
from jax.experimental import pallas as pl
from jax.experimental.pallas import tpu as pltpu


def _round_up(x, m):
    return (x + m - 1) // m * m


# ---------------------------------------------------------------------------
# Fused GEMM:  out = maybe_relu((A @ W) * scale + shift)
#   A, W hit the MXU in bf16; accumulation and the epilogue are f32.
#   Used for conv-as-GEMM (scale/shift = folded BatchNorm) and Linear layers
#   (scale = 1, shift = bias).
# ---------------------------------------------------------------------------
def _mm_single_k_kernel(a_ref, w_ref, s_ref, b_ref, o_ref, *, relu):
    acc = jnp.dot(a_ref[...], w_ref[...], preferred_element_type=jnp.float32)
    y = acc * s_ref[...] + b_ref[...]
    if relu:
        y = jnp.maximum(y, 0.0)
    o_ref[...] = y.astype(o_ref.dtype)


def _mm_multi_k_kernel(a_ref, w_ref, s_ref, b_ref, o_ref, acc_ref, *, relu):
    @pl.when(pl.program_id(2) == 0)
    def _():
        acc_ref[...] = jnp.zeros_like(acc_ref)

    acc_ref[...] += jnp.dot(a_ref[...], w_ref[...],
                            preferred_element_type=jnp.float32)

    @pl.when(pl.program_id(2) == pl.num_programs(2) - 1)
    def _():
        y = acc_ref[...] * s_ref[...] + b_ref[...]
        if relu:
            y = jnp.maximum(y, 0.0)
        o_ref[...] = y.astype(o_ref.dtype)


_SINGLE_K_MAX = 2048       # largest contraction handled without a k grid axis


def _choose_tm(M):
    for t in (512, 256, 128):
        if M % t == 0:
            return t, M
    if M <= 1024:
        return M, M                         # full-dim escape (e.g. batch rows)
    return 128, _round_up(M, 128)


def _choose_tn(N):
    if N <= 512:
        return N, N                         # full-dim escape / already aligned
    for t in (512, 256, 128):
        if N % t == 0:
            return t, N
    return 128, _round_up(N, 128)


def _choose_tk(K):
    if K <= _SINGLE_K_MAX:
        return K, K, True
    for t in (2048, 1024, 512, 256):
        if K % t == 0:
            return t, K, False
    return 512, _round_up(K, 512), False


def fused_matmul(a, w, scale, shift, relu, out_dtype=jnp.float32):
    """a:(M,K), w:(K,N), scale/shift:(N,) f32 -> (M,N) out_dtype."""
    M, K = a.shape
    K2, N = w.shape
    assert K == K2
    tm, Mp = _choose_tm(M)
    tn, Np = _choose_tn(N)
    tk, Kp, single_k = _choose_tk(K)

    a = a.astype(jnp.bfloat16)
    w = w.astype(jnp.bfloat16)
    if (Mp, Kp) != (M, K):
        a = jnp.pad(a, ((0, Mp - M), (0, Kp - K)))
    if (Kp, Np) != (K, N):
        w = jnp.pad(w, ((0, Kp - K), (0, Np - N)))
    s = scale.astype(jnp.float32)
    b = shift.astype(jnp.float32)
    if Np != N:
        s = jnp.pad(s, ((0, Np - N),))
        b = jnp.pad(b, ((0, Np - N),))
    s = s.reshape(1, Np)
    b = b.reshape(1, Np)

    if single_k:
        out = pl.pallas_call(
            functools.partial(_mm_single_k_kernel, relu=relu),
            out_shape=jax.ShapeDtypeStruct((Mp, Np), out_dtype),
            grid_spec=pltpu.PrefetchScalarGridSpec(
                num_scalar_prefetch=0,
                grid=(Mp // tm, Np // tn),
                in_specs=[
                    pl.BlockSpec((tm, Kp), lambda i, j: (i, 0)),
                    pl.BlockSpec((Kp, tn), lambda i, j: (0, j)),
                    pl.BlockSpec((1, tn), lambda i, j: (0, j)),
                    pl.BlockSpec((1, tn), lambda i, j: (0, j)),
                ],
                out_specs=pl.BlockSpec((tm, tn), lambda i, j: (i, j)),
            ),
            compiler_params=pltpu.CompilerParams(
                dimension_semantics=("parallel", "parallel")),
        )(a, w, s, b)
    else:
        out = pl.pallas_call(
            functools.partial(_mm_multi_k_kernel, relu=relu),
            out_shape=jax.ShapeDtypeStruct((Mp, Np), out_dtype),
            grid_spec=pltpu.PrefetchScalarGridSpec(
                num_scalar_prefetch=0,
                grid=(Mp // tm, Np // tn, Kp // tk),
                in_specs=[
                    pl.BlockSpec((tm, tk), lambda i, j, k: (i, k)),
                    pl.BlockSpec((tk, tn), lambda i, j, k: (k, j)),
                    pl.BlockSpec((1, tn), lambda i, j, k: (0, j)),
                    pl.BlockSpec((1, tn), lambda i, j, k: (0, j)),
                ],
                out_specs=pl.BlockSpec((tm, tn), lambda i, j, k: (i, j)),
                scratch_shapes=[pltpu.VMEM((tm, tn), jnp.float32)],
            ),
            compiler_params=pltpu.CompilerParams(
                dimension_semantics=("parallel", "parallel", "arbitrary")),
        )(a, w, s, b)

    if (Mp, Np) != (M, N):
        out = out[:M, :N]
    return out


# ---------------------------------------------------------------------------
# 2x2 stride-2 max pool: single input read, 2x2 reduction done inside the kernel.
#   Input is viewed (free row-major regrouping) as (N*Ho, 2, Wo, 2*C):
#     * H-pair max  -> max of the two leading-dim slabs (cheap VPU max)
#     * W-pair max  -> max of the two C-wide lane groups of the 2*C lane dim
# ---------------------------------------------------------------------------
def _maxpool_kernel(x_ref, o_ref):
    c = o_ref.shape[-1]
    top = x_ref[:, 0, :, :]              # even input rows   (tb, Wo, 2C)
    bot = x_ref[:, 1, :, :]              # odd  input rows
    r = jnp.maximum(top, bot)
    o_ref[...] = jnp.maximum(r[:, :, :c], r[:, :, c:])   # even vs odd columns


def maxpool2x2(x, row_block_bytes=2 << 20):
    """x: (N, H, W, C) -> (N, H//2, W//2, C). H and W must be even."""
    N, H, W, C = x.shape
    assert H % 2 == 0 and W % 2 == 0, "2x2/stride-2 pool requires even H and W"
    Ho, Wo = H // 2, W // 2
    R = N * Ho
    # Row-major regrouping (no data reordering): H -> (Ho, 2) and (W, C) -> (Wo, 2*C).
    x4 = x.reshape(R, 2, Wo, 2 * C)
    per_row = 2 * Wo * 2 * C * jnp.dtype(x.dtype).itemsize
    max_rows = max(1, row_block_bytes // per_row)
    tb = 1
    for cand in range(min(R, max_rows), 0, -1):
        if R % cand == 0:
            tb = cand
            break
    out = pl.pallas_call(
        _maxpool_kernel,
        out_shape=jax.ShapeDtypeStruct((R, Wo, C), x.dtype),
        grid_spec=pltpu.PrefetchScalarGridSpec(
            num_scalar_prefetch=0,
            grid=(R // tb,),
            in_specs=[pl.BlockSpec((tb, 2, Wo, 2 * C), lambda i: (i, 0, 0, 0))],
            out_specs=pl.BlockSpec((tb, Wo, C), lambda i: (i, 0, 0)),
        ),
        compiler_params=pltpu.CompilerParams(dimension_semantics=("parallel",)),
    )(x4)
    return out.reshape(N, Ho, Wo, C)


# ---------------------------------------------------------------------------
# Conv3x3 (stride 1, SAME) + BatchNorm (inference running stats) + ReLU
# ---------------------------------------------------------------------------
def conv3x3_bn_relu(x, w, bias, gamma, beta, mean, var, eps=1e-5):
    """x: (N,H,W,Cin) bf16, w: (3,3,Cin,Cout) (torch weight as KH,KW,Cin,Cout)."""
    N, H, W, Cin = x.shape
    Cout = w.shape[-1]
    xp = jnp.pad(x, ((0, 0), (1, 1), (1, 1), (0, 0)))
    # TODO(synk): implicit-GEMM (9 shifted accumulations inside the kernel) would avoid
    # materializing this 9x im2col copy in HBM; kept as plain-JAX glue for robustness.
    patches = [xp[:, ky:ky + H, kx:kx + W, :]
               for ky in range(3) for kx in range(3)]
    a = jnp.concatenate(patches, axis=-1).reshape(N * H * W, 9 * Cin)
    w_mat = w.reshape(9 * Cin, Cout)
    scale = gamma / jnp.sqrt(var + eps)                  # fold BN into GEMM epilogue
    shift = beta + (bias - mean) * scale
    y = fused_matmul(a, w_mat, scale, shift, relu=True, out_dtype=jnp.bfloat16)
    return y.reshape(N, H, W, Cout)


# ---------------------------------------------------------------------------
# Parameter init (deterministic, synthetic) and forward pass
# ---------------------------------------------------------------------------
def init_params(key, in_h, in_w):
    params = {"convs": []}
    chans = [(3, 32), (32, 64), (64, 128), (128, 256)]
    for li, (cin, cout) in enumerate(chans):
        k = jax.random.fold_in(key, li)
        kw, kb, kg, kbe, km, kv = jax.random.split(k, 6)
        fan_in = 9 * cin
        params["convs"].append({
            "w": jax.random.normal(kw, (3, 3, cin, cout), jnp.float32) / jnp.sqrt(fan_in),
            "b": jax.random.normal(kb, (cout,), jnp.float32) * 0.05,
            "gamma": 0.5 + jax.random.uniform(kg, (cout,), jnp.float32),
            "beta": jax.random.normal(kbe, (cout,), jnp.float32) * 0.05,
            "mean": jax.random.normal(km, (cout,), jnp.float32) * 0.05,
            "var": 0.5 + jax.random.uniform(kv, (cout,), jnp.float32),
        })
    feat_h, feat_w = in_h // 16, in_w // 16
    flat = 256 * feat_h * feat_w       # original module: 256 * 40 * 30 (640x480 input)
    dims = [(flat, 512), (512, 128), (128, 2)]
    for li, (din, dout) in enumerate(dims):
        k = jax.random.fold_in(key, 100 + li)
        kw, kb = jax.random.split(k)
        params[f"fc{li + 1}_w"] = jax.random.normal(kw, (din, dout), jnp.float32) / jnp.sqrt(din)
        params[f"fc{li + 1}_b"] = jax.random.normal(kb, (dout,), jnp.float32) * 0.05
    # fc1 rows are defined in PyTorch's (C,H,W)-flatten order; permute them once at init
    # to NHWC order so the runtime flatten needs no activation transpose.
    idx = jnp.arange(flat).reshape(256, feat_h, feat_w).transpose(1, 2, 0).reshape(-1)
    params["fc1_w_nhwc"] = params.pop("fc1_w")[idx]
    return params


def fall_detection_forward(params, x_nchw):
    """x_nchw: (N, 3, H, W) float32 -> logits (N, 2) float32."""
    x = jnp.transpose(x_nchw, (0, 2, 3, 1)).astype(jnp.bfloat16)   # NCHW -> NHWC, bf16
    for cp in params["convs"]:
        x = conv3x3_bn_relu(x, cp["w"], cp["b"], cp["gamma"], cp["beta"],
                            cp["mean"], cp["var"])
        x = maxpool2x2(x)
        # TODO(synk): fusing the 2x2 pool into the conv GEMM epilogue would remove a
        # full write+read of each pre-pool feature map.
    n = x.shape[0]
    feat = x.reshape(n, -1)        # NHWC flatten; fc1 weight rows pre-permuted to match
    # classifier; Dropout is identity at inference
    # TODO(synk): dropout masks / BatchNorm batch-statistics (training mode) not modeled.
    h = fused_matmul(feat, params["fc1_w_nhwc"],
                     jnp.ones((512,), jnp.float32), params["fc1_b"],
                     relu=True, out_dtype=jnp.bfloat16)
    h = fused_matmul(h, params["fc2_w"],
                     jnp.ones((128,), jnp.float32), params["fc2_b"],
                     relu=True, out_dtype=jnp.bfloat16)
    out = fused_matmul(h, params["fc3_w"],
                       jnp.ones((2,), jnp.float32), params["fc3_b"],
                       relu=False, out_dtype=jnp.float32)
    return out


if __name__ == "__main__":
    key = jax.random.PRNGKey(0)
    N, C, H, W = 2, 3, 64, 48   # scaled-down stand-in for the original 3x640x480 input
    kx, kp = jax.random.split(key)
    x = jax.random.normal(kx, (N, C, H, W), jnp.float32)
    params = init_params(kp, H, W)

    logits = jax.jit(fall_detection_forward)(params, x)
    logits = jax.block_until_ready(logits)
    assert logits.shape == (N, 2) and logits.dtype == jnp.float32
    assert bool(jnp.all(jnp.isfinite(logits)))
    print("KERNEL_OK")
</pallas_src>

<mosaic_0001>
module attributes {stable_mosaic.version = 11 : i64} {
  func.func @_mm_single_k_kernel(%arg0: i32, %arg1: i32, %arg2: memref<512x27xbf16, #tpu.memory_space<vmem>>, %arg3: memref<27x32xbf16, #tpu.memory_space<vmem>>, %arg4: memref<1x32xf32, #tpu.memory_space<vmem>>, %arg5: memref<1x32xf32, #tpu.memory_space<vmem>>, %arg6: memref<512x32xbf16, #tpu.memory_space<vmem>>) attributes {dimension_semantics = [#tpu.dimension_semantics<parallel>, #tpu.dimension_semantics<parallel>], iteration_bounds = array<i64: 12, 1>, scalar_prefetch = 0 : i64, scratch_operands = 0 : i64, tpu.core_type = #tpu.core_type<tc>, window_params = [{transform_indices = @transform_0, window_bounds = array<i64: 512, 27>}, {transform_indices = @transform_1, window_bounds = array<i64: 27, 32>}, {transform_indices = @transform_2, window_bounds = array<i64: 1, 32>}, {transform_indices = @transform_3, window_bounds = array<i64: 1, 32>}, {transform_indices = @transform_4, window_bounds = array<i64: 512, 32>}]} {
    %c0 = arith.constant 0 : index
    %c0_0 = arith.constant 0 : index
    %0 = vector.load %arg2[%c0, %c0_0] : memref<512x27xbf16, #tpu.memory_space<vmem>>, vector<512x27xbf16>
    %c0_1 = arith.constant 0 : index
    %c0_2 = arith.constant 0 : index
    %1 = vector.load %arg3[%c0_1, %c0_2] : memref<27x32xbf16, #tpu.memory_space<vmem>>, vector<27x32xbf16>
    %cst = arith.constant dense<0.000000e+00> : vector<512x32xf32>
    %2 = tpu.matmul %0, %1, %cst {dimension_numbers = #tpu.dot_dimension_numbers<[1], [0], [0], [1], [0, 0, 1, 1], [], []>} : vector<512x27xbf16>, vector<27x32xbf16>, vector<512x32xf32> -> vector<512x32xf32>
    %c0_3 = arith.constant 0 : index
    %c0_4 = arith.constant 0 : index
    %3 = vector.load %arg4[%c0_3, %c0_4] : memref<1x32xf32, #tpu.memory_space<vmem>>, vector<1x32xf32>
    %4 = vector.broadcast %3 : vector<1x32xf32> to vector<512x32xf32>
    %5 = arith.mulf %2, %4 : vector<512x32xf32>
    %c0_5 = arith.constant 0 : index
    %c0_6 = arith.constant 0 : index
    %6 = vector.load %arg5[%c0_5, %c0_6] : memref<1x32xf32, #tpu.memory_space<vmem>>, vector<1x32xf32>
    %7 = vector.broadcast %6 : vector<1x32xf32> to vector<512x32xf32>
    %8 = arith.addf %5, %7 : vector<512x32xf32>
    %cst_7 = arith.constant 0.000000e+00 : f32
    %9 = vector.broadcast %cst_7 : f32 to vector<512x32xf32>
    %10 = arith.maximumf %8, %9 : vector<512x32xf32>
    %11 = arith.truncf %10 : vector<512x32xf32> to vector<512x32xbf16>
    %c0_8 = arith.constant 0 : index
    %c0_9 = arith.constant 0 : index
    %12 = vector.load %arg6[%c0_8, %c0_9] : memref<512x32xbf16, #tpu.memory_space<vmem>>, vector<512x32xbf16>
    tpu.vector_store %arg6[%c0_8, %c0_9], %11 {strides = array<i32>} : memref<512x32xbf16, #tpu.memory_space<vmem>>, vector<512x32xbf16>,
    return
  }
  func.func @transform_0(%arg0: i32, %arg1: i32) -> (i32, i32) {
    %c0_i32 = arith.constant 0 : i32
    %c0_i32_0 = arith.constant 0 : i32
    return %arg0, %c0_i32 : i32, i32
  }
  func.func @transform_1(%arg0: i32, %arg1: i32) -> (i32, i32) {
    %c0_i32 = arith.constant 0 : i32
    %c0_i32_0 = arith.constant 0 : i32
    return %c0_i32, %arg1 : i32, i32
  }
  func.func @transform_2(%arg0: i32, %arg1: i32) -> (i32, i32) {
    %c0_i32 = arith.constant 0 : i32
    %c0_i32_0 = arith.constant 0 : i32
    return %c0_i32, %arg1 : i32, i32
  }
  func.func @transform_3(%arg0: i32, %arg1: i32) -> (i32, i32) {
    %c0_i32 = arith.constant 0 : i32
    %c0_i32_0 = arith.constant 0 : i32
    return %c0_i32, %arg1 : i32, i32
  }
  func.func @transform_4(%arg0: i32, %arg1: i32) -> (i32, i32) {
    %c0_i32 = arith.constant 0 : i32
    return %arg0, %arg1 : i32, i32
  }
}

module attributes {stable_mosaic.version = 11 : i64} {
  func.func @_maxpool_kernel(%arg0: i32, %arg1: memref<64x2x24x64xbf16, #tpu.memory_space<vmem>>, %arg2: memref<64x24x32xbf16, #tpu.memory_space<vmem>>) attributes {dimension_semantics = [#tpu.dimension_semantics<parallel>], iteration_bounds = array<i64: 1>, scalar_prefetch = 0 : i64, scratch_operands = 0 : i64, tpu.core_type = #tpu.core_type<tc>, window_params = [{transform_indices = @transform_0, window_bounds = array<i64: 64, 2, 24, 64>}, {transform_indices = @transform_1, window_bounds = array<i64: 64, 24, 32>}]} {
    %c0 = arith.constant 0 : index
    %c0_0 = arith.constant 0 : index
    %c0_1 = arith.constant 0 : index
    %c0_2 = arith.constant 0 : index
    %0 = vector.load %arg1[%c0, %c0_0, %c0_1, %c0_2] : memref<64x2x24x64xbf16, #tpu.memory_space<vmem>>, vector<64x1x24x64xbf16>
    %1 = vector.shape_cast %0 : vector<64x1x24x64xbf16> to vector<64x24x64xbf16>
    %c0_3 = arith.constant 0 : index
    %c1 = arith.constant 1 : index
    %c0_4 = arith.constant 0 : index
    %c0_5 = arith.constant 0 : index
    %2 = vector.load %arg1[%c0_3, %c1, %c0_4, %c0_5] : memref<64x2x24x64xbf16, #tpu.memory_space<vmem>>, vector<64x1x24x64xbf16>
    %3 = vector.shape_cast %2 : vector<64x1x24x64xbf16> to vector<64x24x64xbf16>
    %4 = arith.maximumf %1, %3 : vector<64x24x64xbf16>
    %5 = vector.extract_strided_slice %4 {offsets = [0, 0, 0], sizes = [64, 24, 32], strides = [1, 1, 1]} : vector<64x24x64xbf16> to vector<64x24x32xbf16>
    %6 = vector.extract_strided_slice %4 {offsets = [0, 0, 32], sizes = [64, 24, 32], strides = [1, 1, 1]} : vector<64x24x64xbf16> to vector<64x24x32xbf16>
    %7 = arith.maximumf %5, %6 : vector<64x24x32xbf16>
    %c0_6 = arith.constant 0 : index
    %c0_7 = arith.constant 0 : index
    %c0_8 = arith.constant 0 : index
    %8 = vector.load %arg2[%c0_6, %c0_7, %c0_8] : memref<64x24x32xbf16, #tpu.memory_space<vmem>>, vector<64x24x32xbf16>
    tpu.vector_store %arg2[%c0_6, %c0_7, %c0_8], %7 {strides = array<i32>} : memref<64x24x32xbf16, #tpu.memory_space<vmem>>, vector<64x24x32xbf16>,
    return
  }
  func.func @transform_0(%arg0: i32) -> (i32, i32, i32, i32) {
    %c0_i32 = arith.constant 0 : i32
    %c0_i32_0 = arith.constant 0 : i32
    %c0_i32_1 = arith.constant 0 : i32
    %c0_i32_2 = arith.constant 0 : i32
    return %arg0, %c0_i32, %c0_i32_0, %c0_i32_1 : i32, i32, i32, i32
  }
  func.func @transform_1(%arg0: i32) -> (i32, i32, i32) {
    %c0_i32 = arith.constant 0 : i32
    %c0_i32_0 = arith.constant 0 : i32
    %c0_i32_1 = arith.constant 0 : i32
    return %arg0, %c0_i32, %c0_i32_0 : i32, i32, i32
  }
}

module attributes {stable_mosaic.version = 11 : i64} {
  func.func @_mm_single_k_kernel(%arg0: i32, %arg1: i32, %arg2: memref<512x288xbf16, #tpu.memory_space<vmem>>, %arg3: memref<288x64xbf16, #tpu.memory_space<vmem>>, %arg4: memref<1x64xf32, #tpu.memory_space<vmem>>, %arg5: memref<1x64xf32, #tpu.memory_space<vmem>>, %arg6: memref<512x64xbf16, #tpu.memory_space<vmem>>) attributes {dimension_semantics = [#tpu.dimension_semantics<parallel>, #tpu.dimension_semantics<parallel>], iteration_bounds = array<i64: 3, 1>, scalar_prefetch = 0 : i64, scratch_operands = 0 : i64, tpu.core_type = #tpu.core_type<tc>, window_params = [{transform_indices = @transform_0, window_bounds = array<i64: 512, 288>}, {transform_indices = @transform_1, window_bounds = array<i64: 288, 64>}, {transform_indices = @transform_2, window_bounds = array<i64: 1, 64>}, {transform_indices = @transform_3, window_bounds = array<i64: 1, 64>}, {transform_indices = @transform_4, window_bounds = array<i64: 512, 64>}]} {
    %c0 = arith.constant 0 : index
    %c0_0 = arith.constant 0 : index
    %0 = vector.load %arg2[%c0, %c0_0] : memref<512x288xbf16, #tpu.memory_space<vmem>>, vector<512x288xbf16>
    %c0_1 = arith.constant 0 : index
    %c0_2 = arith.constant 0 : index
    %1 = vector.load %arg3[%c0_1, %c0_2] : memref<288x64xbf16, #tpu.memory_space<vmem>>, vector<288x64xbf16>
    %cst = arith.constant dense<0.000000e+00> : vector<512x64xf32>
    %2 = tpu.matmul %0, %1, %cst {dimension_numbers = #tpu.dot_dimension_numbers<[1], [0], [0], [1], [0, 0, 1, 1], [], []>} : vector<512x288xbf16>, vector<288x64xbf16>, vector<512x64xf32> -> vector<512x64xf32>
    %c0_3 = arith.constant 0 : index
    %c0_4 = arith.constant 0 : index
    %3 = vector.load %arg4[%c0_3, %c0_4] : memref<1x64xf32, #tpu.memory_space<vmem>>, vector<1x64xf32>
    %4 = vector.broadcast %3 : vector<1x64xf32> to vector<512x64xf32>
    %5 = arith.mulf %2, %4 : vector<512x64xf32>
    %c0_5 = arith.constant 0 : index
    %c0_6 = arith.constant 0 : index
    %6 = vector.load %arg5[%c0_5, %c0_6] : memref<1x64xf32, #tpu.memory_space<vmem>>, vector<1x64xf32>
    %7 = vector.broadcast %6 : vector<1x64xf32> to vector<512x64xf32>
    %8 = arith.addf %5, %7 : vector<512x64xf32>
    %cst_7 = arith.constant 0.000000e+00 : f32
    %9 = vector.broadcast %cst_7 : f32 to vector<512x64xf32>
    %10 = arith.maximumf %8, %9 : vector<512x64xf32>
    %11 = arith.truncf %10 : vector<512x64xf32> to vector<512x64xbf16>
    %c0_8 = arith.constant 0 : index
    %c0_9 = arith.constant 0 : index
    %12 = vector.load %arg6[%c0_8, %c0_9] : memref<512x64xbf16, #tpu.memory_space<vmem>>, vector<512x64xbf16>
    tpu.vector_store %arg6[%c0_8, %c0_9], %11 {strides = array<i32>} : memref<512x64xbf16, #tpu.memory_space<vmem>>, vector<512x64xbf16>,
    return
  }
  func.func @transform_0(%arg0: i32, %arg1: i32) -> (i32, i32) {
    %c0_i32 = arith.constant 0 : i32
    %c0_i32_0 = arith.constant 0 : i32
    return %arg0, %c0_i32 : i32, i32
  }
  func.func @transform_1(%arg0: i32, %arg1: i32) -> (i32, i32) {
    %c0_i32 = arith.constant 0 : i32
    %c0_i32_0 = arith.constant 0 : i32
    return %c0_i32, %arg1 : i32, i32
  }
  func.func @transform_2(%arg0: i32, %arg1: i32) -> (i32, i32) {
    %c0_i32 = arith.constant 0 : i32
    %c0_i32_0 = arith.constant 0 : i32
    return %c0_i32, %arg1 : i32, i32
  }
  func.func @transform_3(%arg0: i32, %arg1: i32) -> (i32, i32) {
    %c0_i32 = arith.constant 0 : i32
    %c0_i32_0 = arith.constant 0 : i32
    return %c0_i32, %arg1 : i32, i32
  }
  func.func @transform_4(%arg0: i32, %arg1: i32) -> (i32, i32) {
    %c0_i32 = arith.constant 0 : i32
    return %arg0, %arg1 : i32, i32
  }
}

module attributes {stable_mosaic.version = 11 : i64} {
  func.func @_maxpool_kernel(%arg0: i32, %arg1: memref<32x2x12x128xbf16, #tpu.memory_space<vmem>>, %arg2: memref<32x12x64xbf16, #tpu.memory_space<vmem>>) attributes {dimension_semantics = [#tpu.dimension_semantics<parallel>], iteration_bounds = array<i64: 1>, scalar_prefetch = 0 : i64, scratch_operands = 0 : i64, tpu.core_type = #tpu.core_type<tc>, window_params = [{transform_indices = @transform_0, window_bounds = array<i64: 32, 2, 12, 128>}, {transform_indices = @transform_1, window_bounds = array<i64: 32, 12, 64>}]} {
    %c0 = arith.constant 0 : index
    %c0_0 = arith.constant 0 : index
    %c0_1 = arith.constant 0 : index
    %c0_2 = arith.constant 0 : index
    %0 = vector.load %arg1[%c0, %c0_0, %c0_1, %c0_2] : memref<32x2x12x128xbf16, #tpu.memory_space<vmem>>, vector<32x1x12x128xbf16>
    %1 = vector.shape_cast %0 : vector<32x1x12x128xbf16> to vector<32x12x128xbf16>
    %c0_3 = arith.constant 0 : index
    %c1 = arith.constant 1 : index
    %c0_4 = arith.constant 0 : index
    %c0_5 = arith.constant 0 : index
    %2 = vector.load %arg1[%c0_3, %c1, %c0_4, %c0_5] : memref<32x2x12x128xbf16, #tpu.memory_space<vmem>>, vector<32x1x12x128xbf16>
    %3 = vector.shape_cast %2 : vector<32x1x12x128xbf16> to vector<32x12x128xbf16>
    %4 = arith.maximumf %1, %3 : vector<32x12x128xbf16>
    %5 = vector.extract_strided_slice %4 {offsets = [0, 0, 0], sizes = [32, 12, 64], strides = [1, 1, 1]} : vector<32x12x128xbf16> to vector<32x12x64xbf16>
    %6 = vector.extract_strided_slice %4 {offsets = [0, 0, 64], sizes = [32, 12, 64], strides = [1, 1, 1]} : vector<32x12x128xbf16> to vector<32x12x64xbf16>
    %7 = arith.maximumf %5, %6 : vector<32x12x64xbf16>
    %c0_6 = arith.constant 0 : index
    %c0_7 = arith.constant 0 : index
    %c0_8 = arith.constant 0 : index
    %8 = vector.load %arg2[%c0_6, %c0_7, %c0_8] : memref<32x12x64xbf16, #tpu.memory_space<vmem>>, vector<32x12x64xbf16>
    tpu.vector_store %arg2[%c0_6, %c0_7, %c0_8], %7 {strides = array<i32>} : memref<32x12x64xbf16, #tpu.memory_space<vmem>>, vector<32x12x64xbf16>,
    return
  }
  func.func @transform_0(%arg0: i32) -> (i32, i32, i32, i32) {
    %c0_i32 = arith.constant 0 : i32
    %c0_i32_0 = arith.constant 0 : i32
    %c0_i32_1 = arith.constant 0 : i32
    %c0_i32_2 = arith.constant 0 : i32
    return %arg0, %c0_i32, %c0_i32_0, %c0_i32_1 : i32, i32, i32, i32
  }
  func.func @transform_1(%arg0: i32) -> (i32, i32, i32) {
    %c0_i32 = arith.constant 0 : i32
    %c0_i32_0 = arith.constant 0 : i32
    %c0_i32_1 = arith.constant 0 : i32
    return %arg0, %c0_i32, %c0_i32_0 : i32, i32, i32
  }
}

module attributes {stable_mosaic.version = 11 : i64} {
  func.func @_mm_single_k_kernel(%arg0: i32, %arg1: i32, %arg2: memref<128x576xbf16, #tpu.memory_space<vmem>>, %arg3: memref<576x128xbf16, #tpu.memory_space<vmem>>, %arg4: memref<1x128xf32, #tpu.memory_space<vmem>>, %arg5: memref<1x128xf32, #tpu.memory_space<vmem>>, %arg6: memref<128x128xbf16, #tpu.memory_space<vmem>>) attributes {dimension_semantics = [#tpu.dimension_semantics<parallel>, #tpu.dimension_semantics<parallel>], iteration_bounds = array<i64: 3, 1>, scalar_prefetch = 0 : i64, scratch_operands = 0 : i64, tpu.core_type = #tpu.core_type<tc>, window_params = [{transform_indices = @transform_0, window_bounds = array<i64: 128, 576>}, {transform_indices = @transform_1, window_bounds = array<i64: 576, 128>}, {transform_indices = @transform_2, window_bounds = array<i64: 1, 128>}, {transform_indices = @transform_3, window_bounds = array<i64: 1, 128>}, {transform_indices = @transform_4, window_bounds = array<i64: 128, 128>}]} {
    %c0 = arith.constant 0 : index
    %c0_0 = arith.constant 0 : index
    %0 = vector.load %arg2[%c0, %c0_0] : memref<128x576xbf16, #tpu.memory_space<vmem>>, vector<128x576xbf16>
    %c0_1 = arith.constant 0 : index
    %c0_2 = arith.constant 0 : index
    %1 = vector.load %arg3[%c0_1, %c0_2] : memref<576x128xbf16, #tpu.memory_space<vmem>>, vector<576x128xbf16>
    %cst = arith.constant dense<0.000000e+00> : vector<128x128xf32>
    %2 = tpu.matmul %0, %1, %cst {dimension_numbers = #tpu.dot_dimension_numbers<[1], [0], [0], [1], [0, 0, 1, 1], [], []>} : vector<128x576xbf16>, vector<576x128xbf16>, vector<128x128xf32> -> vector<128x128xf32>
    %c0_3 = arith.constant 0 : index
    %c0_4 = arith.constant 0 : index
    %3 = vector.load %arg4[%c0_3, %c0_4] : memref<1x128xf32, #tpu.memory_space<vmem>>, vector<1x128xf32>
    %4 = vector.broadcast %3 : vector<1x128xf32> to vector<128x128xf32>
    %5 = arith.mulf %2, %4 : vector<128x128xf32>
    %c0_5 = arith.constant 0 : index
    %c0_6 = arith.constant 0 : index
    %6 = vector.load %arg5[%c0_5, %c0_6] : memref<1x128xf32, #tpu.memory_space<vmem>>, vector<1x128xf32>
    %7 = vector.broadcast %6 : vector<1x128xf32> to vector<128x128xf32>
    %8 = arith.addf %5, %7 : vector<128x128xf32>
    %cst_7 = arith.constant 0.000000e+00 : f32
    %9 = vector.broadcast %cst_7 : f32 to vector<128x128xf32>
    %10 = arith.maximumf %8, %9 : vector<128x128xf32>
    %11 = arith.truncf %10 : vector<128x128xf32> to vector<128x128xbf16>
    %c0_8 = arith.constant 0 : index
    %c0_9 = arith.constant 0 : index
    %12 = vector.load %arg6[%c0_8, %c0_9] : memref<128x128xbf16, #tpu.memory_space<vmem>>, vector<128x128xbf16>
    tpu.vector_store %arg6[%c0_8, %c0_9], %11 {strides = array<i32>} : memref<128x128xbf16, #tpu.memory_space<vmem>>, vector<128x128xbf16>,
    return
  }
  func.func @transform_0(%arg0: i32, %arg1: i32) -> (i32, i32) {
    %c0_i32 = arith.constant 0 : i32
    %c0_i32_0 = arith.constant 0 : i32
    return %arg0, %c0_i32 : i32, i32
  }
  func.func @transform_1(%arg0: i32, %arg1: i32) -> (i32, i32) {
    %c0_i32 = arith.constant 0 : i32
    %c0_i32_0 = arith.constant 0 : i32
    return %c0_i32, %arg1 : i32, i32
  }
  func.func @transform_2(%arg0: i32, %arg1: i32) -> (i32, i32) {
    %c0_i32 = arith.constant 0 : i32
    %c0_i32_0 = arith.constant 0 : i32
    return %c0_i32, %arg1 : i32, i32
  }
  func.func @transform_3(%arg0: i32, %arg1: i32) -> (i32, i32) {
    %c0_i32 = arith.constant 0 : i32
    %c0_i32_0 = arith.constant 0 : i32
    return %c0_i32, %arg1 : i32, i32
  }
  func.func @transform_4(%arg0: i32, %arg1: i32) -> (i32, i32) {
    %c0_i32 = arith.constant 0 : i32
    return %arg0, %arg1 : i32, i32
  }
}

module attributes {stable_mosaic.version = 11 : i64} {
  func.func @_maxpool_kernel(%arg0: i32, %arg1: memref<16x2x6x256xbf16, #tpu.memory_space<vmem>>, %arg2: memref<16x6x128xbf16, #tpu.memory_space<vmem>>) attributes {dimension_semantics = [#tpu.dimension_semantics<parallel>], iteration_bounds = array<i64: 1>, scalar_prefetch = 0 : i64, scratch_operands = 0 : i64, tpu.core_type = #tpu.core_type<tc>, window_params = [{transform_indices = @transform_0, window_bounds = array<i64: 16, 2, 6, 256>}, {transform_indices = @transform_1, window_bounds = array<i64: 16, 6, 128>}]} {
    %c0 = arith.constant 0 : index
    %c0_0 = arith.constant 0 : index
    %c0_1 = arith.constant 0 : index
    %c0_2 = arith.constant 0 : index
    %0 = vector.load %arg1[%c0, %c0_0, %c0_1, %c0_2] : memref<16x2x6x256xbf16, #tpu.memory_space<vmem>>, vector<16x1x6x256xbf16>
    %1 = vector.shape_cast %0 : vector<16x1x6x256xbf16> to vector<16x6x256xbf16>
    %c0_3 = arith.constant 0 : index
    %c1 = arith.constant 1 : index
    %c0_4 = arith.constant 0 : index
    %c0_5 = arith.constant 0 : index
    %2 = vector.load %arg1[%c0_3, %c1, %c0_4, %c0_5] : memref<16x2x6x256xbf16, #tpu.memory_space<vmem>>, vector<16x1x6x256xbf16>
    %3 = vector.shape_cast %2 : vector<16x1x6x256xbf16> to vector<16x6x256xbf16>
    %4 = arith.maximumf %1, %3 : vector<16x6x256xbf16>
    %5 = vector.extract_strided_slice %4 {offsets = [0, 0, 0], sizes = [16, 6, 128], strides = [1, 1, 1]} : vector<16x6x256xbf16> to vector<16x6x128xbf16>
    %6 = vector.extract_strided_slice %4 {offsets = [0, 0, 128], sizes = [16, 6, 128], strides = [1, 1, 1]} : vector<16x6x256xbf16> to vector<16x6x128xbf16>
    %7 = arith.maximumf %5, %6 : vector<16x6x128xbf16>
    %c0_6 = arith.constant 0 : index
    %c0_7 = arith.constant 0 : index
    %c0_8 = arith.constant 0 : index
    %8 = vector.load %arg2[%c0_6, %c0_7, %c0_8] : memref<16x6x128xbf16, #tpu.memory_space<vmem>>, vector<16x6x128xbf16>
    tpu.vector_store %arg2[%c0_6, %c0_7, %c0_8], %7 {strides = array<i32>} : memref<16x6x128xbf16, #tpu.memory_space<vmem>>, vector<16x6x128xbf16>,
    return
  }
  func.func @transform_0(%arg0: i32) -> (i32, i32, i32, i32) {
    %c0_i32 = arith.constant 0 : i32
    %c0_i32_0 = arith.constant 0 : i32
    %c0_i32_1 = arith.constant 0 : i32
    %c0_i32_2 = arith.constant 0 : i32
    return %arg0, %c0_i32, %c0_i32_0, %c0_i32_1 : i32, i32, i32, i32
  }
  func.func @transform_1(%arg0: i32) -> (i32, i32, i32) {
    %c0_i32 = arith.constant 0 : i32
    %c0_i32_0 = arith.constant 0 : i32
    %c0_i32_1 = arith.constant 0 : i32
    return %arg0, %c0_i32, %c0_i32_0 : i32, i32, i32
  }
}

module attributes {stable_mosaic.version = 11 : i64} {
  func.func @_mm_single_k_kernel(%arg0: i32, %arg1: i32, %arg2: memref<96x1152xbf16, #tpu.memory_space<vmem>>, %arg3: memref<1152x256xbf16, #tpu.memory_space<vmem>>, %arg4: memref<1x256xf32, #tpu.memory_space<vmem>>, %arg5: memref<1x256xf32, #tpu.memory_space<vmem>>, %arg6: memref<96x256xbf16, #tpu.memory_space<vmem>>) attributes {dimension_semantics = [#tpu.dimension_semantics<parallel>, #tpu.dimension_semantics<parallel>], iteration_bounds = array<i64: 1, 1>, scalar_prefetch = 0 : i64, scratch_operands = 0 : i64, tpu.core_type = #tpu.core_type<tc>, window_params = [{transform_indices = @transform_0, window_bounds = array<i64: 96, 1152>}, {transform_indices = @transform_1, window_bounds = array<i64: 1152, 256>}, {transform_indices = @transform_2, window_bounds = array<i64: 1, 256>}, {transform_indices = @transform_3, window_bounds = array<i64: 1, 256>}, {transform_indices = @transform_4, window_bounds = array<i64: 96, 256>}]} {
    %c0 = arith.constant 0 : index
    %c0_0 = arith.constant 0 : index
    %0 = vector.load %arg2[%c0, %c0_0] : memref<96x1152xbf16, #tpu.memory_space<vmem>>, vector<96x1152xbf16>
    %c0_1 = arith.constant 0 : index
    %c0_2 = arith.constant 0 : index
    %1 = vector.load %arg3[%c0_1, %c0_2] : memref<1152x256xbf16, #tpu.memory_space<vmem>>, vector<1152x256xbf16>
    %cst = arith.constant dense<0.000000e+00> : vector<96x256xf32>
    %2 = tpu.matmul %0, %1, %cst {dimension_numbers = #tpu.dot_dimension_numbers<[1], [0], [0], [1], [0, 0, 1, 1], [], []>} : vector<96x1152xbf16>, vector<1152x256xbf16>, vector<96x256xf32> -> vector<96x256xf32>
    %c0_3 = arith.constant 0 : index
    %c0_4 = arith.constant 0 : index
    %3 = vector.load %arg4[%c0_3, %c0_4] : memref<1x256xf32, #tpu.memory_space<vmem>>, vector<1x256xf32>
    %4 = vector.broadcast %3 : vector<1x256xf32> to vector<96x256xf32>
    %5 = arith.mulf %2, %4 : vector<96x256xf32>
    %c0_5 = arith.constant 0 : index
    %c0_6 = arith.constant 0 : index
    %6 = vector.load %arg5[%c0_5, %c0_6] : memref<1x256xf32, #tpu.memory_space<vmem>>, vector<1x256xf32>
    %7 = vector.broadcast %6 : vector<1x256xf32> to vector<96x256xf32>
    %8 = arith.addf %5, %7 : vector<96x256xf32>
    %cst_7 = arith.constant 0.000000e+00 : f32
    %9 = vector.broadcast %cst_7 : f32 to vector<96x256xf32>
    %10 = arith.maximumf %8, %9 : vector<96x256xf32>
    %11 = arith.truncf %10 : vector<96x256xf32> to vector<96x256xbf16>
    %c0_8 = arith.constant 0 : index
    %c0_9 = arith.constant 0 : index
    %12 = vector.load %arg6[%c0_8, %c0_9] : memref<96x256xbf16, #tpu.memory_space<vmem>>, vector<96x256xbf16>
    tpu.vector_store %arg6[%c0_8, %c0_9], %11 {strides = array<i32>} : memref<96x256xbf16, #tpu.memory_space<vmem>>, vector<96x256xbf16>,
    return
  }
  func.func @transform_0(%arg0: i32, %arg1: i32) -> (i32, i32) {
    %c0_i32 = arith.constant 0 : i32
    %c0_i32_0 = arith.constant 0 : i32
    return %arg0, %c0_i32 : i32, i32
  }
  func.func @transform_1(%arg0: i32, %arg1: i32) -> (i32, i32) {
    %c0_i32 = arith.constant 0 : i32
    %c0_i32_0 = arith.constant 0 : i32
    return %c0_i32, %arg1 : i32, i32
  }
  func.func @transform_2(%arg0: i32, %arg1: i32) -> (i32, i32) {
    %c0_i32 = arith.constant 0 : i32
    %c0_i32_0 = arith.constant 0 : i32
    return %c0_i32, %arg1 : i32, i32
  }
  func.func @transform_3(%arg0: i32, %arg1: i32) -> (i32, i32) {
    %c0_i32 = arith.constant 0 : i32
    %c0_i32_0 = arith.constant 0 : i32
    return %c0_i32, %arg1 : i32, i32
  }
  func.func @transform_4(%arg0: i32, %arg1: i32) -> (i32, i32) {
    %c0_i32 = arith.constant 0 : i32
    return %arg0, %arg1 : i32, i32
  }
}

module attributes {stable_mosaic.version = 11 : i64} {
  func.func @_maxpool_kernel(%arg0: i32, %arg1: memref<8x2x3x512xbf16, #tpu.memory_space<vmem>>, %arg2: memref<8x3x256xbf16, #tpu.memory_space<vmem>>) attributes {dimension_semantics = [#tpu.dimension_semantics<parallel>], iteration_bounds = array<i64: 1>, scalar_prefetch = 0 : i64, scratch_operands = 0 : i64, tpu.core_type = #tpu.core_type<tc>, window_params = [{transform_indices = @transform_0, window_bounds = array<i64: 8, 2, 3, 512>}, {transform_indices = @transform_1, window_bounds = array<i64: 8, 3, 256>}]} {
    %c0 = arith.constant 0 : index
    %c0_0 = arith.constant 0 : index
    %c0_1 = arith.constant 0 : index
    %c0_2 = arith.constant 0 : index
    %0 = vector.load %arg1[%c0, %c0_0, %c0_1, %c0_2] : memref<8x2x3x512xbf16, #tpu.memory_space<vmem>>, vector<8x1x3x512xbf16>
    %1 = vector.shape_cast %0 : vector<8x1x3x512xbf16> to vector<8x3x512xbf16>
    %c0_3 = arith.constant 0 : index
    %c1 = arith.constant 1 : index
    %c0_4 = arith.constant 0 : index
    %c0_5 = arith.constant 0 : index
    %2 = vector.load %arg1[%c0_3, %c1, %c0_4, %c0_5] : memref<8x2x3x512xbf16, #tpu.memory_space<vmem>>, vector<8x1x3x512xbf16>
    %3 = vector.shape_cast %2 : vector<8x1x3x512xbf16> to vector<8x3x512xbf16>
    %4 = arith.maximumf %1, %3 : vector<8x3x512xbf16>
    %5 = vector.extract_strided_slice %4 {offsets = [0, 0, 0], sizes = [8, 3, 256], strides = [1, 1, 1]} : vector<8x3x512xbf16> to vector<8x3x256xbf16>
    %6 = vector.extract_strided_slice %4 {offsets = [0, 0, 256], sizes = [8, 3, 256], strides = [1, 1, 1]} : vector<8x3x512xbf16> to vector<8x3x256xbf16>
    %7 = arith.maximumf %5, %6 : vector<8x3x256xbf16>
    %c0_6 = arith.constant 0 : index
    %c0_7 = arith.constant 0 : index
    %c0_8 = arith.constant 0 : index
    %8 = vector.load %arg2[%c0_6, %c0_7, %c0_8] : memref<8x3x256xbf16, #tpu.memory_space<vmem>>, vector<8x3x256xbf16>
    tpu.vector_store %arg2[%c0_6, %c0_7, %c0_8], %7 {strides = array<i32>} : memref<8x3x256xbf16, #tpu.memory_space<vmem>>, vector<8x3x256xbf16>,
    return
  }
  func.func @transform_0(%arg0: i32) -> (i32, i32, i32, i32) {
    %c0_i32 = arith.constant 0 : i32
    %c0_i32_0 = arith.constant 0 : i32
    %c0_i32_1 = arith.constant 0 : i32
    %c0_i32_2 = arith.constant 0 : i32
    return %arg0, %c0_i32, %c0_i32_0, %c0_i32_1 : i32, i32, i32, i32
  }
  func.func @transform_1(%arg0: i32) -> (i32, i32, i32) {
    %c0_i32 = arith.constant 0 : i32
    %c0_i32_0 = arith.constant 0 : i32
    %c0_i32_1 = arith.constant 0 : i32
    return %arg0, %c0_i32, %c0_i32_0 : i32, i32, i32
  }
}

module attributes {stable_mosaic.version = 11 : i64} {
  func.func @_mm_multi_k_kernel(%arg0: i32, %arg1: i32, %arg2: i32, %arg3: memref<2x1024xbf16, #tpu.memory_space<vmem>>, %arg4: memref<1024x512xbf16, #tpu.memory_space<vmem>>, %arg5: memref<1x512xf32, #tpu.memory_space<vmem>>, %arg6: memref<1x512xf32, #tpu.memory_space<vmem>>, %arg7: memref<2x512xbf16, #tpu.memory_space<vmem>>, %arg8: memref<2x512xf32, #tpu.memory_space<vmem>>) attributes {dimension_semantics = [#tpu.dimension_semantics<parallel>, #tpu.dimension_semantics<parallel>, #tpu.dimension_semantics<arbitrary>], iteration_bounds = array<i64: 1, 1, 3>, scalar_prefetch = 0 : i64, scratch_operands = 1 : i64, tpu.core_type = #tpu.core_type<tc>, window_params = [{transform_indices = @transform_0, window_bounds = array<i64: 2, 1024>}, {transform_indices = @transform_1, window_bounds = array<i64: 1024, 512>}, {transform_indices = @transform_2, window_bounds = array<i64: 1, 512>}, {transform_indices = @transform_3, window_bounds = array<i64: 1, 512>}, {transform_indices = @transform_4, window_bounds = array<i64: 2, 512>}]} {
    %c0_i32 = arith.constant 0 : i32
    %0 = arith.cmpi eq, %arg2, %c0_i32 : i32
    %1 = arith.extui %0 : i1 to i32
    %c0_i32_0 = arith.constant 0 : i32
    %2 = arith.cmpi ne, %1, %c0_i32_0 : i32
    scf.if %2 {
      %cst_9 = arith.constant 0.000000e+00 : f32
      %12 = vector.broadcast %cst_9 : f32 to vector<2x512xf32>
      %c0_10 = arith.constant 0 : index
      %c0_11 = arith.constant 0 : index
      %13 = vector.load %arg8[%c0_10, %c0_11] : memref<2x512xf32, #tpu.memory_space<vmem>>, vector<2x512xf32>
      tpu.vector_store %arg8[%c0_10, %c0_11], %12 {strides = array<i32>} : memref<2x512xf32, #tpu.memory_space<vmem>>, vector<2x512xf32>,
    } else {
    }
    %c0 = arith.constant 0 : index
    %c0_1 = arith.constant 0 : index
    %3 = vector.load %arg8[%c0, %c0_1] : memref<2x512xf32, #tpu.memory_space<vmem>>, vector<2x512xf32>
    %c0_2 = arith.constant 0 : index
    %c0_3 = arith.constant 0 : index
    %4 = vector.load %arg3[%c0_2, %c0_3] : memref<2x1024xbf16, #tpu.memory_space<vmem>>, vector<2x1024xbf16>
    %c0_4 = arith.constant 0 : index
    %c0_5 = arith.constant 0 : index
    %5 = vector.load %arg4[%c0_4, %c0_5] : memref<1024x512xbf16, #tpu.memory_space<vmem>>, vector<1024x512xbf16>
    %cst = arith.constant dense<0.000000e+00> : vector<2x512xf32>
    %6 = tpu.matmul %4, %5, %cst {dimension_numbers = #tpu.dot_dimension_numbers<[1], [0], [0], [1], [0, 0, 1, 1], [], []>} : vector<2x1024xbf16>, vector<1024x512xbf16>, vector<2x512xf32> -> vector<2x512xf32>
    %7 = arith.addf %3, %6 : vector<2x512xf32>
    %c0_6 = arith.constant 0 : index
    %c0_7 = arith.constant 0 : index
    %8 = vector.load %arg8[%c0_6, %c0_7] : memref<2x512xf32, #tpu.memory_space<vmem>>, vector<2x512xf32>
    tpu.vector_store %arg8[%c0_6, %c0_7], %7 {strides = array<i32>} : memref<2x512xf32, #tpu.memory_space<vmem>>, vector<2x512xf32>,
    %c2_i32 = arith.constant 2 : i32
    %9 = arith.cmpi eq, %arg2, %c2_i32 : i32
    %10 = arith.extui %9 : i1 to i32
    %c0_i32_8 = arith.constant 0 : i32
    %11 = arith.cmpi ne, %10, %c0_i32_8 : i32
    scf.if %11 {
      %c0_9 = arith.constant 0 : index
      %c0_10 = arith.constant 0 : index
      %12 = vector.load %arg8[%c0_9, %c0_10] : memref<2x512xf32, #tpu.memory_space<vmem>>, vector<2x512xf32>
      %c0_11 = arith.constant 0 : index
      %c0_12 = arith.constant 0 : index
      %13 = vector.load %arg5[%c0_11, %c0_12] : memref<1x512xf32, #tpu.memory_space<vmem>>, vector<1x512xf32>
      %14 = vector.broadcast %13 : vector<1x512xf32> to vector<2x512xf32>
      %15 = arith.mulf %12, %14 : vector<2x512xf32>
      %c0_13 = arith.constant 0 : index
      %c0_14 = arith.constant 0 : index
      %16 = vector.load %arg6[%c0_13, %c0_14] : memref<1x512xf32, #tpu.memory_space<vmem>>, vector<1x512xf32>
      %17 = vector.broadcast %16 : vector<1x512xf32> to vector<2x512xf32>
      %18 = arith.addf %15, %17 : vector<2x512xf32>
      %cst_15 = arith.constant 0.000000e+00 : f32
      %19 = vector.broadcast %cst_15 : f32 to vector<2x512xf32>
      %20 = arith.maximumf %18, %19 : vector<2x512xf32>
      %21 = arith.truncf %20 : vector<2x512xf32> to vector<2x512xbf16>
      %c0_16 = arith.constant 0 : index
      %c0_17 = arith.constant 0 : index
      %22 = vector.load %arg7[%c0_16, %c0_17] : memref<2x512xbf16, #tpu.memory_space<vmem>>, vector<2x512xbf16>
      tpu.vector_store %arg7[%c0_16, %c0_17], %21 {strides = array<i32>} : memref<2x512xbf16, #tpu.memory_space<vmem>>, vector<2x512xbf16>,
    } else {
    }
    return
  }
  func.func @transform_0(%arg0: i32, %arg1: i32, %arg2: i32) -> (i32, i32) {
    %c0_i32 = arith.constant 0 : i32
    return %arg0, %arg2 : i32, i32
  }
  func.func @transform_1(%arg0: i32, %arg1: i32, %arg2: i32) -> (i32, i32) {
    %c0_i32 = arith.constant 0 : i32
    return %arg2, %arg1 : i32, i32
  }
  func.func @transform_2(%arg0: i32, %arg1: i32, %arg2: i32) -> (i32, i32) {
    %c0_i32 = arith.constant 0 : i32
    %c0_i32_0 = arith.constant 0 : i32
    return %c0_i32, %arg1 : i32, i32
  }
  func.func @transform_3(%arg0: i32, %arg1: i32, %arg2: i32) -> (i32, i32) {
    %c0_i32 = arith.constant 0 : i32
    %c0_i32_0 = arith.constant 0 : i32
    return %c0_i32, %arg1 : i32, i32
  }
  func.func @transform_4(%arg0: i32, %arg1: i32, %arg2: i32) -> (i32, i32) {
    %c0_i32 = arith.constant 0 : i32
    return %arg0, %arg1 : i32, i32
  }
}

module attributes {stable_mosaic.version = 11 : i64} {
  func.func @_mm_single_k_kernel(%arg0: i32, %arg1: i32, %arg2: memref<2x512xbf16, #tpu.memory_space<vmem>>, %arg3: memref<512x128xbf16, #tpu.memory_space<vmem>>, %arg4: memref<1x128xf32, #tpu.memory_space<vmem>>, %arg5: memref<1x128xf32, #tpu.memory_space<vmem>>, %arg6: memref<2x128xbf16, #tpu.memory_space<vmem>>) attributes {dimension_semantics = [#tpu.dimension_semantics<parallel>, #tpu.dimension_semantics<parallel>], iteration_bounds = array<i64: 1, 1>, scalar_prefetch = 0 : i64, scratch_operands = 0 : i64, tpu.core_type = #tpu.core_type<tc>, window_params = [{transform_indices = @transform_0, window_bounds = array<i64: 2, 512>}, {transform_indices = @transform_1, window_bounds = array<i64: 512, 128>}, {transform_indices = @transform_2, window_bounds = array<i64: 1, 128>}, {transform_indices = @transform_3, window_bounds = array<i64: 1, 128>}, {transform_indices = @transform_4, window_bounds = array<i64: 2, 128>}]} {
    %c0 = arith.constant 0 : index
    %c0_0 = arith.constant 0 : index
    %0 = vector.load %arg2[%c0, %c0_0] : memref<2x512xbf16, #tpu.memory_space<vmem>>, vector<2x512xbf16>
    %c0_1 = arith.constant 0 : index
    %c0_2 = arith.constant 0 : index
    %1 = vector.load %arg3[%c0_1, %c0_2] : memref<512x128xbf16, #tpu.memory_space<vmem>>, vector<512x128xbf16>
    %cst = arith.constant dense<0.000000e+00> : vector<2x128xf32>
    %2 = tpu.matmul %0, %1, %cst {dimension_numbers = #tpu.dot_dimension_numbers<[1], [0], [0], [1], [0, 0, 1, 1], [], []>} : vector<2x512xbf16>, vector<512x128xbf16>, vector<2x128xf32> -> vector<2x128xf32>
    %c0_3 = arith.constant 0 : index
    %c0_4 = arith.constant 0 : index
    %3 = vector.load %arg4[%c0_3, %c0_4] : memref<1x128xf32, #tpu.memory_space<vmem>>, vector<1x128xf32>
    %4 = vector.broadcast %3 : vector<1x128xf32> to vector<2x128xf32>
    %5 = arith.mulf %2, %4 : vector<2x128xf32>
    %c0_5 = arith.constant 0 : index
    %c0_6 = arith.constant 0 : index
    %6 = vector.load %arg5[%c0_5, %c0_6] : memref<1x128xf32, #tpu.memory_space<vmem>>, vector<1x128xf32>
    %7 = vector.broadcast %6 : vector<1x128xf32> to vector<2x128xf32>
    %8 = arith.addf %5, %7 : vector<2x128xf32>
    %cst_7 = arith.constant 0.000000e+00 : f32
    %9 = vector.broadcast %cst_7 : f32 to vector<2x128xf32>
    %10 = arith.maximumf %8, %9 : vector<2x128xf32>
    %11 = arith.truncf %10 : vector<2x128xf32> to vector<2x128xbf16>
    %c0_8 = arith.constant 0 : index
    %c0_9 = arith.constant 0 : index
    %12 = vector.load %arg6[%c0_8, %c0_9] : memref<2x128xbf16, #tpu.memory_space<vmem>>, vector<2x128xbf16>
    tpu.vector_store %arg6[%c0_8, %c0_9], %11 {strides = array<i32>} : memref<2x128xbf16, #tpu.memory_space<vmem>>, vector<2x128xbf16>,
    return
  }
  func.func @transform_0(%arg0: i32, %arg1: i32) -> (i32, i32) {
    %c0_i32 = arith.constant 0 : i32
    %c0_i32_0 = arith.constant 0 : i32
    return %arg0, %c0_i32 : i32, i32
  }
  func.func @transform_1(%arg0: i32, %arg1: i32) -> (i32, i32) {
    %c0_i32 = arith.constant 0 : i32
    %c0_i32_0 = arith.constant 0 : i32
    return %c0_i32, %arg1 : i32, i32
  }
  func.func @transform_2(%arg0: i32, %arg1: i32) -> (i32, i32) {
    %c0_i32 = arith.constant 0 : i32
    %c0_i32_0 = arith.constant 0 : i32
    return %c0_i32, %arg1 : i32, i32
  }
  func.func @transform_3(%arg0: i32, %arg1: i32) -> (i32, i32) {
    %c0_i32 = arith.constant 0 : i32
    %c0_i32_0 = arith.constant 0 : i32
    return %c0_i32, %arg1 : i32, i32
  }
  func.func @transform_4(%arg0: i32, %arg1: i32) -> (i32, i32) {
    %c0_i32 = arith.constant 0 : i32
    return %arg0, %arg1 : i32, i32
  }
}

module attributes {stable_mosaic.version = 11 : i64} {
  func.func @_mm_single_k_kernel(%arg0: i32, %arg1: i32, %arg2: memref<2x128xbf16, #tpu.memory_space<vmem>>, %arg3: memref<128x2xbf16, #tpu.memory_space<vmem>>, %arg4: memref<1x2xf32, #tpu.memory_space<vmem>>, %arg5: memref<1x2xf32, #tpu.memory_space<vmem>>, %arg6: memref<2x2xf32, #tpu.memory_space<vmem>>) attributes {dimension_semantics = [#tpu.dimension_semantics<parallel>, #tpu.dimension_semantics<parallel>], iteration_bounds = array<i64: 1, 1>, scalar_prefetch = 0 : i64, scratch_operands = 0 : i64, tpu.core_type = #tpu.core_type<tc>, window_params = [{transform_indices = @transform_0, window_bounds = array<i64: 2, 128>}, {transform_indices = @transform_1, window_bounds = array<i64: 128, 2>}, {transform_indices = @transform_2, window_bounds = array<i64: 1, 2>}, {transform_indices = @transform_3, window_bounds = array<i64: 1, 2>}, {transform_indices = @transform_4, window_bounds = array<i64: 2, 2>}]} {
    %c0 = arith.constant 0 : index
    %c0_0 = arith.constant 0 : index
    %0 = vector.load %arg2[%c0, %c0_0] : memref<2x128xbf16, #tpu.memory_space<vmem>>, vector<2x128xbf16>
    %c0_1 = arith.constant 0 : index
    %c0_2 = arith.constant 0 : index
    %1 = vector.load %arg3[%c0_1, %c0_2] : memref<128x2xbf16, #tpu.memory_space<vmem>>, vector<128x2xbf16>
    %cst = arith.constant dense<0.000000e+00> : vector<2x2xf32>
    %2 = tpu.matmul %0, %1, %cst {dimension_numbers = #tpu.dot_dimension_numbers<[1], [0], [0], [1], [0, 0, 1, 1], [], []>} : vector<2x128xbf16>, vector<128x2xbf16>, vector<2x2xf32> -> vector<2x2xf32>
    %c0_3 = arith.constant 0 : index
    %c0_4 = arith.constant 0 : index
    %3 = vector.load %arg4[%c0_3, %c0_4] : memref<1x2xf32, #tpu.memory_space<vmem>>, vector<1x2xf32>
    %4 = vector.broadcast %3 : vector<1x2xf32> to vector<2x2xf32>
    %5 = arith.mulf %2, %4 : vector<2x2xf32>
    %c0_5 = arith.constant 0 : index
    %c0_6 = arith.constant 0 : index
    %6 = vector.load %arg5[%c0_5, %c0_6] : memref<1x2xf32, #tpu.memory_space<vmem>>, vector<1x2xf32>
    %7 = vector.broadcast %6 : vector<1x2xf32> to vector<2x2xf32>
    %8 = arith.addf %5, %7 : vector<2x2xf32>
    %c0_7 = arith.constant 0 : index
    %c0_8 = arith.constant 0 : index
    %9 = vector.load %arg6[%c0_7, %c0_8] : memref<2x2xf32, #tpu.memory_space<vmem>>, vector<2x2xf32>
    tpu.vector_store %arg6[%c0_7, %c0_8], %8 {strides = array<i32>} : memref<2x2xf32, #tpu.memory_space<vmem>>, vector<2x2xf32>,
    return
  }
  func.func @transform_0(%arg0: i32, %arg1: i32) -> (i32, i32) {
    %c0_i32 = arith.constant 0 : i32
    %c0_i32_0 = arith.constant 0 : i32
    return %arg0, %c0_i32 : i32, i32
  }
  func.func @transform_1(%arg0: i32, %arg1: i32) -> (i32, i32) {
    %c0_i32 = arith.constant 0 : i32
    %c0_i32_0 = arith.constant 0 : i32
    return %c0_i32, %arg1 : i32, i32
  }
  func.func @transform_2(%arg0: i32, %arg1: i32) -> (i32, i32) {
    %c0_i32 = arith.constant 0 : i32
    %c0_i32_0 = arith.constant 0 : i32
    return %c0_i32, %arg1 : i32, i32
  }
  func.func @transform_3(%arg0: i32, %arg1: i32) -> (i32, i32) {
    %c0_i32 = arith.constant 0 : i32
    %c0_i32_0 = arith.constant 0 : i32
    return %c0_i32, %arg1 : i32, i32
  }
  func.func @transform_4(%arg0: i32, %arg1: i32) -> (i32, i32) {
    %c0_i32 = arith.constant 0 : i32
    return %arg0, %arg1 : i32, i32
  }
}

</mosaic_0001>

<bundles_post_ra>
// kernel: fall_detection_forward.11
= control target key start
LH: loop header
LB: loop body
LE: loop exit
PB: predicated region body
PF: predicated region fallthrough
CT: control target
= control target key end

     0   :  { %s1965_s15 = smov 0   ;;  %s1967_s16 = smov 0   ;;  %s2345_s0 = inlined_call_operand.vmem [shape: bf16[6144,27], index: 0, kind: input, shape index: {}]   ;;  %s2346_s1 = inlined_call_operand.vmem [shape: bf16[27,32], index: 1, kind: input, shape index: {}]   ;;  %s2347_s2 = inlined_call_operand.vmem [shape: f32[1,32], index: 2, kind: input, shape index: {}]   ;;  %s2348_s3 = inlined_call_operand.vmem [shape: f32[1,32], index: 3, kind: input, shape index: {}]   ;;  %s2349_s4 = inlined_call_operand.vmem [shape: bf16[6144,32], index: 4, kind: output, shape index: {}]  }
   0x1   :  { %s1969_s17 = smov 0  }
   0x2 LB: > { %s26_s18 = sadd.s32 1, %s1933_s16  ;;  %p1547_p0 = scmp.ge.s32.totalorder %s1937_s17, 1  ;;  %s1937_s17 = sphi %s1969_s17, %s14_s17   ;;  %s1933_s16 = sphi %s1967_s16, %s2351_s16   ;;  %s1929_s15 = sphi %s1965_s15, %s2350_s15  }
   0x3   : > { %p28_p1 = scmp.ge.s32.totalorder %s26_s18, 12  ;;  %p202_p2 = scmp.lt.s32.totalorder %s1937_s17, 13 }
   0x5   : > { %s2353_s18 = smov (%p28_p1, %s26_s18), 0  ;;  %p203_p3 = pnand %p1547_p0, %p202_p2 }
   0x6   : > { %s1548_s21 = sshll.u32 (!%p203_p3), %s1929_s15, 6 }
   0x7   : > { %206 = sbr.rel (%p203_p3) target bundleno = 294 (0x126), region = 36  ;;  %p242_p4 = scmp.lt.s32.totalorder (!%p203_p3), %s1548_s21, 767 }
   0xc   : > { %v1881_v0 = vld [vmem:[%s2346_s1 + $0x8] sm:$0x3f]   ;;  %vm603_vm0 = vcmask 1044480   ;;  %vm604_vm1 = vcmask 1045504   ;;  %v1939_v1 = vmov 65535   ;;  %v1882_v5 = vld [vmem:[%s2346_s1] sm:$0xff]  }
   0xd   : > { %v605_v2 = vsel %vm603_vm0, 4294967295, %v1939_v1  ;;  %s2355_s21 = smov (!%p242_p4, %s1548_s21), 767  ;;  %vm506_vm2 = vcmask 220160   ;;  %v2066_v38 = vld [vmem:[%s2347_s2] ss:$0 sm:$0xff]  ;;  %vm1361_vm3 = vcmask 257024  }
   0xe   : > { %v606_v3 = vsel %vm604_vm1, %v605_v2, 0  ;;  %s1549_s24 = sshll.u32 %s2355_s21, 2  ;;  %v2071_v40 = vld [vmem:[%s2348_s3] ss:$0 sm:$0xff] }
   0xf   : > { %v608_v4 = vand.u32 %v1881_v0, %v606_v3  ;;  %s1997_s27 = scalar_lea.vmem %s2345_s0, %s1549_s24  ;;  %s2086_s8 = scalar_lea.vmem %s2349_s4, %s1549_s24 }
  0x10   : > { %v1883_v6 = vld [vmem:[%s1997_s27] sm:$0xff]   ;;  %v1885_v8 = vld [vmem:[%s1997_s27 + $0x8] sm:$0xff]   ;;  %v1887_v10 = vld [vmem:[%s1997_s27 + $0x10] sm:$0xff]  }
  0x11   : > { %1784 = vmatprep.subr.bf16.mxu0 %v608_v4  ;;  %1852 = vmatprep.subr.bf16.mxu1 %v608_v4  ;;  %v1884_v7 = vld [vmem:[%s1997_s27 + $0x80] sm:$0xff]   ;;  %v1886_v9 = vld [vmem:[%s1997_s27 + $0x88] sm:$0xff]   ;;  %v1888_v11 = vld [vmem:[%s1997_s27 + $0x90] sm:$0xff]  }
  0x12   : > { %1785 = vmatpush3.bf16.msra.mxu0 %v608_v4  ;;  %1854 = vmatpush3.bf16.msra.mxu1 %v608_v4  ;;  %v1889_v12 = vld [vmem:[%s1997_s27 + $0x18] sm:$0xff]   ;;  %v1891_v14 = vld [vmem:[%s1997_s27 + $0x20] sm:$0xff]   ;;  %v1893_v16 = vld [vmem:[%s1997_s27 + $0x28] sm:$0xff]  }
  0x13   : > { %1786 = vmatprep.subr.bf16.mxu0 %v1882_v5  ;;  %1853 = vmatprep.subr.bf16.mxu1 %v1882_v5  ;;  %v1890_v13 = vld [vmem:[%s1997_s27 + $0x98] sm:$0xff]   ;;  %v1892_v15 = vld [vmem:[%s1997_s27 + $0xa0] sm:$0xff]   ;;  %v1894_v17 = vld [vmem:[%s1997_s27 + $0xa8] sm:$0xff]  }
  0x14   : > { %1788 = vmatprep.mubr.msk.bf16.mxu0 %vm506_vm2, %v1883_v6  ;;  %1820 = vmatprep.mubr.msk.bf16.mxu1 %vm506_vm2, %v1884_v7  ;;  %v1895_v18 = vld [vmem:[%s1997_s27 + $0x30] sm:$0xff]   ;;  %v1897_v20 = vld [vmem:[%s1997_s27 + $0x38] sm:$0xff]   ;;  %v1899_v22 = vld [vmem:[%s1997_s27 + $0x40] sm:$0xff]  }
  0x15   : > { %v1896_v19 = vld [vmem:[%s1997_s27 + $0xb0] sm:$0xff]   ;;  %v1898_v21 = vld [vmem:[%s1997_s27 + $0xb8] sm:$0xff]   ;;  %v1900_v23 = vld [vmem:[%s1997_s27 + $0xc0] sm:$0xff]  }
  0x16   : > { %1787 = vmatpush3.bf16.msra.mxu0 %v1882_v5  ;;  %1855 = vmatpush3.bf16.msra.mxu1 %v1882_v5  ;;  %v1901_v24 = vld [vmem:[%s1997_s27 + $0x48] sm:$0xff]   ;;  %v1903_v26 = vld [vmem:[%s1997_s27 + $0x50] sm:$0xff]   ;;  %v1905_v28 = vld [vmem:[%s1997_s27 + $0x58] sm:$0xff]  }
  0x17   : > { %v1902_v25 = vld [vmem:[%s1997_s27 + $0xc8] sm:$0xff]   ;;  %v1904_v27 = vld [vmem:[%s1997_s27 + $0xd0] sm:$0xff]   ;;  %v1906_v29 = vld [vmem:[%s1997_s27 + $0xd8] sm:$0xff]  }
  0x18   : > { %v1907_v30 = vld [vmem:[%s1997_s27 + $0x60] sm:$0xff]   ;;  %v1909_v32 = vld [vmem:[%s1997_s27 + $0x68] sm:$0xff]   ;;  %v1911_v34 = vld [vmem:[%s1997_s27 + $0x70] sm:$0xff]  }
  0x19   : > { %1789 = vmatmul.mubr.msk.bf16.vlgmr.msra.gmra.mxu0 %vm506_vm2, %v1885_v8  ;;  %1821 = vmatmul.mubr.msk.bf16.vlgmr.msra.gmra.mxu1 %vm506_vm2, %v1886_v9  ;;  %v1908_v31 = vld [vmem:[%s1997_s27 + $0xe0] sm:$0xff]   ;;  %v1910_v33 = vld [vmem:[%s1997_s27 + $0xe8] sm:$0xff]   ;;  %v1912_v35 = vld [vmem:[%s1997_s27 + $0xf0] sm:$0xff]  }
  0x1a   : > { %1792 = vmatprep.mubr.msk.bf16.mxu0 %vm506_vm2, %v1887_v10  ;;  %1824 = vmatprep.mubr.msk.bf16.mxu1 %vm506_vm2, %v1888_v11  ;;  %v1913_v36 = vld [vmem:[%s1997_s27 + $0x78] sm:$0xff]  }
  0x1b   : > { %v1914_v37 = vld [vmem:[%s1997_s27 + $0xf8] sm:$0xff]  }
  0x21   : > { %1793 = vmatmul.mubr.msk.bf16.gmra.mxu0 %vm506_vm2, %v1889_v12  ;;  %1825 = vmatmul.mubr.msk.bf16.gmra.mxu1 %vm506_vm2, %v1890_v13 }
  0x22   : > { %1796 = vmatprep.mubr.msk.bf16.mxu0 %vm506_vm2, %v1891_v14  ;;  %1828 = vmatprep.mubr.msk.bf16.mxu1 %vm506_vm2, %v1892_v15 }
  0x29   : > { %1797 = vmatmul.mubr.msk.bf16.gmra.mxu0 %vm506_vm2, %v1893_v16  ;;  %1829 = vmatmul.mubr.msk.bf16.gmra.mxu1 %vm506_vm2, %v1894_v17 }
  0x2a   : > { %1800 = vmatprep.mubr.msk.bf16.mxu0 %vm506_vm2, %v1895_v18  ;;  %1832 = vmatprep.mubr.msk.bf16.mxu1 %vm506_vm2, %v1896_v19 }
  0x31   : > { %1801 = vmatmul.mubr.msk.bf16.gmra.mxu0 %vm506_vm2, %v1897_v20  ;;  %1833 = vmatmul.mubr.msk.bf16.gmra.mxu1 %vm506_vm2, %v1898_v21 }
  0x32   : > { %1804 = vmatprep.mubr.msk.bf16.mxu0 %vm506_vm2, %v1899_v22  ;;  %1836 = vmatprep.mubr.msk.bf16.mxu1 %vm506_vm2, %v1900_v23 }
  0x39   : > { %1805 = vmatmul.mubr.msk.bf16.gmra.mxu0 %vm506_vm2, %v1901_v24  ;;  %1837 = vmatmul.mubr.msk.bf16.gmra.mxu1 %vm506_vm2, %v1902_v25 }
  0x3a   : > { %1808 = vmatprep.mubr.msk.bf16.mxu0 %vm506_vm2, %v1903_v26  ;;  %1840 = vmatprep.mubr.msk.bf16.mxu1 %vm506_vm2, %v1904_v27 }
  0x41   : > { %1809 = vmatmul.mubr.msk.bf16.gmra.mxu0 %vm506_vm2, %v1905_v28  ;;  %1841 = vmatmul.mubr.msk.bf16.gmra.mxu1 %vm506_vm2, %v1906_v29 }
  0x42   : > { %1812 = vmatprep.mubr.msk.bf16.mxu0 %vm506_vm2, %v1907_v30  ;;  %1844 = vmatprep.mubr.msk.bf16.mxu1 %vm506_vm2, %v1908_v31 }
  0x49   : > { %1813 = vmatmul.mubr.msk.bf16.gmra.mxu0 %vm506_vm2, %v1909_v32  ;;  %1845 = vmatmul.mubr.msk.bf16.gmra.mxu1 %vm506_vm2, %v1910_v33 }
  0x4a   : > { %1816 = vmatprep.mubr.msk.bf16.mxu0 %vm506_vm2, %v1911_v34  ;;  %1848 = vmatprep.mubr.msk.bf16.mxu1 %vm506_vm2, %v1912_v35 }
  0x51   : > { %1817 = vmatmul.mubr.msk.bf16.gmra.mxu0 %vm506_vm2, %v1913_v36  ;;  %1849 = vmatmul.mubr.msk.bf16.gmra.mxu1 %vm506_vm2, %v1914_v37 }
  0xd9   : > { %v1790_v39 = vpop.f32.mrf.mxu0  ;;  %v1822_v41 = vpop.f32.mrf.mxu1 }
  0xda   : > { %v908_v42 = vmul.f32 %v1790_v39, %v2066_v38  ;;  %v940_v43 = vmul.f32 %v1822_v41, %v2066_v38 }
  0xdb   : > { %v644_v44 = vpop.f32.mrf.mxu0  ;;  %v772_v45 = vpop.f32.mrf.mxu1 }
  0xdc   : > { %v979_v46 = vadd.f32 %v2071_v40, %v908_v42  ;;  %v1011_v47 = vadd.f32 %v2071_v40, %v940_v43  ;;  %v906_v48 = vmul.f32 %v2066_v38, %v644_v44  ;;  %v938_v49 = vmul.f32 %v2066_v38, %v772_v45 }
  0xdd   : > { %v1791_v50 = vpop.f32.mrf.mxu0  ;;  %v1823_v51 = vpop.f32.mrf.mxu1 }
  0xde   : > { %v1043_v52 = vmax.f32 %v979_v46, 0.0  ;;  %v1075_v53 = vmax.f32 %v1011_v47, 0.0  ;;  %v977_v54 = vadd.f32 %v2071_v40, %v906_v48  ;;  %v1009_v55 = vadd.f32 %v2071_v40, %v938_v49 }
  0xdf   : > { %v909_v56 = vmul.f32 %v1791_v50, %v2066_v38  ;;  %v941_v57 = vmul.f32 %v1823_v51, %v2066_v38  ;;  %v647_v58 = vpop.f32.mrf.mxu0  ;;  %v775_v59 = vpop.f32.mrf.mxu1 }
  0xe0   : > { %v1688_v60 = vpack.c.bf16 %v1043_v52, %v1043_v52  ;;  %v1720_v61 = vpack.c.bf16 %v1075_v53, %v1075_v53  ;;  %v1041_v62 = vmax.f32 %v977_v54, 0.0  ;;  %v1073_v63 = vmax.f32 %v1009_v55, 0.0 }
  0xe1   : > { %v980_v0 = vadd.f32 %v2071_v40, %v909_v56  ;;  %v1012_v1 = vadd.f32 %v2071_v40, %v941_v57  ;;  %v907_v2 = vmul.f32 %v2066_v38, %v647_v58  ;;  %v939_v3 = vmul.f32 %v2066_v38, %v775_v59  ;;  %v1794_v4 = vpop.f32.mrf.mxu0  ;;  %v1826_v5 = vpop.f32.mrf.mxu1 }
  0xe2   : > { %1364 = vst.msk [vmem:[%s2086_s8 + $0x8] sm:$0xf] %vm1361_vm3, %v1688_v60  ;;  %1396 = vst.msk [vmem:[%s2086_s8 + $0x88] sm:$0xf] %vm1361_vm3, %v1720_v61  ;;  %v1686_v6 = vpack.c.bf16 %v1041_v62, %v1041_v62  ;;  %v1718_v7 = vpack.c.bf16 %v1073_v63, %v1073_v63  ;;  %v912_v8 = vmul.f32 %v1794_v4, %v2066_v38 }
  0xe3   : > { %v944_v9 = vmul.f32 %v1826_v5, %v2066_v38  ;;  %v1044_v10 = vmax.f32 %v980_v0, 0.0  ;;  %v1076_v11 = vmax.f32 %v1012_v1, 0.0  ;;  %v978_v12 = vadd.f32 %v2071_v40, %v907_v2  ;;  %v660_v14 = vpop.f32.mrf.mxu0  ;;  %v788_v15 = vpop.f32.mrf.mxu1 }
  0xe4   : > { %v1010_v13 = vadd.f32 %v2071_v40, %v939_v3  ;;  %1362 = vst.msk [vmem:[%s2086_s8] sm:$0xf] %vm1361_vm3, %v1686_v6  ;;  %1394 = vst.msk [vmem:[%s2086_s8 + $0x80] sm:$0xf] %vm1361_vm3, %v1718_v7  ;;  %v983_v16 = vadd.f32 %v2071_v40, %v912_v8  ;;  %v910_v18 = vmul.f32 %v2066_v38, %v660_v14 }
  0xe5   : > { %v1015_v17 = vadd.f32 %v2071_v40, %v944_v9  ;;  %v942_v19 = vmul.f32 %v2066_v38, %v788_v15  ;;  %v1689_v20 = vpack.c.bf16 %v1044_v10, %v1044_v10  ;;  %v1721_v21 = vpack.c.bf16 %v1076_v11, %v1076_v11  ;;  %v1795_v24 = vpop.f32.mrf.mxu0  ;;  %v1827_v25 = vpop.f32.mrf.mxu1 }
  0xe6   : > { %v1042_v22 = vmax.f32 %v978_v12, 0.0  ;;  %v1074_v23 = vmax.f32 %v1010_v13, 0.0  ;;  %v1047_v26 = vmax.f32 %v983_v16, 0.0  ;;  %v981_v28 = vadd.f32 %v2071_v40, %v910_v18 }
  0xe7   : > { %v1079_v27 = vmax.f32 %v1015_v17, 0.0  ;;  %v1013_v29 = vadd.f32 %v2071_v40, %v942_v19  ;;  %1365 = vst.msk [vmem:[%s2086_s8 + $0xc] sm:$0xf] %vm1361_vm3, %v1689_v20  ;;  %1397 = vst.msk [vmem:[%s2086_s8 + $0x8c] sm:$0xf] %vm1361_vm3, %v1721_v21  ;;  %v913_v32 = vmul.f32 %v1795_v24, %v2066_v38  ;;  %v945_v33 = vmul.f32 %v1827_v25, %v2066_v38  ;;  %v663_v34 = vpop.f32.mrf.mxu0  ;;  %v791_v35 = vpop.f32.mrf.mxu1 }
  0xe8   : > { %v1687_v30 = vpack.c.bf16 %v1042_v22, %v1042_v22  ;;  %v1719_v31 = vpack.c.bf16 %v1074_v23, %v1074_v23  ;;  %v1692_v36 = vpack.c.bf16 %v1047_v26, %v1047_v26  ;;  %v1045_v39 = vmax.f32 %v981_v28, 0.0 }
  0xe9   : > { %v1724_v37 = vpack.c.bf16 %v1079_v27, %v1079_v27  ;;  %v1077_v41 = vmax.f32 %v1013_v29, 0.0  ;;  %v984_v42 = vadd.f32 %v2071_v40, %v913_v32  ;;  %v1016_v43 = vadd.f32 %v2071_v40, %v945_v33  ;;  %v1798_v46 = vpop.f32.mrf.mxu0  ;;  %v1830_v47 = vpop.f32.mrf.mxu1 }
  0xea   : > { %1363 = vst.msk [vmem:[%s2086_s8 + $0x4] sm:$0xf] %vm1361_vm3, %v1687_v30  ;;  %1395 = vst.msk [vmem:[%s2086_s8 + $0x84] sm:$0xf] %vm1361_vm3, %v1719_v31  ;;  %v911_v44 = vmul.f32 %v2066_v38, %v663_v34  ;;  %v943_v45 = vmul.f32 %v2066_v38, %v791_v35  ;;  %v1690_v48 = vpack.c.bf16 %v1045_v39, %v1045_v39 }
  0xeb   : > { %1368 = vst.msk [vmem:[%s2086_s8 + $0x18] sm:$0xf] %vm1361_vm3, %v1692_v36  ;;  %1400 = vst.msk [vmem:[%s2086_s8 + $0x98] sm:$0xf] %vm1361_vm3, %v1724_v37  ;;  %v1722_v49 = vpack.c.bf16 %v1077_v41, %v1077_v41  ;;  %v916_v50 = vmul.f32 %v1798_v46, %v2066_v38  ;;  %v948_v51 = vmul.f32 %v1830_v47, %v2066_v38  ;;  %v1048_v52 = vmax.f32 %v984_v42, 0.0  ;;  %v676_v56 = vpop.f32.mrf.mxu0  ;;  %v804_v57 = vpop.f32.mrf.mxu1 }
  0xec   : > { %v1080_v53 = vmax.f32 %v1016_v43, 0.0  ;;  %v982_v54 = vadd.f32 %v2071_v40, %v911_v44  ;;  %v1014_v55 = vadd.f32 %v2071_v40, %v943_v45  ;;  %1366 = vst.msk [vmem:[%s2086_s8 + $0x10] sm:$0xf] %vm1361_vm3, %v1690_v48  ;;  %v914_v60 = vmul.f32 %v2066_v38, %v676_v56 }
  0xed   : > { %1398 = vst.msk [vmem:[%s2086_s8 + $0x90] sm:$0xf] %vm1361_vm3, %v1722_v49  ;;  %v987_v58 = vadd.f32 %v2071_v40, %v916_v50  ;;  %v1019_v59 = vadd.f32 %v2071_v40, %v948_v51  ;;  %v946_v61 = vmul.f32 %v2066_v38, %v804_v57  ;;  %v1693_v62 = vpack.c.bf16 %v1048_v52, %v1048_v52  ;;  %v1799_v2 = vpop.f32.mrf.mxu0  ;;  %v1831_v3 = vpop.f32.mrf.mxu1 }
  0xee   : > { %v1725_v63 = vpack.c.bf16 %v1080_v53, %v1080_v53  ;;  %v1046_v0 = vmax.f32 %v982_v54, 0.0  ;;  %v1078_v1 = vmax.f32 %v1014_v55, 0.0  ;;  %v985_v6 = vadd.f32 %v2071_v40, %v914_v60 }
  0xef   : > { %v1051_v4 = vmax.f32 %v987_v58, 0.0  ;;  %v1083_v5 = vmax.f32 %v1019_v59, 0.0  ;;  %v1017_v7 = vadd.f32 %v2071_v40, %v946_v61  ;;  %1369 = vst.msk [vmem:[%s2086_s8 + $0x1c] sm:$0xf] %vm1361_vm3, %v1693_v62  ;;  %v917_v10 = vmul.f32 %v1799_v2, %v2066_v38  ;;  %v679_v12 = vpop.f32.mrf.mxu0  ;;  %v807_v13 = vpop.f32.mrf.mxu1 }
  0xf0   : > { %1401 = vst.msk [vmem:[%s2086_s8 + $0x9c] sm:$0xf] %vm1361_vm3, %v1725_v63  ;;  %v1691_v8 = vpack.c.bf16 %v1046_v0, %v1046_v0  ;;  %v1723_v9 = vpack.c.bf16 %v1078_v1, %v1078_v1  ;;  %v949_v11 = vmul.f32 %v1831_v3, %v2066_v38  ;;  %v1049_v16 = vmax.f32 %v985_v6, 0.0 }
  0xf1   : > { %v1696_v14 = vpack.c.bf16 %v1051_v4, %v1051_v4  ;;  %v1728_v15 = vpack.c.bf16 %v1083_v5, %v1083_v5  ;;  %v1081_v17 = vmax.f32 %v1017_v7, 0.0  ;;  %v988_v18 = vadd.f32 %v2071_v40, %v917_v10  ;;  %v1802_v22 = vpop.f32.mrf.mxu0  ;;  %v1834_v23 = vpop.f32.mrf.mxu1 }
  0xf2   : > { %1367 = vst.msk [vmem:[%s2086_s8 + $0x14] sm:$0xf] %vm1361_vm3, %v1691_v8  ;;  %1399 = vst.msk [vmem:[%s2086_s8 + $0x94] sm:$0xf] %vm1361_vm3, %v1723_v9  ;;  %v1020_v19 = vadd.f32 %v2071_v40, %v949_v11  ;;  %v915_v20 = vmul.f32 %v2066_v38, %v679_v12  ;;  %v947_v21 = vmul.f32 %v2066_v38, %v807_v13 }
  0xf3   : > { %1372 = vst.msk [vmem:[%s2086_s8 + $0x28] sm:$0xf] %vm1361_vm3, %v1696_v14  ;;  %1404 = vst.msk [vmem:[%s2086_s8 + $0xa8] sm:$0xf] %vm1361_vm3, %v1728_v15  ;;  %v1694_v24 = vpack.c.bf16 %v1049_v16, %v1049_v16  ;;  %v1726_v25 = vpack.c.bf16 %v1081_v17, %v1081_v17  ;;  %v920_v26 = vmul.f32 %v1802_v22, %v2066_v38  ;;  %v1052_v28 = vmax.f32 %v988_v18, 0.0  ;;  %v692_v32 = vpop.f32.mrf.mxu0  ;;  %v820_v33 = vpop.f32.mrf.mxu1 }
  0xf4   : > { %v952_v27 = vmul.f32 %v1834_v23, %v2066_v38  ;;  %v1084_v29 = vmax.f32 %v1020_v19, 0.0  ;;  %v986_v30 = vadd.f32 %v2071_v40, %v915_v20  ;;  %v1018_v31 = vadd.f32 %v2071_v40, %v947_v21 }
  0xf5   : > { %1370 = vst.msk [vmem:[%s2086_s8 + $0x20] sm:$0xf] %vm1361_vm3, %v1694_v24  ;;  %1402 = vst.msk [vmem:[%s2086_s8 + $0xa0] sm:$0xf] %vm1361_vm3, %v1726_v25  ;;  %v991_v34 = vadd.f32 %v2071_v40, %v920_v26  ;;  %v918_v36 = vmul.f32 %v2066_v38, %v692_v32  ;;  %v950_v37 = vmul.f32 %v2066_v38, %v820_v33  ;;  %v1803_v44 = vpop.f32.mrf.mxu0  ;;  %v1835_v45 = vpop.f32.mrf.mxu1 }
  0xf6   : > { %v1023_v35 = vadd.f32 %v2071_v40, %v952_v27  ;;  %v1697_v39 = vpack.c.bf16 %v1052_v28, %v1052_v28  ;;  %v1729_v41 = vpack.c.bf16 %v1084_v29, %v1084_v29  ;;  %v1050_v42 = vmax.f32 %v986_v30, 0.0 }
  0xf7   : > { %v1082_v43 = vmax.f32 %v1018_v31, 0.0  ;;  %v1055_v46 = vmax.f32 %v991_v34, 0.0  ;;  %v989_v48 = vadd.f32 %v2071_v40, %v918_v36  ;;  %v1021_v49 = vadd.f32 %v2071_v40, %v950_v37  ;;  %v695_v54 = vpop.f32.mrf.mxu0  ;;  %v823_v55 = vpop.f32.mrf.mxu1 }
  0xf8   : > { %v1087_v47 = vmax.f32 %v1023_v35, 0.0  ;;  %1373 = vst.msk [vmem:[%s2086_s8 + $0x2c] sm:$0xf] %vm1361_vm3, %v1697_v39  ;;  %1405 = vst.msk [vmem:[%s2086_s8 + $0xac] sm:$0xf] %vm1361_vm3, %v1729_v41  ;;  %v1695_v50 = vpack.c.bf16 %v1050_v42, %v1050_v42  ;;  %v921_v52 = vmul.f32 %v1803_v44, %v2066_v38  ;;  %v953_v53 = vmul.f32 %v1835_v45, %v2066_v38 }
  0xf9   : > { %v1727_v51 = vpack.c.bf16 %v1082_v43, %v1082_v43  ;;  %v1700_v56 = vpack.c.bf16 %v1055_v46, %v1055_v46  ;;  %v1053_v58 = vmax.f32 %v989_v48, 0.0  ;;  %v1085_v59 = vmax.f32 %v1021_v49, 0.0  ;;  %v1806_v0 = vpop.f32.mrf.mxu0  ;;  %v1838_v1 = vpop.f32.mrf.mxu1 }
  0xfa   : > { %v1732_v57 = vpack.c.bf16 %v1087_v47, %v1087_v47  ;;  %1371 = vst.msk [vmem:[%s2086_s8 + $0x24] sm:$0xf] %vm1361_vm3, %v1695_v50  ;;  %v992_v60 = vadd.f32 %v2071_v40, %v921_v52  ;;  %v1024_v61 = vadd.f32 %v2071_v40, %v953_v53  ;;  %v919_v62 = vmul.f32 %v2066_v38, %v695_v54 }
  0xfb   : > { %1403 = vst.msk [vmem:[%s2086_s8 + $0xa4] sm:$0xf] %vm1361_vm3, %v1727_v51  ;;  %v951_v63 = vmul.f32 %v2066_v38, %v823_v55  ;;  %1376 = vst.msk [vmem:[%s2086_s8 + $0x38] sm:$0xf] %vm1361_vm3, %v1700_v56  ;;  %v1698_v2 = vpack.c.bf16 %v1053_v58, %v1053_v58  ;;  %v1730_v3 = vpack.c.bf16 %v1085_v59, %v1085_v59  ;;  %v708_v10 = vpop.f32.mrf.mxu0  ;;  %v836_v11 = vpop.f32.mrf.mxu1 }
  0xfc   : > { %1408 = vst.msk [vmem:[%s2086_s8 + $0xb8] sm:$0xf] %vm1361_vm3, %v1732_v57  ;;  %v924_v4 = vmul.f32 %v1806_v0, %v2066_v38  ;;  %v956_v5 = vmul.f32 %v1838_v1, %v2066_v38  ;;  %v1056_v6 = vmax.f32 %v992_v60, 0.0  ;;  %v1088_v7 = vmax.f32 %v1024_v61, 0.0 }
  0xfd   : > { %v990_v8 = vadd.f32 %v2071_v40, %v919_v62  ;;  %v1022_v9 = vadd.f32 %v2071_v40, %v951_v63  ;;  %1374 = vst.msk [vmem:[%s2086_s8 + $0x30] sm:$0xf] %vm1361_vm3, %v1698_v2  ;;  %1406 = vst.msk [vmem:[%s2086_s8 + $0xb0] sm:$0xf] %vm1361_vm3, %v1730_v3  ;;  %v922_v14 = vmul.f32 %v2066_v38, %v708_v10  ;;  %v1807_v20 = vpop.f32.mrf.mxu0  ;;  %v1839_v21 = vpop.f32.mrf.mxu1 }
  0xfe   : > { %v995_v12 = vadd.f32 %v2071_v40, %v924_v4  ;;  %v1027_v13 = vadd.f32 %v2071_v40, %v956_v5  ;;  %v954_v15 = vmul.f32 %v2066_v38, %v836_v11  ;;  %v1701_v16 = vpack.c.bf16 %v1056_v6, %v1056_v6 }
  0xff   : > { %v1733_v17 = vpack.c.bf16 %v1088_v7, %v1088_v7  ;;  %v1054_v18 = vmax.f32 %v990_v8, 0.0  ;;  %v1086_v19 = vmax.f32 %v1022_v9, 0.0  ;;  %v993_v24 = vadd.f32 %v2071_v40, %v922_v14  ;;  %v711_v30 = vpop.f32.mrf.mxu0  ;;  %v839_v31 = vpop.f32.mrf.mxu1 }
 0x100   : > { %v1059_v22 = vmax.f32 %v995_v12, 0.0  ;;  %v1091_v23 = vmax.f32 %v1027_v13, 0.0  ;;  %v1025_v25 = vadd.f32 %v2071_v40, %v954_v15  ;;  %1377 = vst.msk [vmem:[%s2086_s8 + $0x3c] sm:$0xf] %vm1361_vm3, %v1701_v16  ;;  %v925_v28 = vmul.f32 %v1807_v20, %v2066_v38 }
 0x101   : > { %1409 = vst.msk [vmem:[%s2086_s8 + $0xbc] sm:$0xf] %vm1361_vm3, %v1733_v17  ;;  %v1699_v26 = vpack.c.bf16 %v1054_v18, %v1054_v18  ;;  %v1731_v27 = vpack.c.bf16 %v1086_v19, %v1086_v19  ;;  %v957_v29 = vmul.f32 %v1839_v21, %v2066_v38  ;;  %v1057_v34 = vmax.f32 %v993_v24, 0.0  ;;  %v1810_v42 = vpop.f32.mrf.mxu0  ;;  %v1842_v43 = vpop.f32.mrf.mxu1 }
 0x102   : > { %v1704_v32 = vpack.c.bf16 %v1059_v22, %v1059_v22  ;;  %v1736_v33 = vpack.c.bf16 %v1091_v23, %v1091_v23  ;;  %v1089_v35 = vmax.f32 %v1025_v25, 0.0  ;;  %v996_v36 = vadd.f32 %v2071_v40, %v925_v28 }
 0x103   : > { %1375 = vst.msk [vmem:[%s2086_s8 + $0x34] sm:$0xf] %vm1361_vm3, %v1699_v26  ;;  %1407 = vst.msk [vmem:[%s2086_s8 + $0xb4] sm:$0xf] %vm1361_vm3, %v1731_v27  ;;  %v1028_v37 = vadd.f32 %v2071_v40, %v957_v29  ;;  %v923_v39 = vmul.f32 %v2066_v38, %v711_v30  ;;  %v955_v41 = vmul.f32 %v2066_v38, %v839_v31  ;;  %v724_v52 = vpop.f32.mrf.mxu0  ;;  %v852_v53 = vpop.f32.mrf.mxu1 }
 0x104   : > { %1380 = vst.msk [vmem:[%s2086_s8 + $0x48] sm:$0xf] %vm1361_vm3, %v1704_v32  ;;  %1412 = vst.msk [vmem:[%s2086_s8 + $0xc8] sm:$0xf] %vm1361_vm3, %v1736_v33  ;;  %v1702_v44 = vpack.c.bf16 %v1057_v34, %v1057_v34  ;;  %v1734_v45 = vpack.c.bf16 %v1089_v35, %v1089_v35  ;;  %v928_v46 = vmul.f32 %v1810_v42, %v2066_v38  ;;  %v1060_v48 = vmax.f32 %v996_v36, 0.0 }
 0x105   : > { %v960_v47 = vmul.f32 %v1842_v43, %v2066_v38  ;;  %v1092_v49 = vmax.f32 %v1028_v37, 0.0  ;;  %v994_v50 = vadd.f32 %v2071_v40, %v923_v39  ;;  %v1026_v51 = vadd.f32 %v2071_v40, %v955_v41  ;;  %v1811_v62 = vpop.f32.mrf.mxu0  ;;  %v1843_v63 = vpop.f32.mrf.mxu1 }
 0x106   : > { %1378 = vst.msk [vmem:[%s2086_s8 + $0x40] sm:$0xf] %vm1361_vm3, %v1702_v44  ;;  %1410 = vst.msk [vmem:[%s2086_s8 + $0xc0] sm:$0xf] %vm1361_vm3, %v1734_v45  ;;  %v999_v54 = vadd.f32 %v2071_v40, %v928_v46  ;;  %v926_v56 = vmul.f32 %v2066_v38, %v724_v52  ;;  %v958_v57 = vmul.f32 %v2066_v38, %v852_v53 }
 0x107   : > { %v1031_v55 = vadd.f32 %v2071_v40, %v960_v47  ;;  %v1705_v58 = vpack.c.bf16 %v1060_v48, %v1060_v48  ;;  %v1737_v59 = vpack.c.bf16 %v1092_v49, %v1092_v49  ;;  %v1058_v60 = vmax.f32 %v994_v50, 0.0  ;;  %v727_v8 = vpop.f32.mrf.mxu0  ;;  %v855_v9 = vpop.f32.mrf.mxu1 }
 0x108   : > { %v1090_v61 = vmax.f32 %v1026_v51, 0.0  ;;  %v1063_v0 = vmax.f32 %v999_v54, 0.0  ;;  %v997_v2 = vadd.f32 %v2071_v40, %v926_v56  ;;  %v1029_v3 = vadd.f32 %v2071_v40, %v958_v57 }
 0x109   : > { %v1095_v1 = vmax.f32 %v1031_v55, 0.0  ;;  %1381 = vst.msk [vmem:[%s2086_s8 + $0x4c] sm:$0xf] %vm1361_vm3, %v1705_v58  ;;  %1413 = vst.msk [vmem:[%s2086_s8 + $0xcc] sm:$0xf] %vm1361_vm3, %v1737_v59  ;;  %v1703_v4 = vpack.c.bf16 %v1058_v60, %v1058_v60  ;;  %v929_v6 = vmul.f32 %v1811_v62, %v2066_v38  ;;  %v961_v7 = vmul.f32 %v1843_v63, %v2066_v38  ;;  %v1814_v18 = vpop.f32.mrf.mxu0  ;;  %v1846_v19 = vpop.f32.mrf.mxu1 }
 0x10a   : > { %v1735_v5 = vpack.c.bf16 %v1090_v61, %v1090_v61  ;;  %v1708_v10 = vpack.c.bf16 %v1063_v0, %v1063_v0  ;;  %v1061_v12 = vmax.f32 %v997_v2, 0.0  ;;  %v1093_v13 = vmax.f32 %v1029_v3, 0.0 }
 0x10b   : > { %v1740_v11 = vpack.c.bf16 %v1095_v1, %v1095_v1  ;;  %1379 = vst.msk [vmem:[%s2086_s8 + $0x44] sm:$0xf] %vm1361_vm3, %v1703_v4  ;;  %v1000_v14 = vadd.f32 %v2071_v40, %v929_v6  ;;  %v1032_v15 = vadd.f32 %v2071_v40, %v961_v7  ;;  %v927_v16 = vmul.f32 %v2066_v38, %v727_v8  ;;  %v740_v28 = vpop.f32.mrf.mxu0  ;;  %v868_v29 = vpop.f32.mrf.mxu1 }
 0x10c   : > { %1411 = vst.msk [vmem:[%s2086_s8 + $0xc4] sm:$0xf] %vm1361_vm3, %v1735_v5  ;;  %v959_v17 = vmul.f32 %v2066_v38, %v855_v9  ;;  %1384 = vst.msk [vmem:[%s2086_s8 + $0x58] sm:$0xf] %vm1361_vm3, %v1708_v10  ;;  %v1706_v20 = vpack.c.bf16 %v1061_v12, %v1061_v12  ;;  %v1738_v21 = vpack.c.bf16 %v1093_v13, %v1093_v13 }
 0x10d   : > { %1416 = vst.msk [vmem:[%s2086_s8 + $0xd8] sm:$0xf] %vm1361_vm3, %v1740_v11  ;;  %v932_v22 = vmul.f32 %v1814_v18, %v2066_v38  ;;  %v964_v23 = vmul.f32 %v1846_v19, %v2066_v38  ;;  %v1064_v24 = vmax.f32 %v1000_v14, 0.0  ;;  %v1096_v25 = vmax.f32 %v1032_v15, 0.0  ;;  %v1815_v39 = vpop.f32.mrf.mxu0  ;;  %v1847_v41 = vpop.f32.mrf.mxu1 }
 0x10e   : > { %v998_v26 = vadd.f32 %v2071_v40, %v927_v16  ;;  %v1030_v27 = vadd.f32 %v2071_v40, %v959_v17  ;;  %1382 = vst.msk [vmem:[%s2086_s8 + $0x50] sm:$0xf] %vm1361_vm3, %v1706_v20  ;;  %1414 = vst.msk [vmem:[%s2086_s8 + $0xd0] sm:$0xf] %vm1361_vm3, %v1738_v21  ;;  %v930_v32 = vmul.f32 %v2066_v38, %v740_v28 }
 0x10f   : > { %v1003_v30 = vadd.f32 %v2071_v40, %v932_v22  ;;  %v1035_v31 = vadd.f32 %v2071_v40, %v964_v23  ;;  %v962_v33 = vmul.f32 %v2066_v38, %v868_v29  ;;  %v1709_v34 = vpack.c.bf16 %v1064_v24, %v1064_v24  ;;  %v743_v50 = vpop.f32.mrf.mxu0  ;;  %v871_v51 = vpop.f32.mrf.mxu1 }
 0x110   : > { %v1741_v35 = vpack.c.bf16 %v1096_v25, %v1096_v25  ;;  %v1062_v36 = vmax.f32 %v998_v26, 0.0  ;;  %v1094_v37 = vmax.f32 %v1030_v27, 0.0  ;;  %v1001_v44 = vadd.f32 %v2071_v40, %v930_v32 }
 0x111   : > { %v1067_v42 = vmax.f32 %v1003_v30, 0.0  ;;  %v1099_v43 = vmax.f32 %v1035_v31, 0.0  ;;  %v1033_v45 = vadd.f32 %v2071_v40, %v962_v33  ;;  %1385 = vst.msk [vmem:[%s2086_s8 + $0x5c] sm:$0xf] %vm1361_vm3, %v1709_v34  ;;  %v933_v48 = vmul.f32 %v1815_v39, %v2066_v38  ;;  %v1818_v60 = vpop.f32.mrf.mxu0  ;;  %v1850_v61 = vpop.f32.mrf.mxu1 }
 0x112   : > { %1417 = vst.msk [vmem:[%s2086_s8 + $0xdc] sm:$0xf] %vm1361_vm3, %v1741_v35  ;;  %v1707_v46 = vpack.c.bf16 %v1062_v36, %v1062_v36  ;;  %v1739_v47 = vpack.c.bf16 %v1094_v37, %v1094_v37  ;;  %v965_v49 = vmul.f32 %v1847_v41, %v2066_v38  ;;  %v1065_v54 = vmax.f32 %v1001_v44, 0.0 }
 0x113   : > { %v1712_v52 = vpack.c.bf16 %v1067_v42, %v1067_v42  ;;  %v1744_v53 = vpack.c.bf16 %v1099_v43, %v1099_v43  ;;  %v1097_v55 = vmax.f32 %v1033_v45, 0.0  ;;  %v1004_v56 = vadd.f32 %v2071_v40, %v933_v48  ;;  %v756_v6 = vpop.f32.mrf.mxu0  ;;  %v884_v7 = vpop.f32.mrf.mxu1 }
 0x114   : > { %1383 = vst.msk [vmem:[%s2086_s8 + $0x54] sm:$0xf] %vm1361_vm3, %v1707_v46  ;;  %1415 = vst.msk [vmem:[%s2086_s8 + $0xd4] sm:$0xf] %vm1361_vm3, %v1739_v47  ;;  %v1036_v57 = vadd.f32 %v2071_v40, %v965_v49  ;;  %v931_v58 = vmul.f32 %v2066_v38, %v743_v50  ;;  %v963_v59 = vmul.f32 %v2066_v38, %v871_v51 }
 0x115   : > { %1388 = vst.msk [vmem:[%s2086_s8 + $0x68] sm:$0xf] %vm1361_vm3, %v1712_v52  ;;  %1420 = vst.msk [vmem:[%s2086_s8 + $0xe8] sm:$0xf] %vm1361_vm3, %v1744_v53  ;;  %v1710_v62 = vpack.c.bf16 %v1065_v54, %v1065_v54  ;;  %v1742_v63 = vpack.c.bf16 %v1097_v55, %v1097_v55  ;;  %v936_v0 = vmul.f32 %v1818_v60, %v2066_v38  ;;  %v1068_v2 = vmax.f32 %v1004_v56, 0.0  ;;  %v1819_v16 = vpop.f32.mrf.mxu0  ;;  %v1851_v17 = vpop.f32.mrf.mxu1 }
 0x116   : > { %v968_v1 = vmul.f32 %v1850_v61, %v2066_v38  ;;  %v1100_v3 = vmax.f32 %v1036_v57, 0.0  ;;  %v1002_v4 = vadd.f32 %v2071_v40, %v931_v58  ;;  %v1034_v5 = vadd.f32 %v2071_v40, %v963_v59 }
 0x117   : > { %1386 = vst.msk [vmem:[%s2086_s8 + $0x60] sm:$0xf] %vm1361_vm3, %v1710_v62  ;;  %1418 = vst.msk [vmem:[%s2086_s8 + $0xe0] sm:$0xf] %vm1361_vm3, %v1742_v63  ;;  %v1007_v8 = vadd.f32 %v2071_v40, %v936_v0  ;;  %v934_v10 = vmul.f32 %v2066_v38, %v756_v6  ;;  %v966_v11 = vmul.f32 %v2066_v38, %v884_v7  ;;  %v759_v26 = vpop.f32.mrf.mxu0  ;;  %v887_v27 = vpop.f32.mrf.mxu1 }
 0x118   : > { %v1039_v9 = vadd.f32 %v2071_v40, %v968_v1  ;;  %v1713_v12 = vpack.c.bf16 %v1068_v2, %v1068_v2  ;;  %v1745_v13 = vpack.c.bf16 %v1100_v3, %v1100_v3  ;;  %v1066_v14 = vmax.f32 %v1002_v4, 0.0 }
 0x119   : > { %v1098_v15 = vmax.f32 %v1034_v5, 0.0  ;;  %v1071_v18 = vmax.f32 %v1007_v8, 0.0  ;;  %v1005_v20 = vadd.f32 %v2071_v40, %v934_v10  ;;  %v1037_v21 = vadd.f32 %v2071_v40, %v966_v11 }
 0x11a   : > { %v1103_v19 = vmax.f32 %v1039_v9, 0.0  ;;  %1389 = vst.msk [vmem:[%s2086_s8 + $0x6c] sm:$0xf] %vm1361_vm3, %v1713_v12  ;;  %1421 = vst.msk [vmem:[%s2086_s8 + $0xec] sm:$0xf] %vm1361_vm3, %v1745_v13  ;;  %v1711_v22 = vpack.c.bf16 %v1066_v14, %v1066_v14  ;;  %v937_v24 = vmul.f32 %v1819_v16, %v2066_v38  ;;  %v969_v25 = vmul.f32 %v1851_v17, %v2066_v38 }
 0x11b   : > { %v1743_v23 = vpack.c.bf16 %v1098_v15, %v1098_v15  ;;  %v1716_v28 = vpack.c.bf16 %v1071_v18, %v1071_v18  ;;  %v1069_v30 = vmax.f32 %v1005_v20, 0.0  ;;  %v1101_v31 = vmax.f32 %v1037_v21, 0.0 }
 0x11c   : > { %v1748_v29 = vpack.c.bf16 %v1103_v19, %v1103_v19  ;;  %1387 = vst.msk [vmem:[%s2086_s8 + $0x64] sm:$0xf] %vm1361_vm3, %v1711_v22  ;;  %v1008_v32 = vadd.f32 %v2071_v40, %v937_v24  ;;  %v1040_v33 = vadd.f32 %v2071_v40, %v969_v25  ;;  %v935_v34 = vmul.f32 %v2066_v38, %v759_v26 }
 0x11d   : > { %1419 = vst.msk [vmem:[%s2086_s8 + $0xe4] sm:$0xf] %vm1361_vm3, %v1743_v23  ;;  %v967_v35 = vmul.f32 %v2066_v38, %v887_v27  ;;  %1392 = vst.msk [vmem:[%s2086_s8 + $0x78] sm:$0xf] %vm1361_vm3, %v1716_v28  ;;  %v1714_v36 = vpack.c.bf16 %v1069_v30, %v1069_v30  ;;  %v1746_v37 = vpack.c.bf16 %v1101_v31, %v1101_v31 }
 0x11e   : > { %1424 = vst.msk [vmem:[%s2086_s8 + $0xf8] sm:$0xf] %vm1361_vm3, %v1748_v29  ;;  %v1072_v39 = vmax.f32 %v1008_v32, 0.0  ;;  %v1104_v41 = vmax.f32 %v1040_v33, 0.0  ;;  %v1006_v42 = vadd.f32 %v2071_v40, %v935_v34 }
 0x11f   : > { %v1038_v43 = vadd.f32 %v2071_v40, %v967_v35  ;;  %1390 = vst.msk [vmem:[%s2086_s8 + $0x70] sm:$0xf] %vm1361_vm3, %v1714_v36  ;;  %1422 = vst.msk [vmem:[%s2086_s8 + $0xf0] sm:$0xf] %vm1361_vm3, %v1746_v37 }
 0x120   : > { %v1717_v38 = vpack.c.bf16 %v1072_v39, %v1072_v39  ;;  %v1749_v44 = vpack.c.bf16 %v1104_v41, %v1104_v41  ;;  %v1070_v45 = vmax.f32 %v1006_v42, 0.0 }
 0x121   : > { %v1102_v46 = vmax.f32 %v1038_v43, 0.0 }
 0x122   : > { %1393 = vst.msk [vmem:[%s2086_s8 + $0x7c] sm:$0xf] %vm1361_vm3, %v1717_v38  ;;  %1425 = vst.msk [vmem:[%s2086_s8 + $0xfc] sm:$0xf] %vm1361_vm3, %v1749_v44  ;;  %v1715_v47 = vpack.c.bf16 %v1070_v45, %v1070_v45 }
 0x123   : > { %v1747_v48 = vpack.c.bf16 %v1102_v46, %v1102_v46 }
 0x124   : > { %1391 = vst.msk [vmem:[%s2086_s8 + $0x74] sm:$0xf] %vm1361_vm3, %v1715_v47 }
 0x125   : > { %1423 = vst.msk [vmem:[%s2086_s8 + $0xf4] sm:$0xf] %vm1361_vm3, %v1747_v48 }
 0x126 PF: > { %s14_s17 = sadd.s32 1, %s1937_s17   ;;  %s2350_s15 = smov %s1933_s16 }
 0x127   : > { %p11_p5 = scmp.ge.s32.totalorder %s14_s17, 14   ;;  %s2351_s16 = smov %s2353_s18 }
 0x129   :  { %13 = sbr.rel (!%p11_p5) target bundleno = 2 (0x2), region = 75 }

// kernel: fall_detection_forward.12
= control target key start
LH: loop header
LB: loop body
LE: loop exit
PB: predicated region body
PF: predicated region fallthrough
CT: control target
= control target key end

     0   :  { %s1935_s22 = smov 96   ;;  %vm1545_vm0 = vcmask 257024   ;;  %s4826_s0 = inlined_call_operand.vmem [shape: bf16[64,2,24,64], index: 0, kind: input, shape index: {}]   ;;  %s4827_s1 = inlined_call_operand.vmem [shape: bf16[64,24,32], index: 1, kind: output, shape index: {}]  }
   0x1   :  { %v10_v0 = vld [vmem:[%s4826_s0 + $0x8] sm:$0xf]  ;;  %v1744_v1 = vld [vmem:[%s4826_s0 + $0x14] sm:$0xf]  ;;  %v8_v2 = vld [vmem:[%s4826_s0] sm:$0xf] }
   0x2   :  { %v1955_v3 = vmax.bf16 %v1744_v1, %v10_v0  ;;  %v1742_v4 = vld [vmem:[%s4826_s0 + $0xc] sm:$0xf]  ;;  %v11_v5 = vld [vmem:[%s4826_s0 + $0x18] sm:$0xf]  ;;  %v1745_v6 = vld [vmem:[%s4826_s0 + $0x24] sm:$0xf] }
   0x3   :  { %v1966_v7 = vmax.bf16 %v1742_v4, %v8_v2  ;;  %v9_v8 = vld [vmem:[%s4826_s0 + $0x4] sm:$0xf]  ;;  %v1743_v9 = vld [vmem:[%s4826_s0 + $0x10] sm:$0xf]  ;;  %v1976_v10 = vmax.bf16 %v1745_v6, %v11_v5  ;;  %v13_v12 = vld [vmem:[%s4826_s0 + $0x20] sm:$0xf] }
   0x4   :  { %781 = vrot.lane.b32.xlu1 %v1955_v3, %s1935_s22  ;;  %v1980_v11 = vmax.bf16 %v1743_v9, %v9_v8  ;;  %v1747_v13 = vld [vmem:[%s4826_s0 + $0x2c] sm:$0xf]  ;;  %v12_v14 = vld [vmem:[%s4826_s0 + $0x1c] sm:$0xf]  ;;  %v1746_v15 = vld [vmem:[%s4826_s0 + $0x28] sm:$0xf] }
   0x5   :  { %777 = vrot.lane.b32.xlu0 %v1966_v7, %s1935_s22  ;;  %v1996_v16 = vmax.bf16 %v1747_v13, %v13_v12  ;;  %v2000_v17 = vmax.bf16 %v1746_v15, %v12_v14  ;;  %v15_v18 = vld [vmem:[%s4826_s0 + $0x34] sm:$0xf]  ;;  %v1749_v19 = vld [vmem:[%s4826_s0 + $0x40] sm:$0xf]  ;;  %v14_v20 = vld [vmem:[%s4826_s0 + $0x30] sm:$0xf] }
   0x6   :  { %v1748_v21 = vld [vmem:[%s4826_s0 + $0x3c] sm:$0xf]  ;;  %v2016_v22 = vmax.bf16 %v1749_v19, %v15_v18  ;;  %v17_v24 = vld [vmem:[%s4826_s0 + $0x48] sm:$0xf]  ;;  %v1751_v25 = vld [vmem:[%s4826_s0 + $0x54] sm:$0xf] }
   0x7   :  { %v2020_v23 = vmax.bf16 %v1748_v21, %v14_v20  ;;  %v16_v26 = vld [vmem:[%s4826_s0 + $0x38] sm:$0xf]  ;;  %v1750_v27 = vld [vmem:[%s4826_s0 + $0x44] sm:$0xf]  ;;  %v2036_v28 = vmax.bf16 %v1751_v25, %v17_v24  ;;  %v19_v30 = vld [vmem:[%s4826_s0 + $0x50] sm:$0xf] }
   0x8   :  { %783 = vrot.lane.b32.xlu1 %v1976_v10, %s1935_s22  ;;  %v2040_v29 = vmax.bf16 %v1750_v27, %v16_v26  ;;  %v1753_v31 = vld [vmem:[%s4826_s0 + $0x5c] sm:$0xf]  ;;  %v18_v32 = vld [vmem:[%s4826_s0 + $0x4c] sm:$0xf]  ;;  %v1752_v33 = vld [vmem:[%s4826_s0 + $0x58] sm:$0xf] }
   0x9   :  { %779 = vrot.lane.b32.xlu0 %v1980_v11, %s1935_s22  ;;  %v2056_v34 = vmax.bf16 %v1753_v31, %v19_v30  ;;  %v2060_v35 = vmax.bf16 %v1752_v33, %v18_v32  ;;  %v21_v36 = vld [vmem:[%s4826_s0 + $0x64] sm:$0xf]  ;;  %v1755_v37 = vld [vmem:[%s4826_s0 + $0x70] sm:$0xf]  ;;  %v20_v38 = vld [vmem:[%s4826_s0 + $0x60] sm:$0xf] }
   0xa   :  { %v1754_v39 = vld [vmem:[%s4826_s0 + $0x6c] sm:$0xf]  ;;  %v2076_v40 = vmax.bf16 %v1755_v37, %v21_v36  ;;  %v23_v42 = vld [vmem:[%s4826_s0 + $0x78] sm:$0xf]  ;;  %v1757_v43 = vld [vmem:[%s4826_s0 + $0x84] sm:$0xf] }
   0xb   :  { %v2080_v41 = vmax.bf16 %v1754_v39, %v20_v38  ;;  %v22_v44 = vld [vmem:[%s4826_s0 + $0x68] sm:$0xf]  ;;  %v1756_v45 = vld [vmem:[%s4826_s0 + $0x74] sm:$0xf]  ;;  %v2096_v46 = vmax.bf16 %v1757_v43, %v23_v42  ;;  %v25_v48 = vld [vmem:[%s4826_s0 + $0x80] sm:$0xf] }
   0xc   :  { %787 = vrot.lane.b32.xlu1 %v1996_v16, %s1935_s22  ;;  %v2100_v47 = vmax.bf16 %v1756_v45, %v22_v44  ;;  %v1759_v49 = vld [vmem:[%s4826_s0 + $0x8c] sm:$0xf]  ;;  %v24_v50 = vld [vmem:[%s4826_s0 + $0x7c] sm:$0xf]  ;;  %v1758_v51 = vld [vmem:[%s4826_s0 + $0x88] sm:$0xf] }
   0xd   :  { %785 = vrot.lane.b32.xlu0 %v2000_v17, %s1935_s22  ;;  %v2116_v52 = vmax.bf16 %v1759_v49, %v25_v48  ;;  %v2120_v53 = vmax.bf16 %v1758_v51, %v24_v50  ;;  %v27_v54 = vld [vmem:[%s4826_s0 + $0x94] sm:$0xf]  ;;  %v1761_v55 = vld [vmem:[%s4826_s0 + $0xa0] sm:$0xf]  ;;  %v26_v56 = vld [vmem:[%s4826_s0 + $0x90] sm:$0xf] }
   0xe   :  { %v1760_v57 = vld [vmem:[%s4826_s0 + $0x9c] sm:$0xf]  ;;  %v2136_v58 = vmax.bf16 %v1761_v55, %v27_v54  ;;  %v29_v60 = vld [vmem:[%s4826_s0 + $0xa8] sm:$0xf]  ;;  %v1763_v61 = vld [vmem:[%s4826_s0 + $0xb4] sm:$0xf] }
   0xf   :  { %v2140_v59 = vmax.bf16 %v1760_v57, %v26_v56  ;;  %v28_v62 = vld [vmem:[%s4826_s0 + $0x98] sm:$0xf]  ;;  %v1762_v63 = vld [vmem:[%s4826_s0 + $0xa4] sm:$0xf]  ;;  %v2156_v0 = vmax.bf16 %v1763_v61, %v29_v60  ;;  %v31_v2 = vld [vmem:[%s4826_s0 + $0xb0] sm:$0xf] }
  0x10   :  { %791 = vrot.lane.b32.xlu1 %v2016_v22, %s1935_s22  ;;  %v2160_v1 = vmax.bf16 %v1762_v63, %v28_v62  ;;  %v1765_v4 = vld [vmem:[%s4826_s0 + $0xbc] sm:$0xf]  ;;  %v30_v5 = vld [vmem:[%s4826_s0 + $0xac] sm:$0xf]  ;;  %v1764_v6 = vld [vmem:[%s4826_s0 + $0xb8] sm:$0xf] }
  0x11   :  { %789 = vrot.lane.b32.xlu0 %v2020_v23, %s1935_s22  ;;  %v2176_v8 = vmax.bf16 %v1765_v4, %v31_v2  ;;  %v2180_v9 = vmax.bf16 %v1764_v6, %v30_v5  ;;  %v33_v12 = vld [vmem:[%s4826_s0 + $0xc4] sm:$0xf]  ;;  %v1767_v13 = vld [vmem:[%s4826_s0 + $0xd0] sm:$0xf]  ;;  %v32_v14 = vld [vmem:[%s4826_s0 + $0xc0] sm:$0xf] }
  0x12   :  { %v1766_v15 = vld [vmem:[%s4826_s0 + $0xcc] sm:$0xf]  ;;  %v2196_v18 = vmax.bf16 %v1767_v13, %v33_v12  ;;  %v35_v20 = vld [vmem:[%s4826_s0 + $0xd8] sm:$0xf]  ;;  %v1769_v21 = vld [vmem:[%s4826_s0 + $0xe4] sm:$0xf] }
  0x13   :  { %v2200_v19 = vmax.bf16 %v1766_v15, %v32_v14  ;;  %v34_v24 = vld [vmem:[%s4826_s0 + $0xc8] sm:$0xf]  ;;  %v1768_v25 = vld [vmem:[%s4826_s0 + $0xd4] sm:$0xf]  ;;  %v2216_v26 = vmax.bf16 %v1769_v21, %v35_v20  ;;  %v37_v30 = vld [vmem:[%s4826_s0 + $0xe0] sm:$0xf] }
  0x14   :  { %795 = vrot.lane.b32.xlu1 %v2036_v28, %s1935_s22  ;;  %v2220_v27 = vmax.bf16 %v1768_v25, %v34_v24  ;;  %v1771_v31 = vld [vmem:[%s4826_s0 + $0xec] sm:$0xf]  ;;  %v36_v32 = vld [vmem:[%s4826_s0 + $0xdc] sm:$0xf]  ;;  %v1770_v33 = vld [vmem:[%s4826_s0 + $0xe8] sm:$0xf] }
  0x15   :  { %793 = vrot.lane.b32.xlu0 %v2040_v29, %s1935_s22  ;;  %v2236_v36 = vmax.bf16 %v1771_v31, %v37_v30  ;;  %v2240_v37 = vmax.bf16 %v1770_v33, %v36_v32  ;;  %v39_v38 = vld [vmem:[%s4826_s0 + $0xf4] sm:$0xf]  ;;  %v1773_v39 = vld [vmem:[%s4826_s0 + $0x100] sm:$0xf]  ;;  %v38_v42 = vld [vmem:[%s4826_s0 + $0xf0] sm:$0xf] }
  0x16   :  { %v1772_v43 = vld [vmem:[%s4826_s0 + $0xfc] sm:$0xf]  ;;  %v2256_v44 = vmax.bf16 %v1773_v39, %v39_v38  ;;  %v41_v48 = vld [vmem:[%s4826_s0 + $0x108] sm:$0xf]  ;;  %v1775_v49 = vld [vmem:[%s4826_s0 + $0x114] sm:$0xf] }
  0x17   :  { %v2260_v45 = vmax.bf16 %v1772_v43, %v38_v42  ;;  %v40_v50 = vld [vmem:[%s4826_s0 + $0xf8] sm:$0xf]  ;;  %v1774_v51 = vld [vmem:[%s4826_s0 + $0x104] sm:$0xf]  ;;  %v2276_v54 = vmax.bf16 %v1775_v49, %v41_v48  ;;  %v43_v56 = vld [vmem:[%s4826_s0 + $0x110] sm:$0xf] }
  0x18   :  { %799 = vrot.lane.b32.xlu1 %v2056_v34, %s1935_s22  ;;  %v2280_v55 = vmax.bf16 %v1774_v51, %v40_v50  ;;  %v1777_v57 = vld [vmem:[%s4826_s0 + $0x11c] sm:$0xf]  ;;  %v42_v60 = vld [vmem:[%s4826_s0 + $0x10c] sm:$0xf]  ;;  %v1776_v61 = vld [vmem:[%s4826_s0 + $0x118] sm:$0xf] }
  0x19   :  { %797 = vrot.lane.b32.xlu0 %v2060_v35, %s1935_s22  ;;  %v2296_v62 = vmax.bf16 %v1777_v57, %v43_v56  ;;  %v2300_v63 = vmax.bf16 %v1776_v61, %v42_v60  ;;  %v45_v2 = vld [vmem:[%s4826_s0 + $0x124] sm:$0xf]  ;;  %v1779_v4 = vld [vmem:[%s4826_s0 + $0x130] sm:$0xf]  ;;  %v44_v5 = vld [vmem:[%s4826_s0 + $0x120] sm:$0xf] }
  0x1a   :  { %v1778_v6 = vld [vmem:[%s4826_s0 + $0x12c] sm:$0xf]  ;;  %v2316_v12 = vmax.bf16 %v1779_v4, %v45_v2  ;;  %v47_v14 = vld [vmem:[%s4826_s0 + $0x138] sm:$0xf]  ;;  %v1781_v15 = vld [vmem:[%s4826_s0 + $0x144] sm:$0xf] }
  0x1b   :  { %v2320_v13 = vmax.bf16 %v1778_v6, %v44_v5  ;;  %v46_v20 = vld [vmem:[%s4826_s0 + $0x128] sm:$0xf]  ;;  %v1780_v21 = vld [vmem:[%s4826_s0 + $0x134] sm:$0xf]  ;;  %v2336_v24 = vmax.bf16 %v1781_v15, %v47_v14  ;;  %v49_v30 = vld [vmem:[%s4826_s0 + $0x140] sm:$0xf] }
  0x1c   :  { %803 = vrot.lane.b32.xlu1 %v2076_v40, %s1935_s22  ;;  %v2340_v25 = vmax.bf16 %v1780_v21, %v46_v20  ;;  %v1783_v31 = vld [vmem:[%s4826_s0 + $0x14c] sm:$0xf]  ;;  %v48_v32 = vld [vmem:[%s4826_s0 + $0x13c] sm:$0xf]  ;;  %v1782_v33 = vld [vmem:[%s4826_s0 + $0x148] sm:$0xf] }
  0x1d   :  { %801 = vrot.lane.b32.xlu0 %v2080_v41, %s1935_s22  ;;  %v2356_v38 = vmax.bf16 %v1783_v31, %v49_v30  ;;  %v2360_v39 = vmax.bf16 %v1782_v33, %v48_v32  ;;  %v51_v42 = vld [vmem:[%s4826_s0 + $0x154] sm:$0xf]  ;;  %v1785_v43 = vld [vmem:[%s4826_s0 + $0x160] sm:$0xf]  ;;  %v50_v48 = vld [vmem:[%s4826_s0 + $0x150] sm:$0xf] }
  0x1e   :  { %v1784_v49 = vld [vmem:[%s4826_s0 + $0x15c] sm:$0xf]  ;;  %v2376_v50 = vmax.bf16 %v1785_v43, %v51_v42  ;;  %v53_v56 = vld [vmem:[%s4826_s0 + $0x168] sm:$0xf]  ;;  %v1787_v57 = vld [vmem:[%s4826_s0 + $0x174] sm:$0xf] }
  0x1f   :  { %v2380_v51 = vmax.bf16 %v1784_v49, %v50_v48  ;;  %v52_v60 = vld [vmem:[%s4826_s0 + $0x158] sm:$0xf]  ;;  %v1786_v61 = vld [vmem:[%s4826_s0 + $0x164] sm:$0xf]  ;;  %v2396_v2 = vmax.bf16 %v1787_v57, %v53_v56  ;;  %v55_v5 = vld [vmem:[%s4826_s0 + $0x170] sm:$0xf] }
  0x20   :  { %807 = vrot.lane.b32.xlu1 %v2096_v46, %s1935_s22  ;;  %v2400_v4 = vmax.bf16 %v1786_v61, %v52_v60  ;;  %v1789_v6 = vld [vmem:[%s4826_s0 + $0x17c] sm:$0xf]  ;;  %v54_v14 = vld [vmem:[%s4826_s0 + $0x16c] sm:$0xf]  ;;  %v1788_v15 = vld [vmem:[%s4826_s0 + $0x178] sm:$0xf] }
  0x21   :  { %805 = vrot.lane.b32.xlu0 %v2100_v47, %s1935_s22  ;;  %v2416_v20 = vmax.bf16 %v1789_v6, %v55_v5  ;;  %v2420_v21 = vmax.bf16 %v1788_v15, %v54_v14  ;;  %v57_v30 = vld [vmem:[%s4826_s0 + $0x184] sm:$0xf]  ;;  %v1791_v31 = vld [vmem:[%s4826_s0 + $0x190] sm:$0xf]  ;;  %v56_v32 = vld [vmem:[%s4826_s0 + $0x180] sm:$0xf] }
  0x22   :  { %v1790_v33 = vld [vmem:[%s4826_s0 + $0x18c] sm:$0xf]  ;;  %v2436_v42 = vmax.bf16 %v1791_v31, %v57_v30  ;;  %v59_v48 = vld [vmem:[%s4826_s0 + $0x198] sm:$0xf]  ;;  %v1793_v49 = vld [vmem:[%s4826_s0 + $0x1a4] sm:$0xf] }
  0x23   :  { %v2440_v43 = vmax.bf16 %v1790_v33, %v56_v32  ;;  %v58_v56 = vld [vmem:[%s4826_s0 + $0x188] sm:$0xf]  ;;  %v1792_v57 = vld [vmem:[%s4826_s0 + $0x194] sm:$0xf]  ;;  %v2456_v60 = vmax.bf16 %v1793_v49, %v59_v48  ;;  %v61_v5 = vld [vmem:[%s4826_s0 + $0x1a0] sm:$0xf] }
  0x24   :  { %811 = vrot.lane.b32.xlu1 %v2116_v52, %s1935_s22  ;;  %v2460_v61 = vmax.bf16 %v1792_v57, %v58_v56  ;;  %v1795_v6 = vld [vmem:[%s4826_s0 + $0x1ac] sm:$0xf]  ;;  %v60_v14 = vld [vmem:[%s4826_s0 + $0x19c] sm:$0xf]  ;;  %v1794_v15 = vld [vmem:[%s4826_s0 + $0x1a8] sm:$0xf] }
  0x25   :  { %809 = vrot.lane.b32.xlu0 %v2120_v53, %s1935_s22  ;;  %v2476_v30 = vmax.bf16 %v1795_v6, %v61_v5  ;;  %v2480_v31 = vmax.bf16 %v1794_v15, %v60_v14  ;;  %v63_v32 = vld [vmem:[%s4826_s0 + $0x1b4] sm:$0xf]  ;;  %v1797_v33 = vld [vmem:[%s4826_s0 + $0x1c0] sm:$0xf]  ;;  %v62_v48 = vld [vmem:[%s4826_s0 + $0x1b0] sm:$0xf] }
  0x26   :  { %v1796_v49 = vld [vmem:[%s4826_s0 + $0x1bc] sm:$0xf]  ;;  %v2496_v56 = vmax.bf16 %v1797_v33, %v63_v32  ;;  %v65_v5 = vld [vmem:[%s4826_s0 + $0x1c8] sm:$0xf]  ;;  %v1799_v6 = vld [vmem:[%s4826_s0 + $0x1d4] sm:$0xf] }
  0x27   :  { %4846 = vst [vmem:[#allocation2_spill] sm:$0xff] %v2476_v30  ;;  %4847 = vst [vmem:[#allocation3_spill] sm:$0xff] %v2480_v31  ;;  %v2500_v57 = vmax.bf16 %v1796_v49, %v62_v48  ;;  %v64_v14 = vld [vmem:[%s4826_s0 + $0x1b8] sm:$0xf]  ;;  %v1798_v15 = vld [vmem:[%s4826_s0 + $0x1c4] sm:$0xf]  ;;  %v2516_v32 = vmax.bf16 %v1799_v6, %v65_v5 }
  0x28   :  { %815 = vrot.lane.b32.xlu1 %v2136_v58, %s1935_s22  ;;  %4848 = vst [vmem:[#allocation4_spill] sm:$0xff] %v2496_v56  ;;  %v2520_v33 = vmax.bf16 %v1798_v15, %v64_v14  ;;  %v67_v48 = vld [vmem:[%s4826_s0 + $0x1d0] sm:$0xf]  ;;  %v1801_v49 = vld [vmem:[%s4826_s0 + $0x1dc] sm:$0xf] }
  0x29   :  { %813 = vrot.lane.b32.xlu0 %v2140_v59, %s1935_s22  ;;  %4849 = vst [vmem:[#allocation5_spill] sm:$0xff] %v2500_v57  ;;  %4850 = vst [vmem:[#allocation6_spill] sm:$0xff] %v2516_v32  ;;  %v1800_v5 = vld [vmem:[%s4826_s0 + $0x1d8] sm:$0xf]  ;;  %v2536_v6 = vmax.bf16 %v1801_v49, %v67_v48  ;;  %v69_v15 = vld [vmem:[%s4826_s0 + $0x1e4] sm:$0xf] }
  0x2a   :  { %4851 = vst [vmem:[#allocation7_spill] sm:$0xff] %v2520_v33  ;;  %v68_v48 = vld [vmem:[%s4826_s0 + $0x1e0] sm:$0xf]  ;;  %v1802_v49 = vld [vmem:[%s4826_s0 + $0x1ec] sm:$0xf] }
  0x2c   :  { %819 = vrot.lane.b32.xlu1 %v2156_v0, %s1935_s22 }
  0x2d   :  { %817 = vrot.lane.b32.xlu0 %v2160_v1, %s1935_s22 }
  0x30   :  { %823 = vrot.lane.b32.xlu1 %v2176_v8, %s1935_s22 }
  0x31   :  { %821 = vrot.lane.b32.xlu0 %v2180_v9, %s1935_s22 }
  0x34   :  { %827 = vrot.lane.b32.xlu1 %v2196_v18, %s1935_s22 }
  0x35   :  { %825 = vrot.lane.b32.xlu0 %v2200_v19, %s1935_s22 }
  0x38   :  { %831 = vrot.lane.b32.xlu1 %v2216_v26, %s1935_s22 }
  0x39   :  { %829 = vrot.lane.b32.xlu0 %v2220_v27, %s1935_s22 }
  0x3c   :  { %835 = vrot.lane.b32.xlu1 %v2236_v36, %s1935_s22 }
  0x3d   :  { %833 = vrot.lane.b32.xlu0 %v2240_v37, %s1935_s22 }
  0x40   :  { %839 = vrot.lane.b32.xlu1 %v2256_v44, %s1935_s22 }
  0x41   :  { %837 = vrot.lane.b32.xlu0 %v2260_v45, %s1935_s22 }
  0x44   :  { %843 = vrot.lane.b32.xlu1 %v2276_v54, %s1935_s22 }
  0x45   :  { %841 = vrot.lane.b32.xlu0 %v2280_v55, %s1935_s22 }
  0x48   :  { %847 = vrot.lane.b32.xlu1 %v2296_v62, %s1935_s22 }
  0x49   :  { %845 = vrot.lane.b32.xlu0 %v2300_v63, %s1935_s22 }
  0x4c   :  { %851 = vrot.lane.b32.xlu1 %v2316_v12, %s1935_s22 }
  0x4d   :  { %849 = vrot.lane.b32.xlu0 %v2320_v13, %s1935_s22 }
  0x50   :  { %855 = vrot.lane.b32.xlu1 %v2336_v24, %s1935_s22 }
  0x51   :  { %853 = vrot.lane.b32.xlu0 %v2340_v25, %s1935_s22 }
  0x54   :  { %859 = vrot.lane.b32.xlu1 %v2356_v38, %s1935_s22 }
  0x55   :  { %857 = vrot.lane.b32.xlu0 %v2360_v39, %s1935_s22 }
  0x58   :  { %863 = vrot.lane.b32.xlu1 %v2376_v50, %s1935_s22 }
  0x59   :  { %861 = vrot.lane.b32.xlu0 %v2380_v51, %s1935_s22 }
  0x5c   :  { %867 = vrot.lane.b32.xlu1 %v2396_v2, %s1935_s22 }
  0x5d   :  { %865 = vrot.lane.b32.xlu0 %v2400_v4, %s1935_s22 }
  0x60   :  { %871 = vrot.lane.b32.xlu1 %v2416_v20, %s1935_s22 }
  0x61   :  { %869 = vrot.lane.b32.xlu0 %v2420_v21, %s1935_s22 }
  0x64   :  { %875 = vrot.lane.b32.xlu1 %v2436_v42, %s1935_s22 }
  0x65   :  { %873 = vrot.lane.b32.xlu0 %v2440_v43, %s1935_s22 }
  0x68   :  { %879 = vrot.lane.b32.xlu1 %v2456_v60, %s1935_s22 }
  0x69   :  { %877 = vrot.lane.b32.xlu0 %v2460_v61, %s1935_s22 }
  0x6c   :  { %883 = vrot.lane.b32.xlu1 %v2476_v30, %s1935_s22  ;;  %v2566_v30 = vmax.bf16 %v1802_v49, %v68_v48 }
  0x6d   :  { %881 = vrot.lane.b32.xlu0 %v2480_v31, %s1935_s22  ;;  %v66_v31 = vld [vmem:[%s4826_s0 + $0x1cc] sm:$0xf] }
  0x6e   :  { %v2540_v14 = vmax.bf16 %v1800_v5, %v66_v31 }
  0x70   :  { %887 = vrot.lane.b32.xlu1 %v2496_v56, %s1935_s22 }
  0x71   :  { %885 = vrot.lane.b32.xlu0 %v2500_v57, %s1935_s22  ;;  %v1803_v57 = vld [vmem:[%s4826_s0 + $0x1f0] sm:$0xf] }
  0x74   :  { %891 = vrot.lane.b32.xlu1 %v2516_v32, %s1935_s22  ;;  %v2558_v32 = vmax.bf16 %v1803_v57, %v69_v15  ;;  %v70_v57 = vld [vmem:[%s4826_s0 + $0x1e8] sm:$0xf]  ;;  %v1804_v15 = vld [vmem:[%s4826_s0 + $0x1f4] sm:$0xf] }
  0x75   :  { %889 = vrot.lane.b32.xlu0 %v2520_v33, %s1935_s22 }
  0x76   :  { %v782_v56 = vpop.permute.xlu1 %781 }
  0x77   :  { %v1355_v31 = vmax.bf16 %v782_v56, %v1955_v3  ;;  %v778_v5 = vpop.permute.xlu0 %777  ;;  %v71_v3 = vld [vmem:[%s4826_s0 + $0x1f8] sm:$0xf] }
  0x78   :  { %v1353_v33 = vmax.bf16 %v778_v5, %v1966_v7  ;;  %895 = vrot.lane.b32.xlu1 %v2536_v6, %s1935_s22  ;;  %v1805_v7 = vld [vmem:[%s4826_s0 + $0x204] sm:$0xf] }
  0x79   :  { %1548 = vst.msk [vmem:[%s4827_s1 + $0x8] sm:$0xf] %vm1545_vm0, %v1355_v31  ;;  %893 = vrot.lane.b32.xlu0 %v2540_v14, %s1935_s22  ;;  %v2588_v5 = vmax.bf16 %v1805_v7, %v71_v3  ;;  %v72_v7 = vld [vmem:[%s4826_s0 + $0x1fc] sm:$0xf] }
  0x7a   :  { %1546 = vst.msk [vmem:[%s4827_s1] sm:$0xf] %vm1545_vm0, %v1353_v33  ;;  %v784_v56 = vpop.permute.xlu1 %783  ;;  %v2596_v33 = vmax.bf16 %v1804_v15, %v70_v57 }
  0x7b   :  { %v1356_v48 = vmax.bf16 %v784_v56, %v1976_v10  ;;  %v780_v49 = vpop.permute.xlu0 %779  ;;  %v73_v10 = vld [vmem:[%s4826_s0 + $0x200] sm:$0xf]  ;;  %v1806_v56 = vld [vmem:[%s4826_s0 + $0x208] sm:$0xf] }
  0x7c   :  { %v1354_v31 = vmax.bf16 %v780_v49, %v1980_v11  ;;  %899 = vrot.lane.b32.xlu1 %v2558_v32, %s1935_s22  ;;  %v1807_v11 = vld [vmem:[%s4826_s0 + $0x20c] sm:$0xf] }
  0x7d   :  { %1549 = vst.msk [vmem:[%s4827_s1 + $0xc] sm:$0xf] %vm1545_vm0, %v1356_v48  ;;  %897 = vrot.lane.b32.xlu0 %v2566_v30, %s1935_s22  ;;  %v2618_v49 = vmax.bf16 %v1807_v11, %v73_v10  ;;  %v74_v11 = vld [vmem:[%s4826_s0 + $0x210] sm:$0xf] }
  0x7e   :  { %1547 = vst.msk [vmem:[%s4827_s1 + $0x4] sm:$0xf] %vm1545_vm0, %v1354_v31  ;;  %v788_v3 = vpop.permute.xlu1 %787  ;;  %v2626_v31 = vmax.bf16 %v1806_v56, %v72_v7 }
  0x7f   :  { %v1358_v57 = vmax.bf16 %v788_v3, %v1996_v16  ;;  %v786_v15 = vpop.permute.xlu0 %785  ;;  %v75_v16 = vld [vmem:[%s4826_s0 + $0x214] sm:$0xf]  ;;  %v1808_v3 = vld [vmem:[%s4826_s0 + $0x21c] sm:$0xf] }
  0x80   :  { %v1357_v48 = vmax.bf16 %v786_v15, %v2000_v17  ;;  %903 = vrot.lane.b32.xlu1 %v2588_v5, %s1935_s22  ;;  %v1809_v17 = vld [vmem:[%s4826_s0 + $0x220] sm:$0xf] }
  0x81   :  { %1551 = vst.msk [vmem:[%s4827_s1 + $0x14] sm:$0xf] %vm1545_vm0, %v1358_v57  ;;  %901 = vrot.lane.b32.xlu0 %v2596_v33, %s1935_s22  ;;  %v2648_v15 = vmax.bf16 %v1809_v17, %v75_v16  ;;  %v76_v17 = vld [vmem:[%s4826_s0 + $0x218] sm:$0xf] }
  0x82   :  { %1550 = vst.msk [vmem:[%s4827_s1 + $0x10] sm:$0xf] %vm1545_vm0, %v1357_v48  ;;  %v792_v10 = vpop.permute.xlu1 %791  ;;  %v2656_v48 = vmax.bf16 %v1808_v3, %v74_v11 }
  0x83   :  { %v1360_v7 = vmax.bf16 %v792_v10, %v2016_v22  ;;  %v790_v56 = vpop.permute.xlu0 %789  ;;  %v77_v22 = vld [vmem:[%s4826_s0 + $0x228] sm:$0xf]  ;;  %v1810_v10 = vld [vmem:[%s4826_s0 + $0x224] sm:$0xf] }
  0x84   :  { %v1359_v57 = vmax.bf16 %v790_v56, %v2020_v23  ;;  %907 = vrot.lane.b32.xlu1 %v2618_v49, %s1935_s22  ;;  %v1811_v23 = vld [vmem:[%s4826_s0 + $0x234] sm:$0xf] }
  0x85   :  { %1553 = vst.msk [vmem:[%s4827_s1 + $0x1c] sm:$0xf] %vm1545_vm0, %v1360_v7  ;;  %905 = vrot.lane.b32.xlu0 %v2626_v31, %s1935_s22  ;;  %v2678_v56 = vmax.bf16 %v1811_v23, %v77_v22  ;;  %v78_v23 = vld [vmem:[%s4826_s0 + $0x22c] sm:$0xf] }
  0x86   :  { %1552 = vst.msk [vmem:[%s4827_s1 + $0x18] sm:$0xf] %vm1545_vm0, %v1359_v57  ;;  %v796_v16 = vpop.permute.xlu1 %795  ;;  %v2686_v57 = vmax.bf16 %v1810_v10, %v76_v17 }
  0x87   :  { %v1362_v11 = vmax.bf16 %v796_v16, %v2036_v28  ;;  %v794_v3 = vpop.permute.xlu0 %793  ;;  %v79_v28 = vld [vmem:[%s4826_s0 + $0x230] sm:$0xf]  ;;  %v1812_v16 = vld [vmem:[%s4826_s0 + $0x238] sm:$0xf] }
  0x88   :  { %v1361_v7 = vmax.bf16 %v794_v3, %v2040_v29  ;;  %911 = vrot.lane.b32.xlu1 %v2648_v15, %s1935_s22  ;;  %v1813_v29 = vld [vmem:[%s4826_s0 + $0x23c] sm:$0xf] }
  0x89   :  { %1555 = vst.msk [vmem:[%s4827_s1 + $0x24] sm:$0xf] %vm1545_vm0, %v1362_v11  ;;  %909 = vrot.lane.b32.xlu0 %v2656_v48, %s1935_s22  ;;  %v2708_v3 = vmax.bf16 %v1813_v29, %v79_v28  ;;  %v80_v29 = vld [vmem:[%s4826_s0 + $0x240] sm:$0xf] }
  0x8a   :  { %1554 = vst.msk [vmem:[%s4827_s1 + $0x20] sm:$0xf] %vm1545_vm0, %v1361_v7  ;;  %v800_v22 = vpop.permute.xlu1 %799  ;;  %v2716_v7 = vmax.bf16 %v1812_v16, %v78_v23 }
  0x8b   :  { %v1364_v17 = vmax.bf16 %v800_v22, %v2056_v34  ;;  %v798_v10 = vpop.permute.xlu0 %797  ;;  %v81_v34 = vld [vmem:[%s4826_s0 + $0x244] sm:$0xf]  ;;  %v1814_v22 = vld [vmem:[%s4826_s0 + $0x24c] sm:$0xf] }
  0x8c   :  { %v1363_v11 = vmax.bf16 %v798_v10, %v2060_v35  ;;  %915 = vrot.lane.b32.xlu1 %v2678_v56, %s1935_s22  ;;  %v1815_v35 = vld [vmem:[%s4826_s0 + $0x250] sm:$0xf] }
  0x8d   :  { %1557 = vst.msk [vmem:[%s4827_s1 + $0x2c] sm:$0xf] %vm1545_vm0, %v1364_v17  ;;  %913 = vrot.lane.b32.xlu0 %v2686_v57, %s1935_s22  ;;  %v2738_v10 = vmax.bf16 %v1815_v35, %v81_v34  ;;  %v82_v35 = vld [vmem:[%s4826_s0 + $0x248] sm:$0xf] }
  0x8e   :  { %1556 = vst.msk [vmem:[%s4827_s1 + $0x28] sm:$0xf] %vm1545_vm0, %v1363_v11  ;;  %v804_v28 = vpop.permute.xlu1 %803  ;;  %v2746_v11 = vmax.bf16 %v1814_v22, %v80_v29 }
  0x8f   :  { %v1366_v23 = vmax.bf16 %v804_v28, %v2076_v40  ;;  %v802_v16 = vpop.permute.xlu0 %801  ;;  %v83_v40 = vld [vmem:[%s4826_s0 + $0x258] sm:$0xf]  ;;  %v1816_v28 = vld [vmem:[%s4826_s0 + $0x254] sm:$0xf] }
  0x90   :  { %v1365_v17 = vmax.bf16 %v802_v16, %v2080_v41  ;;  %919 = vrot.lane.b32.xlu1 %v2708_v3, %s1935_s22  ;;  %v1817_v41 = vld [vmem:[%s4826_s0 + $0x264] sm:$0xf] }
  0x91   :  { %1559 = vst.msk [vmem:[%s4827_s1 + $0x34] sm:$0xf] %vm1545_vm0, %v1366_v23  ;;  %917 = vrot.lane.b32.xlu0 %v2716_v7, %s1935_s22  ;;  %v2768_v16 = vmax.bf16 %v1817_v41, %v83_v40  ;;  %v84_v41 = vld [vmem:[%s4826_s0 + $0x25c] sm:$0xf] }
  0x92   :  { %1558 = vst.msk [vmem:[%s4827_s1 + $0x30] sm:$0xf] %vm1545_vm0, %v1365_v17  ;;  %v808_v34 = vpop.permute.xlu1 %807  ;;  %v2776_v17 = vmax.bf16 %v1816_v28, %v82_v35 }
  0x93   :  { %v1368_v29 = vmax.bf16 %v808_v34, %v2096_v46  ;;  %v806_v22 = vpop.permute.xlu0 %805  ;;  %v85_v46 = vld [vmem:[%s4826_s0 + $0x260] sm:$0xf]  ;;  %v1818_v34 = vld [vmem:[%s4826_s0 + $0x268] sm:$0xf] }
  0x94   :  { %v1367_v23 = vmax.bf16 %v806_v22, %v2100_v47  ;;  %923 = vrot.lane.b32.xlu1 %v2738_v10, %s1935_s22  ;;  %v1819_v47 = vld [vmem:[%s4826_s0 + $0x26c] sm:$0xf] }
  0x95   :  { %1561 = vst.msk [vmem:[%s4827_s1 + $0x3c] sm:$0xf] %vm1545_vm0, %v1368_v29  ;;  %921 = vrot.lane.b32.xlu0 %v2746_v11, %s1935_s22  ;;  %v2798_v22 = vmax.bf16 %v1819_v47, %v85_v46  ;;  %v86_v47 = vld [vmem:[%s4826_s0 + $0x270] sm:$0xf] }
  0x96   :  { %1560 = vst.msk [vmem:[%s4827_s1 + $0x38] sm:$0xf] %vm1545_vm0, %v1367_v23  ;;  %v812_v40 = vpop.permute.xlu1 %811  ;;  %v2806_v23 = vmax.bf16 %v1818_v34, %v84_v41 }
  0x97   :  { %v1370_v35 = vmax.bf16 %v812_v40, %v2116_v52  ;;  %v810_v28 = vpop.permute.xlu0 %809  ;;  %v87_v52 = vld [vmem:[%s4826_s0 + $0x274] sm:$0xf]  ;;  %v1820_v40 = vld [vmem:[%s4826_s0 + $0x27c] sm:$0xf] }
  0x98   :  { %v1369_v29 = vmax.bf16 %v810_v28, %v2120_v53  ;;  %927 = vrot.lane.b32.xlu1 %v2768_v16, %s1935_s22  ;;  %v1821_v53 = vld [vmem:[%s4826_s0 + $0x280] sm:$0xf] }
  0x99   :  { %1563 = vst.msk [vmem:[%s4827_s1 + $0x44] sm:$0xf] %vm1545_vm0, %v1370_v35  ;;  %925 = vrot.lane.b32.xlu0 %v2776_v17, %s1935_s22  ;;  %v2828_v28 = vmax.bf16 %v1821_v53, %v87_v52  ;;  %v88_v53 = vld [vmem:[%s4826_s0 + $0x278] sm:$0xf] }
  0x9a   :  { %1562 = vst.msk [vmem:[%s4827_s1 + $0x40] sm:$0xf] %vm1545_vm0, %v1369_v29  ;;  %v816_v46 = vpop.permute.xlu1 %815  ;;  %v2836_v29 = vmax.bf16 %v1820_v40, %v86_v47 }
  0x9b   :  { %v1372_v41 = vmax.bf16 %v816_v46, %v2136_v58  ;;  %v814_v34 = vpop.permute.xlu0 %813  ;;  %v89_v58 = vld [vmem:[%s4826_s0 + $0x288] sm:$0xf]  ;;  %v1822_v46 = vld [vmem:[%s4826_s0 + $0x284] sm:$0xf] }
  0x9c   :  { %v1371_v35 = vmax.bf16 %v814_v34, %v2140_v59  ;;  %931 = vrot.lane.b32.xlu1 %v2798_v22, %s1935_s22  ;;  %v1823_v59 = vld [vmem:[%s4826_s0 + $0x294] sm:$0xf] }
  0x9d   :  { %1565 = vst.msk [vmem:[%s4827_s1 + $0x4c] sm:$0xf] %vm1545_vm0, %v1372_v41  ;;  %929 = vrot.lane.b32.xlu0 %v2806_v23, %s1935_s22  ;;  %v2858_v34 = vmax.bf16 %v1823_v59, %v89_v58  ;;  %v90_v59 = vld [vmem:[%s4826_s0 + $0x28c] sm:$0xf] }
  0x9e   :  { %1564 = vst.msk [vmem:[%s4827_s1 + $0x48] sm:$0xf] %vm1545_vm0, %v1371_v35  ;;  %v820_v52 = vpop.permute.xlu1 %819  ;;  %v2866_v35 = vmax.bf16 %v1822_v46, %v88_v53 }
  0x9f   :  { %v1374_v47 = vmax.bf16 %v820_v52, %v2156_v0  ;;  %v818_v40 = vpop.permute.xlu0 %817  ;;  %v91_v0 = vld [vmem:[%s4826_s0 + $0x290] sm:$0xf]  ;;  %v1824_v52 = vld [vmem:[%s4826_s0 + $0x298] sm:$0xf] }
  0xa0   :  { %v1373_v41 = vmax.bf16 %v818_v40, %v2160_v1  ;;  %935 = vrot.lane.b32.xlu1 %v2828_v28, %s1935_s22  ;;  %v1825_v1 = vld [vmem:[%s4826_s0 + $0x29c] sm:$0xf] }
  0xa1   :  { %1567 = vst.msk [vmem:[%s4827_s1 + $0x54] sm:$0xf] %vm1545_vm0, %v1374_v47  ;;  %933 = vrot.lane.b32.xlu0 %v2836_v29, %s1935_s22  ;;  %v2888_v40 = vmax.bf16 %v1825_v1, %v91_v0  ;;  %v92_v1 = vld [vmem:[%s4826_s0 + $0x2a0] sm:$0xf] }
  0xa2   :  { %1566 = vst.msk [vmem:[%s4827_s1 + $0x50] sm:$0xf] %vm1545_vm0, %v1373_v41  ;;  %v824_v58 = vpop.permute.xlu1 %823  ;;  %v2896_v41 = vmax.bf16 %v1824_v52, %v90_v59 }
  0xa3   :  { %v1376_v53 = vmax.bf16 %v824_v58, %v2176_v8  ;;  %v822_v46 = vpop.permute.xlu0 %821  ;;  %v93_v8 = vld [vmem:[%s4826_s0 + $0x2a4] sm:$0xf]  ;;  %v1826_v58 = vld [vmem:[%s4826_s0 + $0x2ac] sm:$0xf] }
  0xa4   :  { %v1375_v47 = vmax.bf16 %v822_v46, %v2180_v9  ;;  %939 = vrot.lane.b32.xlu1 %v2858_v34, %s1935_s22  ;;  %v1827_v9 = vld [vmem:[%s4826_s0 + $0x2b0] sm:$0xf] }
  0xa5   :  { %1569 = vst.msk [vmem:[%s4827_s1 + $0x5c] sm:$0xf] %vm1545_vm0, %v1376_v53  ;;  %937 = vrot.lane.b32.xlu0 %v2866_v35, %s1935_s22  ;;  %v2918_v46 = vmax.bf16 %v1827_v9, %v93_v8  ;;  %v94_v9 = vld [vmem:[%s4826_s0 + $0x2a8] sm:$0xf] }
  0xa6   :  { %1568 = vst.msk [vmem:[%s4827_s1 + $0x58] sm:$0xf] %vm1545_vm0, %v1375_v47  ;;  %v828_v0 = vpop.permute.xlu1 %827  ;;  %v2926_v47 = vmax.bf16 %v1826_v58, %v92_v1 }
  0xa7   :  { %v1378_v59 = vmax.bf16 %v828_v0, %v2196_v18  ;;  %v826_v52 = vpop.permute.xlu0 %825  ;;  %v95_v18 = vld [vmem:[%s4826_s0 + $0x2b8] sm:$0xf]  ;;  %v1828_v0 = vld [vmem:[%s4826_s0 + $0x2b4] sm:$0xf] }
  0xa8   :  { %v1377_v53 = vmax.bf16 %v826_v52, %v2200_v19  ;;  %943 = vrot.lane.b32.xlu1 %v2888_v40, %s1935_s22  ;;  %v1829_v19 = vld [vmem:[%s4826_s0 + $0x2c4] sm:$0xf] }
  0xa9   :  { %1571 = vst.msk [vmem:[%s4827_s1 + $0x64] sm:$0xf] %vm1545_vm0, %v1378_v59  ;;  %941 = vrot.lane.b32.xlu0 %v2896_v41, %s1935_s22  ;;  %v2948_v52 = vmax.bf16 %v1829_v19, %v95_v18  ;;  %v96_v19 = vld [vmem:[%s4826_s0 + $0x2bc] sm:$0xf] }
  0xaa   :  { %1570 = vst.msk [vmem:[%s4827_s1 + $0x60] sm:$0xf] %vm1545_vm0, %v1377_v53  ;;  %v832_v8 = vpop.permute.xlu1 %831  ;;  %v2956_v53 = vmax.bf16 %v1828_v0, %v94_v9 }
  0xab   :  { %v1380_v1 = vmax.bf16 %v832_v8, %v2216_v26  ;;  %v830_v58 = vpop.permute.xlu0 %829  ;;  %v97_v26 = vld [vmem:[%s4826_s0 + $0x2c0] sm:$0xf]  ;;  %v1830_v8 = vld [vmem:[%s4826_s0 + $0x2c8] sm:$0xf] }
  0xac   :  { %v1379_v59 = vmax.bf16 %v830_v58, %v2220_v27  ;;  %947 = vrot.lane.b32.xlu1 %v2918_v46, %s1935_s22  ;;  %v1831_v27 = vld [vmem:[%s4826_s0 + $0x2cc] sm:$0xf] }
  0xad   :  { %1573 = vst.msk [vmem:[%s4827_s1 + $0x6c] sm:$0xf] %vm1545_vm0, %v1380_v1  ;;  %945 = vrot.lane.b32.xlu0 %v2926_v47, %s1935_s22  ;;  %v2978_v58 = vmax.bf16 %v1831_v27, %v97_v26  ;;  %v98_v27 = vld [vmem:[%s4826_s0 + $0x2d0] sm:$0xf] }
  0xae   :  { %1572 = vst.msk [vmem:[%s4827_s1 + $0x68] sm:$0xf] %vm1545_vm0, %v1379_v59  ;;  %v836_v18 = vpop.permute.xlu1 %835  ;;  %v2986_v59 = vmax.bf16 %v1830_v8, %v96_v19 }
  0xaf   :  { %v1382_v9 = vmax.bf16 %v836_v18, %v2236_v36  ;;  %v834_v0 = vpop.permute.xlu0 %833  ;;  %v99_v36 = vld [vmem:[%s4826_s0 + $0x2d4] sm:$0xf]  ;;  %v1832_v18 = vld [vmem:[%s4826_s0 + $0x2dc] sm:$0xf] }
  0xb0   :  { %v1381_v1 = vmax.bf16 %v834_v0, %v2240_v37  ;;  %951 = vrot.lane.b32.xlu1 %v2948_v52, %s1935_s22  ;;  %v1833_v37 = vld [vmem:[%s4826_s0 + $0x2e0] sm:$0xf] }
  0xb1   :  { %1575 = vst.msk [vmem:[%s4827_s1 + $0x74] sm:$0xf] %vm1545_vm0, %v1382_v9  ;;  %949 = vrot.lane.b32.xlu0 %v2956_v53, %s1935_s22  ;;  %v3008_v0 = vmax.bf16 %v1833_v37, %v99_v36  ;;  %v100_v37 = vld [vmem:[%s4826_s0 + $0x2d8] sm:$0xf] }
  0xb2   :  { %1574 = vst.msk [vmem:[%s4827_s1 + $0x70] sm:$0xf] %vm1545_vm0, %v1381_v1  ;;  %v840_v26 = vpop.permute.xlu1 %839  ;;  %v3016_v1 = vmax.bf16 %v1832_v18, %v98_v27 }
  0xb3   :  { %v1384_v19 = vmax.bf16 %v840_v26, %v2256_v44  ;;  %v838_v8 = vpop.permute.xlu0 %837  ;;  %v101_v44 = vld [vmem:[%s4826_s0 + $0x2e8] sm:$0xf]  ;;  %v1834_v26 = vld [vmem:[%s4826_s0 + $0x2e4] sm:$0xf] }
  0xb4   :  { %v1383_v9 = vmax.bf16 %v838_v8, %v2260_v45  ;;  %955 = vrot.lane.b32.xlu1 %v2978_v58, %s1935_s22  ;;  %v1835_v45 = vld [vmem:[%s4826_s0 + $0x2f4] sm:$0xf] }
  0xb5   :  { %1577 = vst.msk [vmem:[%s4827_s1 + $0x7c] sm:$0xf] %vm1545_vm0, %v1384_v19  ;;  %953 = vrot.lane.b32.xlu0 %v2986_v59, %s1935_s22  ;;  %v3038_v8 = vmax.bf16 %v1835_v45, %v101_v44  ;;  %v102_v45 = vld [vmem:[%s4826_s0 + $0x2ec] sm:$0xf] }
  0xb6   :  { %1576 = vst.msk [vmem:[%s4827_s1 + $0x78] sm:$0xf] %vm1545_vm0, %v1383_v9  ;;  %v844_v36 = vpop.permute.xlu1 %843  ;;  %v3046_v9 = vmax.bf16 %v1834_v26, %v100_v37 }
  0xb7   :  { %v1386_v27 = vmax.bf16 %v844_v36, %v2276_v54  ;;  %v842_v18 = vpop.permute.xlu0 %841  ;;  %v103_v54 = vld [vmem:[%s4826_s0 + $0x2f0] sm:$0xf]  ;;  %v1836_v36 = vld [vmem:[%s4826_s0 + $0x2f8] sm:$0xf] }
  0xb8   :  { %v1385_v19 = vmax.bf16 %v842_v18, %v2280_v55  ;;  %959 = vrot.lane.b32.xlu1 %v3008_v0, %s1935_s22  ;;  %v1837_v55 = vld [vmem:[%s4826_s0 + $0x2fc] sm:$0xf] }
  0xb9   :  { %1579 = vst.msk [vmem:[%s4827_s1 + $0x84] sm:$0xf] %vm1545_vm0, %v1386_v27  ;;  %957 = vrot.lane.b32.xlu0 %v3016_v1, %s1935_s22  ;;  %v3068_v18 = vmax.bf16 %v1837_v55, %v103_v54  ;;  %v104_v55 = vld [vmem:[%s4826_s0 + $0x300] sm:$0xf] }
  0xba   :  { %1578 = vst.msk [vmem:[%s4827_s1 + $0x80] sm:$0xf] %vm1545_vm0, %v1385_v19  ;;  %v848_v44 = vpop.permute.xlu1 %847  ;;  %v3076_v19 = vmax.bf16 %v1836_v36, %v102_v45 }
  0xbb   :  { %v1388_v37 = vmax.bf16 %v848_v44, %v2296_v62  ;;  %v846_v26 = vpop.permute.xlu0 %845  ;;  %v105_v62 = vld [vmem:[%s4826_s0 + $0x304] sm:$0xf]  ;;  %v1838_v44 = vld [vmem:[%s4826_s0 + $0x30c] sm:$0xf] }
  0xbc   :  { %v1387_v27 = vmax.bf16 %v846_v26, %v2300_v63  ;;  %963 = vrot.lane.b32.xlu1 %v3038_v8, %s1935_s22  ;;  %v1839_v63 = vld [vmem:[%s4826_s0 + $0x310] sm:$0xf] }
  0xbd   :  { %1581 = vst.msk [vmem:[%s4827_s1 + $0x8c] sm:$0xf] %vm1545_vm0, %v1388_v37  ;;  %961 = vrot.lane.b32.xlu0 %v3046_v9, %s1935_s22  ;;  %v3098_v26 = vmax.bf16 %v1839_v63, %v105_v62  ;;  %v106_v63 = vld [vmem:[%s4826_s0 + $0x308] sm:$0xf] }
  0xbe   :  { %1580 = vst.msk [vmem:[%s4827_s1 + $0x88] sm:$0xf] %vm1545_vm0, %v1387_v27  ;;  %v852_v54 = vpop.permute.xlu1 %851  ;;  %v3106_v27 = vmax.bf16 %v1838_v44, %v104_v55 }
  0xbf   :  { %v1390_v45 = vmax.bf16 %v852_v54, %v2316_v12  ;;  %v850_v36 = vpop.permute.xlu0 %849  ;;  %v107_v12 = vld [vmem:[%s4826_s0 + $0x318] sm:$0xf]  ;;  %v1840_v54 = vld [vmem:[%s4826_s0 + $0x314] sm:$0xf] }
  0xc0   :  { %v1389_v37 = vmax.bf16 %v850_v36, %v2320_v13  ;;  %967 = vrot.lane.b32.xlu1 %v3068_v18, %s1935_s22  ;;  %v1841_v13 = vld [vmem:[%s4826_s0 + $0x324] sm:$0xf] }
  0xc1   :  { %1583 = vst.msk [vmem:[%s4827_s1 + $0x94] sm:$0xf] %vm1545_vm0, %v1390_v45  ;;  %965 = vrot.lane.b32.xlu0 %v3076_v19, %s1935_s22  ;;  %v3128_v36 = vmax.bf16 %v1841_v13, %v107_v12  ;;  %v108_v13 = vld [vmem:[%s4826_s0 + $0x31c] sm:$0xf] }
  0xc2   :  { %1582 = vst.msk [vmem:[%s4827_s1 + $0x90] sm:$0xf] %vm1545_vm0, %v1389_v37  ;;  %v856_v62 = vpop.permute.xlu1 %855  ;;  %v3136_v37 = vmax.bf16 %v1840_v54, %v106_v63 }
  0xc3   :  { %v1392_v55 = vmax.bf16 %v856_v62, %v2336_v24  ;;  %v854_v44 = vpop.permute.xlu0 %853  ;;  %v109_v24 = vld [vmem:[%s4826_s0 + $0x320] sm:$0xf]  ;;  %v1842_v62 = vld [vmem:[%s4826_s0 + $0x328] sm:$0xf] }
  0xc4   :  { %v1391_v45 = vmax.bf16 %v854_v44, %v2340_v25  ;;  %971 = vrot.lane.b32.xlu1 %v3098_v26, %s1935_s22  ;;  %v1843_v25 = vld [vmem:[%s4826_s0 + $0x32c] sm:$0xf] }
  0xc5   :  { %1585 = vst.msk [vmem:[%s4827_s1 + $0x9c] sm:$0xf] %vm1545_vm0, %v1392_v55  ;;  %969 = vrot.lane.b32.xlu0 %v3106_v27, %s1935_s22  ;;  %v3158_v44 = vmax.bf16 %v1843_v25, %v109_v24  ;;  %v110_v25 = vld [vmem:[%s4826_s0 + $0x330] sm:$0xf] }
  0xc6   :  { %1584 = vst.msk [vmem:[%s4827_s1 + $0x98] sm:$0xf] %vm1545_vm0, %v1391_v45  ;;  %v860_v12 = vpop.permute.xlu1 %859  ;;  %v3166_v45 = vmax.bf16 %v1842_v62, %v108_v13 }
  0xc7   :  { %v1394_v63 = vmax.bf16 %v860_v12, %v2356_v38  ;;  %v858_v54 = vpop.permute.xlu0 %857  ;;  %v111_v38 = vld [vmem:[%s4826_s0 + $0x334] sm:$0xf]  ;;  %v1844_v12 = vld [vmem:[%s4826_s0 + $0x33c] sm:$0xf] }
  0xc8   :  { %v1393_v55 = vmax.bf16 %v858_v54, %v2360_v39  ;;  %975 = vrot.lane.b32.xlu1 %v3128_v36, %s1935_s22  ;;  %v1845_v39 = vld [vmem:[%s4826_s0 + $0x340] sm:$0xf] }
  0xc9   :  { %1587 = vst.msk [vmem:[%s4827_s1 + $0xa4] sm:$0xf] %vm1545_vm0, %v1394_v63  ;;  %973 = vrot.lane.b32.xlu0 %v3136_v37, %s1935_s22  ;;  %v3188_v54 = vmax.bf16 %v1845_v39, %v111_v38  ;;  %v112_v39 = vld [vmem:[%s4826_s0 + $0x338] sm:$0xf] }
  0xca   :  { %1586 = vst.msk [vmem:[%s4827_s1 + $0xa0] sm:$0xf] %vm1545_vm0, %v1393_v55  ;;  %v864_v24 = vpop.permute.xlu1 %863  ;;  %v3196_v55 = vmax.bf16 %v1844_v12, %v110_v25 }
  0xcb   :  { %v1396_v13 = vmax.bf16 %v864_v24, %v2376_v50  ;;  %v862_v62 = vpop.permute.xlu0 %861  ;;  %v113_v50 = vld [vmem:[%s4826_s0 + $0x348] sm:$0xf]  ;;  %v1846_v24 = vld [vmem:[%s4826_s0 + $0x344] sm:$0xf] }
  0xcc   :  { %v1395_v63 = vmax.bf16 %v862_v62, %v2380_v51  ;;  %979 = vrot.lane.b32.xlu1 %v3158_v44, %s1935_s22  ;;  %v1847_v51 = vld [vmem:[%s4826_s0 + $0x354] sm:$0xf] }
  0xcd   :  { %1589 = vst.msk [vmem:[%s4827_s1 + $0xac] sm:$0xf] %vm1545_vm0, %v1396_v13  ;;  %977 = vrot.lane.b32.xlu0 %v3166_v45, %s1935_s22  ;;  %v3218_v62 = vmax.bf16 %v1847_v51, %v113_v50  ;;  %v114_v51 = vld [vmem:[%s4826_s0 + $0x34c] sm:$0xf] }
  0xce   :  { %1588 = vst.msk [vmem:[%s4827_s1 + $0xa8] sm:$0xf] %vm1545_vm0, %v1395_v63  ;;  %v868_v38 = vpop.permute.xlu1 %867  ;;  %v3226_v63 = vmax.bf16 %v1846_v24, %v112_v39 }
  0xcf   :  { %v1398_v25 = vmax.bf16 %v868_v38, %v2396_v2  ;;  %v866_v12 = vpop.permute.xlu0 %865  ;;  %v115_v2 = vld [vmem:[%s4826_s0 + $0x350] sm:$0xf]  ;;  %v1848_v38 = vld [vmem:[%s4826_s0 + $0x358] sm:$0xf] }
  0xd0   :  { %v1397_v13 = vmax.bf16 %v866_v12, %v2400_v4  ;;  %983 = vrot.lane.b32.xlu1 %v3188_v54, %s1935_s22  ;;  %v1849_v4 = vld [vmem:[%s4826_s0 + $0x35c] sm:$0xf] }
  0xd1   :  { %1591 = vst.msk [vmem:[%s4827_s1 + $0xb4] sm:$0xf] %vm1545_vm0, %v1398_v25  ;;  %981 = vrot.lane.b32.xlu0 %v3196_v55, %s1935_s22  ;;  %v3248_v12 = vmax.bf16 %v1849_v4, %v115_v2  ;;  %v116_v4 = vld [vmem:[%s4826_s0 + $0x360] sm:$0xf] }
  0xd2   :  { %1590 = vst.msk [vmem:[%s4827_s1 + $0xb0] sm:$0xf] %vm1545_vm0, %v1397_v13  ;;  %v872_v50 = vpop.permute.xlu1 %871  ;;  %v3256_v13 = vmax.bf16 %v1848_v38, %v114_v51 }
  0xd3   :  { %v1400_v39 = vmax.bf16 %v872_v50, %v2416_v20  ;;  %v870_v24 = vpop.permute.xlu0 %869  ;;  %v117_v20 = vld [vmem:[%s4826_s0 + $0x364] sm:$0xf]  ;;  %v1850_v50 = vld [vmem:[%s4826_s0 + $0x36c] sm:$0xf] }
  0xd4   :  { %v1399_v25 = vmax.bf16 %v870_v24, %v2420_v21  ;;  %987 = vrot.lane.b32.xlu1 %v3218_v62, %s1935_s22  ;;  %v1851_v21 = vld [vmem:[%s4826_s0 + $0x370] sm:$0xf] }
  0xd5   :  { %1593 = vst.msk [vmem:[%s4827_s1 + $0xbc] sm:$0xf] %vm1545_vm0, %v1400_v39  ;;  %985 = vrot.lane.b32.xlu0 %v3226_v63, %s1935_s22  ;;  %v3278_v24 = vmax.bf16 %v1851_v21, %v117_v20  ;;  %v118_v21 = vld [vmem:[%s4826_s0 + $0x368] sm:$0xf] }
  0xd6   :  { %1592 = vst.msk [vmem:[%s4827_s1 + $0xb8] sm:$0xf] %vm1545_vm0, %v1399_v25  ;;  %v876_v2 = vpop.permute.xlu1 %875  ;;  %v3286_v25 = vmax.bf16 %v1850_v50, %v116_v4 }
  0xd7   :  { %v1402_v51 = vmax.bf16 %v876_v2, %v2436_v42  ;;  %v874_v38 = vpop.permute.xlu0 %873  ;;  %4852 = vst [vmem:[#allocation8_spill] sm:$0xff] %v3278_v24  ;;  %v119_v42 = vld [vmem:[%s4826_s0 + $0x378] sm:$0xf]  ;;  %v1852_v2 = vld [vmem:[%s4826_s0 + $0x374] sm:$0xf] }
  0xd8   :  { %v1401_v39 = vmax.bf16 %v874_v38, %v2440_v43  ;;  %991 = vrot.lane.b32.xlu1 %v3248_v12, %s1935_s22  ;;  %4853 = vst [vmem:[#allocation9_spill] sm:$0xff] %v3286_v25  ;;  %v1853_v43 = vld [vmem:[%s4826_s0 + $0x384] sm:$0xf] }
  0xd9   :  { %1595 = vst.msk [vmem:[%s4827_s1 + $0xc4] sm:$0xf] %vm1545_vm0, %v1402_v51  ;;  %989 = vrot.lane.b32.xlu0 %v3256_v13, %s1935_s22  ;;  %v3308_v38 = vmax.bf16 %v1853_v43, %v119_v42  ;;  %v120_v43 = vld [vmem:[%s4826_s0 + $0x37c] sm:$0xf] }
  0xda   :  { %1594 = vst.msk [vmem:[%s4827_s1 + $0xc0] sm:$0xf] %vm1545_vm0, %v1401_v39  ;;  %v880_v20 = vpop.permute.xlu1 %879  ;;  %v3316_v39 = vmax.bf16 %v1852_v2, %v118_v21  ;;  %v4856_v21 = vld [vmem:[#allocation2_spill] sm:$0xff] }
  0xdb   :  { %v1404_v4 = vmax.bf16 %v880_v20, %v2456_v60  ;;  %v878_v50 = vpop.permute.xlu0 %877  ;;  %4854 = vst [vmem:[#allocation10_spill] sm:$0xff] %v3308_v38  ;;  %v121_v60 = vld [vmem:[%s4826_s0 + $0x380] sm:$0xf]  ;;  %v1854_v20 = vld [vmem:[%s4826_s0 + $0x388] sm:$0xf] }
  0xdc   :  { %v1403_v51 = vmax.bf16 %v878_v50, %v2460_v61  ;;  %995 = vrot.lane.b32.xlu1 %v3278_v24, %s1935_s22  ;;  %4855 = vst [vmem:[#allocation11_spill] sm:$0xff] %v3316_v39  ;;  %v1855_v61 = vld [vmem:[%s4826_s0 + $0x38c] sm:$0xf] }
  0xdd   :  { %1597 = vst.msk [vmem:[%s4827_s1 + $0xcc] sm:$0xf] %vm1545_vm0, %v1404_v4  ;;  %993 = vrot.lane.b32.xlu0 %v3286_v25, %s1935_s22  ;;  %v4857_v50 = vld [vmem:[#allocation3_spill] sm:$0xff]  ;;  %v3338_v24 = vmax.bf16 %v1855_v61, %v121_v60  ;;  %v122_v61 = vld [vmem:[%s4826_s0 + $0x390] sm:$0xf] }
  0xde   :  { %1596 = vst.msk [vmem:[%s4827_s1 + $0xc8] sm:$0xf] %vm1545_vm0, %v1403_v51  ;;  %v884_v42 = vpop.permute.xlu1 %883  ;;  %v3346_v51 = vmax.bf16 %v1854_v20, %v120_v43  ;;  %v1856_v43 = vld [vmem:[%s4826_s0 + $0x39c] sm:$0xf]  ;;  %v4860_v20 = vld [vmem:[#allocation4_spill] sm:$0xff] }
  0xdf   :  { %v1406_v2 = vmax.bf16 %v884_v42, %v4856_v21  ;;  %v882_v4 = vpop.permute.xlu0 %881  ;;  %4858 = vst [vmem:[#allocation2_spill] sm:$0xff] %v3338_v24  ;;  %v123_v42 = vld [vmem:[%s4826_s0 + $0x394] sm:$0xf]  ;;  %v1857_v21 = vld [vmem:[%s4826_s0 + $0x3a0] sm:$0xf] }
  0xe0   :  { %v1405_v25 = vmax.bf16 %v882_v4, %v4857_v50  ;;  %999 = vrot.lane.b32.xlu1 %v3308_v38, %s1935_s22  ;;  %4859 = vst [vmem:[#allocation3_spill] sm:$0xff] %v3346_v51  ;;  %v4861_v50 = vld [vmem:[#allocation5_spill] sm:$0xff]  ;;  %v3368_v38 = vmax.bf16 %v1857_v21, %v123_v42 }
  0xe1   :  { %1599 = vst.msk [vmem:[%s4827_s1 + $0xd4] sm:$0xf] %vm1545_vm0, %v1406_v2  ;;  %997 = vrot.lane.b32.xlu0 %v3316_v39, %s1935_s22  ;;  %v124_v21 = vld [vmem:[%s4826_s0 + $0x398] sm:$0xf] }
  0xe2   :  { %1598 = vst.msk [vmem:[%s4827_s1 + $0xd0] sm:$0xf] %vm1545_vm0, %v1405_v25  ;;  %v888_v60 = vpop.permute.xlu1 %887  ;;  %v3376_v25 = vmax.bf16 %v1856_v43, %v122_v61  ;;  %v1858_v61 = vld [vmem:[%s4826_s0 + $0x3a4] sm:$0xf] }
  0xe3   :  { %v1408_v2 = vmax.bf16 %v888_v60, %v4860_v20  ;;  %v886_v4 = vpop.permute.xlu0 %885  ;;  %v125_v60 = vld [vmem:[%s4826_s0 + $0x3a8] sm:$0xf]  ;;  %v1859_v20 = vld [vmem:[%s4826_s0 + $0x3b4] sm:$0xf]  ;;  %v4862_v43 = vld [vmem:[#allocation6_spill] sm:$0xff] }
  0xe4   :  { %v1407_v39 = vmax.bf16 %v886_v4, %v4861_v50  ;;  %1003 = vrot.lane.b32.xlu1 %v3338_v24, %s1935_s22  ;;  %v4863_v50 = vld [vmem:[#allocation7_spill] sm:$0xff]  ;;  %v3398_v24 = vmax.bf16 %v1859_v20, %v125_v60 }
  0xe5   :  { %1601 = vst.msk [vmem:[%s4827_s1 + $0xdc] sm:$0xf] %vm1545_vm0, %v1408_v2  ;;  %1001 = vrot.lane.b32.xlu0 %v3346_v51, %s1935_s22  ;;  %v126_v20 = vld [vmem:[%s4826_s0 + $0x3ac] sm:$0xf] }
  0xe6   :  { %1600 = vst.msk [vmem:[%s4827_s1 + $0xd8] sm:$0xf] %vm1545_vm0, %v1407_v39  ;;  %v892_v42 = vpop.permute.xlu1 %891  ;;  %v3406_v39 = vmax.bf16 %v1858_v61, %v124_v21  ;;  %v1860_v21 = vld [vmem:[%s4826_s0 + $0x3b8] sm:$0xf] }
  0xe7   :  { %v1410_v2 = vmax.bf16 %v892_v42, %v4862_v43  ;;  %v890_v4 = vpop.permute.xlu0 %889  ;;  %v127_v42 = vld [vmem:[%s4826_s0 + $0x3b0] sm:$0xf]  ;;  %v1861_v43 = vld [vmem:[%s4826_s0 + $0x3bc] sm:$0xf] }
  0xe8   :  { %v1409_v51 = vmax.bf16 %v890_v4, %v4863_v50  ;;  %1007 = vrot.lane.b32.xlu1 %v3368_v38, %s1935_s22  ;;  %v3428_v50 = vmax.bf16 %v1861_v43, %v127_v42  ;;  %v128_v43 = vld [vmem:[%s4826_s0 + $0x3c0] sm:$0xf] }
  0xe9   :  { %1603 = vst.msk [vmem:[%s4827_s1 + $0xe4] sm:$0xf] %vm1545_vm0, %v1410_v2  ;;  %1005 = vrot.lane.b32.xlu0 %v3376_v25, %s1935_s22 }
  0xea   :  { %1602 = vst.msk [vmem:[%s4827_s1 + $0xe0] sm:$0xf] %vm1545_vm0, %v1409_v51  ;;  %v896_v60 = vpop.permute.xlu1 %895  ;;  %v3436_v51 = vmax.bf16 %v1860_v21, %v126_v20 }
  0xeb   :  { %v1412_v61 = vmax.bf16 %v896_v60, %v2536_v6  ;;  %v894_v2 = vpop.permute.xlu0 %893  ;;  %v129_v6 = vld [vmem:[%s4826_s0 + $0x3c4] sm:$0xf]  ;;  %v1862_v60 = vld [vmem:[%s4826_s0 + $0x3cc] sm:$0xf] }
  0xec   :  { %v1411_v4 = vmax.bf16 %v894_v2, %v2540_v14  ;;  %1011 = vrot.lane.b32.xlu1 %v3398_v24, %s1935_s22  ;;  %v1863_v14 = vld [vmem:[%s4826_s0 + $0x3d0] sm:$0xf] }
  0xed   :  { %1605 = vst.msk [vmem:[%s4827_s1 + $0xec] sm:$0xf] %vm1545_vm0, %v1412_v61  ;;  %1009 = vrot.lane.b32.xlu0 %v3406_v39, %s1935_s22  ;;  %v3458_v2 = vmax.bf16 %v1863_v14, %v129_v6  ;;  %v130_v14 = vld [vmem:[%s4826_s0 + $0x3c8] sm:$0xf] }
  0xee   :  { %1604 = vst.msk [vmem:[%s4827_s1 + $0xe8] sm:$0xf] %vm1545_vm0, %v1411_v4  ;;  %v900_v42 = vpop.permute.xlu1 %899  ;;  %v3466_v4 = vmax.bf16 %v1862_v60, %v128_v43 }
  0xef   :  { %v1414_v20 = vmax.bf16 %v900_v42, %v2558_v32  ;;  %v898_v21 = vpop.permute.xlu0 %897  ;;  %v131_v32 = vld [vmem:[%s4826_s0 + $0x3d8] sm:$0xf]  ;;  %v1864_v42 = vld [vmem:[%s4826_s0 + $0x3d4] sm:$0xf] }
  0xf0   :  { %v1413_v61 = vmax.bf16 %v898_v21, %v2566_v30  ;;  %1015 = vrot.lane.b32.xlu1 %v3428_v50, %s1935_s22  ;;  %v1865_v30 = vld [vmem:[%s4826_s0 + $0x3e4] sm:$0xf] }
  0xf1   :  { %1607 = vst.msk [vmem:[%s4827_s1 + $0xf4] sm:$0xf] %vm1545_vm0, %v1414_v20  ;;  %1013 = vrot.lane.b32.xlu0 %v3436_v51, %s1935_s22  ;;  %v3488_v21 = vmax.bf16 %v1865_v30, %v131_v32  ;;  %v132_v30 = vld [vmem:[%s4826_s0 + $0x3dc] sm:$0xf] }
  0xf2   :  { %1606 = vst.msk [vmem:[%s4827_s1 + $0xf0] sm:$0xf] %vm1545_vm0, %v1413_v61  ;;  %v904_v6 = vpop.permute.xlu1 %903  ;;  %v3496_v61 = vmax.bf16 %v1864_v42, %v130_v14 }
  0xf3   :  { %v1416_v43 = vmax.bf16 %v904_v6, %v2588_v5  ;;  %v902_v60 = vpop.permute.xlu0 %901  ;;  %v133_v5 = vld [vmem:[%s4826_s0 + $0x3e0] sm:$0xf]  ;;  %v1866_v6 = vld [vmem:[%s4826_s0 + $0x3e8] sm:$0xf] }
  0xf4   :  { %v1415_v20 = vmax.bf16 %v902_v60, %v2596_v33  ;;  %1019 = vrot.lane.b32.xlu1 %v3458_v2, %s1935_s22  ;;  %v1867_v33 = vld [vmem:[%s4826_s0 + $0x3ec] sm:$0xf] }
  0xf5   :  { %1609 = vst.msk [vmem:[%s4827_s1 + $0xfc] sm:$0xf] %vm1545_vm0, %v1416_v43  ;;  %1017 = vrot.lane.b32.xlu0 %v3466_v4, %s1935_s22  ;;  %v3518_v60 = vmax.bf16 %v1867_v33, %v133_v5  ;;  %v134_v33 = vld [vmem:[%s4826_s0 + $0x3f0] sm:$0xf] }
  0xf6   :  { %1608 = vst.msk [vmem:[%s4827_s1 + $0xf8] sm:$0xf] %vm1545_vm0, %v1415_v20  ;;  %v908_v32 = vpop.permute.xlu1 %907  ;;  %v3526_v20 = vmax.bf16 %v1866_v6, %v132_v30 }
  0xf7   :  { %v1418_v14 = vmax.bf16 %v908_v32, %v2618_v49  ;;  %v906_v42 = vpop.permute.xlu0 %905  ;;  %v135_v49 = vld [vmem:[%s4826_s0 + $0x3f4] sm:$0xf]  ;;  %v1868_v32 = vld [vmem:[%s4826_s0 + $0x3fc] sm:$0xf] }
  0xf8   :  { %v1417_v43 = vmax.bf16 %v906_v42, %v2626_v31  ;;  %1023 = vrot.lane.b32.xlu1 %v3488_v21, %s1935_s22  ;;  %v1869_v31 = vld [vmem:[%s4826_s0 + $0x400] sm:$0xf] }
  0xf9   :  { %1611 = vst.msk [vmem:[%s4827_s1 + $0x104] sm:$0xf] %vm1545_vm0, %v1418_v14  ;;  %1021 = vrot.lane.b32.xlu0 %v3496_v61, %s1935_s22  ;;  %v3548_v42 = vmax.bf16 %v1869_v31, %v135_v49  ;;  %v136_v31 = vld [vmem:[%s4826_s0 + $0x3f8] sm:$0xf] }
  0xfa   :  { %1610 = vst.msk [vmem:[%s4827_s1 + $0x100] sm:$0xf] %vm1545_vm0, %v1417_v43  ;;  %v912_v5 = vpop.permute.xlu1 %911  ;;  %v3556_v43 = vmax.bf16 %v1868_v32, %v134_v33 }
  0xfb   :  { %v1420_v30 = vmax.bf16 %v912_v5, %v2648_v15  ;;  %v910_v6 = vpop.permute.xlu0 %909  ;;  %v137_v15 = vld [vmem:[%s4826_s0 + $0x408] sm:$0xf]  ;;  %v1870_v5 = vld [vmem:[%s4826_s0 + $0x404] sm:$0xf] }
  0xfc   :  { %v1419_v14 = vmax.bf16 %v910_v6, %v2656_v48  ;;  %1027 = vrot.lane.b32.xlu1 %v3518_v60, %s1935_s22  ;;  %v1871_v48 = vld [vmem:[%s4826_s0 + $0x414] sm:$0xf] }
  0xfd   :  { %1613 = vst.msk [vmem:[%s4827_s1 + $0x10c] sm:$0xf] %vm1545_vm0, %v1420_v30  ;;  %1025 = vrot.lane.b32.xlu0 %v3526_v20, %s1935_s22  ;;  %v3578_v6 = vmax.bf16 %v1871_v48, %v137_v15  ;;  %v138_v48 = vld [vmem:[%s4826_s0 + $0x40c] sm:$0xf] }
  0xfe   :  { %1612 = vst.msk [vmem:[%s4827_s1 + $0x108] sm:$0xf] %vm1545_vm0, %v1419_v14  ;;  %v916_v49 = vpop.permute.xlu1 %915  ;;  %v3586_v14 = vmax.bf16 %v1870_v5, %v136_v31 }
  0xff   :  { %v1422_v33 = vmax.bf16 %v916_v49, %v2678_v56  ;;  %v914_v32 = vpop.permute.xlu0 %913  ;;  %v139_v56 = vld [vmem:[%s4826_s0 + $0x410] sm:$0xf]  ;;  %v1872_v49 = vld [vmem:[%s4826_s0 + $0x418] sm:$0xf] }
 0x100   :  { %v1421_v30 = vmax.bf16 %v914_v32, %v2686_v57  ;;  %1031 = vrot.lane.b32.xlu1 %v3548_v42, %s1935_s22  ;;  %v1873_v57 = vld [vmem:[%s4826_s0 + $0x41c] sm:$0xf] }
 0x101   :  { %1615 = vst.msk [vmem:[%s4827_s1 + $0x114] sm:$0xf] %vm1545_vm0, %v1422_v33  ;;  %1029 = vrot.lane.b32.xlu0 %v3556_v43, %s1935_s22  ;;  %v3608_v32 = vmax.bf16 %v1873_v57, %v139_v56  ;;  %v140_v57 = vld [vmem:[%s4826_s0 + $0x420] sm:$0xf] }
 0x102   :  { %1614 = vst.msk [vmem:[%s4827_s1 + $0x110] sm:$0xf] %vm1545_vm0, %v1421_v30  ;;  %v920_v15 = vpop.permute.xlu1 %919  ;;  %v3616_v30 = vmax.bf16 %v1872_v49, %v138_v48 }
 0x103   :  { %v1424_v31 = vmax.bf16 %v920_v15, %v2708_v3  ;;  %v918_v5 = vpop.permute.xlu0 %917  ;;  %v141_v3 = vld [vmem:[%s4826_s0 + $0x424] sm:$0xf]  ;;  %v1874_v15 = vld [vmem:[%s4826_s0 + $0x42c] sm:$0xf] }
 0x104   :  { %v1423_v33 = vmax.bf16 %v918_v5, %v2716_v7  ;;  %1035 = vrot.lane.b32.xlu1 %v3578_v6, %s1935_s22  ;;  %v1875_v7 = vld [vmem:[%s4826_s0 + $0x430] sm:$0xf] }
 0x105   :  { %1617 = vst.msk [vmem:[%s4827_s1 + $0x11c] sm:$0xf] %vm1545_vm0, %v1424_v31  ;;  %1033 = vrot.lane.b32.xlu0 %v3586_v14, %s1935_s22  ;;  %v3638_v5 = vmax.bf16 %v1875_v7, %v141_v3  ;;  %v142_v7 = vld [vmem:[%s4826_s0 + $0x428] sm:$0xf] }
 0x106   :  { %1616 = vst.msk [vmem:[%s4827_s1 + $0x118] sm:$0xf] %vm1545_vm0, %v1423_v33  ;;  %v924_v56 = vpop.permute.xlu1 %923  ;;  %v3646_v33 = vmax.bf16 %v1874_v15, %v140_v57 }
 0x107   :  { %v1426_v48 = vmax.bf16 %v924_v56, %v2738_v10  ;;  %v922_v49 = vpop.permute.xlu0 %921  ;;  %v143_v10 = vld [vmem:[%s4826_s0 + $0x438] sm:$0xf]  ;;  %v1876_v56 = vld [vmem:[%s4826_s0 + $0x434] sm:$0xf] }
 0x108   :  { %v1425_v31 = vmax.bf16 %v922_v49, %v2746_v11  ;;  %1039 = vrot.lane.b32.xlu1 %v3608_v32, %s1935_s22  ;;  %v1877_v11 = vld [vmem:[%s4826_s0 + $0x444] sm:$0xf] }
 0x109   :  { %1619 = vst.msk [vmem:[%s4827_s1 + $0x124] sm:$0xf] %vm1545_vm0, %v1426_v48  ;;  %1037 = vrot.lane.b32.xlu0 %v3616_v30, %s1935_s22  ;;  %v3668_v49 = vmax.bf16 %v1877_v11, %v143_v10  ;;  %v144_v11 = vld [vmem:[%s4826_s0 + $0x43c] sm:$0xf] }
 0x10a   :  { %1618 = vst.msk [vmem:[%s4827_s1 + $0x120] sm:$0xf] %vm1545_vm0, %v1425_v31  ;;  %v928_v3 = vpop.permute.xlu1 %927  ;;  %v3676_v31 = vmax.bf16 %v1876_v56, %v142_v7 }
 0x10b   :  { %v1428_v57 = vmax.bf16 %v928_v3, %v2768_v16  ;;  %v926_v15 = vpop.permute.xlu0 %925  ;;  %v145_v16 = vld [vmem:[%s4826_s0 + $0x440] sm:$0xf]  ;;  %v1878_v3 = vld [vmem:[%s4826_s0 + $0x448] sm:$0xf] }
 0x10c   :  { %v1427_v48 = vmax.bf16 %v926_v15, %v2776_v17  ;;  %1043 = vrot.lane.b32.xlu1 %v3638_v5, %s1935_s22  ;;  %v1879_v17 = vld [vmem:[%s4826_s0 + $0x44c] sm:$0xf] }
 0x10d   :  { %1621 = vst.msk [vmem:[%s4827_s1 + $0x12c] sm:$0xf] %vm1545_vm0, %v1428_v57  ;;  %1041 = vrot.lane.b32.xlu0 %v3646_v33, %s1935_s22  ;;  %v3698_v15 = vmax.bf16 %v1879_v17, %v145_v16  ;;  %v146_v17 = vld [vmem:[%s4826_s0 + $0x450] sm:$0xf] }
 0x10e   :  { %1620 = vst.msk [vmem:[%s4827_s1 + $0x128] sm:$0xf] %vm1545_vm0, %v1427_v48  ;;  %v932_v10 = vpop.permute.xlu1 %931  ;;  %v3706_v48 = vmax.bf16 %v1878_v3, %v144_v11 }
 0x10f   :  { %v1430_v7 = vmax.bf16 %v932_v10, %v2798_v22  ;;  %v930_v56 = vpop.permute.xlu0 %929  ;;  %v147_v22 = vld [vmem:[%s4826_s0 + $0x454] sm:$0xf]  ;;  %v1880_v10 = vld [vmem:[%s4826_s0 + $0x45c] sm:$0xf] }
 0x110   :  { %v1429_v57 = vmax.bf16 %v930_v56, %v2806_v23  ;;  %1047 = vrot.lane.b32.xlu1 %v3668_v49, %s1935_s22  ;;  %v1881_v23 = vld [vmem:[%s4826_s0 + $0x460] sm:$0xf] }
 0x111   :  { %1623 = vst.msk [vmem:[%s4827_s1 + $0x134] sm:$0xf] %vm1545_vm0, %v1430_v7  ;;  %1045 = vrot.lane.b32.xlu0 %v3676_v31, %s1935_s22  ;;  %v3728_v56 = vmax.bf16 %v1881_v23, %v147_v22  ;;  %v148_v23 = vld [vmem:[%s4826_s0 + $0x458] sm:$0xf] }
 0x112   :  { %1622 = vst.msk [vmem:[%s4827_s1 + $0x130] sm:$0xf] %vm1545_vm0, %v1429_v57  ;;  %v936_v16 = vpop.permute.xlu1 %935  ;;  %v3736_v57 = vmax.bf16 %v1880_v10, %v146_v17 }
 0x113   :  { %v1432_v11 = vmax.bf16 %v936_v16, %v2828_v28  ;;  %v934_v3 = vpop.permute.xlu0 %933  ;;  %v149_v28 = vld [vmem:[%s4826_s0 + $0x468] sm:$0xf]  ;;  %v1882_v16 = vld [vmem:[%s4826_s0 + $0x464] sm:$0xf] }
 0x114   :  { %v1431_v7 = vmax.bf16 %v934_v3, %v2836_v29  ;;  %1051 = vrot.lane.b32.xlu1 %v3698_v15, %s1935_s22  ;;  %v1883_v29 = vld [vmem:[%s4826_s0 + $0x474] sm:$0xf] }
 0x115   :  { %1625 = vst.msk [vmem:[%s4827_s1 + $0x13c] sm:$0xf] %vm1545_vm0, %v1432_v11  ;;  %1049 = vrot.lane.b32.xlu0 %v3706_v48, %s1935_s22  ;;  %v3758_v3 = vmax.bf16 %v1883_v29, %v149_v28  ;;  %v150_v29 = vld [vmem:[%s4826_s0 + $0x46c] sm:$0xf] }
 0x116   :  { %1624 = vst.msk [vmem:[%s4827_s1 + $0x138] sm:$0xf] %vm1545_vm0, %v1431_v7  ;;  %v940_v22 = vpop.permute.xlu1 %939  ;;  %v3766_v7 = vmax.bf16 %v1882_v16, %v148_v23 }
 0x117   :  { %v1434_v17 = vmax.bf16 %v940_v22, %v2858_v34  ;;  %v938_v10 = vpop.permute.xlu0 %937  ;;  %v151_v34 = vld [vmem:[%s4826_s0 + $0x470] sm:$0xf]  ;;  %v1884_v22 = vld [vmem:[%s4826_s0 + $0x478] sm:$0xf] }
 0x118   :  { %v1433_v11 = vmax.bf16 %v938_v10, %v2866_v35  ;;  %1055 = vrot.lane.b32.xlu1 %v3728_v56, %s1935_s22  ;;  %v1885_v35 = vld [vmem:[%s4826_s0 + $0x47c] sm:$0xf] }
 0x119   :  { %1627 = vst.msk [vmem:[%s4827_s1 + $0x144] sm:$0xf] %vm1545_vm0, %v1434_v17  ;;  %1053 = vrot.lane.b32.xlu0 %v3736_v57, %s1935_s22  ;;  %v3788_v10 = vmax.bf16 %v1885_v35, %v151_v34  ;;  %v152_v35 = vld [vmem:[%s4826_s0 + $0x480] sm:$0xf] }
 0x11a   :  { %1626 = vst.msk [vmem:[%s4827_s1 + $0x140] sm:$0xf] %vm1545_vm0, %v1433_v11  ;;  %v944_v28 = vpop.permute.xlu1 %943  ;;  %v3796_v11 = vmax.bf16 %v1884_v22, %v150_v29 }
 0x11b   :  { %v1436_v23 = vmax.bf16 %v944_v28, %v2888_v40  ;;  %v942_v16 = vpop.permute.xlu0 %941  ;;  %v153_v40 = vld [vmem:[%s4826_s0 + $0x484] sm:$0xf]  ;;  %v1886_v28 = vld [vmem:[%s4826_s0 + $0x48c] sm:$0xf] }
 0x11c   :  { %v1435_v17 = vmax.bf16 %v942_v16, %v2896_v41  ;;  %1059 = vrot.lane.b32.xlu1 %v3758_v3, %s1935_s22  ;;  %v1887_v41 = vld [vmem:[%s4826_s0 + $0x490] sm:$0xf] }
 0x11d   :  { %1629 = vst.msk [vmem:[%s4827_s1 + $0x14c] sm:$0xf] %vm1545_vm0, %v1436_v23  ;;  %1057 = vrot.lane.b32.xlu0 %v3766_v7, %s1935_s22  ;;  %v3818_v16 = vmax.bf16 %v1887_v41, %v153_v40  ;;  %v154_v41 = vld [vmem:[%s4826_s0 + $0x488] sm:$0xf] }
 0x11e   :  { %1628 = vst.msk [vmem:[%s4827_s1 + $0x148] sm:$0xf] %vm1545_vm0, %v1435_v17  ;;  %v948_v34 = vpop.permute.xlu1 %947  ;;  %v3826_v17 = vmax.bf16 %v1886_v28, %v152_v35 }
 0x11f   :  { %v1438_v29 = vmax.bf16 %v948_v34, %v2918_v46  ;;  %v946_v22 = vpop.permute.xlu0 %945  ;;  %v155_v46 = vld [vmem:[%s4826_s0 + $0x498] sm:$0xf]  ;;  %v1888_v34 = vld [vmem:[%s4826_s0 + $0x494] sm:$0xf] }
 0x120   :  { %v1437_v23 = vmax.bf16 %v946_v22, %v2926_v47  ;;  %1063 = vrot.lane.b32.xlu1 %v3788_v10, %s1935_s22  ;;  %v1889_v47 = vld [vmem:[%s4826_s0 + $0x4a4] sm:$0xf] }
 0x121   :  { %1631 = vst.msk [vmem:[%s4827_s1 + $0x154] sm:$0xf] %vm1545_vm0, %v1438_v29  ;;  %1061 = vrot.lane.b32.xlu0 %v3796_v11, %s1935_s22  ;;  %v3848_v22 = vmax.bf16 %v1889_v47, %v155_v46  ;;  %v156_v47 = vld [vmem:[%s4826_s0 + $0x49c] sm:$0xf] }
 0x122   :  { %1630 = vst.msk [vmem:[%s4827_s1 + $0x150] sm:$0xf] %vm1545_vm0, %v1437_v23  ;;  %v952_v40 = vpop.permute.xlu1 %951  ;;  %v3856_v23 = vmax.bf16 %v1888_v34, %v154_v41 }
 0x123   :  { %v1440_v35 = vmax.bf16 %v952_v40, %v2948_v52  ;;  %v950_v28 = vpop.permute.xlu0 %949  ;;  %v157_v52 = vld [vmem:[%s4826_s0 + $0x4a0] sm:$0xf]  ;;  %v1890_v40 = vld [vmem:[%s4826_s0 + $0x4a8] sm:$0xf] }
 0x124   :  { %v1439_v29 = vmax.bf16 %v950_v28, %v2956_v53  ;;  %1067 = vrot.lane.b32.xlu1 %v3818_v16, %s1935_s22  ;;  %v1891_v53 = vld [vmem:[%s4826_s0 + $0x4ac] sm:$0xf] }
 0x125   :  { %1633 = vst.msk [vmem:[%s4827_s1 + $0x15c] sm:$0xf] %vm1545_vm0, %v1440_v35  ;;  %1065 = vrot.lane.b32.xlu0 %v3826_v17, %s1935_s22  ;;  %v3878_v28 = vmax.bf16 %v1891_v53, %v157_v52  ;;  %v158_v53 = vld [vmem:[%s4826_s0 + $0x4b0] sm:$0xf] }
 0x126   :  { %1632 = vst.msk [vmem:[%s4827_s1 + $0x158] sm:$0xf] %vm1545_vm0, %v1439_v29  ;;  %v956_v46 = vpop.permute.xlu1 %955  ;;  %v3886_v29 = vmax.bf16 %v1890_v40, %v156_v47 }
 0x127   :  { %v1442_v41 = vmax.bf16 %v956_v46, %v2978_v58  ;;  %v954_v34 = vpop.permute.xlu0 %953  ;;  %v159_v58 = vld [vmem:[%s4826_s0 + $0x4b4] sm:$0xf]  ;;  %v1892_v46 = vld [vmem:[%s4826_s0 + $0x4bc] sm:$0xf] }
 0x128   :  { %v1441_v35 = vmax.bf16 %v954_v34, %v2986_v59  ;;  %1071 = vrot.lane.b32.xlu1 %v3848_v22, %s1935_s22  ;;  %v1893_v59 = vld [vmem:[%s4826_s0 + $0x4c0] sm:$0xf] }
 0x129   :  { %1635 = vst.msk [vmem:[%s4827_s1 + $0x164] sm:$0xf] %vm1545_vm0, %v1442_v41  ;;  %1069 = vrot.lane.b32.xlu0 %v3856_v23, %s1935_s22  ;;  %v3908_v34 = vmax.bf16 %v1893_v59, %v159_v58  ;;  %v160_v59 = vld [vmem:[%s4826_s0 + $0x4b8] sm:$0xf] }
 0x12a   :  { %1634 = vst.msk [vmem:[%s4827_s1 + $0x160] sm:$0xf] %vm1545_vm0, %v1441_v35  ;;  %v960_v52 = vpop.permute.xlu1 %959  ;;  %v3916_v35 = vmax.bf16 %v1892_v46, %v158_v53 }
 0x12b   :  { %v1444_v47 = vmax.bf16 %v960_v52, %v3008_v0  ;;  %v958_v40 = vpop.permute.xlu0 %957  ;;  %v161_v0 = vld [vmem:[%s4826_s0 + $0x4c8] sm:$0xf]  ;;  %v1894_v52 = vld [vmem:[%s4826_s0 + $0x4c4] sm:$0xf] }
 0x12c   :  { %v1443_v41 = vmax.bf16 %v958_v40, %v3016_v1  ;;  %1075 = vrot.lane.b32.xlu1 %v3878_v28, %s1935_s22  ;;  %v1895_v1 = vld [vmem:[%s4826_s0 + $0x4d4] sm:$0xf] }
 0x12d   :  { %1637 = vst.msk [vmem:[%s4827_s1 + $0x16c] sm:$0xf] %vm1545_vm0, %v1444_v47  ;;  %1073 = vrot.lane.b32.xlu0 %v3886_v29, %s1935_s22  ;;  %v3938_v40 = vmax.bf16 %v1895_v1, %v161_v0  ;;  %v162_v1 = vld [vmem:[%s4826_s0 + $0x4cc] sm:$0xf] }
 0x12e   :  { %1636 = vst.msk [vmem:[%s4827_s1 + $0x168] sm:$0xf] %vm1545_vm0, %v1443_v41  ;;  %v964_v58 = vpop.permute.xlu1 %963  ;;  %v3946_v41 = vmax.bf16 %v1894_v52, %v160_v59 }
 0x12f   :  { %v1446_v53 = vmax.bf16 %v964_v58, %v3038_v8  ;;  %v962_v46 = vpop.permute.xlu0 %961  ;;  %v163_v8 = vld [vmem:[%s4826_s0 + $0x4d0] sm:$0xf]  ;;  %v1896_v58 = vld [vmem:[%s4826_s0 + $0x4d8] sm:$0xf] }
 0x130   :  { %v1445_v47 = vmax.bf16 %v962_v46, %v3046_v9  ;;  %1079 = vrot.lane.b32.xlu1 %v3908_v34, %s1935_s22  ;;  %v1897_v9 = vld [vmem:[%s4826_s0 + $0x4dc] sm:$0xf] }
 0x131   :  { %1639 = vst.msk [vmem:[%s4827_s1 + $0x174] sm:$0xf] %vm1545_vm0, %v1446_v53  ;;  %1077 = vrot.lane.b32.xlu0 %v3916_v35, %s1935_s22  ;;  %v3968_v46 = vmax.bf16 %v1897_v9, %v163_v8  ;;  %v164_v9 = vld [vmem:[%s4826_s0 + $0x4e0] sm:$0xf] }
 0x132   :  { %1638 = vst.msk [vmem:[%s4827_s1 + $0x170] sm:$0xf] %vm1545_vm0, %v1445_v47  ;;  %v968_v0 = vpop.permute.xlu1 %967  ;;  %v3976_v47 = vmax.bf16 %v1896_v58, %v162_v1 }
 0x133   :  { %v1448_v59 = vmax.bf16 %v968_v0, %v3068_v18  ;;  %v966_v52 = vpop.permute.xlu0 %965  ;;  %v165_v18 = vld [vmem:[%s4826_s0 + $0x4e4] sm:$0xf]  ;;  %v1898_v0 = vld [vmem:[%s4826_s0 + $0x4ec] sm:$0xf] }
 0x134   :  { %v1447_v53 = vmax.bf16 %v966_v52, %v3076_v19  ;;  %1083 = vrot.lane.b32.xlu1 %v3938_v40, %s1935_s22  ;;  %v1899_v19 = vld [vmem:[%s4826_s0 + $0x4f0] sm:$0xf] }
 0x135   :  { %1641 = vst.msk [vmem:[%s4827_s1 + $0x17c] sm:$0xf] %vm1545_vm0, %v1448_v59  ;;  %1081 = vrot.lane.b32.xlu0 %v3946_v41, %s1935_s22  ;;  %v3998_v52 = vmax.bf16 %v1899_v19, %v165_v18  ;;  %v166_v19 = vld [vmem:[%s4826_s0 + $0x4e8] sm:$0xf] }
 0x136   :  { %1640 = vst.msk [vmem:[%s4827_s1 + $0x178] sm:$0xf] %vm1545_vm0, %v1447_v53  ;;  %v972_v8 = vpop.permute.xlu1 %971  ;;  %v4006_v53 = vmax.bf16 %v1898_v0, %v164_v9 }
 0x137   :  { %v1450_v1 = vmax.bf16 %v972_v8, %v3098_v26  ;;  %v970_v58 = vpop.permute.xlu0 %969  ;;  %v167_v26 = vld [vmem:[%s4826_s0 + $0x4f8] sm:$0xf]  ;;  %v1900_v8 = vld [vmem:[%s4826_s0 + $0x4f4] sm:$0xf] }
 0x138   :  { %v1449_v59 = vmax.bf16 %v970_v58, %v3106_v27  ;;  %1087 = vrot.lane.b32.xlu1 %v3968_v46, %s1935_s22  ;;  %v1901_v27 = vld [vmem:[%s4826_s0 + $0x504] sm:$0xf] }
 0x139   :  { %1643 = vst.msk [vmem:[%s4827_s1 + $0x184] sm:$0xf] %vm1545_vm0, %v1450_v1  ;;  %1085 = vrot.lane.b32.xlu0 %v3976_v47, %s1935_s22  ;;  %v4028_v58 = vmax.bf16 %v1901_v27, %v167_v26  ;;  %v168_v27 = vld [vmem:[%s4826_s0 + $0x4fc] sm:$0xf] }
 0x13a   :  { %1642 = vst.msk [vmem:[%s4827_s1 + $0x180] sm:$0xf] %vm1545_vm0, %v1449_v59  ;;  %v976_v18 = vpop.permute.xlu1 %975  ;;  %v4036_v59 = vmax.bf16 %v1900_v8, %v166_v19 }
 0x13b   :  { %v1452_v9 = vmax.bf16 %v976_v18, %v3128_v36  ;;  %v974_v0 = vpop.permute.xlu0 %973  ;;  %v169_v36 = vld [vmem:[%s4826_s0 + $0x500] sm:$0xf]  ;;  %v1902_v18 = vld [vmem:[%s4826_s0 + $0x508] sm:$0xf] }
 0x13c   :  { %v1451_v1 = vmax.bf16 %v974_v0, %v3136_v37  ;;  %1091 = vrot.lane.b32.xlu1 %v3998_v52, %s1935_s22  ;;  %v1903_v37 = vld [vmem:[%s4826_s0 + $0x50c] sm:$0xf] }
 0x13d   :  { %1645 = vst.msk [vmem:[%s4827_s1 + $0x18c] sm:$0xf] %vm1545_vm0, %v1452_v9  ;;  %1089 = vrot.lane.b32.xlu0 %v4006_v53, %s1935_s22  ;;  %v4058_v0 = vmax.bf16 %v1903_v37, %v169_v36  ;;  %v170_v37 = vld [vmem:[%s4826_s0 + $0x510] sm:$0xf] }
 0x13e   :  { %1644 = vst.msk [vmem:[%s4827_s1 + $0x188] sm:$0xf] %vm1545_vm0, %v1451_v1  ;;  %v980_v26 = vpop.permute.xlu1 %979  ;;  %v4066_v1 = vmax.bf16 %v1902_v18, %v168_v27 }
 0x13f   :  { %v1454_v19 = vmax.bf16 %v980_v26, %v3158_v44  ;;  %v978_v8 = vpop.permute.xlu0 %977  ;;  %v171_v44 = vld [vmem:[%s4826_s0 + $0x514] sm:$0xf]  ;;  %v1904_v26 = vld [vmem:[%s4826_s0 + $0x51c] sm:$0xf] }
 0x140   :  { %v1453_v9 = vmax.bf16 %v978_v8, %v3166_v45  ;;  %1095 = vrot.lane.b32.xlu1 %v4028_v58, %s1935_s22  ;;  %v1905_v45 = vld [vmem:[%s4826_s0 + $0x520] sm:$0xf] }
 0x141   :  { %1647 = vst.msk [vmem:[%s4827_s1 + $0x194] sm:$0xf] %vm1545_vm0, %v1454_v19  ;;  %1093 = vrot.lane.b32.xlu0 %v4036_v59, %s1935_s22  ;;  %v4088_v8 = vmax.bf16 %v1905_v45, %v171_v44  ;;  %v172_v45 = vld [vmem:[%s4826_s0 + $0x518] sm:$0xf] }
 0x142   :  { %1646 = vst.msk [vmem:[%s4827_s1 + $0x190] sm:$0xf] %vm1545_vm0, %v1453_v9  ;;  %v984_v36 = vpop.permute.xlu1 %983  ;;  %v4096_v9 = vmax.bf16 %v1904_v26, %v170_v37 }
 0x143   :  { %v1456_v27 = vmax.bf16 %v984_v36, %v3188_v54  ;;  %v982_v18 = vpop.permute.xlu0 %981  ;;  %v173_v54 = vld [vmem:[%s4826_s0 + $0x528] sm:$0xf]  ;;  %v1906_v36 = vld [vmem:[%s4826_s0 + $0x524] sm:$0xf] }
 0x144   :  { %v1455_v19 = vmax.bf16 %v982_v18, %v3196_v55  ;;  %1099 = vrot.lane.b32.xlu1 %v4058_v0, %s1935_s22  ;;  %v1907_v55 = vld [vmem:[%s4826_s0 + $0x534] sm:$0xf] }
 0x145   :  { %1649 = vst.msk [vmem:[%s4827_s1 + $0x19c] sm:$0xf] %vm1545_vm0, %v1456_v27  ;;  %1097 = vrot.lane.b32.xlu0 %v4066_v1, %s1935_s22  ;;  %v4118_v18 = vmax.bf16 %v1907_v55, %v173_v54  ;;  %v174_v55 = vld [vmem:[%s4826_s0 + $0x52c] sm:$0xf] }
 0x146   :  { %1648 = vst.msk [vmem:[%s4827_s1 + $0x198] sm:$0xf] %vm1545_vm0, %v1455_v19  ;;  %v988_v44 = vpop.permute.xlu1 %987  ;;  %v4126_v19 = vmax.bf16 %v1906_v36, %v172_v45 }
 0x147   :  { %v1458_v37 = vmax.bf16 %v988_v44, %v3218_v62  ;;  %v986_v26 = vpop.permute.xlu0 %985  ;;  %4864 = vst [vmem:[#allocation4_spill] sm:$0xff] %v4118_v18  ;;  %v175_v62 = vld [vmem:[%s4826_s0 + $0x530] sm:$0xf]  ;;  %v1908_v44 = vld [vmem:[%s4826_s0 + $0x538] sm:$0xf] }
 0x148   :  { %v1457_v27 = vmax.bf16 %v986_v26, %v3226_v63  ;;  %1103 = vrot.lane.b32.xlu1 %v4088_v8, %s1935_s22  ;;  %4865 = vst [vmem:[#allocation5_spill] sm:$0xff] %v4126_v19  ;;  %v1909_v63 = vld [vmem:[%s4826_s0 + $0x53c] sm:$0xf] }
 0x149   :  { %1651 = vst.msk [vmem:[%s4827_s1 + $0x1a4] sm:$0xf] %vm1545_vm0, %v1458_v37  ;;  %1101 = vrot.lane.b32.xlu0 %v4096_v9, %s1935_s22  ;;  %v4148_v26 = vmax.bf16 %v1909_v63, %v175_v62  ;;  %v176_v63 = vld [vmem:[%s4826_s0 + $0x540] sm:$0xf] }
 0x14a   :  { %1650 = vst.msk [vmem:[%s4827_s1 + $0x1a0] sm:$0xf] %vm1545_vm0, %v1457_v27  ;;  %v992_v54 = vpop.permute.xlu1 %991  ;;  %v4156_v27 = vmax.bf16 %v1908_v44, %v174_v55  ;;  %v4868_v55 = vld [vmem:[#allocation8_spill] sm:$0xff] }
 0x14b   :  { %v1460_v45 = vmax.bf16 %v992_v54, %v3248_v12  ;;  %v990_v36 = vpop.permute.xlu0 %989  ;;  %4866 = vst [vmem:[#allocation6_spill] sm:$0xff] %v4148_v26  ;;  %v177_v12 = vld [vmem:[%s4826_s0 + $0x544] sm:$0xf]  ;;  %v1910_v54 = vld [vmem:[%s4826_s0 + $0x54c] sm:$0xf] }
 0x14c   :  { %v1459_v37 = vmax.bf16 %v990_v36, %v3256_v13  ;;  %1107 = vrot.lane.b32.xlu1 %v4118_v18, %s1935_s22  ;;  %4867 = vst [vmem:[#allocation7_spill] sm:$0xff] %v4156_v27  ;;  %v1911_v13 = vld [vmem:[%s4826_s0 + $0x550] sm:$0xf]  ;;  %v4869_v36 = vld [vmem:[#allocation9_spill] sm:$0xff] }
 0x14d   :  { %1653 = vst.msk [vmem:[%s4827_s1 + $0x1ac] sm:$0xf] %vm1545_vm0, %v1460_v45  ;;  %1105 = vrot.lane.b32.xlu0 %v4126_v19, %s1935_s22  ;;  %v4178_v18 = vmax.bf16 %v1911_v13, %v177_v12  ;;  %v178_v13 = vld [vmem:[%s4826_s0 + $0x548] sm:$0xf] }
 0x14e   :  { %1652 = vst.msk [vmem:[%s4827_s1 + $0x1a8] sm:$0xf] %vm1545_vm0, %v1459_v37  ;;  %v996_v62 = vpop.permute.xlu1 %995  ;;  %v4186_v37 = vmax.bf16 %v1910_v54, %v176_v63  ;;  %v1912_v63 = vld [vmem:[%s4826_s0 + $0x554] sm:$0xf]  ;;  %v4872_v54 = vld [vmem:[#allocation10_spill] sm:$0xff] }
 0x14f   :  { %v1462_v44 = vmax.bf16 %v996_v62, %v4868_v55  ;;  %v994_v45 = vpop.permute.xlu0 %993  ;;  %4870 = vst [vmem:[#allocation8_spill] sm:$0xff] %v4178_v18  ;;  %v179_v62 = vld [vmem:[%s4826_s0 + $0x558] sm:$0xf]  ;;  %v1913_v55 = vld [vmem:[%s4826_s0 + $0x564] sm:$0xf] }
 0x150   :  { %v1461_v19 = vmax.bf16 %v994_v45, %v4869_v36  ;;  %1111 = vrot.lane.b32.xlu1 %v4148_v26, %s1935_s22  ;;  %4871 = vst [vmem:[#allocation9_spill] sm:$0xff] %v4186_v37  ;;  %v4873_v36 = vld [vmem:[#allocation11_spill] sm:$0xff]  ;;  %v4208_v26 = vmax.bf16 %v1913_v55, %v179_v62  ;;  %v180_v55 = vld [vmem:[%s4826_s0 + $0x55c] sm:$0xf] }
 0x151   :  { %1655 = vst.msk [vmem:[%s4827_s1 + $0x1b4] sm:$0xf] %vm1545_vm0, %v1462_v44  ;;  %1109 = vrot.lane.b32.xlu0 %v4156_v27, %s1935_s22 }
 0x152   :  { %1654 = vst.msk [vmem:[%s4827_s1 + $0x1b0] sm:$0xf] %vm1545_vm0, %v1461_v19  ;;  %v1000_v12 = vpop.permute.xlu1 %999  ;;  %v4216_v19 = vmax.bf16 %v1912_v63, %v178_v13  ;;  %v1914_v13 = vld [vmem:[%s4826_s0 + $0x568] sm:$0xf]  ;;  %v4874_v63 = vld [vmem:[#allocation2_spill] sm:$0xff] }
 0x153   :  { %v1464_v44 = vmax.bf16 %v1000_v12, %v4872_v54  ;;  %v998_v45 = vpop.permute.xlu0 %997  ;;  %v181_v12 = vld [vmem:[%s4826_s0 + $0x560] sm:$0xf]  ;;  %v1915_v54 = vld [vmem:[%s4826_s0 + $0x56c] sm:$0xf] }
 0x154   :  { %v1463_v27 = vmax.bf16 %v998_v45, %v4873_v36  ;;  %1115 = vrot.lane.b32.xlu1 %v4178_v18, %s1935_s22  ;;  %v4875_v36 = vld [vmem:[#allocation3_spill] sm:$0xff]  ;;  %v4238_v18 = vmax.bf16 %v1915_v54, %v181_v12  ;;  %v182_v54 = vld [vmem:[%s4826_s0 + $0x570] sm:$0xf] }
 0x155   :  { %1657 = vst.msk [vmem:[%s4827_s1 + $0x1bc] sm:$0xf] %vm1545_vm0, %v1464_v44  ;;  %1113 = vrot.lane.b32.xlu0 %v4186_v37, %s1935_s22 }
 0x156   :  { %1656 = vst.msk [vmem:[%s4827_s1 + $0x1b8] sm:$0xf] %vm1545_vm0, %v1463_v27  ;;  %v1004_v62 = vpop.permute.xlu1 %1003  ;;  %v4246_v27 = vmax.bf16 %v1914_v13, %v180_v55  ;;  %v1916_v55 = vld [vmem:[%s4826_s0 + $0x57c] sm:$0xf] }
 0x157   :  { %v1466_v44 = vmax.bf16 %v1004_v62, %v4874_v63  ;;  %v1002_v45 = vpop.permute.xlu0 %1001  ;;  %v183_v62 = vld [vmem:[%s4826_s0 + $0x574] sm:$0xf]  ;;  %v1917_v63 = vld [vmem:[%s4826_s0 + $0x580] sm:$0xf] }
 0x158   :  { %v1465_v37 = vmax.bf16 %v1002_v45, %v4875_v36  ;;  %1119 = vrot.lane.b32.xlu1 %v4208_v26, %s1935_s22  ;;  %v4268_v36 = vmax.bf16 %v1917_v63, %v183_v62  ;;  %v184_v63 = vld [vmem:[%s4826_s0 + $0x578] sm:$0xf] }
 0x159   :  { %1659 = vst.msk [vmem:[%s4827_s1 + $0x1c4] sm:$0xf] %vm1545_vm0, %v1466_v44  ;;  %1117 = vrot.lane.b32.xlu0 %v4216_v19, %s1935_s22 }
 0x15a   :  { %1658 = vst.msk [vmem:[%s4827_s1 + $0x1c0] sm:$0xf] %vm1545_vm0, %v1465_v37  ;;  %v1008_v12 = vpop.permute.xlu1 %1007  ;;  %v4276_v37 = vmax.bf16 %v1916_v55, %v182_v54 }
 0x15b   :  { %v1468_v13 = vmax.bf16 %v1008_v12, %v3368_v38  ;;  %v1006_v44 = vpop.permute.xlu0 %1005  ;;  %v185_v38 = vld [vmem:[%s4826_s0 + $0x588] sm:$0xf]  ;;  %v1918_v12 = vld [vmem:[%s4826_s0 + $0x584] sm:$0xf] }
 0x15c   :  { %v1467_v45 = vmax.bf16 %v1006_v44, %v3376_v25  ;;  %1123 = vrot.lane.b32.xlu1 %v4238_v18, %s1935_s22  ;;  %v1919_v25 = vld [vmem:[%s4826_s0 + $0x594] sm:$0xf] }
 0x15d   :  { %1661 = vst.msk [vmem:[%s4827_s1 + $0x1cc] sm:$0xf] %vm1545_vm0, %v1468_v13  ;;  %1121 = vrot.lane.b32.xlu0 %v4246_v27, %s1935_s22  ;;  %v4298_v44 = vmax.bf16 %v1919_v25, %v185_v38  ;;  %v186_v25 = vld [vmem:[%s4826_s0 + $0x58c] sm:$0xf] }
 0x15e   :  { %1660 = vst.msk [vmem:[%s4827_s1 + $0x1c8] sm:$0xf] %vm1545_vm0, %v1467_v45  ;;  %v1012_v62 = vpop.permute.xlu1 %1011  ;;  %v4306_v45 = vmax.bf16 %v1918_v12, %v184_v63 }
 0x15f   :  { %v1470_v54 = vmax.bf16 %v1012_v62, %v3398_v24  ;;  %v1010_v55 = vpop.permute.xlu0 %1009  ;;  %v187_v24 = vld [vmem:[%s4826_s0 + $0x590] sm:$0xf]  ;;  %v1920_v62 = vld [vmem:[%s4826_s0 + $0x598] sm:$0xf] }
 0x160   :  { %v1469_v13 = vmax.bf16 %v1010_v55, %v3406_v39  ;;  %1127 = vrot.lane.b32.xlu1 %v4268_v36, %s1935_s22  ;;  %v1921_v39 = vld [vmem:[%s4826_s0 + $0x59c] sm:$0xf] }
 0x161   :  { %1663 = vst.msk [vmem:[%s4827_s1 + $0x1d4] sm:$0xf] %vm1545_vm0, %v1470_v54  ;;  %1125 = vrot.lane.b32.xlu0 %v4276_v37, %s1935_s22  ;;  %v4328_v55 = vmax.bf16 %v1921_v39, %v187_v24  ;;  %v188_v39 = vld [vmem:[%s4826_s0 + $0x5a0] sm:$0xf] }
 0x162   :  { %1662 = vst.msk [vmem:[%s4827_s1 + $0x1d0] sm:$0xf] %vm1545_vm0, %v1469_v13  ;;  %v1016_v38 = vpop.permute.xlu1 %1015  ;;  %v4336_v13 = vmax.bf16 %v1920_v62, %v186_v25 }
 0x163   :  { %v1472_v63 = vmax.bf16 %v1016_v38, %v3428_v50  ;;  %v1014_v12 = vpop.permute.xlu0 %1013  ;;  %v189_v50 = vld [vmem:[%s4826_s0 + $0x5a4] sm:$0xf]  ;;  %v1922_v38 = vld [vmem:[%s4826_s0 + $0x5ac] sm:$0xf] }
 0x164   :  { %v1471_v54 = vmax.bf16 %v1014_v12, %v3436_v51  ;;  %1131 = vrot.lane.b32.xlu1 %v4298_v44, %s1935_s22  ;;  %v1923_v51 = vld [vmem:[%s4826_s0 + $0x5b0] sm:$0xf] }
 0x165   :  { %1665 = vst.msk [vmem:[%s4827_s1 + $0x1dc] sm:$0xf] %vm1545_vm0, %v1472_v63  ;;  %1129 = vrot.lane.b32.xlu0 %v4306_v45, %s1935_s22  ;;  %v4358_v12 = vmax.bf16 %v1923_v51, %v189_v50  ;;  %v190_v51 = vld [vmem:[%s4826_s0 + $0x5a8] sm:$0xf] }
 0x166   :  { %1664 = vst.msk [vmem:[%s4827_s1 + $0x1d8] sm:$0xf] %vm1545_vm0, %v1471_v54  ;;  %v1020_v24 = vpop.permute.xlu1 %1019  ;;  %v4366_v54 = vmax.bf16 %v1922_v38, %v188_v39 }
 0x167   :  { %v1474_v25 = vmax.bf16 %v1020_v24, %v3458_v2  ;;  %v1018_v62 = vpop.permute.xlu0 %1017  ;;  %v191_v2 = vld [vmem:[%s4826_s0 + $0x5b8] sm:$0xf]  ;;  %v1924_v24 = vld [vmem:[%s4826_s0 + $0x5b4] sm:$0xf] }
 0x168   :  { %v1473_v63 = vmax.bf16 %v1018_v62, %v3466_v4  ;;  %1135 = vrot.lane.b32.xlu1 %v4328_v55, %s1935_s22  ;;  %v1925_v4 = vld [vmem:[%s4826_s0 + $0x5c4] sm:$0xf] }
 0x169   :  { %1667 = vst.msk [vmem:[%s4827_s1 + $0x1e4] sm:$0xf] %vm1545_vm0, %v1474_v25  ;;  %1133 = vrot.lane.b32.xlu0 %v4336_v13, %s1935_s22  ;;  %v4388_v62 = vmax.bf16 %v1925_v4, %v191_v2  ;;  %v192_v4 = vld [vmem:[%s4826_s0 + $0x5bc] sm:$0xf] }
 0x16a   :  { %1666 = vst.msk [vmem:[%s4827_s1 + $0x1e0] sm:$0xf] %vm1545_vm0, %v1473_v63  ;;  %v1024_v50 = vpop.permute.xlu1 %1023  ;;  %v4396_v63 = vmax.bf16 %v1924_v24, %v190_v51 }
 0x16b   :  { %v1476_v39 = vmax.bf16 %v1024_v50, %v3488_v21  ;;  %v1022_v38 = vpop.permute.xlu0 %1021  ;;  %v193_v21 = vld [vmem:[%s4826_s0 + $0x5c0] sm:$0xf]  ;;  %v1926_v50 = vld [vmem:[%s4826_s0 + $0x5c8] sm:$0xf] }
 0x16c   :  { %v1475_v25 = vmax.bf16 %v1022_v38, %v3496_v61  ;;  %1139 = vrot.lane.b32.xlu1 %v4358_v12, %s1935_s22  ;;  %v1927_v61 = vld [vmem:[%s4826_s0 + $0x5cc] sm:$0xf] }
 0x16d   :  { %1669 = vst.msk [vmem:[%s4827_s1 + $0x1ec] sm:$0xf] %vm1545_vm0, %v1476_v39  ;;  %1137 = vrot.lane.b32.xlu0 %v4366_v54, %s1935_s22  ;;  %v4418_v38 = vmax.bf16 %v1927_v61, %v193_v21  ;;  %v194_v61 = vld [vmem:[%s4826_s0 + $0x5d0] sm:$0xf] }
 0x16e   :  { %1668 = vst.msk [vmem:[%s4827_s1 + $0x1e8] sm:$0xf] %vm1545_vm0, %v1475_v25  ;;  %v1028_v2 = vpop.permute.xlu1 %1027  ;;  %v4426_v25 = vmax.bf16 %v1926_v50, %v192_v4 }
 0x16f   :  { %v1478_v51 = vmax.bf16 %v1028_v2, %v3518_v60  ;;  %v1026_v24 = vpop.permute.xlu0 %1025  ;;  %v195_v60 = vld [vmem:[%s4826_s0 + $0x5d4] sm:$0xf]  ;;  %v1928_v2 = vld [vmem:[%s4826_s0 + $0x5dc] sm:$0xf] }
 0x170   :  { %v1477_v39 = vmax.bf16 %v1026_v24, %v3526_v20  ;;  %1143 = vrot.lane.b32.xlu1 %v4388_v62, %s1935_s22  ;;  %v1929_v20 = vld [vmem:[%s4826_s0 + $0x5e0] sm:$0xf] }
 0x171   :  { %1671 = vst.msk [vmem:[%s4827_s1 + $0x1f4] sm:$0xf] %vm1545_vm0, %v1478_v51  ;;  %1141 = vrot.lane.b32.xlu0 %v4396_v63, %s1935_s22  ;;  %v4448_v24 = vmax.bf16 %v1929_v20, %v195_v60  ;;  %v196_v20 = vld [vmem:[%s4826_s0 + $0x5d8] sm:$0xf] }
 0x172   :  { %1670 = vst.msk [vmem:[%s4827_s1 + $0x1f0] sm:$0xf] %vm1545_vm0, %v1477_v39  ;;  %v1032_v21 = vpop.permute.xlu1 %1031  ;;  %v4456_v39 = vmax.bf16 %v1928_v2, %v194_v61 }
 0x173   :  { %v1480_v4 = vmax.bf16 %v1032_v21, %v3548_v42  ;;  %v1030_v50 = vpop.permute.xlu0 %1029  ;;  %v197_v42 = vld [vmem:[%s4826_s0 + $0x5e8] sm:$0xf]  ;;  %v1930_v21 = vld [vmem:[%s4826_s0 + $0x5e4] sm:$0xf] }
 0x174   :  { %v1479_v51 = vmax.bf16 %v1030_v50, %v3556_v43  ;;  %1147 = vrot.lane.b32.xlu1 %v4418_v38, %s1935_s22  ;;  %v1931_v43 = vld [vmem:[%s4826_s0 + $0x5f4] sm:$0xf] }
 0x175   :  { %1673 = vst.msk [vmem:[%s4827_s1 + $0x1fc] sm:$0xf] %vm1545_vm0, %v1480_v4  ;;  %1145 = vrot.lane.b32.xlu0 %v4426_v25, %s1935_s22  ;;  %v4478_v50 = vmax.bf16 %v1931_v43, %v197_v42  ;;  %v198_v43 = vld [vmem:[%s4826_s0 + $0x5ec] sm:$0xf] }
 0x176   :  { %1672 = vst.msk [vmem:[%s4827_s1 + $0x1f8] sm:$0xf] %vm1545_vm0, %v1479_v51  ;;  %v1036_v60 = vpop.permute.xlu1 %1035  ;;  %v4486_v51 = vmax.bf16 %v1930_v21, %v196_v20 }
 0x177   :  { %v1482_v61 = vmax.bf16 %v1036_v60, %v3578_v6  ;;  %v1034_v2 = vpop.permute.xlu0 %1033  ;;  %v199_v6 = vld [vmem:[%s4826_s0 + $0x5f0] sm:$0xf]  ;;  %v1932_v60 = vld [vmem:[%s4826_s0 + $0x5f8] sm:$0xf] }
 0x178   :  { %v1481_v4 = vmax.bf16 %v1034_v2, %v3586_v14  ;;  %1151 = vrot.lane.b32.xlu1 %v4448_v24, %s1935_s22  ;;  %v1933_v14 = vld [vmem:[%s4826_s0 + $0x5fc] sm:$0xf] }
 0x179   :  { %1675 = vst.msk [vmem:[%s4827_s1 + $0x204] sm:$0xf] %vm1545_vm0, %v1482_v61  ;;  %1149 = vrot.lane.b32.xlu0 %v4456_v39, %s1935_s22  ;;  %v4508_v2 = vmax.bf16 %v1933_v14, %v199_v6 }
 0x17a   :  { %1674 = vst.msk [vmem:[%s4827_s1 + $0x200] sm:$0xf] %vm1545_vm0, %v1481_v4  ;;  %v1040_v42 = vpop.permute.xlu1 %1039  ;;  %v4516_v4 = vmax.bf16 %v1932_v60, %v198_v43 }
 0x17b   :  { %v1484_v20 = vmax.bf16 %v1040_v42, %v3608_v32  ;;  %v1038_v21 = vpop.permute.xlu0 %1037 }
 0x17c   :  { %v1483_v61 = vmax.bf16 %v1038_v21, %v3616_v30  ;;  %1155 = vrot.lane.b32.xlu1 %v4478_v50, %s1935_s22 }
 0x17d   :  { %1677 = vst.msk [vmem:[%s4827_s1 + $0x20c] sm:$0xf] %vm1545_vm0, %v1484_v20  ;;  %1153 = vrot.lane.b32.xlu0 %v4486_v51, %s1935_s22 }
 0x17e   :  { %1676 = vst.msk [vmem:[%s4827_s1 + $0x208] sm:$0xf] %vm1545_vm0, %v1483_v61  ;;  %v1044_v32 = vpop.permute.xlu1 %1043 }
 0x17f   :  { %v1486_v30 = vmax.bf16 %v1044_v32, %v3638_v5  ;;  %v1042_v6 = vpop.permute.xlu0 %1041 }
 0x180   :  { %v1485_v14 = vmax.bf16 %v1042_v6, %v3646_v33  ;;  %1159 = vrot.lane.b32.xlu1 %v4508_v2, %s1935_s22 }
 0x181   :  { %1679 = vst.msk [vmem:[%s4827_s1 + $0x214] sm:$0xf] %vm1545_vm0, %v1486_v30  ;;  %1157 = vrot.lane.b32.xlu0 %v4516_v4, %s1935_s22 }
 0x182   :  { %1678 = vst.msk [vmem:[%s4827_s1 + $0x210] sm:$0xf] %vm1545_vm0, %v1485_v14  ;;  %v1048_v5 = vpop.permute.xlu1 %1047 }
 0x183   :  { %v1488_v42 = vmax.bf16 %v1048_v5, %v3668_v49  ;;  %v1046_v33 = vpop.permute.xlu0 %1045 }
 0x184   :  { %v1487_v43 = vmax.bf16 %v1046_v33, %v3676_v31 }
 0x185   :  { %1681 = vst.msk [vmem:[%s4827_s1 + $0x21c] sm:$0xf] %vm1545_vm0, %v1488_v42 }
 0x186   :  { %1680 = vst.msk [vmem:[%s4827_s1 + $0x218] sm:$0xf] %vm1545_vm0, %v1487_v43  ;;  %v1052_v60 = vpop.permute.xlu1 %1051 }
 0x187   :  { %v1490_v20 = vmax.bf16 %v1052_v60, %v3698_v15  ;;  %v1050_v21 = vpop.permute.xlu0 %1049 }
 0x188   :  { %v1489_v61 = vmax.bf16 %v1050_v21, %v3706_v48 }
 0x189   :  { %1683 = vst.msk [vmem:[%s4827_s1 + $0x224] sm:$0xf] %vm1545_vm0, %v1490_v20 }
 0x18a   :  { %1682 = vst.msk [vmem:[%s4827_s1 + $0x220] sm:$0xf] %vm1545_vm0, %v1489_v61  ;;  %v1056_v49 = vpop.permute.xlu1 %1055 }
 0x18b   :  { %v1492_v31 = vmax.bf16 %v1056_v49, %v3728_v56  ;;  %v1054_v32 = vpop.permute.xlu0 %1053 }
 0x18c   :  { %v1491_v30 = vmax.bf16 %v1054_v32, %v3736_v57 }
 0x18d   :  { %1685 = vst.msk [vmem:[%s4827_s1 + $0x22c] sm:$0xf] %vm1545_vm0, %v1492_v31 }
 0x18e   :  { %1684 = vst.msk [vmem:[%s4827_s1 + $0x228] sm:$0xf] %vm1545_vm0, %v1491_v30  ;;  %v1060_v15 = vpop.permute.xlu1 %1059 }
 0x18f   :  { %v1494_v48 = vmax.bf16 %v1060_v15, %v3758_v3  ;;  %v1058_v6 = vpop.permute.xlu0 %1057 }
 0x190   :  { %v1493_v14 = vmax.bf16 %v1058_v6, %v3766_v7 }
 0x191   :  { %1687 = vst.msk [vmem:[%s4827_s1 + $0x234] sm:$0xf] %vm1545_vm0, %v1494_v48 }
 0x192   :  { %1686 = vst.msk [vmem:[%s4827_s1 + $0x230] sm:$0xf] %vm1545_vm0, %v1493_v14  ;;  %v1064_v56 = vpop.permute.xlu1 %1063 }
 0x193   :  { %v1496_v57 = vmax.bf16 %v1064_v56, %v3788_v10  ;;  %v1062_v5 = vpop.permute.xlu0 %1061 }
 0x194   :  { %v1495_v42 = vmax.bf16 %v1062_v5, %v3796_v11 }
 0x195   :  { %1689 = vst.msk [vmem:[%s4827_s1 + $0x23c] sm:$0xf] %vm1545_vm0, %v1496_v57 }
 0x196   :  { %1688 = vst.msk [vmem:[%s4827_s1 + $0x238] sm:$0xf] %vm1545_vm0, %v1495_v42  ;;  %v1068_v3 = vpop.permute.xlu1 %1067 }
 0x197   :  { %v1498_v7 = vmax.bf16 %v1068_v3, %v3818_v16  ;;  %v1066_v33 = vpop.permute.xlu0 %1065 }
 0x198   :  { %v1497_v43 = vmax.bf16 %v1066_v33, %v3826_v17 }
 0x199   :  { %1691 = vst.msk [vmem:[%s4827_s1 + $0x244] sm:$0xf] %vm1545_vm0, %v1498_v7 }
 0x19a   :  { %1690 = vst.msk [vmem:[%s4827_s1 + $0x240] sm:$0xf] %vm1545_vm0, %v1497_v43  ;;  %v1072_v10 = vpop.permute.xlu1 %1071 }
 0x19b   :  { %v1500_v11 = vmax.bf16 %v1072_v10, %v3848_v22  ;;  %v1070_v60 = vpop.permute.xlu0 %1069  ;;  %v4877_v10 = vld [vmem:[#allocation5_spill] sm:$0xff] }
 0x19c   :  { %v1499_v20 = vmax.bf16 %v1070_v60, %v3856_v23 }
 0x19d   :  { %1693 = vst.msk [vmem:[%s4827_s1 + $0x24c] sm:$0xf] %vm1545_vm0, %v1500_v11 }
 0x19e   :  { %1692 = vst.msk [vmem:[%s4827_s1 + $0x248] sm:$0xf] %vm1545_vm0, %v1499_v20  ;;  %v1076_v16 = vpop.permute.xlu1 %1075 }
 0x19f   :  { %v1502_v17 = vmax.bf16 %v1076_v16, %v3878_v28  ;;  %v1074_v21 = vpop.permute.xlu0 %1073  ;;  %v4879_v16 = vld [vmem:[#allocation7_spill] sm:$0xff] }
 0x1a0   :  { %v1501_v61 = vmax.bf16 %v1074_v21, %v3886_v29 }
 0x1a1   :  { %1695 = vst.msk [vmem:[%s4827_s1 + $0x254] sm:$0xf] %vm1545_vm0, %v1502_v17 }
 0x1a2   :  { %1694 = vst.msk [vmem:[%s4827_s1 + $0x250] sm:$0xf] %vm1545_vm0, %v1501_v61  ;;  %v1080_v22 = vpop.permute.xlu1 %1079  ;;  %v4880_v61 = vld [vmem:[#allocation8_spill] sm:$0xff] }
 0x1a3   :  { %v1504_v23 = vmax.bf16 %v1080_v22, %v3908_v34  ;;  %v1078_v49 = vpop.permute.xlu0 %1077 }
 0x1a4   :  { %v1503_v31 = vmax.bf16 %v1078_v49, %v3916_v35  ;;  %v4881_v49 = vld [vmem:[#allocation9_spill] sm:$0xff] }
 0x1a5   :  { %1697 = vst.msk [vmem:[%s4827_s1 + $0x25c] sm:$0xf] %vm1545_vm0, %v1504_v23 }
 0x1a6   :  { %1696 = vst.msk [vmem:[%s4827_s1 + $0x258] sm:$0xf] %vm1545_vm0, %v1503_v31  ;;  %v1084_v28 = vpop.permute.xlu1 %1083 }
 0x1a7   :  { %v1506_v29 = vmax.bf16 %v1084_v28, %v3938_v40  ;;  %v1082_v32 = vpop.permute.xlu0 %1081 }
 0x1a8   :  { %v1505_v30 = vmax.bf16 %v1082_v32, %v3946_v41 }
 0x1a9   :  { %1699 = vst.msk [vmem:[%s4827_s1 + $0x264] sm:$0xf] %vm1545_vm0, %v1506_v29 }
 0x1aa   :  { %1698 = vst.msk [vmem:[%s4827_s1 + $0x260] sm:$0xf] %vm1545_vm0, %v1505_v30  ;;  %v1088_v34 = vpop.permute.xlu1 %1087 }
 0x1ab   :  { %v1508_v35 = vmax.bf16 %v1088_v34, %v3968_v46  ;;  %v1086_v15 = vpop.permute.xlu0 %1085 }
 0x1ac   :  { %v1507_v48 = vmax.bf16 %v1086_v15, %v3976_v47 }
 0x1ad   :  { %1701 = vst.msk [vmem:[%s4827_s1 + $0x26c] sm:$0xf] %vm1545_vm0, %v1508_v35 }
 0x1ae   :  { %1700 = vst.msk [vmem:[%s4827_s1 + $0x268] sm:$0xf] %vm1545_vm0, %v1507_v48  ;;  %v1092_v40 = vpop.permute.xlu1 %1091 }
 0x1af   :  { %v1510_v41 = vmax.bf16 %v1092_v40, %v3998_v52  ;;  %v1090_v6 = vpop.permute.xlu0 %1089 }
 0x1b0   :  { %v1509_v14 = vmax.bf16 %v1090_v6, %v4006_v53 }
 0x1b1   :  { %1703 = vst.msk [vmem:[%s4827_s1 + $0x274] sm:$0xf] %vm1545_vm0, %v1510_v41 }
 0x1b2   :  { %1702 = vst.msk [vmem:[%s4827_s1 + $0x270] sm:$0xf] %vm1545_vm0, %v1509_v14  ;;  %v1096_v46 = vpop.permute.xlu1 %1095 }
 0x1b3   :  { %v1512_v47 = vmax.bf16 %v1096_v46, %v4028_v58  ;;  %v1094_v56 = vpop.permute.xlu0 %1093 }
 0x1b4   :  { %v1511_v57 = vmax.bf16 %v1094_v56, %v4036_v59 }
 0x1b5   :  { %1705 = vst.msk [vmem:[%s4827_s1 + $0x27c] sm:$0xf] %vm1545_vm0, %v1512_v47 }
 0x1b6   :  { %1704 = vst.msk [vmem:[%s4827_s1 + $0x278] sm:$0xf] %vm1545_vm0, %v1511_v57  ;;  %v1100_v52 = vpop.permute.xlu1 %1099 }
 0x1b7   :  { %v1514_v53 = vmax.bf16 %v1100_v52, %v4058_v0  ;;  %v1098_v5 = vpop.permute.xlu0 %1097 }
 0x1b8   :  { %v1513_v42 = vmax.bf16 %v1098_v5, %v4066_v1  ;;  %v4876_v1 = vld [vmem:[#allocation4_spill] sm:$0xff] }
 0x1b9   :  { %1707 = vst.msk [vmem:[%s4827_s1 + $0x284] sm:$0xf] %vm1545_vm0, %v1514_v53 }
 0x1ba   :  { %1706 = vst.msk [vmem:[%s4827_s1 + $0x280] sm:$0xf] %vm1545_vm0, %v1513_v42  ;;  %v1104_v58 = vpop.permute.xlu1 %1103 }
 0x1bb   :  { %v1516_v59 = vmax.bf16 %v1104_v58, %v4088_v8  ;;  %v1102_v3 = vpop.permute.xlu0 %1101 }
 0x1bc   :  { %v1515_v7 = vmax.bf16 %v1102_v3, %v4096_v9  ;;  %v4878_v9 = vld [vmem:[#allocation6_spill] sm:$0xff] }
 0x1bd   :  { %1709 = vst.msk [vmem:[%s4827_s1 + $0x28c] sm:$0xf] %vm1545_vm0, %v1516_v59 }
 0x1be   :  { %1708 = vst.msk [vmem:[%s4827_s1 + $0x288] sm:$0xf] %vm1545_vm0, %v1515_v7  ;;  %v1108_v0 = vpop.permute.xlu1 %1107 }
 0x1bf   :  { %v1518_v33 = vmax.bf16 %v1108_v0, %v4876_v1  ;;  %v1106_v43 = vpop.permute.xlu0 %1105 }
 0x1c0   :  { %v1517_v11 = vmax.bf16 %v1106_v43, %v4877_v10 }
 0x1c1   :  { %1711 = vst.msk [vmem:[%s4827_s1 + $0x294] sm:$0xf] %vm1545_vm0, %v1518_v33 }
 0x1c2   :  { %1710 = vst.msk [vmem:[%s4827_s1 + $0x290] sm:$0xf] %vm1545_vm0, %v1517_v11  ;;  %v1112_v8 = vpop.permute.xlu1 %1111 }
 0x1c3   :  { %v1520_v60 = vmax.bf16 %v1112_v8, %v4878_v9  ;;  %v1110_v20 = vpop.permute.xlu0 %1109 }
 0x1c4   :  { %v1519_v17 = vmax.bf16 %v1110_v20, %v4879_v16 }
 0x1c5   :  { %1713 = vst.msk [vmem:[%s4827_s1 + $0x29c] sm:$0xf] %vm1545_vm0, %v1520_v60 }
 0x1c6   :  { %1712 = vst.msk [vmem:[%s4827_s1 + $0x298] sm:$0xf] %vm1545_vm0, %v1519_v17  ;;  %v1116_v21 = vpop.permute.xlu1 %1115 }
 0x1c7   :  { %v1522_v22 = vmax.bf16 %v1116_v21, %v4880_v61  ;;  %v1114_v23 = vpop.permute.xlu0 %1113 }
 0x1c8   :  { %v1521_v31 = vmax.bf16 %v1114_v23, %v4881_v49 }
 0x1c9   :  { %1715 = vst.msk [vmem:[%s4827_s1 + $0x2a4] sm:$0xf] %vm1545_vm0, %v1522_v22 }
 0x1ca   :  { %1714 = vst.msk [vmem:[%s4827_s1 + $0x2a0] sm:$0xf] %vm1545_vm0, %v1521_v31  ;;  %v1120_v28 = vpop.permute.xlu1 %1119 }
 0x1cb   :  { %v1524_v29 = vmax.bf16 %v1120_v28, %v4208_v26  ;;  %v1118_v32 = vpop.permute.xlu0 %1117 }
 0x1cc   :  { %v1523_v30 = vmax.bf16 %v1118_v32, %v4216_v19 }
 0x1cd   :  { %1717 = vst.msk [vmem:[%s4827_s1 + $0x2ac] sm:$0xf] %vm1545_vm0, %v1524_v29 }
 0x1ce   :  { %1716 = vst.msk [vmem:[%s4827_s1 + $0x2a8] sm:$0xf] %vm1545_vm0, %v1523_v30  ;;  %v1124_v34 = vpop.permute.xlu1 %1123 }
 0x1cf   :  { %v1526_v35 = vmax.bf16 %v1124_v34, %v4238_v18  ;;  %v1122_v15 = vpop.permute.xlu0 %1121 }
 0x1d0   :  { %v1525_v48 = vmax.bf16 %v1122_v15, %v4246_v27 }
 0x1d1   :  { %1719 = vst.msk [vmem:[%s4827_s1 + $0x2b4] sm:$0xf] %vm1545_vm0, %v1526_v35 }
 0x1d2   :  { %1718 = vst.msk [vmem:[%s4827_s1 + $0x2b0] sm:$0xf] %vm1545_vm0, %v1525_v48  ;;  %v1128_v26 = vpop.permute.xlu1 %1127 }
 0x1d3   :  { %v1528_v19 = vmax.bf16 %v1128_v26, %v4268_v36  ;;  %v1126_v40 = vpop.permute.xlu0 %1125 }
 0x1d4   :  { %v1527_v41 = vmax.bf16 %v1126_v40, %v4276_v37 }
 0x1d5   :  { %1721 = vst.msk [vmem:[%s4827_s1 + $0x2bc] sm:$0xf] %vm1545_vm0, %v1528_v19 }
 0x1d6   :  { %1720 = vst.msk [vmem:[%s4827_s1 + $0x2b8] sm:$0xf] %vm1545_vm0, %v1527_v41  ;;  %v1132_v18 = vpop.permute.xlu1 %1131 }
 0x1d7   :  { %v1530_v27 = vmax.bf16 %v1132_v18, %v4298_v44  ;;  %v1130_v6 = vpop.permute.xlu0 %1129 }
 0x1d8   :  { %v1529_v14 = vmax.bf16 %v1130_v6, %v4306_v45 }
 0x1d9   :  { %1723 = vst.msk [vmem:[%s4827_s1 + $0x2c4] sm:$0xf] %vm1545_vm0, %v1530_v27 }
 0x1da   :  { %1722 = vst.msk [vmem:[%s4827_s1 + $0x2c0] sm:$0xf] %vm1545_vm0, %v1529_v14  ;;  %v1136_v36 = vpop.permute.xlu1 %1135 }
 0x1db   :  { %v1532_v37 = vmax.bf16 %v1136_v36, %v4328_v55  ;;  %v1134_v46 = vpop.permute.xlu0 %1133 }
 0x1dc   :  { %v1531_v47 = vmax.bf16 %v1134_v46, %v4336_v13 }
 0x1dd   :  { %1725 = vst.msk [vmem:[%s4827_s1 + $0x2cc] sm:$0xf] %vm1545_vm0, %v1532_v37 }
 0x1de   :  { %1724 = vst.msk [vmem:[%s4827_s1 + $0x2c8] sm:$0xf] %vm1545_vm0, %v1531_v47  ;;  %v1140_v44 = vpop.permute.xlu1 %1139 }
 0x1df   :  { %v1534_v45 = vmax.bf16 %v1140_v44, %v4358_v12  ;;  %v1138_v56 = vpop.permute.xlu0 %1137 }
 0x1e0   :  { %v1533_v57 = vmax.bf16 %v1138_v56, %v4366_v54 }
 0x1e1   :  { %1727 = vst.msk [vmem:[%s4827_s1 + $0x2d4] sm:$0xf] %vm1545_vm0, %v1534_v45 }
 0x1e2   :  { %1726 = vst.msk [vmem:[%s4827_s1 + $0x2d0] sm:$0xf] %vm1545_vm0, %v1533_v57  ;;  %v1144_v55 = vpop.permute.xlu1 %1143 }
 0x1e3   :  { %v1536_v13 = vmax.bf16 %v1144_v55, %v4388_v62  ;;  %v1142_v52 = vpop.permute.xlu0 %1141 }
 0x1e4   :  { %v1535_v53 = vmax.bf16 %v1142_v52, %v4396_v63 }
 0x1e5   :  { %1729 = vst.msk [vmem:[%s4827_s1 + $0x2dc] sm:$0xf] %vm1545_vm0, %v1536_v13 }
 0x1e6   :  { %1728 = vst.msk [vmem:[%s4827_s1 + $0x2d8] sm:$0xf] %vm1545_vm0, %v1535_v53  ;;  %v1148_v12 = vpop.permute.xlu1 %1147 }
 0x1e7   :  { %v1538_v54 = vmax.bf16 %v1148_v12, %v4418_v38  ;;  %v1146_v5 = vpop.permute.xlu0 %1145 }
 0x1e8   :  { %v1537_v42 = vmax.bf16 %v1146_v5, %v4426_v25 }
 0x1e9   :  { %1731 = vst.msk [vmem:[%s4827_s1 + $0x2e4] sm:$0xf] %vm1545_vm0, %v1538_v54 }
 0x1ea   :  { %1730 = vst.msk [vmem:[%s4827_s1 + $0x2e0] sm:$0xf] %vm1545_vm0, %v1537_v42  ;;  %v1152_v62 = vpop.permute.xlu1 %1151 }
 0x1eb   :  { %v1540_v63 = vmax.bf16 %v1152_v62, %v4448_v24  ;;  %v1150_v58 = vpop.permute.xlu0 %1149 }
 0x1ec   :  { %v1539_v59 = vmax.bf16 %v1150_v58, %v4456_v39 }
 0x1ed   :  { %1733 = vst.msk [vmem:[%s4827_s1 + $0x2ec] sm:$0xf] %vm1545_vm0, %v1540_v63 }
 0x1ee   :  { %1732 = vst.msk [vmem:[%s4827_s1 + $0x2e8] sm:$0xf] %vm1545_vm0, %v1539_v59  ;;  %v1156_v38 = vpop.permute.xlu1 %1155 }
 0x1ef   :  { %v1542_v25 = vmax.bf16 %v1156_v38, %v4478_v50  ;;  %v1154_v3 = vpop.permute.xlu0 %1153 }
 0x1f0   :  { %v1541_v7 = vmax.bf16 %v1154_v3, %v4486_v51 }
 0x1f1   :  { %1735 = vst.msk [vmem:[%s4827_s1 + $0x2f4] sm:$0xf] %vm1545_vm0, %v1542_v25 }
 0x1f2   :  { %1734 = vst.msk [vmem:[%s4827_s1 + $0x2f0] sm:$0xf] %vm1545_vm0, %v1541_v7  ;;  %v1160_v24 = vpop.permute.xlu1 %1159 }
 0x1f3   :  { %v1544_v39 = vmax.bf16 %v1160_v24, %v4508_v2  ;;  %v1158_v0 = vpop.permute.xlu0 %1157 }
 0x1f4   :  { %v1543_v1 = vmax.bf16 %v1158_v0, %v4516_v4 }
 0x1f5   :  { %1737 = vst.msk [vmem:[%s4827_s1 + $0x2fc] sm:$0xf] %vm1545_vm0, %v1544_v39 }
 0x1f6   :  { %1736 = vst.msk [vmem:[%s4827_s1 + $0x2f8] sm:$0xf] %vm1545_vm0, %v1543_v1 }

// kernel: fall_detection_forward.13
= control target key start
LH: loop header
LB: loop body
LE: loop exit
PB: predicated region body
PF: predicated region fallthrough
CT: control target
= control target key end

     0   :  { %s2984_s15 = smov 0   ;;  %s2986_s16 = smov 0   ;;  %s3646_s0 = inlined_call_operand.vmem [shape: bf16[1536,288], index: 0, kind: input, shape index: {}]   ;;  %s3647_s1 = inlined_call_operand.vmem [shape: bf16[288,64], index: 1, kind: input, shape index: {}]   ;;  %s3648_s2 = inlined_call_operand.vmem [shape: f32[1,64], index: 2, kind: input, shape index: {}]   ;;  %s3649_s3 = inlined_call_operand.vmem [shape: f32[1,64], index: 3, kind: input, shape index: {}]   ;;  %s3650_s4 = inlined_call_operand.vmem [shape: bf16[1536,64], index: 4, kind: output, shape index: {}]  }
   0x1   :  { %s2988_s17 = smov 0  }
   0x2 LB: > { %s26_s18 = sadd.s32 1, %s2952_s16  ;;  %p2345_p0 = scmp.ge.s32.totalorder %s2956_s17, 1  ;;  %s2956_s17 = sphi %s2988_s17, %s14_s17   ;;  %s2952_s16 = sphi %s2986_s16, %s3652_s16   ;;  %s2948_s15 = sphi %s2984_s15, %s3651_s15  }
   0x3   : > { %p28_p1 = scmp.ge.s32.totalorder %s26_s18, 3  ;;  %p203_p2 = scmp.lt.s32.totalorder %s2956_s17, 4 }
   0x5   : > { %s3654_s18 = smov (%p28_p1, %s26_s18), 0  ;;  %p204_p3 = pnand %p2345_p0, %p203_p2 }
   0x6   : > { %s2346_s21 = sshll.u32 (!%p204_p3), %s2948_s15, 6 }
   0x7   : > { %207 = sbr.rel (%p204_p3) target bundleno = 471 (0x1d7), region = 36  ;;  %p244_p4 = scmp.lt.s32.totalorder (!%p204_p3), %s2346_s21, 191 }
   0xc   : > { %v2788_v0 = vld [vmem:[%s3647_s1 + $0x38] sm:$0xff]   ;;  %v2958_v1 = vmov 0   ;;  %v2789_v2 = vld [vmem:[%s3647_s1 + $0x30] sm:$0xff]   ;;  %v2790_v3 = vld [vmem:[%s3647_s1 + $0x28] sm:$0xff]   ;;  %s3656_s21 = smov (!%p244_p4, %s2346_s21), 191  ;;  %vm1022_vm0 = vcmask 261120  }
   0xd   : > { %1119 = vmatprep.subr.bf16.mxu0 %v2958_v1  ;;  %2730 = vmatprep.subr.bf16.mxu1 %v2958_v1  ;;  %v2791_v4 = vld [vmem:[%s3647_s1 + $0x20] sm:$0xff]   ;;  %s2762_s28 = smul.u32 12, %s3656_s21  ;;  %v2792_v5 = vld [vmem:[%s3647_s1 + $0x18] sm:$0xff]   ;;  %v2793_v7 = vld [vmem:[%s3647_s1 + $0x10] sm:$0xff]   ;;  %s2349_s19 = sshll.u32 %s3656_s21, 2  ;;  %vm2159_vm1 = vcmask 519168  }
   0xe   : > { %1120 = vmatpush1.bf16.msra.mxu0 %v2788_v0  ;;  %2746 = vmatpush1.bf16.msra.mxu1 %v2788_v0  ;;  %v2794_v9 = vld [vmem:[%s3647_s1 + $0x8] sm:$0xff]   ;;  %v2795_v10 = vld [vmem:[%s3647_s1] sm:$0xff]   ;;  %v2796_v11 = vld [vmem:[%s3647_s1 + $0x78] sm:$0xff]   ;;  %s3312_s23 = scalar_lea.vmem %s3650_s4, %s2349_s19 }
   0xf   : > { %1121 = vmatprep.subr.bf16.mxu0 %v2958_v1  ;;  %2731 = vmatprep.subr.bf16.mxu1 %v2958_v1  ;;  %s3031_s7 = scalar_lea.vmem %s3646_s0, %s2762_s28  ;;  %v2797_v12 = vld [vmem:[%s3647_s1 + $0x70] sm:$0xff]   ;;  %v2798_v13 = vld [vmem:[%s3647_s1 + $0x68] sm:$0xff]   ;;  %v2799_v14 = vld [vmem:[%s3647_s1 + $0x60] sm:$0xff]  }
  0x10   : > { %v2806_v6 = vld [vmem:[%s3031_s7 + $0x4] ss:$12 sps:$4 sm:$0xff]   ;;  %v2800_v15 = vld [vmem:[%s3647_s1 + $0x58] sm:$0xff]   ;;  %v2802_v17 = vld [vmem:[%s3647_s1 + $0x48] sm:$0xff]  }
  0x11   : > { %v2809_v8 = vld [vmem:[%s3031_s7 + $0x244] ss:$12 sps:$4 sm:$0xff]   ;;  %1151 = vmatprep.mubr.bf16.mxu0 %v2806_v6  ;;  %v2810_v19 = vld [vmem:[%s3647_s1 + $0x88] sm:$0xff]   ;;  %v2817_v27 = vld [vmem:[%s3031_s7 + $0x34] ss:$12 sps:$4 sm:$0xff]  }
  0x12   : > { %1122 = vmatpush1.bf16.msra.mxu0 %v2789_v2  ;;  %2747 = vmatpush1.bf16.msra.mxu1 %v2789_v2  ;;  %v2801_v16 = vld [vmem:[%s3647_s1 + $0x50] sm:$0xff]   ;;  %v2803_v18 = vld [vmem:[%s3647_s1 + $0x40] sm:$0xff]   ;;  %v2811_v22 = vld [vmem:[%s3031_s7 + $0x1c] ss:$12 sps:$4 sm:$0xff]  }
  0x13   : > { %1123 = vmatprep.subr.bf16.mxu0 %v2958_v1  ;;  %2732 = vmatprep.subr.bf16.mxu1 %v2958_v1  ;;  %v2804_v20 = vld [vmem:[%s3031_s7] ss:$12 sps:$4 sm:$0xff]   ;;  %v2813_v23 = vld [vmem:[%s3031_s7 + $0x25c] ss:$12 sps:$4 sm:$0xff]   ;;  %v2815_v25 = vld [vmem:[%s3031_s7 + $0x18] ss:$12 sps:$4 sm:$0xff]  }
  0x14   : > { %1343 = vmatprep.mubr.bf16.mxu1 %v2809_v8  ;;  %v2807_v21 = vld [vmem:[%s3031_s7 + $0x240] ss:$12 sps:$4 sm:$0xff]   ;;  %v2816_v26 = vld [vmem:[%s3031_s7 + $0x258] ss:$12 sps:$4 sm:$0xff]   ;;  %v2821_v29 = vld [vmem:[%s3031_s7 + $0x30] ss:$12 sps:$4 sm:$0xff]  }
  0x15   : > { %v2835_v24 = vld [vmem:[%s3647_s1 + $0x80] sm:$0xff]   ;;  %v2822_v30 = vld [vmem:[%s3031_s7 + $0x270] ss:$12 sps:$4 sm:$0xff]   ;;  %v2823_v31 = vld [vmem:[%s3031_s7 + $0x4c] ss:$12 sps:$4 sm:$0xff]  }
  0x16   : > { %1124 = vmatpush1.bf16.msra.mxu0 %v2790_v3  ;;  %2748 = vmatpush1.bf16.msra.mxu1 %v2790_v3  ;;  %v2819_v28 = vld [vmem:[%s3031_s7 + $0x274] ss:$12 sps:$4 sm:$0xff]   ;;  %v2825_v32 = vld [vmem:[%s3031_s7 + $0x28c] ss:$12 sps:$4 sm:$0xff]   ;;  %v2829_v35 = vld [vmem:[%s3031_s7 + $0x64] ss:$12 sps:$4 sm:$0xff]  }
  0x17   : > { %1125 = vmatprep.subr.bf16.mxu0 %v2958_v1  ;;  %2733 = vmatprep.subr.bf16.mxu1 %v2958_v1  ;;  %v2827_v33 = vld [vmem:[%s3031_s7 + $0x48] ss:$12 sps:$4 sm:$0xff]   ;;  %v2831_v36 = vld [vmem:[%s3031_s7 + $0x2a4] ss:$12 sps:$4 sm:$0xff]   ;;  %v2833_v37 = vld [vmem:[%s3031_s7 + $0x60] ss:$12 sps:$4 sm:$0xff]  }
  0x18   : > { %v2828_v34 = vld [vmem:[%s3031_s7 + $0x288] ss:$12 sps:$4 sm:$0xff]   ;;  %v2834_v38 = vld [vmem:[%s3031_s7 + $0x2a0] ss:$12 sps:$4 sm:$0xff]   ;;  %v2840_v41 = vld [vmem:[%s3031_s7 + $0x78] ss:$12 sps:$4 sm:$0xff]  }
  0x19   : > { %v2836_v39 = vld [vmem:[%s3031_s7 + $0x7c] ss:$12 sps:$4 sm:$0xff]   ;;  %v2841_v42 = vld [vmem:[%s3031_s7 + $0x2b8] ss:$12 sps:$4 sm:$0xff]   ;;  %v2842_v43 = vld [vmem:[%s3031_s7 + $0x94] ss:$12 sps:$4 sm:$0xff]  }
  0x1a   : > { %1126 = vmatpush1.bf16.msra.mxu0 %v2791_v4  ;;  %2749 = vmatpush1.bf16.msra.mxu1 %v2791_v4  ;;  %v2838_v40 = vld [vmem:[%s3031_s7 + $0x2bc] ss:$12 sps:$4 sm:$0xff]   ;;  %v2844_v44 = vld [vmem:[%s3031_s7 + $0x2d4] ss:$12 sps:$4 sm:$0xff]   ;;  %v2848_v47 = vld [vmem:[%s3031_s7 + $0xac] ss:$12 sps:$4 sm:$0xff]  }
  0x1b   : > { %1127 = vmatprep.subr.bf16.mxu0 %v2958_v1  ;;  %2734 = vmatprep.subr.bf16.mxu1 %v2958_v1  ;;  %v2846_v45 = vld [vmem:[%s3031_s7 + $0x90] ss:$12 sps:$4 sm:$0xff]   ;;  %v2850_v48 = vld [vmem:[%s3031_s7 + $0x2ec] ss:$12 sps:$4 sm:$0xff]   ;;  %v2852_v49 = vld [vmem:[%s3031_s7 + $0xa8] ss:$12 sps:$4 sm:$0xff]  }
  0x1c   : > { %v2847_v46 = vld [vmem:[%s3031_s7 + $0x2d0] ss:$12 sps:$4 sm:$0xff]   ;;  %v2853_v50 = vld [vmem:[%s3031_s7 + $0x2e8] ss:$12 sps:$4 sm:$0xff]   ;;  %v2857_v53 = vld [vmem:[%s3031_s7 + $0xc0] ss:$12 sps:$4 sm:$0xff]  }
  0x1d   : > { %v2854_v51 = vld [vmem:[%s3031_s7 + $0xc4] ss:$12 sps:$4 sm:$0xff]   ;;  %v2856_v52 = vld [vmem:[%s3031_s7 + $0x8] ss:$12 sps:$4 sm:$0xff]   ;;  %v2858_v54 = vld [vmem:[%s3031_s7 + $0x20] ss:$12 sps:$4 sm:$0xff]  }
  0x1e   : > { %1128 = vmatpush1.bf16.msra.mxu0 %v2792_v5  ;;  %2750 = vmatpush1.bf16.msra.mxu1 %v2792_v5  ;;  %v2859_v55 = vld [vmem:[%s3031_s7 + $0xdc] ss:$12 sps:$4 sm:$0xff]   ;;  %v2861_v56 = vld [vmem:[%s3031_s7 + $0x38] ss:$12 sps:$4 sm:$0xff]   ;;  %v2864_v59 = vld [vmem:[%s3031_s7 + $0xf4] ss:$12 sps:$4 sm:$0xff]  }
  0x1f   : > { %1129 = vmatprep.subr.bf16.mxu0 %v2958_v1  ;;  %2735 = vmatprep.subr.bf16.mxu1 %v2958_v1  ;;  %v2862_v57 = vld [vmem:[%s3031_s7 + $0xd8] ss:$12 sps:$4 sm:$0xff]   ;;  %v2863_v58 = vld [vmem:[%s3031_s7 + $0x50] ss:$12 sps:$4 sm:$0xff]   ;;  %v2866_v60 = vld [vmem:[%s3031_s7 + $0x68] ss:$12 sps:$4 sm:$0xff]  }
  0x20   : > { %v2867_v61 = vld [vmem:[%s3031_s7 + $0xf0] ss:$12 sps:$4 sm:$0xff]   ;;  %v2868_v62 = vld [vmem:[%s3031_s7 + $0x80] ss:$12 sps:$4 sm:$0xff]   ;;  %v2871_v0 = vld [vmem:[%s3031_s7 + $0x98] ss:$12 sps:$4 sm:$0xff]  }
  0x21   : > { %v2869_v63 = vld [vmem:[%s3031_s7 + $0x10c] ss:$12 sps:$4 sm:$0xff]   ;;  %v2873_v2 = vld [vmem:[%s3031_s7 + $0xb0] ss:$12 sps:$4 sm:$0xff]   ;;  %v2876_v4 = vld [vmem:[%s3031_s7 + $0xc8] ss:$12 sps:$4 sm:$0xff]  }
  0x22   : > { %1130 = vmatpush1.bf16.msra.mxu0 %v2793_v7  ;;  %2751 = vmatpush1.bf16.msra.mxu1 %v2793_v7  ;;  %v2874_v3 = vld [vmem:[%s3031_s7 + $0x124] ss:$12 sps:$4 sm:$0xff]   ;;  %v2877_v5 = vld [vmem:[%s3031_s7 + $0x120] ss:$12 sps:$4 sm:$0xff]   ;;  %v2879_v7 = vld [vmem:[%s3031_s7 + $0x13c] ss:$12 sps:$4 sm:$0xff]  }
  0x23   : > { %1131 = vmatprep.subr.bf16.mxu0 %v2958_v1  ;;  %2736 = vmatprep.subr.bf16.mxu1 %v2958_v1  ;;  %v2878_v6 = vld [vmem:[%s3031_s7 + $0xe0] ss:$12 sps:$4 sm:$0xff]   ;;  %v2881_v8 = vld [vmem:[%s3031_s7 + $0xf8] ss:$12 sps:$4 sm:$0xff]  }
  0x26   : > { %1132 = vmatpush1.bf16.msra.mxu0 %v2794_v9  ;;  %2752 = vmatpush1.bf16.msra.mxu1 %v2794_v9  ;;  %v2882_v9 = vld [vmem:[%s3031_s7 + $0x138] ss:$12 sps:$4 sm:$0xff]  }
  0x27   : > { %1133 = vmatprep.subr.bf16.mxu0 %v2958_v1  ;;  %2737 = vmatprep.subr.bf16.mxu1 %v2958_v1 }
  0x2a   : > { %1134 = vmatpush1.bf16.msra.mxu0 %v2795_v10  ;;  %2753 = vmatpush1.bf16.msra.mxu1 %v2795_v10  ;;  %v2883_v10 = vld [vmem:[%s3031_s7 + $0x110] ss:$12 sps:$4 sm:$0xff]  }
  0x2b   : > { %1135 = vmatprep.subr.bf16.mxu0 %v2958_v1  ;;  %2738 = vmatprep.subr.bf16.mxu1 %v2958_v1 }
  0x2e   : > { %1136 = vmatpush2.bf16.msra.mxu0 %v2796_v11  ;;  %2754 = vmatpush2.bf16.msra.mxu1 %v2796_v11  ;;  %v2884_v11 = vld [vmem:[%s3031_s7 + $0x154] ss:$12 sps:$4 sm:$0xff]  }
  0x2f   : > { %1137 = vmatprep.subr.bf16.mxu0 %v2958_v1  ;;  %2739 = vmatprep.subr.bf16.mxu1 %v2958_v1 }
  0x32   : > { %1138 = vmatpush2.bf16.msra.mxu0 %v2797_v12  ;;  %2755 = vmatpush2.bf16.msra.mxu1 %v2797_v12  ;;  %v2886_v12 = vld [vmem:[%s3031_s7 + $0x128] ss:$12 sps:$4 sm:$0xff]  }
  0x33   : > { %1139 = vmatprep.subr.bf16.mxu0 %v2958_v1  ;;  %2740 = vmatprep.subr.bf16.mxu1 %v2958_v1 }
  0x36   : > { %1140 = vmatpush2.bf16.msra.mxu0 %v2798_v13  ;;  %2756 = vmatpush2.bf16.msra.mxu1 %v2798_v13  ;;  %v2887_v13 = vld [vmem:[%s3031_s7 + $0x150] ss:$12 sps:$4 sm:$0xff]  }
  0x37   : > { %1141 = vmatprep.subr.bf16.mxu0 %v2958_v1  ;;  %2741 = vmatprep.subr.bf16.mxu1 %v2958_v1 }
  0x3a   : > { %1142 = vmatpush2.bf16.msra.mxu0 %v2799_v14  ;;  %2757 = vmatpush2.bf16.msra.mxu1 %v2799_v14  ;;  %v2888_v14 = vld [vmem:[%s3031_s7 + $0x140] ss:$12 sps:$4 sm:$0xff]  }
  0x3b   : > { %1143 = vmatprep.subr.bf16.mxu0 %v2958_v1  ;;  %2742 = vmatprep.subr.bf16.mxu1 %v2958_v1 }
  0x3e   : > { %1144 = vmatpush2.bf16.msra.mxu0 %v2800_v15  ;;  %2758 = vmatpush2.bf16.msra.mxu1 %v2800_v15  ;;  %v2889_v15 = vld [vmem:[%s3031_s7 + $0x16c] ss:$12 sps:$4 sm:$0xff]  }
  0x3f   : > { %1145 = vmatprep.subr.bf16.mxu0 %v2958_v1  ;;  %2743 = vmatprep.subr.bf16.mxu1 %v2958_v1 }
  0x42   : > { %1146 = vmatpush2.bf16.msra.mxu0 %v2801_v16  ;;  %2759 = vmatpush2.bf16.msra.mxu1 %v2801_v16  ;;  %v2891_v16 = vld [vmem:[%s3031_s7 + $0x158] ss:$12 sps:$4 sm:$0xff]  }
  0x43   : > { %1147 = vmatprep.subr.bf16.mxu0 %v2958_v1  ;;  %2744 = vmatprep.subr.bf16.mxu1 %v2958_v1 }
  0x46   : > { %1148 = vmatpush2.bf16.msra.mxu0 %v2802_v17  ;;  %2760 = vmatpush2.bf16.msra.mxu1 %v2802_v17  ;;  %v2892_v17 = vld [vmem:[%s3031_s7 + $0x168] ss:$12 sps:$4 sm:$0xff]  }
  0x47   : > { %1149 = vmatprep.subr.bf16.mxu0 %v2958_v1  ;;  %2745 = vmatprep.subr.bf16.mxu1 %v2958_v1  ;;  %v2872_v1 = vld [vmem:[%s3031_s7 + $0x108] ss:$12 sps:$4 sm:$0xff]  }
  0x4a   : > { %1150 = vmatpush2.bf16.msra.mxu0 %v2803_v18  ;;  %2761 = vmatpush2.bf16.msra.mxu1 %v2803_v18  ;;  %v2893_v18 = vld [vmem:[%s3031_s7 + $0x170] ss:$12 sps:$4 sm:$0xff]  }
  0x4b   : > { %2662 = vmatprep.subr.bf16.mxu1 %v2810_v19 }
  0x4d   : > { %1152 = vmatmul.mubr.bf16.vlgmr.msra.gmra.mxu0 %v2804_v20  ;;  %1344 = vmatmul.mubr.bf16.vlgmr.msra.gmra.mxu1 %v2807_v21  ;;  %v2896_v20 = vld [vmem:[%s3031_s7 + $0x188] ss:$12 sps:$4 sm:$0xff]   ;;  %v2897_v21 = vld [vmem:[%s3031_s7 + $0x180] ss:$12 sps:$4 sm:$0xff]  }
  0x4e   : > { %2663 = vmatpush3.bf16.msra.mxu1 %v2810_v19  ;;  %1159 = vmatprep.mubr.bf16.mxu0 %v2811_v22  ;;  %v2894_v19 = vld [vmem:[%s3031_s7 + $0x184] ss:$12 sps:$4 sm:$0xff]   ;;  %v2898_v22 = vld [vmem:[%s3031_s7 + $0x1a0] ss:$12 sps:$4 sm:$0xff]  }
  0x4f   : > { %1351 = vmatprep.mubr.bf16.mxu1 %v2813_v23  ;;  %2664 = vmatprep.subr.bf16.mxu1 %v2835_v24  ;;  %v2899_v23 = vld [vmem:[%s3031_s7 + $0x19c] ss:$12 sps:$4 sm:$0xff]  }
  0x52   : > { %2665 = vmatpush3.bf16.msra.mxu1 %v2835_v24  ;;  %v2901_v24 = vld [vmem:[%s3031_s7 + $0x1b8] ss:$12 sps:$4 sm:$0xff]  }
  0x55   : > { %1160 = vmatmul.mubr.bf16.gmra.mxu0 %v2815_v25  ;;  %1352 = vmatmul.mubr.bf16.gmra.mxu1 %v2816_v26  ;;  %v2902_v25 = vld [vmem:[%s3031_s7 + $0x198] ss:$12 sps:$4 sm:$0xff]   ;;  %v2903_v26 = vld [vmem:[%s3031_s7 + $0x1d0] ss:$12 sps:$4 sm:$0xff]  }
  0x56   : > { %1167 = vmatprep.mubr.bf16.mxu0 %v2817_v27  ;;  %1359 = vmatprep.mubr.bf16.mxu1 %v2819_v28  ;;  %v2904_v27 = vld [vmem:[%s3031_s7 + $0x1b4] ss:$12 sps:$4 sm:$0xff]  }
  0x57   : > { %v2906_v28 = vld [vmem:[%s3031_s7 + $0x1e8] ss:$12 sps:$4 sm:$0xff]  }
  0x5d   : > { %1168 = vmatmul.mubr.bf16.gmra.mxu0 %v2821_v29  ;;  %1360 = vmatmul.mubr.bf16.gmra.mxu1 %v2822_v30  ;;  %v2907_v29 = vld [vmem:[%s3031_s7 + $0x1b0] ss:$12 sps:$4 sm:$0xff]   ;;  %v2908_v30 = vld [vmem:[%s3031_s7 + $0x200] ss:$12 sps:$4 sm:$0xff]  }
  0x5e   : > { %1175 = vmatprep.mubr.bf16.mxu0 %v2823_v31  ;;  %1367 = vmatprep.mubr.bf16.mxu1 %v2825_v32  ;;  %v2909_v31 = vld [vmem:[%s3031_s7 + $0x1cc] ss:$12 sps:$4 sm:$0xff]  }
  0x5f   : > { %v2911_v32 = vld [vmem:[%s3031_s7 + $0x218] ss:$12 sps:$4 sm:$0xff]  }
  0x65   : > { %1176 = vmatmul.mubr.bf16.gmra.mxu0 %v2827_v33  ;;  %1368 = vmatmul.mubr.bf16.gmra.mxu1 %v2828_v34  ;;  %v2912_v33 = vld [vmem:[%s3031_s7 + $0x1c8] ss:$12 sps:$4 sm:$0xff]   ;;  %v2913_v34 = vld [vmem:[%s3031_s7 + $0x230] ss:$12 sps:$4 sm:$0xff]  }
  0x66   : > { %1183 = vmatprep.mubr.bf16.mxu0 %v2829_v35  ;;  %1375 = vmatprep.mubr.bf16.mxu1 %v2831_v36  ;;  %v2914_v35 = vld [vmem:[%s3031_s7 + $0x1e4] ss:$12 sps:$4 sm:$0xff]   ;;  %v2916_v36 = vld [vmem:[%s3031_s7 + $0x248] ss:$12 sps:$4 sm:$0xff]  }
  0x6d   : > { %1184 = vmatmul.mubr.bf16.gmra.mxu0 %v2833_v37  ;;  %1376 = vmatmul.mubr.bf16.gmra.mxu1 %v2834_v38  ;;  %v2917_v37 = vld [vmem:[%s3031_s7 + $0x1e0] ss:$12 sps:$4 sm:$0xff]  }
  0x6e   : > { %1191 = vmatprep.mubr.bf16.mxu0 %v2836_v39  ;;  %1383 = vmatprep.mubr.bf16.mxu1 %v2838_v40  ;;  %v2918_v38 = vld [vmem:[%s3031_s7 + $0x260] ss:$12 sps:$4 sm:$0xff]   ;;  %v2919_v39 = vld [vmem:[%s3031_s7 + $0x1fc] ss:$12 sps:$4 sm:$0xff]   ;;  %v2921_v40 = vld [vmem:[%s3031_s7 + $0x278] ss:$12 sps:$4 sm:$0xff]  }
  0x75   : > { %1192 = vmatmul.mubr.bf16.gmra.mxu0 %v2840_v41  ;;  %1384 = vmatmul.mubr.bf16.gmra.mxu1 %v2841_v42  ;;  %v2922_v41 = vld [vmem:[%s3031_s7 + $0x1f8] ss:$12 sps:$4 sm:$0xff]   ;;  %v2923_v42 = vld [vmem:[%s3031_s7 + $0x290] ss:$12 sps:$4 sm:$0xff]  }
  0x76   : > { %1199 = vmatprep.mubr.bf16.mxu0 %v2842_v43  ;;  %1391 = vmatprep.mubr.bf16.mxu1 %v2844_v44  ;;  %v2924_v43 = vld [vmem:[%s3031_s7 + $0x214] ss:$12 sps:$4 sm:$0xff]  }
  0x77   : > { %v2926_v44 = vld [vmem:[%s3031_s7 + $0x2a8] ss:$12 sps:$4 sm:$0xff]  }
  0x7d   : > { %1200 = vmatmul.mubr.bf16.gmra.mxu0 %v2846_v45  ;;  %1392 = vmatmul.mubr.bf16.gmra.mxu1 %v2847_v46  ;;  %v2927_v45 = vld [vmem:[%s3031_s7 + $0x210] ss:$12 sps:$4 sm:$0xff]   ;;  %v2928_v46 = vld [vmem:[%s3031_s7 + $0x2c0] ss:$12 sps:$4 sm:$0xff]  }
  0x7e   : > { %1207 = vmatprep.mubr.bf16.mxu0 %v2848_v47  ;;  %1399 = vmatprep.mubr.bf16.mxu1 %v2850_v48  ;;  %v2929_v47 = vld [vmem:[%s3031_s7 + $0x22c] ss:$12 sps:$4 sm:$0xff]  }
  0x7f   : > { %v2931_v48 = vld [vmem:[%s3031_s7 + $0x2d8] ss:$12 sps:$4 sm:$0xff]  }
  0x85   : > { %1208 = vmatmul.mubr.bf16.gmra.mxu0 %v2852_v49  ;;  %1400 = vmatmul.mubr.bf16.gmra.mxu1 %v2853_v50  ;;  %v2932_v49 = vld [vmem:[%s3031_s7 + $0x228] ss:$12 sps:$4 sm:$0xff]   ;;  %v2933_v50 = vld [vmem:[%s3031_s7 + $0x2f0] ss:$12 sps:$4 sm:$0xff]  }
  0x86   : > { %1215 = vmatprep.mubr.bf16.mxu0 %v2854_v51  ;;  %2666 = vmatprep.mubr.msk.bf16.mxu1 %vm1022_vm0, %v2856_v52 }
  0x8d   : > { %1216 = vmatmul.mubr.bf16.gmra.mxu0 %v2857_v53  ;;  %2667 = vmatmul.mubr.msk.bf16.vlgmr.msra.gmra.mxu1 %vm1022_vm0, %v2858_v54 }
  0x8e   : > { %1223 = vmatprep.mubr.bf16.mxu0 %v2859_v55  ;;  %2670 = vmatprep.mubr.msk.bf16.mxu1 %vm1022_vm0, %v2861_v56 }
  0x95   : > { %1224 = vmatmul.mubr.bf16.gmra.mxu0 %v2862_v57  ;;  %2671 = vmatmul.mubr.msk.bf16.gmra.mxu1 %vm1022_vm0, %v2863_v58 }
  0x96   : > { %1231 = vmatprep.mubr.bf16.mxu0 %v2864_v59  ;;  %2674 = vmatprep.mubr.msk.bf16.mxu1 %vm1022_vm0, %v2866_v60 }
  0x9d   : > { %1232 = vmatmul.mubr.bf16.gmra.mxu0 %v2867_v61  ;;  %2675 = vmatmul.mubr.msk.bf16.gmra.mxu1 %vm1022_vm0, %v2868_v62 }
  0x9e   : > { %1239 = vmatprep.mubr.bf16.mxu0 %v2869_v63  ;;  %2678 = vmatprep.mubr.msk.bf16.mxu1 %vm1022_vm0, %v2871_v0 }
  0xa5   : > { %1240 = vmatmul.mubr.bf16.gmra.mxu0 %v2872_v1  ;;  %2679 = vmatmul.mubr.msk.bf16.gmra.mxu1 %vm1022_vm0, %v2873_v2 }
  0xa6   : > { %1247 = vmatprep.mubr.bf16.mxu0 %v2874_v3  ;;  %2682 = vmatprep.mubr.msk.bf16.mxu1 %vm1022_vm0, %v2876_v4 }
  0xad   : > { %1248 = vmatmul.mubr.bf16.gmra.mxu0 %v2877_v5  ;;  %2683 = vmatmul.mubr.msk.bf16.gmra.mxu1 %vm1022_vm0, %v2878_v6 }
  0xae   : > { %1255 = vmatprep.mubr.bf16.mxu0 %v2879_v7  ;;  %2686 = vmatprep.mubr.msk.bf16.mxu1 %vm1022_vm0, %v2881_v8 }
  0xb5   : > { %1256 = vmatmul.mubr.bf16.gmra.mxu0 %v2882_v9  ;;  %2687 = vmatmul.mubr.msk.bf16.gmra.mxu1 %vm1022_vm0, %v2883_v10 }
  0xb6   : > { %1263 = vmatprep.mubr.bf16.mxu0 %v2884_v11  ;;  %2690 = vmatprep.mubr.msk.bf16.mxu1 %vm1022_vm0, %v2886_v12 }
  0xbd   : > { %1264 = vmatmul.mubr.bf16.gmra.mxu0 %v2887_v13  ;;  %2691 = vmatmul.mubr.msk.bf16.gmra.mxu1 %vm1022_vm0, %v2888_v14 }
  0xbe   : > { %1271 = vmatprep.mubr.bf16.mxu0 %v2889_v15  ;;  %2694 = vmatprep.mubr.msk.bf16.mxu1 %vm1022_vm0, %v2891_v16 }
  0xc5   : > { %1272 = vmatmul.mubr.bf16.gmra.mxu0 %v2892_v17  ;;  %2695 = vmatmul.mubr.msk.bf16.gmra.mxu1 %vm1022_vm0, %v2893_v18 }
  0xc6   : > { %1279 = vmatprep.mubr.bf16.mxu0 %v2894_v19  ;;  %2698 = vmatprep.mubr.msk.bf16.mxu1 %vm1022_vm0, %v2896_v20 }
  0xcd   : > { %1280 = vmatmul.mubr.bf16.gmra.mxu0 %v2897_v21  ;;  %2699 = vmatmul.mubr.msk.bf16.gmra.mxu1 %vm1022_vm0, %v2898_v22 }
  0xce   : > { %1287 = vmatprep.mubr.bf16.mxu0 %v2899_v23  ;;  %2702 = vmatprep.mubr.msk.bf16.mxu1 %vm1022_vm0, %v2901_v24 }
  0xd5   : > { %1288 = vmatmul.mubr.bf16.gmra.mxu0 %v2902_v25  ;;  %2703 = vmatmul.mubr.msk.bf16.gmra.mxu1 %vm1022_vm0, %v2903_v26 }
  0xd6   : > { %1295 = vmatprep.mubr.bf16.mxu0 %v2904_v27  ;;  %2706 = vmatprep.mubr.msk.bf16.mxu1 %vm1022_vm0, %v2906_v28 }
  0xdd   : > { %1296 = vmatmul.mubr.bf16.gmra.mxu0 %v2907_v29  ;;  %2707 = vmatmul.mubr.msk.bf16.gmra.mxu1 %vm1022_vm0, %v2908_v30 }
  0xde   : > { %1303 = vmatprep.mubr.bf16.mxu0 %v2909_v31  ;;  %2710 = vmatprep.mubr.msk.bf16.mxu1 %vm1022_vm0, %v2911_v32 }
  0xe5   : > { %1304 = vmatmul.mubr.bf16.gmra.mxu0 %v2912_v33  ;;  %2711 = vmatmul.mubr.msk.bf16.gmra.mxu1 %vm1022_vm0, %v2913_v34 }
  0xe6   : > { %1311 = vmatprep.mubr.bf16.mxu0 %v2914_v35  ;;  %2714 = vmatprep.mubr.msk.bf16.mxu1 %vm1022_vm0, %v2916_v36 }
  0xed   : > { %1312 = vmatmul.mubr.bf16.gmra.mxu0 %v2917_v37  ;;  %2715 = vmatmul.mubr.msk.bf16.gmra.mxu1 %vm1022_vm0, %v2918_v38 }
  0xee   : > { %1319 = vmatprep.mubr.bf16.mxu0 %v2919_v39  ;;  %2718 = vmatprep.mubr.msk.bf16.mxu1 %vm1022_vm0, %v2921_v40 }
  0xf5   : > { %1320 = vmatmul.mubr.bf16.gmra.mxu0 %v2922_v41  ;;  %2719 = vmatmul.mubr.msk.bf16.gmra.mxu1 %vm1022_vm0, %v2923_v42 }
  0xf6   : > { %1327 = vmatprep.mubr.bf16.mxu0 %v2924_v43  ;;  %2722 = vmatprep.mubr.msk.bf16.mxu1 %vm1022_vm0, %v2926_v44 }
  0xfd   : > { %1328 = vmatmul.mubr.bf16.gmra.mxu0 %v2927_v45  ;;  %2723 = vmatmul.mubr.msk.bf16.gmra.mxu1 %vm1022_vm0, %v2928_v46 }
  0xfe   : > { %1335 = vmatprep.mubr.bf16.mxu0 %v2929_v47  ;;  %2726 = vmatprep.mubr.msk.bf16.mxu1 %vm1022_vm0, %v2931_v48 }
 0x105   : > { %1336 = vmatmul.mubr.bf16.gmra.mxu0 %v2932_v49  ;;  %2727 = vmatmul.mubr.msk.bf16.gmra.mxu1 %vm1022_vm0, %v2933_v50 }
 0x10d   : > { %v3224_v51 = vpop.f32.mrf.mxu0  ;;  %v3226_v52 = vpop.f32.mrf.mxu1 }
 0x10f   : > { %v1155_v53 = vpop.f32.mrf.mxu0  ;;  %v1347_v54 = vpop.f32.mrf.mxu1 }
 0x111   : > { %v3228_v55 = vpop.f32.mrf.mxu0  ;;  %v3230_v56 = vpop.f32.mrf.mxu1 }
 0x113   : > { %v1158_v57 = vpop.f32.mrf.mxu0  ;;  %v1350_v58 = vpop.f32.mrf.mxu1 }
 0x114   : > { %v3291_v57 = vld [vmem:[%s3648_s2] ss:$0 sm:$0xff] }
 0x115   : > { %v1161_v59 = vpop.f32.mrf.mxu0  ;;  %v3232_v60 = vpop.f32.mrf.mxu1 }
 0x117   : > { %v1163_v61 = vpop.f32.mrf.mxu0  ;;  %v1355_v62 = vpop.f32.mrf.mxu1 }
 0x118   : > { %v3296_v61 = vld [vmem:[%s3649_s3] ss:$0 sm:$0xff] }
 0x119   : > { %v3234_v63 = vpop.f32.mrf.mxu0  ;;  %v3236_v0 = vpop.f32.mrf.mxu1 }
 0x11b   : > { %v1166_v1 = vpop.f32.mrf.mxu0  ;;  %v1358_v2 = vpop.f32.mrf.mxu1 }
 0x11d   : > { %v3238_v3 = vpop.f32.mrf.mxu0  ;;  %v3240_v4 = vpop.f32.mrf.mxu1 }
 0x11f   : > { %v1171_v5 = vpop.f32.mrf.mxu0  ;;  %v1363_v6 = vpop.f32.mrf.mxu1 }
 0x121   : > { %v3242_v7 = vpop.f32.mrf.mxu0  ;;  %v3244_v8 = vpop.f32.mrf.mxu1 }
 0x123   : > { %v1174_v9 = vpop.f32.mrf.mxu0  ;;  %v1366_v10 = vpop.f32.mrf.mxu1 }
 0x125   : > { %v3246_v11 = vpop.f32.mrf.mxu0  ;;  %v3248_v12 = vpop.f32.mrf.mxu1 }
 0x127   : > { %v1179_v13 = vpop.f32.mrf.mxu0  ;;  %v1371_v14 = vpop.f32.mrf.mxu1 }
 0x129   : > { %v3250_v15 = vpop.f32.mrf.mxu0  ;;  %v3252_v16 = vpop.f32.mrf.mxu1 }
 0x12b   : > { %v1182_v17 = vpop.f32.mrf.mxu0  ;;  %v1374_v18 = vpop.f32.mrf.mxu1 }
 0x12d   : > { %v3254_v19 = vpop.f32.mrf.mxu0  ;;  %v3256_v20 = vpop.f32.mrf.mxu1 }
 0x12f   : > { %v1187_v21 = vpop.f32.mrf.mxu0  ;;  %v1379_v22 = vpop.f32.mrf.mxu1 }
 0x131   : > { %v3258_v23 = vpop.f32.mrf.mxu0  ;;  %v3260_v24 = vpop.f32.mrf.mxu1 }
 0x133   : > { %v1190_v25 = vpop.f32.mrf.mxu0  ;;  %v1382_v26 = vpop.f32.mrf.mxu1 }
 0x135   : > { %v3262_v27 = vpop.f32.mrf.mxu0  ;;  %v3264_v28 = vpop.f32.mrf.mxu1 }
 0x137   : > { %v1195_v29 = vpop.f32.mrf.mxu0  ;;  %v1387_v30 = vpop.f32.mrf.mxu1 }
 0x139   : > { %v3266_v31 = vpop.f32.mrf.mxu0  ;;  %v3268_v32 = vpop.f32.mrf.mxu1 }
 0x13b   : > { %v1198_v33 = vpop.f32.mrf.mxu0  ;;  %v1390_v34 = vpop.f32.mrf.mxu1 }
 0x13d   : > { %v3270_v35 = vpop.f32.mrf.mxu0  ;;  %v3272_v36 = vpop.f32.mrf.mxu1 }
 0x13f   : > { %v1203_v37 = vpop.f32.mrf.mxu0  ;;  %v1395_v38 = vpop.f32.mrf.mxu1 }
 0x141   : > { %v3274_v39 = vpop.f32.mrf.mxu0  ;;  %v3276_v40 = vpop.f32.mrf.mxu1 }
 0x143   : > { %v1206_v41 = vpop.f32.mrf.mxu0  ;;  %v1398_v42 = vpop.f32.mrf.mxu1 }
 0x145   : > { %v3278_v43 = vpop.f32.mrf.mxu0  ;;  %v3280_v44 = vpop.f32.mrf.mxu1 }
 0x147   : > { %v1211_v45 = vpop.f32.mrf.mxu0  ;;  %v1403_v46 = vpop.f32.mrf.mxu1 }
 0x149   : > { %v3282_v47 = vpop.f32.mrf.mxu0  ;;  %v3284_v48 = vpop.f32.mrf.mxu1 }
 0x14b   : > { %v1214_v49 = vpop.f32.mrf.mxu0  ;;  %v1406_v50 = vpop.f32.mrf.mxu1 }
 0x14d   : > { %v3286_v53 = vpop.f32.mrf.mxu0  ;;  %v2668_v54 = vpop.f32.mrf.mxu1 }
 0x14e   : > { %v1451_v58 = vadd.f32 %v2668_v54, %v1161_v59 }
 0x14f   : > { %v1219_v62 = vpop.f32.mrf.mxu0  ;;  %v1442_v1 = vpop.f32.mrf.mxu1 }
 0x150   : > { %v1706_v2 = vmul.f32 %v3291_v57, %v1451_v58  ;;  %v1443_v5 = vadd.f32 %v1442_v1, %v3224_v51 }
 0x151   : > { %v3300_v6 = vpop.f32.mrf.mxu0  ;;  %v2669_v9 = vpop.f32.mrf.mxu1 }
 0x152   : > { %v1777_v10 = vadd.f32 %v3296_v61, %v1706_v2  ;;  %v1704_v13 = vmul.f32 %v3291_v57, %v1443_v5  ;;  %v1454_v59 = vadd.f32 %v2669_v9, %v3234_v63 }
 0x153   : > { %v1222_v14 = vpop.f32.mrf.mxu0  ;;  %v1445_v17 = vpop.f32.mrf.mxu1 }
 0x154   : > { %v1841_v18 = vmax.f32 %v1777_v10, 0.0  ;;  %v1775_v21 = vadd.f32 %v3296_v61, %v1704_v13  ;;  %v1707_v22 = vmul.f32 %v3291_v57, %v1454_v59  ;;  %v1446_v25 = vadd.f32 %v1445_v17, %v3228_v55 }
 0x155   : > { %v3314_v51 = vpop.f32.mrf.mxu0  ;;  %v2672_v26 = vpop.f32.mrf.mxu1 }
 0x156   : > { %v2566_v63 = vpack.c.bf16 %v1841_v18, %v1841_v18  ;;  %v1839_v29 = vmax.f32 %v1775_v21, 0.0  ;;  %v1778_v30 = vadd.f32 %v3296_v61, %v1707_v22  ;;  %v1705_v33 = vmul.f32 %v3291_v57, %v1446_v25 }
 0x157   : > { %v1467_v34 = vadd.f32 %v2672_v26, %v3246_v11  ;;  %v1227_v55 = vpop.f32.mrf.mxu0  ;;  %v1458_v37 = vpop.f32.mrf.mxu1 }
 0x158   : > { %2162 = vst.msk [vmem:[%s3312_s23 + $0x8] sm:$0xf] %vm2159_vm1, %v2566_v63  ;;  %v2564_v38 = vpack.c.bf16 %v1839_v29, %v1839_v29  ;;  %v1842_v41 = vmax.f32 %v1778_v30, 0.0  ;;  %v1776_v42 = vadd.f32 %v3296_v61, %v1705_v33  ;;  %v1459_v45 = vadd.f32 %v1458_v37, %v3238_v3 }
 0x159   : > { %v1710_v46 = vmul.f32 %v3291_v57, %v1467_v34  ;;  %v3324_v49 = vpop.f32.mrf.mxu0  ;;  %v2673_v50 = vpop.f32.mrf.mxu1 }
 0x15a   : > { %2160 = vst.msk [vmem:[%s3312_s23] sm:$0xf] %vm2159_vm1, %v2564_v38  ;;  %v2567_v11 = vpack.c.bf16 %v1842_v41, %v1842_v41  ;;  %v1840_v54 = vmax.f32 %v1776_v42, 0.0  ;;  %v1708_v58 = vmul.f32 %v3291_v57, %v1459_v45  ;;  %v1470_v62 = vadd.f32 %v2673_v50, %v3250_v15 }
 0x15b   : > { %v1781_v1 = vadd.f32 %v3296_v61, %v1710_v46  ;;  %v1230_v2 = vpop.f32.mrf.mxu0  ;;  %v1461_v5 = vpop.f32.mrf.mxu1 }
 0x15c   : > { %2163 = vst.msk [vmem:[%s3312_s23 + $0xc] sm:$0xf] %vm2159_vm1, %v2567_v11  ;;  %v2565_v3 = vpack.c.bf16 %v1840_v54, %v1840_v54  ;;  %v1779_v9 = vadd.f32 %v3296_v61, %v1708_v58  ;;  %v1711_v10 = vmul.f32 %v3291_v57, %v1470_v62  ;;  %v1462_v13 = vadd.f32 %v1461_v5, %v3242_v7 }
 0x15d   : > { %v1845_v59 = vmax.f32 %v1781_v1, 0.0  ;;  %v3336_v14 = vpop.f32.mrf.mxu0  ;;  %v2676_v17 = vpop.f32.mrf.mxu1 }
 0x15e   : > { %2161 = vst.msk [vmem:[%s3312_s23 + $0x4] sm:$0xf] %vm2159_vm1, %v2565_v3  ;;  %v1843_v15 = vmax.f32 %v1779_v9, 0.0  ;;  %v1782_v18 = vadd.f32 %v3296_v61, %v1711_v10  ;;  %v1709_v21 = vmul.f32 %v3291_v57, %v1462_v13  ;;  %v1483_v22 = vadd.f32 %v2676_v17, %v3262_v27 }
 0x15f   : > { %v2570_v25 = vpack.c.bf16 %v1845_v59, %v1845_v59  ;;  %v1235_v26 = vpop.f32.mrf.mxu0  ;;  %v1474_v63 = vpop.f32.mrf.mxu1 }
 0x160   : > { %v2568_v29 = vpack.c.bf16 %v1843_v15, %v1843_v15  ;;  %v1846_v7 = vmax.f32 %v1782_v18, 0.0  ;;  %v1780_v30 = vadd.f32 %v3296_v61, %v1709_v21  ;;  %v1714_v33 = vmul.f32 %v3291_v57, %v1483_v22 }
 0x161   : > { %2166 = vst.msk [vmem:[%s3312_s23 + $0x18] sm:$0xf] %vm2159_vm1, %v2570_v25  ;;  %v1475_v34 = vadd.f32 %v1474_v63, %v3254_v19  ;;  %v3348_v55 = vpop.f32.mrf.mxu0  ;;  %v2677_v37 = vpop.f32.mrf.mxu1 }
 0x162   : > { %2164 = vst.msk [vmem:[%s3312_s23 + $0x10] sm:$0xf] %vm2159_vm1, %v2568_v29  ;;  %v2571_v27 = vpack.c.bf16 %v1846_v7, %v1846_v7  ;;  %v1844_v38 = vmax.f32 %v1780_v30, 0.0  ;;  %v1785_v41 = vadd.f32 %v3296_v61, %v1714_v33  ;;  %v1486_v42 = vadd.f32 %v2677_v37, %v3266_v31 }
 0x163   : > { %v1712_v45 = vmul.f32 %v3291_v57, %v1475_v34  ;;  %v1238_v46 = vpop.f32.mrf.mxu0  ;;  %v1477_v50 = vpop.f32.mrf.mxu1 }
 0x164   : > { %2167 = vst.msk [vmem:[%s3312_s23 + $0x1c] sm:$0xf] %vm2159_vm1, %v2571_v27  ;;  %v2569_v19 = vpack.c.bf16 %v1844_v38, %v1844_v38  ;;  %v1849_v11 = vmax.f32 %v1785_v41, 0.0  ;;  %v1715_v54 = vmul.f32 %v3291_v57, %v1486_v42  ;;  %v1478_v58 = vadd.f32 %v1477_v50, %v3258_v23 }
 0x165   : > { %v1783_v62 = vadd.f32 %v3296_v61, %v1712_v45  ;;  %v3360_v1 = vpop.f32.mrf.mxu0  ;;  %v2680_v2 = vpop.f32.mrf.mxu1 }
 0x166   : > { %2165 = vst.msk [vmem:[%s3312_s23 + $0x14] sm:$0xf] %vm2159_vm1, %v2569_v19  ;;  %v2574_v31 = vpack.c.bf16 %v1849_v11, %v1849_v11  ;;  %v1786_v5 = vadd.f32 %v3296_v61, %v1715_v54  ;;  %v1713_v3 = vmul.f32 %v3291_v57, %v1478_v58  ;;  %v1499_v9 = vadd.f32 %v2680_v2, %v3278_v43 }
 0x167   : > { %v1847_v10 = vmax.f32 %v1783_v62, 0.0  ;;  %v1243_v13 = vpop.f32.mrf.mxu0  ;;  %v1490_v59 = vpop.f32.mrf.mxu1 }
 0x168   : > { %2170 = vst.msk [vmem:[%s3312_s23 + $0x28] sm:$0xf] %vm2159_vm1, %v2574_v31  ;;  %v1850_v23 = vmax.f32 %v1786_v5, 0.0  ;;  %v1784_v17 = vadd.f32 %v3296_v61, %v1713_v3  ;;  %v1718_v15 = vmul.f32 %v3291_v57, %v1499_v9  ;;  %v1491_v18 = vadd.f32 %v1490_v59, %v3270_v35 }
 0x169   : > { %v2572_v21 = vpack.c.bf16 %v1847_v10, %v1847_v10  ;;  %v3372_v22 = vpop.f32.mrf.mxu0  ;;  %v2681_v25 = vpop.f32.mrf.mxu1 }
 0x16a   : > { %v2575_v26 = vpack.c.bf16 %v1850_v23, %v1850_v23  ;;  %v1848_v43 = vmax.f32 %v1784_v17, 0.0  ;;  %v1789_v63 = vadd.f32 %v3296_v61, %v1718_v15  ;;  %v1716_v29 = vmul.f32 %v3291_v57, %v1491_v18 }
 0x16b   : > { %2168 = vst.msk [vmem:[%s3312_s23 + $0x20] sm:$0xf] %vm2159_vm1, %v2572_v21  ;;  %v1502_v7 = vadd.f32 %v2681_v25, %v3282_v47  ;;  %v1246_v30 = vpop.f32.mrf.mxu0  ;;  %v1493_v33 = vpop.f32.mrf.mxu1 }
 0x16c   : > { %2171 = vst.msk [vmem:[%s3312_s23 + $0x2c] sm:$0xf] %vm2159_vm1, %v2575_v26  ;;  %v2573_v35 = vpack.c.bf16 %v1848_v43, %v1848_v43  ;;  %v1853_v34 = vmax.f32 %v1789_v63, 0.0  ;;  %v1787_v37 = vadd.f32 %v3296_v61, %v1716_v29  ;;  %v1494_v27 = vadd.f32 %v1493_v33, %v3274_v39 }
 0x16d   : > { %v1719_v38 = vmul.f32 %v3291_v57, %v1502_v7  ;;  %v3384_v41 = vpop.f32.mrf.mxu0  ;;  %v2684_v42 = vpop.f32.mrf.mxu1 }
 0x16e   : > { %2169 = vst.msk [vmem:[%s3312_s23 + $0x24] sm:$0xf] %vm2159_vm1, %v2573_v35  ;;  %v2578_v47 = vpack.c.bf16 %v1853_v34, %v1853_v34  ;;  %v1851_v45 = vmax.f32 %v1787_v37, 0.0  ;;  %v1717_v46 = vmul.f32 %v3291_v57, %v1494_v27  ;;  %v1515_v50 = vadd.f32 %v2684_v42, %v3314_v51 }
 0x16f   : > { %v1790_v19 = vadd.f32 %v3296_v61, %v1719_v38  ;;  %v1251_v11 = vpop.f32.mrf.mxu0  ;;  %v1506_v54 = vpop.f32.mrf.mxu1 }
 0x170   : > { %2174 = vst.msk [vmem:[%s3312_s23 + $0x38] sm:$0xf] %vm2159_vm1, %v2578_v47  ;;  %v2576_v39 = vpack.c.bf16 %v1851_v45, %v1851_v45  ;;  %v1788_v58 = vadd.f32 %v3296_v61, %v1717_v46  ;;  %v1722_v62 = vmul.f32 %v3291_v57, %v1515_v50  ;;  %v1507_v2 = vadd.f32 %v1506_v54, %v3286_v53 }
 0x171   : > { %v1854_v31 = vmax.f32 %v1790_v19, 0.0  ;;  %v3396_v5 = vpop.f32.mrf.mxu0  ;;  %v2685_v3 = vpop.f32.mrf.mxu1 }
 0x172   : > { %2172 = vst.msk [vmem:[%s3312_s23 + $0x30] sm:$0xf] %vm2159_vm1, %v2576_v39  ;;  %v1852_v51 = vmax.f32 %v1788_v58, 0.0  ;;  %v1793_v9 = vadd.f32 %v3296_v61, %v1722_v62  ;;  %v1720_v10 = vmul.f32 %v3291_v57, %v1507_v2  ;;  %v1518_v13 = vadd.f32 %v2685_v3, %v3324_v49 }
 0x173   : > { %v2579_v59 = vpack.c.bf16 %v1854_v31, %v1854_v31  ;;  %v1254_v23 = vpop.f32.mrf.mxu0  ;;  %v1509_v17 = vpop.f32.mrf.mxu1 }
 0x174   : > { %v2577_v15 = vpack.c.bf16 %v1852_v51, %v1852_v51  ;;  %v1857_v53 = vmax.f32 %v1793_v9, 0.0  ;;  %v1791_v18 = vadd.f32 %v3296_v61, %v1720_v10  ;;  %v1723_v21 = vmul.f32 %v3291_v57, %v1518_v13 }
 0x175   : > { %2175 = vst.msk [vmem:[%s3312_s23 + $0x3c] sm:$0xf] %vm2159_vm1, %v2579_v59  ;;  %v1510_v25 = vadd.f32 %v1509_v17, %v3300_v6  ;;  %v1257_v26 = vpop.f32.mrf.mxu0  ;;  %v2688_v43 = vpop.f32.mrf.mxu1 }
 0x176   : > { %2173 = vst.msk [vmem:[%s3312_s23 + $0x34] sm:$0xf] %vm2159_vm1, %v2577_v15  ;;  %v2582_v49 = vpack.c.bf16 %v1857_v53, %v1857_v53  ;;  %v1855_v63 = vmax.f32 %v1791_v18, 0.0  ;;  %v1794_v29 = vadd.f32 %v3296_v61, %v1723_v21  ;;  %v1531_v7 = vadd.f32 %v2688_v43, %v3360_v1 }
 0x177   : > { %v1721_v30 = vmul.f32 %v3291_v57, %v1510_v25  ;;  %v1259_v33 = vpop.f32.mrf.mxu0  ;;  %v1522_v35 = vpop.f32.mrf.mxu1 }
 0x178   : > { %2178 = vst.msk [vmem:[%s3312_s23 + $0x48] sm:$0xf] %vm2159_vm1, %v2582_v49  ;;  %v2580_v34 = vpack.c.bf16 %v1855_v63, %v1855_v63  ;;  %v1858_v6 = vmax.f32 %v1794_v29, 0.0  ;;  %v1726_v37 = vmul.f32 %v3291_v57, %v1531_v7  ;;  %v1523_v27 = vadd.f32 %v1522_v35, %v3336_v14 }
 0x179   : > { %v1792_v38 = vadd.f32 %v3296_v61, %v1721_v30  ;;  %v1260_v42 = vpop.f32.mrf.mxu0  ;;  %v2689_v47 = vpop.f32.mrf.mxu1 }
 0x17a   : > { %2176 = vst.msk [vmem:[%s3312_s23 + $0x40] sm:$0xf] %vm2159_vm1, %v2580_v34  ;;  %v2583_v1 = vpack.c.bf16 %v1858_v6, %v1858_v6  ;;  %v1797_v45 = vadd.f32 %v3296_v61, %v1726_v37  ;;  %v1724_v46 = vmul.f32 %v3291_v57, %v1523_v27  ;;  %v1534_v50 = vadd.f32 %v2689_v47, %v3372_v22 }
 0x17b   : > { %v1856_v19 = vmax.f32 %v1792_v38, 0.0  ;;  %v1262_v11 = vpop.f32.mrf.mxu0  ;;  %v1525_v54 = vpop.f32.mrf.mxu1 }
 0x17c   : > { %2179 = vst.msk [vmem:[%s3312_s23 + $0x4c] sm:$0xf] %vm2159_vm1, %v2583_v1  ;;  %v1861_v14 = vmax.f32 %v1797_v45, 0.0  ;;  %v1795_v39 = vadd.f32 %v3296_v61, %v1724_v46  ;;  %v1727_v58 = vmul.f32 %v3291_v57, %v1534_v50  ;;  %v1526_v62 = vadd.f32 %v1525_v54, %v3348_v55 }
 0x17d   : > { %v2581_v2 = vpack.c.bf16 %v1856_v19, %v1856_v19  ;;  %v1265_v31 = vpop.f32.mrf.mxu0  ;;  %v2692_v3 = vpop.f32.mrf.mxu1 }
 0x17e   : > { %v2586_v51 = vpack.c.bf16 %v1861_v14, %v1861_v14  ;;  %v1859_v22 = vmax.f32 %v1795_v39, 0.0  ;;  %v1798_v9 = vadd.f32 %v3296_v61, %v1727_v58  ;;  %v1725_v10 = vmul.f32 %v3291_v57, %v1526_v62 }
 0x17f   : > { %2177 = vst.msk [vmem:[%s3312_s23 + $0x44] sm:$0xf] %vm2159_vm1, %v2581_v2  ;;  %v1547_v13 = vadd.f32 %v2692_v3, %v1257_v26  ;;  %v1267_v59 = vpop.f32.mrf.mxu0  ;;  %v1538_v23 = vpop.f32.mrf.mxu1 }
 0x180   : > { %2182 = vst.msk [vmem:[%s3312_s23 + $0x58] sm:$0xf] %vm2159_vm1, %v2586_v51  ;;  %v2584_v17 = vpack.c.bf16 %v1859_v22, %v1859_v22  ;;  %v1862_v55 = vmax.f32 %v1798_v9, 0.0  ;;  %v1796_v15 = vadd.f32 %v3296_v61, %v1725_v10  ;;  %v1539_v53 = vadd.f32 %v1538_v23, %v3384_v41 }
 0x181   : > { %v1730_v18 = vmul.f32 %v3291_v57, %v1547_v13  ;;  %v1268_v21 = vpop.f32.mrf.mxu0  ;;  %v2693_v25 = vpop.f32.mrf.mxu1 }
 0x182   : > { %2180 = vst.msk [vmem:[%s3312_s23 + $0x50] sm:$0xf] %vm2159_vm1, %v2584_v17  ;;  %v2587_v43 = vpack.c.bf16 %v1862_v55, %v1862_v55  ;;  %v1860_v26 = vmax.f32 %v1796_v15, 0.0  ;;  %v1728_v49 = vmul.f32 %v3291_v57, %v1539_v53  ;;  %v1550_v63 = vadd.f32 %v2693_v25, %v1260_v42 }
 0x183   : > { %v1801_v29 = vadd.f32 %v3296_v61, %v1730_v18  ;;  %v1270_v7 = vpop.f32.mrf.mxu0  ;;  %v1541_v30 = vpop.f32.mrf.mxu1 }
 0x184   : > { %2183 = vst.msk [vmem:[%s3312_s23 + $0x5c] sm:$0xf] %vm2159_vm1, %v2587_v43  ;;  %v2585_v33 = vpack.c.bf16 %v1860_v26, %v1860_v26  ;;  %v1799_v41 = vadd.f32 %v3296_v61, %v1728_v49  ;;  %v1731_v35 = vmul.f32 %v3291_v57, %v1550_v63  ;;  %v1542_v34 = vadd.f32 %v1541_v30, %v3396_v5 }
 0x185   : > { %v1865_v6 = vmax.f32 %v1801_v29, 0.0  ;;  %v1273_v37 = vpop.f32.mrf.mxu0  ;;  %v2696_v27 = vpop.f32.mrf.mxu1 }
 0x186   : > { %2181 = vst.msk [vmem:[%s3312_s23 + $0x54] sm:$0xf] %vm2159_vm1, %v2585_v33  ;;  %v1863_v38 = vmax.f32 %v1799_v41, 0.0  ;;  %v1802_v42 = vadd.f32 %v3296_v61, %v1731_v35  ;;  %v1729_v47 = vmul.f32 %v3291_v57, %v1542_v34  ;;  %v1563_v1 = vadd.f32 %v2696_v27, %v1273_v37 }
 0x187   : > { %v2590_v45 = vpack.c.bf16 %v1865_v6, %v1865_v6  ;;  %v1275_v46 = vpop.f32.mrf.mxu0  ;;  %v1554_v50 = vpop.f32.mrf.mxu1 }
 0x188   : > { %v2588_v19 = vpack.c.bf16 %v1863_v38, %v1863_v38  ;;  %v1866_v11 = vmax.f32 %v1802_v42, 0.0  ;;  %v1800_v5 = vadd.f32 %v3296_v61, %v1729_v47  ;;  %v1734_v54 = vmul.f32 %v3291_v57, %v1563_v1 }
 0x189   : > { %2186 = vst.msk [vmem:[%s3312_s23 + $0x68] sm:$0xf] %vm2159_vm1, %v2590_v45  ;;  %v1555_v14 = vadd.f32 %v1554_v50, %v1265_v31  ;;  %v1276_v39 = vpop.f32.mrf.mxu0  ;;  %v2697_v58 = vpop.f32.mrf.mxu1 }
 0x18a   : > { %2184 = vst.msk [vmem:[%s3312_s23 + $0x60] sm:$0xf] %vm2159_vm1, %v2588_v19  ;;  %v2591_v62 = vpack.c.bf16 %v1866_v11, %v1866_v11  ;;  %v1864_v2 = vmax.f32 %v1800_v5, 0.0  ;;  %v1805_v3 = vadd.f32 %v3296_v61, %v1734_v54  ;;  %v1566_v51 = vadd.f32 %v2697_v58, %v1276_v39 }
 0x18b   : > { %v1732_v22 = vmul.f32 %v3291_v57, %v1555_v14  ;;  %v1278_v9 = vpop.f32.mrf.mxu0  ;;  %v1557_v10 = vpop.f32.mrf.mxu1 }
 0x18c   : > { %2187 = vst.msk [vmem:[%s3312_s23 + $0x6c] sm:$0xf] %vm2159_vm1, %v2591_v62  ;;  %v2589_v13 = vpack.c.bf16 %v1864_v2, %v1864_v2  ;;  %v1869_v59 = vmax.f32 %v1805_v3, 0.0  ;;  %v1735_v31 = vmul.f32 %v3291_v57, %v1566_v51  ;;  %v1558_v23 = vadd.f32 %v1557_v10, %v1268_v21 }
 0x18d   : > { %v1803_v17 = vadd.f32 %v3296_v61, %v1732_v22  ;;  %v1281_v55 = vpop.f32.mrf.mxu0  ;;  %v2700_v15 = vpop.f32.mrf.mxu1 }
 0x18e   : > { %2185 = vst.msk [vmem:[%s3312_s23 + $0x64] sm:$0xf] %vm2159_vm1, %v2589_v13  ;;  %v2594_v53 = vpack.c.bf16 %v1869_v59, %v1869_v59  ;;  %v1806_v18 = vadd.f32 %v3296_v61, %v1735_v31  ;;  %v1733_v25 = vmul.f32 %v3291_v57, %v1558_v23 }
 0x18f   : > { %v1867_v43 = vmax.f32 %v1803_v17, 0.0  ;;  %v1283_v26 = vpop.f32.mrf.mxu0  ;;  %v1570_v49 = vpop.f32.mrf.mxu1 }
 0x190   : > { %2190 = vst.msk [vmem:[%s3312_s23 + $0x78] sm:$0xf] %vm2159_vm1, %v2594_v53  ;;  %v1870_v63 = vmax.f32 %v1806_v18, 0.0  ;;  %v1804_v21 = vadd.f32 %v3296_v61, %v1733_v25  ;;  %v1571_v29 = vadd.f32 %v1570_v49, %v1281_v55 }
 0x191   : > { %v2592_v7 = vpack.c.bf16 %v1867_v43, %v1867_v43  ;;  %v1284_v30 = vpop.f32.mrf.mxu0  ;;  %v2701_v33 = vpop.f32.mrf.mxu1 }
 0x192   : > { %v2595_v41 = vpack.c.bf16 %v1870_v63, %v1870_v63  ;;  %v1868_v35 = vmax.f32 %v1804_v21, 0.0  ;;  %v1736_v34 = vmul.f32 %v3291_v57, %v1571_v29 }
 0x193   : > { %2188 = vst.msk [vmem:[%s3312_s23 + $0x70] sm:$0xf] %vm2159_vm1, %v2592_v7  ;;  %v1286_v6 = vpop.f32.mrf.mxu0  ;;  %v1573_v37 = vpop.f32.mrf.mxu1 }
 0x194   : > { %2191 = vst.msk [vmem:[%s3312_s23 + $0x7c] sm:$0xf] %vm2159_vm1, %v2595_v41  ;;  %v2593_v27 = vpack.c.bf16 %v1868_v35, %v1868_v35  ;;  %v1807_v38 = vadd.f32 %v3296_v61, %v1736_v34  ;;  %v1574_v42 = vadd.f32 %v1573_v37, %v1284_v30 }
 0x195   : > { %v1289_v47 = vpop.f32.mrf.mxu0  ;;  %v2704_v1 = vpop.f32.mrf.mxu1 }
 0x196   : > { %2189 = vst.msk [vmem:[%s3312_s23 + $0x74] sm:$0xf] %vm2159_vm1, %v2593_v27  ;;  %v1871_v45 = vmax.f32 %v1807_v38, 0.0  ;;  %v1737_v46 = vmul.f32 %v3291_v57, %v1574_v42  ;;  %v1579_v50 = vadd.f32 %v2700_v15, %v1289_v47 }
 0x197   : > { %v1291_v19 = vpop.f32.mrf.mxu0  ;;  %v1586_v11 = vpop.f32.mrf.mxu1 }
 0x198   : > { %v2596_v5 = vpack.c.bf16 %v1871_v45, %v1871_v45  ;;  %v1808_v54 = vadd.f32 %v3296_v61, %v1737_v46  ;;  %v1738_v14 = vmul.f32 %v3291_v57, %v1579_v50 }
 0x199   : > { %v1292_v39 = vpop.f32.mrf.mxu0  ;;  %v2705_v58 = vpop.f32.mrf.mxu1 }
 0x19a   : > { %2192 = vst.msk [vmem:[%s3312_s23 + $0x80] sm:$0xf] %vm2159_vm1, %v2596_v5  ;;  %v1872_v62 = vmax.f32 %v1808_v54, 0.0  ;;  %v1809_v2 = vadd.f32 %v3296_v61, %v1738_v14  ;;  %v1582_v3 = vadd.f32 %v2701_v33, %v1292_v39 }
 0x19b   : > { %v1294_v51 = vpop.f32.mrf.mxu0  ;;  %v1589_v22 = vpop.f32.mrf.mxu1 }
 0x19c   : > { %v2597_v9 = vpack.c.bf16 %v1872_v62, %v1872_v62  ;;  %v1873_v10 = vmax.f32 %v1809_v2, 0.0  ;;  %v1739_v13 = vmul.f32 %v3291_v57, %v1582_v3 }
 0x19d   : > { %v1297_v59 = vpop.f32.mrf.mxu0  ;;  %v3484_v31 = vpop.f32.mrf.mxu1 }
 0x19e   : > { %2193 = vst.msk [vmem:[%s3312_s23 + $0x84] sm:$0xf] %vm2159_vm1, %v2597_v9  ;;  %v2598_v23 = vpack.c.bf16 %v1873_v10, %v1873_v10  ;;  %v1810_v17 = vadd.f32 %v3296_v61, %v1739_v13  ;;  %v1587_v55 = vadd.f32 %v1586_v11, %v1297_v59 }
 0x19f   : > { %v1299_v15 = vpop.f32.mrf.mxu0  ;;  %v1602_v53 = vpop.f32.mrf.mxu1 }
 0x1a0   : > { %2194 = vst.msk [vmem:[%s3312_s23 + $0x88] sm:$0xf] %vm2159_vm1, %v2598_v23  ;;  %v1874_v18 = vmax.f32 %v1810_v17, 0.0  ;;  %v1740_v25 = vmul.f32 %v3291_v57, %v1587_v55 }
 0x1a1   : > { %v1300_v43 = vpop.f32.mrf.mxu0  ;;  %v3492_v26 = vpop.f32.mrf.mxu1 }
 0x1a2   : > { %v2599_v49 = vpack.c.bf16 %v1874_v18, %v1874_v18  ;;  %v1811_v63 = vadd.f32 %v3296_v61, %v1740_v25  ;;  %v1590_v21 = vadd.f32 %v1589_v22, %v1300_v43 }
 0x1a3   : > { %v1302_v29 = vpop.f32.mrf.mxu0  ;;  %v1605_v7 = vpop.f32.mrf.mxu1 }
 0x1a4   : > { %2195 = vst.msk [vmem:[%s3312_s23 + $0x8c] sm:$0xf] %vm2159_vm1, %v2599_v49  ;;  %v1875_v30 = vmax.f32 %v1811_v63, 0.0  ;;  %v1741_v33 = vmul.f32 %v3291_v57, %v1590_v21 }
 0x1a5   : > { %v1305_v41 = vpop.f32.mrf.mxu0  ;;  %v3498_v35 = vpop.f32.mrf.mxu1 }
 0x1a6   : > { %v2600_v34 = vpack.c.bf16 %v1875_v30, %v1875_v30  ;;  %v1812_v6 = vadd.f32 %v3296_v61, %v1741_v33  ;;  %v1595_v37 = vadd.f32 %v2704_v1, %v1305_v41 }
 0x1a7   : > { %v1307_v27 = vpop.f32.mrf.mxu0  ;;  %v3501_v38 = vpop.f32.mrf.mxu1 }
 0x1a8   : > { %2196 = vst.msk [vmem:[%s3312_s23 + $0x90] sm:$0xf] %vm2159_vm1, %v2600_v34  ;;  %v1876_v42 = vmax.f32 %v1812_v6, 0.0  ;;  %v1742_v47 = vmul.f32 %v3291_v57, %v1595_v37 }
 0x1a9   : > { %v1308_v45 = vpop.f32.mrf.mxu0  ;;  %v3506_v46 = vpop.f32.mrf.mxu1 }
 0x1aa   : > { %v2601_v50 = vpack.c.bf16 %v1876_v42, %v1876_v42  ;;  %v1813_v19 = vadd.f32 %v3296_v61, %v1742_v47  ;;  %v1598_v11 = vadd.f32 %v2705_v58, %v1308_v45 }
 0x1ab   : > { %v1310_v5 = vpop.f32.mrf.mxu0  ;;  %v3509_v54 = vpop.f32.mrf.mxu1 }
 0x1ac   : > { %2197 = vst.msk [vmem:[%s3312_s23 + $0x94] sm:$0xf] %vm2159_vm1, %v2601_v50  ;;  %v1877_v1 = vmax.f32 %v1813_v19, 0.0  ;;  %v1743_v14 = vmul.f32 %v3291_v57, %v1598_v11 }
 0x1ad   : > { %v1313_v39 = vpop.f32.mrf.mxu0  ;;  %v2716_v62 = vpop.f32.mrf.mxu1 }
 0x1ae   : > { %v2602_v2 = vpack.c.bf16 %v1877_v1, %v1877_v1  ;;  %v1814_v3 = vadd.f32 %v3296_v61, %v1743_v14  ;;  %v1603_v51 = vadd.f32 %v1602_v53, %v1313_v39  ;;  %v1643_v22 = vadd.f32 %v2716_v62, %v3232_v60 }
 0x1af   : > { %v1315_v9 = vpop.f32.mrf.mxu0  ;;  %v1634_v10 = vpop.f32.mrf.mxu1 }
 0x1b0   : > { %2198 = vst.msk [vmem:[%s3312_s23 + $0x98] sm:$0xf] %vm2159_vm1, %v2602_v2  ;;  %v1878_v58 = vmax.f32 %v1814_v3, 0.0  ;;  %v1744_v13 = vmul.f32 %v3291_v57, %v1603_v51  ;;  %v1754_v59 = vmul.f32 %v3291_v57, %v1643_v22  ;;  %v1635_v23 = vadd.f32 %v1634_v10, %v3226_v52 }
 0x1b1   : > { %v1316_v17 = vpop.f32.mrf.mxu0  ;;  %v2717_v55 = vpop.f32.mrf.mxu1 }
 0x1b2   : > { %v2603_v15 = vpack.c.bf16 %v1878_v58, %v1878_v58  ;;  %v1815_v18 = vadd.f32 %v3296_v61, %v1744_v13  ;;  %v1825_v53 = vadd.f32 %v3296_v61, %v1754_v59  ;;  %v1752_v60 = vmul.f32 %v3291_v57, %v1635_v23 }
 0x1b3   : > { %v1606_v25 = vadd.f32 %v1605_v7, %v1316_v17  ;;  %v1646_v43 = vadd.f32 %v2717_v55, %v3236_v0  ;;  %v1318_v49 = vpop.f32.mrf.mxu0  ;;  %v1637_v63 = vpop.f32.mrf.mxu1 }
 0x1b4   : > { %2199 = vst.msk [vmem:[%s3312_s23 + $0x9c] sm:$0xf] %vm2159_vm1, %v2603_v15  ;;  %v1879_v21 = vmax.f32 %v1815_v18, 0.0  ;;  %v1889_v29 = vmax.f32 %v1825_v53, 0.0  ;;  %v1823_v52 = vadd.f32 %v3296_v61, %v1752_v60  ;;  %v1638_v30 = vadd.f32 %v1637_v63, %v3230_v56 }
 0x1b5   : > { %v1745_v33 = vmul.f32 %v3291_v57, %v1606_v25  ;;  %v1755_v41 = vmul.f32 %v3291_v57, %v1646_v43  ;;  %v1321_v34 = vpop.f32.mrf.mxu0  ;;  %v2720_v7 = vpop.f32.mrf.mxu1 }
 0x1b6   : > { %v2604_v6 = vpack.c.bf16 %v1879_v21, %v1879_v21  ;;  %v2614_v0 = vpack.c.bf16 %v1889_v29, %v1889_v29  ;;  %v1887_v37 = vmax.f32 %v1823_v52, 0.0  ;;  %v1753_v27 = vmul.f32 %v3291_v57, %v1638_v30 }
 0x1b7   : > { %v1816_v42 = vadd.f32 %v3296_v61, %v1745_v33  ;;  %v1826_v47 = vadd.f32 %v3296_v61, %v1755_v41  ;;  %v1611_v45 = vadd.f32 %v3484_v31, %v1321_v34  ;;  %v1659_v56 = vadd.f32 %v2720_v7, %v3248_v12  ;;  %v1323_v50 = vpop.f32.mrf.mxu0  ;;  %v1650_v19 = vpop.f32.mrf.mxu1 }
 0x1b8   : > { %2200 = vst.msk [vmem:[%s3312_s23 + $0xa0] sm:$0xf] %vm2159_vm1, %v2604_v6  ;;  %2210 = vst.msk [vmem:[%s3312_s23 + $0xc8] sm:$0xf] %vm2159_vm1, %v2614_v0  ;;  %v2612_v11 = vpack.c.bf16 %v1887_v37, %v1887_v37  ;;  %v1824_v5 = vadd.f32 %v3296_v61, %v1753_v27  ;;  %v1651_v1 = vadd.f32 %v1650_v19, %v3240_v4 }
 0x1b9   : > { %v1880_v14 = vmax.f32 %v1816_v42, 0.0  ;;  %v1890_v39 = vmax.f32 %v1826_v47, 0.0  ;;  %v1746_v62 = vmul.f32 %v3291_v57, %v1611_v45  ;;  %v1758_v2 = vmul.f32 %v3291_v57, %v1659_v56  ;;  %v1324_v31 = vpop.f32.mrf.mxu0  ;;  %v2721_v3 = vpop.f32.mrf.mxu1 }
 0x1ba   : > { %2208 = vst.msk [vmem:[%s3312_s23 + $0xc0] sm:$0xf] %vm2159_vm1, %v2612_v11  ;;  %v1888_v12 = vmax.f32 %v1824_v5, 0.0  ;;  %v1756_v51 = vmul.f32 %v3291_v57, %v1651_v1  ;;  %v1614_v22 = vadd.f32 %v3492_v26, %v1324_v31  ;;  %v1662_v9 = vadd.f32 %v2721_v3, %v3252_v16 }
 0x1bb   : > { %v2605_v4 = vpack.c.bf16 %v1880_v14, %v1880_v14  ;;  %v2615_v10 = vpack.c.bf16 %v1890_v39, %v1890_v39  ;;  %v1817_v58 = vadd.f32 %v3296_v61, %v1746_v62  ;;  %v1829_v13 = vadd.f32 %v3296_v61, %v1758_v2  ;;  %v1326_v59 = vpop.f32.mrf.mxu0  ;;  %v1653_v23 = vpop.f32.mrf.mxu1 }
 0x1bc   : > { %v2613_v17 = vpack.c.bf16 %v1888_v12, %v1888_v12  ;;  %v1827_v55 = vadd.f32 %v3296_v61, %v1756_v51  ;;  %v1747_v15 = vmul.f32 %v3291_v57, %v1614_v22  ;;  %v1759_v18 = vmul.f32 %v3291_v57, %v1662_v9 }
 0x1bd   : > { %2201 = vst.msk [vmem:[%s3312_s23 + $0xa4] sm:$0xf] %vm2159_vm1, %v2605_v4  ;;  %2211 = vst.msk [vmem:[%s3312_s23 + $0xcc] sm:$0xf] %vm2159_vm1, %v2615_v10  ;;  %v1881_v16 = vmax.f32 %v1817_v58, 0.0  ;;  %v1893_v26 = vmax.f32 %v1829_v13, 0.0  ;;  %v1654_v53 = vadd.f32 %v1653_v23, %v3244_v8  ;;  %v1329_v60 = vpop.f32.mrf.mxu0  ;;  %v2724_v25 = vpop.f32.mrf.mxu1 }
 0x1be   : > { %2209 = vst.msk [vmem:[%s3312_s23 + $0xc4] sm:$0xf] %vm2159_vm1, %v2613_v17  ;;  %v1891_v43 = vmax.f32 %v1827_v55, 0.0  ;;  %v1818_v49 = vadd.f32 %v3296_v61, %v1747_v15  ;;  %v1830_v63 = vadd.f32 %v3296_v61, %v1759_v18  ;;  %v1619_v21 = vadd.f32 %v3501_v38, %v1329_v60 }
 0x1bf   : > { %v2606_v29 = vpack.c.bf16 %v1881_v16, %v1881_v16  ;;  %v2618_v52 = vpack.c.bf16 %v1893_v26, %v1893_v26  ;;  %v1757_v30 = vmul.f32 %v3291_v57, %v1654_v53  ;;  %v1675_v8 = vadd.f32 %v2724_v25, %v3264_v28  ;;  %v1331_v33 = vpop.f32.mrf.mxu0  ;;  %v1666_v41 = vpop.f32.mrf.mxu1 }
 0x1c0   : > { %v2616_v34 = vpack.c.bf16 %v1891_v43, %v1891_v43  ;;  %v1882_v7 = vmax.f32 %v1818_v49, 0.0  ;;  %v1894_v6 = vmax.f32 %v1830_v63, 0.0  ;;  %v1748_v0 = vmul.f32 %v3291_v57, %v1619_v21 }
 0x1c1   : > { %2202 = vst.msk [vmem:[%s3312_s23 + $0xa8] sm:$0xf] %vm2159_vm1, %v2606_v29  ;;  %2214 = vst.msk [vmem:[%s3312_s23 + $0xd8] sm:$0xf] %vm2159_vm1, %v2618_v52  ;;  %v1828_v38 = vadd.f32 %v3296_v61, %v1757_v30  ;;  %v1762_v37 = vmul.f32 %v3291_v57, %v1675_v8  ;;  %v1667_v27 = vadd.f32 %v1666_v41, %v3256_v20  ;;  %v1332_v28 = vpop.f32.mrf.mxu0  ;;  %v2725_v42 = vpop.f32.mrf.mxu1 }
 0x1c2   : > { %2212 = vst.msk [vmem:[%s3312_s23 + $0xd0] sm:$0xf] %vm2159_vm1, %v2616_v34  ;;  %v2607_v47 = vpack.c.bf16 %v1882_v7, %v1882_v7  ;;  %v2619_v45 = vpack.c.bf16 %v1894_v6, %v1894_v6  ;;  %v1819_v56 = vadd.f32 %v3296_v61, %v1748_v0  ;;  %v1622_v50 = vadd.f32 %v3509_v54, %v1332_v28 }
 0x1c3   : > { %v1892_v19 = vmax.f32 %v1828_v38, 0.0  ;;  %v1833_v11 = vadd.f32 %v3296_v61, %v1762_v37  ;;  %v1760_v5 = vmul.f32 %v3291_v57, %v1667_v27  ;;  %v1678_v1 = vadd.f32 %v2725_v42, %v3268_v32  ;;  %v1334_v14 = vpop.f32.mrf.mxu0  ;;  %v1669_v39 = vpop.f32.mrf.mxu1 }
 0x1c4   : > { %2203 = vst.msk [vmem:[%s3312_s23 + $0xac] sm:$0xf] %vm2159_vm1, %v2607_v47  ;;  %2215 = vst.msk [vmem:[%s3312_s23 + $0xdc] sm:$0xf] %vm2159_vm1, %v2619_v45  ;;  %v1883_v20 = vmax.f32 %v1819_v56, 0.0  ;;  %v1749_v62 = vmul.f32 %v3291_v57, %v1622_v50  ;;  %v1670_v2 = vadd.f32 %v1669_v39, %v3260_v24 }
 0x1c5   : > { %v2617_v54 = vpack.c.bf16 %v1892_v19, %v1892_v19  ;;  %v1897_v31 = vmax.f32 %v1833_v11, 0.0  ;;  %v1831_v3 = vadd.f32 %v3296_v61, %v1760_v5  ;;  %v1763_v12 = vmul.f32 %v3291_v57, %v1678_v1  ;;  %v1337_v32 = vpop.f32.mrf.mxu0  ;;  %v2728_v51 = vpop.f32.mrf.mxu1 }
 0x1c6   : > { %v2608_v22 = vpack.c.bf16 %v1883_v20, %v1883_v20  ;;  %v1820_v9 = vadd.f32 %v3296_v61, %v1749_v62  ;;  %v1761_v4 = vmul.f32 %v3291_v57, %v1670_v2  ;;  %v1627_v10 = vadd.f32 %v3498_v35, %v1337_v32 }
 0x1c7   : > { %2213 = vst.msk [vmem:[%s3312_s23 + $0xd4] sm:$0xf] %vm2159_vm1, %v2617_v54  ;;  %v2622_v24 = vpack.c.bf16 %v1897_v31, %v1897_v31  ;;  %v1895_v58 = vmax.f32 %v1831_v3, 0.0  ;;  %v1834_v13 = vadd.f32 %v3296_v61, %v1763_v12  ;;  %v1691_v59 = vadd.f32 %v2728_v51, %v3280_v44  ;;  %v1339_v23 = vpop.f32.mrf.mxu0  ;;  %v1682_v17 = vpop.f32.mrf.mxu1 }
 0x1c8   : > { %2204 = vst.msk [vmem:[%s3312_s23 + $0xb0] sm:$0xf] %vm2159_vm1, %v2608_v22  ;;  %v1884_v55 = vmax.f32 %v1820_v9, 0.0  ;;  %v1832_v15 = vadd.f32 %v3296_v61, %v1761_v4  ;;  %v1750_v18 = vmul.f32 %v3291_v57, %v1627_v10  ;;  %v1683_v35 = vadd.f32 %v1682_v17, %v3272_v36 }
 0x1c9   : > { %2218 = vst.msk [vmem:[%s3312_s23 + $0xe8] sm:$0xf] %vm2159_vm1, %v2622_v24  ;;  %v2620_v16 = vpack.c.bf16 %v1895_v58, %v1895_v58  ;;  %v1898_v26 = vmax.f32 %v1834_v13, 0.0  ;;  %v1766_v53 = vmul.f32 %v3291_v57, %v1691_v59  ;;  %v1340_v44 = vpop.f32.mrf.mxu0  ;;  %v2729_v60 = vpop.f32.mrf.mxu1 }
 0x1ca   : > { %v2609_v25 = vpack.c.bf16 %v1884_v55, %v1884_v55  ;;  %v1896_v43 = vmax.f32 %v1832_v15, 0.0  ;;  %v1821_v49 = vadd.f32 %v3296_v61, %v1750_v18  ;;  %v1764_v63 = vmul.f32 %v3291_v57, %v1683_v35 }
 0x1cb   : > { %2216 = vst.msk [vmem:[%s3312_s23 + $0xe0] sm:$0xf] %vm2159_vm1, %v2620_v16  ;;  %v2623_v36 = vpack.c.bf16 %v1898_v26, %v1898_v26  ;;  %v1837_v21 = vadd.f32 %v3296_v61, %v1766_v53  ;;  %v1630_v29 = vadd.f32 %v3506_v46, %v1340_v44  ;;  %v1694_v52 = vadd.f32 %v2729_v60, %v3284_v48  ;;  %v1342_v30 = vpop.f32.mrf.mxu0  ;;  %v1685_v8 = vpop.f32.mrf.mxu1 }
 0x1cc   : > { %2205 = vst.msk [vmem:[%s3312_s23 + $0xb4] sm:$0xf] %vm2159_vm1, %v2609_v25  ;;  %v2621_v33 = vpack.c.bf16 %v1896_v43, %v1896_v43  ;;  %v1885_v41 = vmax.f32 %v1821_v49, 0.0  ;;  %v1835_v34 = vadd.f32 %v3296_v61, %v1764_v63  ;;  %v1686_v7 = vadd.f32 %v1685_v8, %v3276_v40 }
 0x1cd   : > { %2219 = vst.msk [vmem:[%s3312_s23 + $0xec] sm:$0xf] %vm2159_vm1, %v2623_v36  ;;  %v1901_v6 = vmax.f32 %v1837_v21, 0.0  ;;  %v1751_v46 = vmul.f32 %v3291_v57, %v1630_v29  ;;  %v1767_v48 = vmul.f32 %v3291_v57, %v1694_v52 }
 0x1ce   : > { %2217 = vst.msk [vmem:[%s3312_s23 + $0xe4] sm:$0xf] %vm2159_vm1, %v2621_v33  ;;  %v2610_v0 = vpack.c.bf16 %v1885_v41, %v1885_v41  ;;  %v1899_v38 = vmax.f32 %v1835_v34, 0.0  ;;  %v1765_v37 = vmul.f32 %v3291_v57, %v1686_v7 }
 0x1cf   : > { %v2626_v27 = vpack.c.bf16 %v1901_v6, %v1901_v6  ;;  %v1822_v40 = vadd.f32 %v3296_v61, %v1751_v46  ;;  %v1838_v28 = vadd.f32 %v3296_v61, %v1767_v48 }
 0x1d0   : > { %2206 = vst.msk [vmem:[%s3312_s23 + $0xb8] sm:$0xf] %vm2159_vm1, %v2610_v0  ;;  %v2624_v42 = vpack.c.bf16 %v1899_v38, %v1899_v38  ;;  %v1836_v47 = vadd.f32 %v3296_v61, %v1765_v37 }
 0x1d1   : > { %2222 = vst.msk [vmem:[%s3312_s23 + $0xf8] sm:$0xf] %vm2159_vm1, %v2626_v27  ;;  %v1886_v45 = vmax.f32 %v1822_v40, 0.0  ;;  %v1902_v56 = vmax.f32 %v1838_v28, 0.0 }
 0x1d2   : > { %2220 = vst.msk [vmem:[%s3312_s23 + $0xf0] sm:$0xf] %vm2159_vm1, %v2624_v42  ;;  %v1900_v50 = vmax.f32 %v1836_v47, 0.0 }
 0x1d3   : > { %v2611_v57 = vpack.c.bf16 %v1886_v45, %v1886_v45  ;;  %v2627_v19 = vpack.c.bf16 %v1902_v56, %v1902_v56 }
 0x1d4   : > { %v2625_v11 = vpack.c.bf16 %v1900_v50, %v1900_v50 }
 0x1d5   : > { %2207 = vst.msk [vmem:[%s3312_s23 + $0xbc] sm:$0xf] %vm2159_vm1, %v2611_v57  ;;  %2223 = vst.msk [vmem:[%s3312_s23 + $0xfc] sm:$0xf] %vm2159_vm1, %v2627_v19 }
 0x1d6   : > { %2221 = vst.msk [vmem:[%s3312_s23 + $0xf4] sm:$0xf] %vm2159_vm1, %v2625_v11 }
 0x1d7 PF: > { %s14_s17 = sadd.s32 1, %s2956_s17   ;;  %s3651_s15 = smov %s2952_s16 }
 0x1d8   : > { %p11_p5 = scmp.ge.s32.totalorder %s14_s17, 5   ;;  %s3652_s16 = smov %s3654_s18 }
 0x1da   :  { %13 = sbr.rel (!%p11_p5) target bundleno = 2 (0x2), region = 75 }

// kernel: fall_detection_forward.14
= control target key start
LH: loop header
LB: loop body
LE: loop exit
PB: predicated region body
PF: predicated region fallthrough
CT: control target
= control target key end

     0   :  { %s656_s22 = smov 64   ;;  %vm521_vm0 = vcmask 519168   ;;  %vm523_vm1 = vcmask 517120   ;;  %s1627_s0 = inlined_call_operand.vmem [shape: bf16[32,2,12,128], index: 0, kind: input, shape index: {}]   ;;  %s1628_s1 = inlined_call_operand.vmem [shape: bf16[32,12,64], index: 1, kind: output, shape index: {}]  }
   0x1   :  { %v10_v0 = vld [vmem:[%s1627_s0 + $0x10] sm:$0xf]  ;;  %v593_v1 = vld [vmem:[%s1627_s0 + $0x18] sm:$0xf]  ;;  %v8_v2 = vld [vmem:[%s1627_s0] sm:$0xf] }
   0x2   :  { %v676_v3 = vmax.bf16 %v593_v1, %v10_v0  ;;  %v591_v4 = vld [vmem:[%s1627_s0 + $0x8] sm:$0xf]  ;;  %v11_v5 = vld [vmem:[%s1627_s0 + $0x14] sm:$0x3]  ;;  %v594_v6 = vld [vmem:[%s1627_s0 + $0x1c] sm:$0x3] }
   0x3   :  { %v687_v7 = vmax.bf16 %v591_v4, %v8_v2  ;;  %v9_v8 = vld [vmem:[%s1627_s0 + $0x4] sm:$0x3]  ;;  %v592_v9 = vld [vmem:[%s1627_s0 + $0xc] sm:$0x3]  ;;  %v697_v10 = vmax.bf16 %v594_v6, %v11_v5  ;;  %v12_v14 = vld [vmem:[%s1627_s0 + $0x20] sm:$0xf] }
   0x4   :  { %269 = vrot.lane.b32.xlu1 %v676_v3, %s656_s22  ;;  %v701_v11 = vmax.bf16 %v592_v9, %v9_v8  ;;  %v13_v12 = vld [vmem:[%s1627_s0 + $0x24] sm:$0x3]  ;;  %v596_v13 = vld [vmem:[%s1627_s0 + $0x2c] sm:$0x3]  ;;  %v595_v15 = vld [vmem:[%s1627_s0 + $0x28] sm:$0xf] }
   0x5   :  { %265 = vrot.lane.b32.xlu0 %v687_v7, %s656_s22  ;;  %v717_v16 = vmax.bf16 %v596_v13, %v13_v12  ;;  %v721_v17 = vmax.bf16 %v595_v15, %v12_v14  ;;  %v15_v18 = vld [vmem:[%s1627_s0 + $0x34] sm:$0x3]  ;;  %v598_v19 = vld [vmem:[%s1627_s0 + $0x3c] sm:$0x3]  ;;  %v14_v20 = vld [vmem:[%s1627_s0 + $0x30] sm:$0xf] }
   0x6   :  { %v597_v21 = vld [vmem:[%s1627_s0 + $0x38] sm:$0xf]  ;;  %v737_v22 = vmax.bf16 %v598_v19, %v15_v18  ;;  %v17_v24 = vld [vmem:[%s1627_s0 + $0x44] sm:$0x3]  ;;  %v600_v25 = vld [vmem:[%s1627_s0 + $0x4c] sm:$0x3] }
   0x7   :  { %v741_v23 = vmax.bf16 %v597_v21, %v14_v20  ;;  %v16_v26 = vld [vmem:[%s1627_s0 + $0x40] sm:$0xf]  ;;  %v599_v27 = vld [vmem:[%s1627_s0 + $0x48] sm:$0xf]  ;;  %v757_v28 = vmax.bf16 %v600_v25, %v17_v24  ;;  %v19_v30 = vld [vmem:[%s1627_s0 + $0x54] sm:$0x3] }
   0x8   :  { %271 = vrot.lane.b32.xlu1 %v697_v10, %s656_s22  ;;  %v761_v29 = vmax.bf16 %v599_v27, %v16_v26  ;;  %v602_v31 = vld [vmem:[%s1627_s0 + $0x5c] sm:$0x3]  ;;  %v18_v32 = vld [vmem:[%s1627_s0 + $0x50] sm:$0xf]  ;;  %v601_v33 = vld [vmem:[%s1627_s0 + $0x58] sm:$0xf] }
   0x9   :  { %267 = vrot.lane.b32.xlu0 %v701_v11, %s656_s22  ;;  %v777_v34 = vmax.bf16 %v602_v31, %v19_v30  ;;  %v781_v35 = vmax.bf16 %v601_v33, %v18_v32  ;;  %v21_v36 = vld [vmem:[%s1627_s0 + $0x64] sm:$0x3]  ;;  %v604_v37 = vld [vmem:[%s1627_s0 + $0x6c] sm:$0x3]  ;;  %v20_v38 = vld [vmem:[%s1627_s0 + $0x60] sm:$0xf] }
   0xa   :  { %v603_v39 = vld [vmem:[%s1627_s0 + $0x68] sm:$0xf]  ;;  %v797_v40 = vmax.bf16 %v604_v37, %v21_v36  ;;  %v23_v42 = vld [vmem:[%s1627_s0 + $0x74] sm:$0x3]  ;;  %v606_v43 = vld [vmem:[%s1627_s0 + $0x7c] sm:$0x3] }
   0xb   :  { %v801_v41 = vmax.bf16 %v603_v39, %v20_v38  ;;  %v22_v44 = vld [vmem:[%s1627_s0 + $0x70] sm:$0xf]  ;;  %v605_v45 = vld [vmem:[%s1627_s0 + $0x78] sm:$0xf]  ;;  %v817_v46 = vmax.bf16 %v606_v43, %v23_v42  ;;  %v25_v48 = vld [vmem:[%s1627_s0 + $0x84] sm:$0x3] }
   0xc   :  { %275 = vrot.lane.b32.xlu1 %v717_v16, %s656_s22  ;;  %v821_v47 = vmax.bf16 %v605_v45, %v22_v44  ;;  %v608_v49 = vld [vmem:[%s1627_s0 + $0x8c] sm:$0x3]  ;;  %v24_v50 = vld [vmem:[%s1627_s0 + $0x80] sm:$0xf]  ;;  %v607_v51 = vld [vmem:[%s1627_s0 + $0x88] sm:$0xf] }
   0xd   :  { %273 = vrot.lane.b32.xlu0 %v721_v17, %s656_s22  ;;  %v837_v52 = vmax.bf16 %v608_v49, %v25_v48  ;;  %v841_v53 = vmax.bf16 %v607_v51, %v24_v50  ;;  %v27_v54 = vld [vmem:[%s1627_s0 + $0x94] sm:$0x3]  ;;  %v610_v55 = vld [vmem:[%s1627_s0 + $0x9c] sm:$0x3]  ;;  %v26_v56 = vld [vmem:[%s1627_s0 + $0x90] sm:$0xf] }
   0xe   :  { %v609_v57 = vld [vmem:[%s1627_s0 + $0x98] sm:$0xf]  ;;  %v857_v58 = vmax.bf16 %v610_v55, %v27_v54  ;;  %v29_v60 = vld [vmem:[%s1627_s0 + $0xa4] sm:$0x3]  ;;  %v612_v61 = vld [vmem:[%s1627_s0 + $0xac] sm:$0x3] }
   0xf   :  { %v861_v59 = vmax.bf16 %v609_v57, %v26_v56  ;;  %v28_v62 = vld [vmem:[%s1627_s0 + $0xa0] sm:$0xf]  ;;  %v611_v63 = vld [vmem:[%s1627_s0 + $0xa8] sm:$0xf]  ;;  %v877_v0 = vmax.bf16 %v612_v61, %v29_v60  ;;  %v31_v2 = vld [vmem:[%s1627_s0 + $0xb4] sm:$0x3] }
  0x10   :  { %279 = vrot.lane.b32.xlu1 %v737_v22, %s656_s22  ;;  %v881_v1 = vmax.bf16 %v611_v63, %v28_v62  ;;  %v614_v4 = vld [vmem:[%s1627_s0 + $0xbc] sm:$0x3]  ;;  %v30_v5 = vld [vmem:[%s1627_s0 + $0xb0] sm:$0xf]  ;;  %v613_v6 = vld [vmem:[%s1627_s0 + $0xb8] sm:$0xf] }
  0x11   :  { %277 = vrot.lane.b32.xlu0 %v741_v23, %s656_s22  ;;  %v897_v8 = vmax.bf16 %v614_v4, %v31_v2  ;;  %v901_v9 = vmax.bf16 %v613_v6, %v30_v5  ;;  %v33_v12 = vld [vmem:[%s1627_s0 + $0xc4] sm:$0x3]  ;;  %v616_v13 = vld [vmem:[%s1627_s0 + $0xcc] sm:$0x3]  ;;  %v32_v14 = vld [vmem:[%s1627_s0 + $0xc0] sm:$0xf] }
  0x12   :  { %v615_v15 = vld [vmem:[%s1627_s0 + $0xc8] sm:$0xf]  ;;  %v917_v18 = vmax.bf16 %v616_v13, %v33_v12  ;;  %v35_v20 = vld [vmem:[%s1627_s0 + $0xd4] sm:$0x3]  ;;  %v618_v21 = vld [vmem:[%s1627_s0 + $0xdc] sm:$0x3] }
  0x13   :  { %v921_v19 = vmax.bf16 %v615_v15, %v32_v14  ;;  %v34_v24 = vld [vmem:[%s1627_s0 + $0xd0] sm:$0xf]  ;;  %v617_v25 = vld [vmem:[%s1627_s0 + $0xd8] sm:$0xf]  ;;  %v937_v26 = vmax.bf16 %v618_v21, %v35_v20  ;;  %v37_v30 = vld [vmem:[%s1627_s0 + $0xe4] sm:$0x3] }
  0x14   :  { %283 = vrot.lane.b32.xlu1 %v757_v28, %s656_s22  ;;  %v941_v27 = vmax.bf16 %v617_v25, %v34_v24  ;;  %v620_v31 = vld [vmem:[%s1627_s0 + $0xec] sm:$0x3]  ;;  %v36_v32 = vld [vmem:[%s1627_s0 + $0xe0] sm:$0xf]  ;;  %v619_v33 = vld [vmem:[%s1627_s0 + $0xe8] sm:$0xf] }
  0x15   :  { %281 = vrot.lane.b32.xlu0 %v761_v29, %s656_s22  ;;  %v957_v36 = vmax.bf16 %v620_v31, %v37_v30  ;;  %v961_v37 = vmax.bf16 %v619_v33, %v36_v32  ;;  %v39_v38 = vld [vmem:[%s1627_s0 + $0xf4] sm:$0x3]  ;;  %v622_v39 = vld [vmem:[%s1627_s0 + $0xfc] sm:$0x3]  ;;  %v38_v42 = vld [vmem:[%s1627_s0 + $0xf0] sm:$0xf] }
  0x16   :  { %v621_v43 = vld [vmem:[%s1627_s0 + $0xf8] sm:$0xf]  ;;  %v977_v44 = vmax.bf16 %v622_v39, %v39_v38  ;;  %v41_v48 = vld [vmem:[%s1627_s0 + $0x104] sm:$0x3]  ;;  %v624_v49 = vld [vmem:[%s1627_s0 + $0x10c] sm:$0x3] }
  0x17   :  { %v981_v45 = vmax.bf16 %v621_v43, %v38_v42  ;;  %v40_v50 = vld [vmem:[%s1627_s0 + $0x100] sm:$0xf]  ;;  %v623_v51 = vld [vmem:[%s1627_s0 + $0x108] sm:$0xf]  ;;  %v997_v54 = vmax.bf16 %v624_v49, %v41_v48  ;;  %v43_v56 = vld [vmem:[%s1627_s0 + $0x114] sm:$0x3] }
  0x18   :  { %287 = vrot.lane.b32.xlu1 %v777_v34, %s656_s22  ;;  %v1001_v55 = vmax.bf16 %v623_v51, %v40_v50  ;;  %v626_v57 = vld [vmem:[%s1627_s0 + $0x11c] sm:$0x3]  ;;  %v42_v60 = vld [vmem:[%s1627_s0 + $0x110] sm:$0xf]  ;;  %v625_v61 = vld [vmem:[%s1627_s0 + $0x118] sm:$0xf] }
  0x19   :  { %285 = vrot.lane.b32.xlu0 %v781_v35, %s656_s22  ;;  %v1017_v62 = vmax.bf16 %v626_v57, %v43_v56  ;;  %v1021_v63 = vmax.bf16 %v625_v61, %v42_v60  ;;  %v45_v2 = vld [vmem:[%s1627_s0 + $0x124] sm:$0x3]  ;;  %v628_v4 = vld [vmem:[%s1627_s0 + $0x12c] sm:$0x3]  ;;  %v44_v5 = vld [vmem:[%s1627_s0 + $0x120] sm:$0xf] }
  0x1a   :  { %v627_v6 = vld [vmem:[%s1627_s0 + $0x128] sm:$0xf]  ;;  %v1037_v12 = vmax.bf16 %v628_v4, %v45_v2  ;;  %v47_v14 = vld [vmem:[%s1627_s0 + $0x134] sm:$0x3]  ;;  %v630_v15 = vld [vmem:[%s1627_s0 + $0x13c] sm:$0x3] }
  0x1b   :  { %v1041_v13 = vmax.bf16 %v627_v6, %v44_v5  ;;  %v46_v20 = vld [vmem:[%s1627_s0 + $0x130] sm:$0xf]  ;;  %v629_v21 = vld [vmem:[%s1627_s0 + $0x138] sm:$0xf]  ;;  %v1057_v24 = vmax.bf16 %v630_v15, %v47_v14  ;;  %v49_v30 = vld [vmem:[%s1627_s0 + $0x144] sm:$0x3] }
  0x1c   :  { %291 = vrot.lane.b32.xlu1 %v797_v40, %s656_s22  ;;  %v1061_v25 = vmax.bf16 %v629_v21, %v46_v20  ;;  %v632_v31 = vld [vmem:[%s1627_s0 + $0x14c] sm:$0x3]  ;;  %v48_v32 = vld [vmem:[%s1627_s0 + $0x140] sm:$0xf]  ;;  %v631_v33 = vld [vmem:[%s1627_s0 + $0x148] sm:$0xf] }
  0x1d   :  { %289 = vrot.lane.b32.xlu0 %v801_v41, %s656_s22  ;;  %v1077_v38 = vmax.bf16 %v632_v31, %v49_v30  ;;  %v1081_v39 = vmax.bf16 %v631_v33, %v48_v32  ;;  %v51_v42 = vld [vmem:[%s1627_s0 + $0x154] sm:$0x3]  ;;  %v634_v43 = vld [vmem:[%s1627_s0 + $0x15c] sm:$0x3]  ;;  %v50_v48 = vld [vmem:[%s1627_s0 + $0x150] sm:$0xf] }
  0x1e   :  { %v633_v49 = vld [vmem:[%s1627_s0 + $0x158] sm:$0xf]  ;;  %v1097_v50 = vmax.bf16 %v634_v43, %v51_v42  ;;  %v53_v56 = vld [vmem:[%s1627_s0 + $0x164] sm:$0x3]  ;;  %v636_v57 = vld [vmem:[%s1627_s0 + $0x16c] sm:$0x3] }
  0x1f   :  { %v1101_v51 = vmax.bf16 %v633_v49, %v50_v48  ;;  %v52_v60 = vld [vmem:[%s1627_s0 + $0x160] sm:$0xf]  ;;  %v635_v61 = vld [vmem:[%s1627_s0 + $0x168] sm:$0xf]  ;;  %v1117_v2 = vmax.bf16 %v636_v57, %v53_v56  ;;  %v55_v5 = vld [vmem:[%s1627_s0 + $0x174] sm:$0x3] }
  0x20   :  { %295 = vrot.lane.b32.xlu1 %v817_v46, %s656_s22  ;;  %v1121_v4 = vmax.bf16 %v635_v61, %v52_v60  ;;  %v638_v6 = vld [vmem:[%s1627_s0 + $0x17c] sm:$0x3]  ;;  %v54_v14 = vld [vmem:[%s1627_s0 + $0x170] sm:$0xf]  ;;  %v637_v15 = vld [vmem:[%s1627_s0 + $0x178] sm:$0xf] }
  0x21   :  { %293 = vrot.lane.b32.xlu0 %v821_v47, %s656_s22  ;;  %v1137_v20 = vmax.bf16 %v638_v6, %v55_v5  ;;  %v1141_v21 = vmax.bf16 %v637_v15, %v54_v14  ;;  %v57_v30 = vld [vmem:[%s1627_s0 + $0x184] sm:$0x3]  ;;  %v640_v31 = vld [vmem:[%s1627_s0 + $0x18c] sm:$0x3]  ;;  %v56_v32 = vld [vmem:[%s1627_s0 + $0x180] sm:$0xf] }
  0x22   :  { %v639_v33 = vld [vmem:[%s1627_s0 + $0x188] sm:$0xf]  ;;  %v1157_v42 = vmax.bf16 %v640_v31, %v57_v30  ;;  %v59_v48 = vld [vmem:[%s1627_s0 + $0x194] sm:$0x3]  ;;  %v642_v49 = vld [vmem:[%s1627_s0 + $0x19c] sm:$0x3] }
  0x23   :  { %v1161_v43 = vmax.bf16 %v639_v33, %v56_v32  ;;  %v58_v56 = vld [vmem:[%s1627_s0 + $0x190] sm:$0xf]  ;;  %v641_v57 = vld [vmem:[%s1627_s0 + $0x198] sm:$0xf]  ;;  %v1177_v60 = vmax.bf16 %v642_v49, %v59_v48  ;;  %v61_v5 = vld [vmem:[%s1627_s0 + $0x1a4] sm:$0x3] }
  0x24   :  { %299 = vrot.lane.b32.xlu1 %v837_v52, %s656_s22  ;;  %v1181_v61 = vmax.bf16 %v641_v57, %v58_v56  ;;  %v644_v6 = vld [vmem:[%s1627_s0 + $0x1ac] sm:$0x3]  ;;  %v60_v14 = vld [vmem:[%s1627_s0 + $0x1a0] sm:$0xf]  ;;  %v643_v15 = vld [vmem:[%s1627_s0 + $0x1a8] sm:$0xf] }
  0x25   :  { %297 = vrot.lane.b32.xlu0 %v841_v53, %s656_s22  ;;  %v1197_v30 = vmax.bf16 %v644_v6, %v61_v5  ;;  %v1201_v31 = vmax.bf16 %v643_v15, %v60_v14  ;;  %v63_v32 = vld [vmem:[%s1627_s0 + $0x1b4] sm:$0x3]  ;;  %v646_v33 = vld [vmem:[%s1627_s0 + $0x1bc] sm:$0x3]  ;;  %v62_v48 = vld [vmem:[%s1627_s0 + $0x1b0] sm:$0xf] }
  0x26   :  { %v645_v49 = vld [vmem:[%s1627_s0 + $0x1b8] sm:$0xf]  ;;  %v1217_v56 = vmax.bf16 %v646_v33, %v63_v32  ;;  %v65_v5 = vld [vmem:[%s1627_s0 + $0x1c4] sm:$0x3]  ;;  %v648_v6 = vld [vmem:[%s1627_s0 + $0x1cc] sm:$0x3] }
  0x27   :  { %1635 = vst [vmem:[#allocation2_spill] sm:$0xff] %v1197_v30  ;;  %1636 = vst [vmem:[#allocation3_spill] sm:$0xff] %v1201_v31  ;;  %v1221_v57 = vmax.bf16 %v645_v49, %v62_v48  ;;  %v64_v14 = vld [vmem:[%s1627_s0 + $0x1c0] sm:$0xf]  ;;  %v647_v15 = vld [vmem:[%s1627_s0 + $0x1c8] sm:$0xf]  ;;  %v1237_v32 = vmax.bf16 %v648_v6, %v65_v5 }
  0x28   :  { %303 = vrot.lane.b32.xlu1 %v857_v58, %s656_s22  ;;  %1637 = vst [vmem:[#allocation4_spill] sm:$0xff] %v1217_v56  ;;  %v1241_v33 = vmax.bf16 %v647_v15, %v64_v14  ;;  %v67_v48 = vld [vmem:[%s1627_s0 + $0x1d4] sm:$0x3]  ;;  %v650_v49 = vld [vmem:[%s1627_s0 + $0x1dc] sm:$0x3] }
  0x29   :  { %301 = vrot.lane.b32.xlu0 %v861_v59, %s656_s22  ;;  %1638 = vst [vmem:[#allocation5_spill] sm:$0xff] %v1221_v57  ;;  %1639 = vst [vmem:[#allocation6_spill] sm:$0xff] %v1237_v32  ;;  %v649_v5 = vld [vmem:[%s1627_s0 + $0x1d8] sm:$0xf]  ;;  %v1257_v6 = vmax.bf16 %v650_v49, %v67_v48  ;;  %v69_v15 = vld [vmem:[%s1627_s0 + $0x1e4] sm:$0x3] }
  0x2a   :  { %1640 = vst [vmem:[#allocation7_spill] sm:$0xff] %v1241_v33  ;;  %v68_v48 = vld [vmem:[%s1627_s0 + $0x1e0] sm:$0xf]  ;;  %v651_v49 = vld [vmem:[%s1627_s0 + $0x1e8] sm:$0xf] }
  0x2c   :  { %307 = vrot.lane.b32.xlu1 %v877_v0, %s656_s22 }
  0x2d   :  { %305 = vrot.lane.b32.xlu0 %v881_v1, %s656_s22 }
  0x30   :  { %311 = vrot.lane.b32.xlu1 %v897_v8, %s656_s22 }
  0x31   :  { %309 = vrot.lane.b32.xlu0 %v901_v9, %s656_s22 }
  0x34   :  { %315 = vrot.lane.b32.xlu1 %v917_v18, %s656_s22 }
  0x35   :  { %313 = vrot.lane.b32.xlu0 %v921_v19, %s656_s22 }
  0x38   :  { %319 = vrot.lane.b32.xlu1 %v937_v26, %s656_s22 }
  0x39   :  { %317 = vrot.lane.b32.xlu0 %v941_v27, %s656_s22 }
  0x3c   :  { %323 = vrot.lane.b32.xlu1 %v957_v36, %s656_s22 }
  0x3d   :  { %321 = vrot.lane.b32.xlu0 %v961_v37, %s656_s22 }
  0x40   :  { %327 = vrot.lane.b32.xlu1 %v977_v44, %s656_s22 }
  0x41   :  { %325 = vrot.lane.b32.xlu0 %v981_v45, %s656_s22 }
  0x44   :  { %331 = vrot.lane.b32.xlu1 %v997_v54, %s656_s22 }
  0x45   :  { %329 = vrot.lane.b32.xlu0 %v1001_v55, %s656_s22 }
  0x48   :  { %335 = vrot.lane.b32.xlu1 %v1017_v62, %s656_s22 }
  0x49   :  { %333 = vrot.lane.b32.xlu0 %v1021_v63, %s656_s22 }
  0x4c   :  { %339 = vrot.lane.b32.xlu1 %v1037_v12, %s656_s22 }
  0x4d   :  { %337 = vrot.lane.b32.xlu0 %v1041_v13, %s656_s22 }
  0x50   :  { %343 = vrot.lane.b32.xlu1 %v1057_v24, %s656_s22 }
  0x51   :  { %341 = vrot.lane.b32.xlu0 %v1061_v25, %s656_s22 }
  0x54   :  { %347 = vrot.lane.b32.xlu1 %v1077_v38, %s656_s22 }
  0x55   :  { %345 = vrot.lane.b32.xlu0 %v1081_v39, %s656_s22 }
  0x58   :  { %351 = vrot.lane.b32.xlu1 %v1097_v50, %s656_s22 }
  0x59   :  { %349 = vrot.lane.b32.xlu0 %v1101_v51, %s656_s22 }
  0x5c   :  { %355 = vrot.lane.b32.xlu1 %v1117_v2, %s656_s22 }
  0x5d   :  { %353 = vrot.lane.b32.xlu0 %v1121_v4, %s656_s22 }
  0x60   :  { %359 = vrot.lane.b32.xlu1 %v1137_v20, %s656_s22 }
  0x61   :  { %357 = vrot.lane.b32.xlu0 %v1141_v21, %s656_s22 }
  0x64   :  { %363 = vrot.lane.b32.xlu1 %v1157_v42, %s656_s22 }
  0x65   :  { %361 = vrot.lane.b32.xlu0 %v1161_v43, %s656_s22 }
  0x68   :  { %367 = vrot.lane.b32.xlu1 %v1177_v60, %s656_s22 }
  0x69   :  { %365 = vrot.lane.b32.xlu0 %v1181_v61, %s656_s22 }
  0x6c   :  { %371 = vrot.lane.b32.xlu1 %v1197_v30, %s656_s22  ;;  %v1287_v30 = vmax.bf16 %v651_v49, %v68_v48 }
  0x6d   :  { %369 = vrot.lane.b32.xlu0 %v1201_v31, %s656_s22  ;;  %v66_v31 = vld [vmem:[%s1627_s0 + $0x1d0] sm:$0xf] }
  0x6e   :  { %v1261_v14 = vmax.bf16 %v649_v5, %v66_v31 }
  0x70   :  { %375 = vrot.lane.b32.xlu1 %v1217_v56, %s656_s22 }
  0x71   :  { %373 = vrot.lane.b32.xlu0 %v1221_v57, %s656_s22  ;;  %v652_v57 = vld [vmem:[%s1627_s0 + $0x1ec] sm:$0x3] }
  0x74   :  { %379 = vrot.lane.b32.xlu1 %v1237_v32, %s656_s22  ;;  %v1279_v32 = vmax.bf16 %v652_v57, %v69_v15  ;;  %v70_v57 = vld [vmem:[%s1627_s0 + $0x1f0] sm:$0xf]  ;;  %v653_v15 = vld [vmem:[%s1627_s0 + $0x1f8] sm:$0xf] }
  0x75   :  { %377 = vrot.lane.b32.xlu0 %v1241_v33, %s656_s22 }
  0x76   :  { %v270_v56 = vpop.permute.xlu1 %269 }
  0x77   :  { %v459_v31 = vmax.bf16 %v270_v56, %v676_v3  ;;  %v266_v5 = vpop.permute.xlu0 %265  ;;  %v71_v3 = vld [vmem:[%s1627_s0 + $0x1f4] sm:$0x3] }
  0x78   :  { %v457_v33 = vmax.bf16 %v266_v5, %v687_v7  ;;  %383 = vrot.lane.b32.xlu1 %v1257_v6, %s656_s22  ;;  %v654_v7 = vld [vmem:[%s1627_s0 + $0x1fc] sm:$0x3] }
  0x79   :  { %525 = vst.msk [vmem:[%s1628_s1 + $0x8] sm:$0xf] %vm521_vm0, %v459_v31  ;;  %381 = vrot.lane.b32.xlu0 %v1261_v14, %s656_s22  ;;  %v1309_v5 = vmax.bf16 %v654_v7, %v71_v3 }
  0x7a   :  { %522 = vst.msk [vmem:[%s1628_s1] sm:$0xf] %vm521_vm0, %v457_v33  ;;  %v272_v56 = vpop.permute.xlu1 %271  ;;  %v1317_v33 = vmax.bf16 %v653_v15, %v70_v57 }
  0x7b   :  { %v460_v48 = vmax.bf16 %v272_v56, %v697_v10  ;;  %v268_v49 = vpop.permute.xlu0 %267 }
  0x7c   :  { %v458_v31 = vmax.bf16 %v268_v49, %v701_v11  ;;  %387 = vrot.lane.b32.xlu1 %v1279_v32, %s656_s22 }
  0x7d   :  { %526 = vst.msk [vmem:[%s1628_s1 + $0xc] sm:$0x3] %vm523_vm1, %v460_v48  ;;  %385 = vrot.lane.b32.xlu0 %v1287_v30, %s656_s22 }
  0x7e   :  { %524 = vst.msk [vmem:[%s1628_s1 + $0x4] sm:$0x3] %vm523_vm1, %v458_v31  ;;  %v276_v10 = vpop.permute.xlu1 %275 }
  0x7f   :  { %v462_v11 = vmax.bf16 %v276_v10, %v717_v16  ;;  %v274_v3 = vpop.permute.xlu0 %273 }
  0x80   :  { %v461_v7 = vmax.bf16 %v274_v3, %v721_v17  ;;  %391 = vrot.lane.b32.xlu1 %v1309_v5, %s656_s22 }
  0x81   :  { %528 = vst.msk [vmem:[%s1628_s1 + $0x14] sm:$0x3] %vm523_vm1, %v462_v11  ;;  %389 = vrot.lane.b32.xlu0 %v1317_v33, %s656_s22 }
  0x82   :  { %527 = vst.msk [vmem:[%s1628_s1 + $0x10] sm:$0xf] %vm521_vm0, %v461_v7  ;;  %v280_v16 = vpop.permute.xlu1 %279 }
  0x83   :  { %v464_v56 = vmax.bf16 %v280_v16, %v737_v22  ;;  %v278_v17 = vpop.permute.xlu0 %277 }
  0x84   :  { %v463_v57 = vmax.bf16 %v278_v17, %v741_v23 }
  0x85   :  { %530 = vst.msk [vmem:[%s1628_s1 + $0x1c] sm:$0x3] %vm523_vm1, %v464_v56 }
  0x86   :  { %529 = vst.msk [vmem:[%s1628_s1 + $0x18] sm:$0xf] %vm521_vm0, %v463_v57  ;;  %v284_v15 = vpop.permute.xlu1 %283 }
  0x87   :  { %v466_v48 = vmax.bf16 %v284_v15, %v757_v28  ;;  %v282_v49 = vpop.permute.xlu0 %281 }
  0x88   :  { %v465_v31 = vmax.bf16 %v282_v49, %v761_v29 }
  0x89   :  { %532 = vst.msk [vmem:[%s1628_s1 + $0x24] sm:$0x3] %vm523_vm1, %v466_v48 }
  0x8a   :  { %531 = vst.msk [vmem:[%s1628_s1 + $0x20] sm:$0xf] %vm521_vm0, %v465_v31  ;;  %v288_v22 = vpop.permute.xlu1 %287 }
  0x8b   :  { %v468_v23 = vmax.bf16 %v288_v22, %v777_v34  ;;  %v286_v10 = vpop.permute.xlu0 %285 }
  0x8c   :  { %v467_v11 = vmax.bf16 %v286_v10, %v781_v35 }
  0x8d   :  { %534 = vst.msk [vmem:[%s1628_s1 + $0x2c] sm:$0x3] %vm523_vm1, %v468_v23 }
  0x8e   :  { %533 = vst.msk [vmem:[%s1628_s1 + $0x28] sm:$0xf] %vm521_vm0, %v467_v11  ;;  %v292_v28 = vpop.permute.xlu1 %291 }
  0x8f   :  { %v470_v29 = vmax.bf16 %v292_v28, %v797_v40  ;;  %v290_v3 = vpop.permute.xlu0 %289 }
  0x90   :  { %v469_v7 = vmax.bf16 %v290_v3, %v801_v41 }
  0x91   :  { %536 = vst.msk [vmem:[%s1628_s1 + $0x34] sm:$0x3] %vm523_vm1, %v470_v29 }
  0x92   :  { %535 = vst.msk [vmem:[%s1628_s1 + $0x30] sm:$0xf] %vm521_vm0, %v469_v7  ;;  %v296_v34 = vpop.permute.xlu1 %295 }
  0x93   :  { %v472_v35 = vmax.bf16 %v296_v34, %v817_v46  ;;  %v294_v16 = vpop.permute.xlu0 %293 }
  0x94   :  { %v471_v56 = vmax.bf16 %v294_v16, %v821_v47 }
  0x95   :  { %538 = vst.msk [vmem:[%s1628_s1 + $0x3c] sm:$0x3] %vm523_vm1, %v472_v35 }
  0x96   :  { %537 = vst.msk [vmem:[%s1628_s1 + $0x38] sm:$0xf] %vm521_vm0, %v471_v56  ;;  %v300_v40 = vpop.permute.xlu1 %299 }
  0x97   :  { %v474_v41 = vmax.bf16 %v300_v40, %v837_v52  ;;  %v298_v17 = vpop.permute.xlu0 %297 }
  0x98   :  { %v473_v57 = vmax.bf16 %v298_v17, %v841_v53 }
  0x99   :  { %540 = vst.msk [vmem:[%s1628_s1 + $0x44] sm:$0x3] %vm523_vm1, %v474_v41 }
  0x9a   :  { %539 = vst.msk [vmem:[%s1628_s1 + $0x40] sm:$0xf] %vm521_vm0, %v473_v57  ;;  %v304_v46 = vpop.permute.xlu1 %303 }
  0x9b   :  { %v476_v47 = vmax.bf16 %v304_v46, %v857_v58  ;;  %v302_v15 = vpop.permute.xlu0 %301 }
  0x9c   :  { %v475_v48 = vmax.bf16 %v302_v15, %v861_v59 }
  0x9d   :  { %542 = vst.msk [vmem:[%s1628_s1 + $0x4c] sm:$0x3] %vm523_vm1, %v476_v47 }
  0x9e   :  { %541 = vst.msk [vmem:[%s1628_s1 + $0x48] sm:$0xf] %vm521_vm0, %v475_v48  ;;  %v308_v52 = vpop.permute.xlu1 %307 }
  0x9f   :  { %v478_v53 = vmax.bf16 %v308_v52, %v877_v0  ;;  %v306_v49 = vpop.permute.xlu0 %305 }
  0xa0   :  { %v477_v31 = vmax.bf16 %v306_v49, %v881_v1 }
  0xa1   :  { %544 = vst.msk [vmem:[%s1628_s1 + $0x54] sm:$0x3] %vm523_vm1, %v478_v53 }
  0xa2   :  { %543 = vst.msk [vmem:[%s1628_s1 + $0x50] sm:$0xf] %vm521_vm0, %v477_v31  ;;  %v312_v58 = vpop.permute.xlu1 %311 }
  0xa3   :  { %v480_v59 = vmax.bf16 %v312_v58, %v897_v8  ;;  %v310_v22 = vpop.permute.xlu0 %309 }
  0xa4   :  { %v479_v23 = vmax.bf16 %v310_v22, %v901_v9 }
  0xa5   :  { %546 = vst.msk [vmem:[%s1628_s1 + $0x5c] sm:$0x3] %vm523_vm1, %v480_v59 }
  0xa6   :  { %545 = vst.msk [vmem:[%s1628_s1 + $0x58] sm:$0xf] %vm521_vm0, %v479_v23  ;;  %v316_v0 = vpop.permute.xlu1 %315 }
  0xa7   :  { %v482_v1 = vmax.bf16 %v316_v0, %v917_v18  ;;  %v314_v10 = vpop.permute.xlu0 %313 }
  0xa8   :  { %v481_v11 = vmax.bf16 %v314_v10, %v921_v19 }
  0xa9   :  { %548 = vst.msk [vmem:[%s1628_s1 + $0x64] sm:$0x3] %vm523_vm1, %v482_v1 }
  0xaa   :  { %547 = vst.msk [vmem:[%s1628_s1 + $0x60] sm:$0xf] %vm521_vm0, %v481_v11  ;;  %v320_v8 = vpop.permute.xlu1 %319 }
  0xab   :  { %v484_v9 = vmax.bf16 %v320_v8, %v937_v26  ;;  %v318_v28 = vpop.permute.xlu0 %317  ;;  %v1642_v8 = vld [vmem:[#allocation3_spill] sm:$0xff] }
  0xac   :  { %v483_v29 = vmax.bf16 %v318_v28, %v941_v27 }
  0xad   :  { %550 = vst.msk [vmem:[%s1628_s1 + $0x6c] sm:$0x3] %vm523_vm1, %v484_v9 }
  0xae   :  { %549 = vst.msk [vmem:[%s1628_s1 + $0x68] sm:$0xf] %vm521_vm0, %v483_v29  ;;  %v324_v18 = vpop.permute.xlu1 %323 }
  0xaf   :  { %v486_v19 = vmax.bf16 %v324_v18, %v957_v36  ;;  %v322_v3 = vpop.permute.xlu0 %321  ;;  %v1644_v18 = vld [vmem:[#allocation5_spill] sm:$0xff] }
  0xb0   :  { %v485_v7 = vmax.bf16 %v322_v3, %v961_v37 }
  0xb1   :  { %552 = vst.msk [vmem:[%s1628_s1 + $0x74] sm:$0x3] %vm523_vm1, %v486_v19 }
  0xb2   :  { %551 = vst.msk [vmem:[%s1628_s1 + $0x70] sm:$0xf] %vm521_vm0, %v485_v7  ;;  %v328_v26 = vpop.permute.xlu1 %327  ;;  %v1645_v7 = vld [vmem:[#allocation6_spill] sm:$0xff] }
  0xb3   :  { %v488_v27 = vmax.bf16 %v328_v26, %v977_v44  ;;  %v326_v34 = vpop.permute.xlu0 %325 }
  0xb4   :  { %v487_v35 = vmax.bf16 %v326_v34, %v981_v45  ;;  %v1646_v34 = vld [vmem:[#allocation7_spill] sm:$0xff] }
  0xb5   :  { %554 = vst.msk [vmem:[%s1628_s1 + $0x7c] sm:$0x3] %vm523_vm1, %v488_v27 }
  0xb6   :  { %553 = vst.msk [vmem:[%s1628_s1 + $0x78] sm:$0xf] %vm521_vm0, %v487_v35  ;;  %v332_v36 = vpop.permute.xlu1 %331 }
  0xb7   :  { %v490_v37 = vmax.bf16 %v332_v36, %v997_v54  ;;  %v330_v16 = vpop.permute.xlu0 %329 }
  0xb8   :  { %v489_v56 = vmax.bf16 %v330_v16, %v1001_v55 }
  0xb9   :  { %556 = vst.msk [vmem:[%s1628_s1 + $0x84] sm:$0x3] %vm523_vm1, %v490_v37 }
  0xba   :  { %555 = vst.msk [vmem:[%s1628_s1 + $0x80] sm:$0xf] %vm521_vm0, %v489_v56  ;;  %v336_v44 = vpop.permute.xlu1 %335 }
  0xbb   :  { %v492_v45 = vmax.bf16 %v336_v44, %v1017_v62  ;;  %v334_v40 = vpop.permute.xlu0 %333 }
  0xbc   :  { %v491_v41 = vmax.bf16 %v334_v40, %v1021_v63 }
  0xbd   :  { %558 = vst.msk [vmem:[%s1628_s1 + $0x8c] sm:$0x3] %vm523_vm1, %v492_v45 }
  0xbe   :  { %557 = vst.msk [vmem:[%s1628_s1 + $0x88] sm:$0xf] %vm521_vm0, %v491_v41  ;;  %v340_v54 = vpop.permute.xlu1 %339 }
  0xbf   :  { %v494_v55 = vmax.bf16 %v340_v54, %v1037_v12  ;;  %v338_v17 = vpop.permute.xlu0 %337 }
  0xc0   :  { %v493_v57 = vmax.bf16 %v338_v17, %v1041_v13 }
  0xc1   :  { %560 = vst.msk [vmem:[%s1628_s1 + $0x94] sm:$0x3] %vm523_vm1, %v494_v55 }
  0xc2   :  { %559 = vst.msk [vmem:[%s1628_s1 + $0x90] sm:$0xf] %vm521_vm0, %v493_v57  ;;  %v344_v62 = vpop.permute.xlu1 %343 }
  0xc3   :  { %v496_v63 = vmax.bf16 %v344_v62, %v1057_v24  ;;  %v342_v46 = vpop.permute.xlu0 %341 }
  0xc4   :  { %v495_v47 = vmax.bf16 %v342_v46, %v1061_v25 }
  0xc5   :  { %562 = vst.msk [vmem:[%s1628_s1 + $0x9c] sm:$0x3] %vm523_vm1, %v496_v63 }
  0xc6   :  { %561 = vst.msk [vmem:[%s1628_s1 + $0x98] sm:$0xf] %vm521_vm0, %v495_v47  ;;  %v348_v12 = vpop.permute.xlu1 %347 }
  0xc7   :  { %v498_v13 = vmax.bf16 %v348_v12, %v1077_v38  ;;  %v346_v15 = vpop.permute.xlu0 %345 }
  0xc8   :  { %v497_v48 = vmax.bf16 %v346_v15, %v1081_v39 }
  0xc9   :  { %564 = vst.msk [vmem:[%s1628_s1 + $0xa4] sm:$0x3] %vm523_vm1, %v498_v13 }
  0xca   :  { %563 = vst.msk [vmem:[%s1628_s1 + $0xa0] sm:$0xf] %vm521_vm0, %v497_v48  ;;  %v352_v24 = vpop.permute.xlu1 %351 }
  0xcb   :  { %v500_v25 = vmax.bf16 %v352_v24, %v1097_v50  ;;  %v350_v52 = vpop.permute.xlu0 %349 }
  0xcc   :  { %v499_v53 = vmax.bf16 %v350_v52, %v1101_v51 }
  0xcd   :  { %566 = vst.msk [vmem:[%s1628_s1 + $0xac] sm:$0x3] %vm523_vm1, %v500_v25 }
  0xce   :  { %565 = vst.msk [vmem:[%s1628_s1 + $0xa8] sm:$0xf] %vm521_vm0, %v499_v53  ;;  %v356_v38 = vpop.permute.xlu1 %355 }
  0xcf   :  { %v502_v39 = vmax.bf16 %v356_v38, %v1117_v2  ;;  %v354_v49 = vpop.permute.xlu0 %353 }
  0xd0   :  { %v501_v31 = vmax.bf16 %v354_v49, %v1121_v4 }
  0xd1   :  { %568 = vst.msk [vmem:[%s1628_s1 + $0xb4] sm:$0x3] %vm523_vm1, %v502_v39 }
  0xd2   :  { %567 = vst.msk [vmem:[%s1628_s1 + $0xb0] sm:$0xf] %vm521_vm0, %v501_v31  ;;  %v360_v50 = vpop.permute.xlu1 %359 }
  0xd3   :  { %v504_v51 = vmax.bf16 %v360_v50, %v1137_v20  ;;  %v358_v58 = vpop.permute.xlu0 %357 }
  0xd4   :  { %v503_v59 = vmax.bf16 %v358_v58, %v1141_v21 }
  0xd5   :  { %570 = vst.msk [vmem:[%s1628_s1 + $0xbc] sm:$0x3] %vm523_vm1, %v504_v51 }
  0xd6   :  { %569 = vst.msk [vmem:[%s1628_s1 + $0xb8] sm:$0xf] %vm521_vm0, %v503_v59  ;;  %v364_v2 = vpop.permute.xlu1 %363 }
  0xd7   :  { %v506_v4 = vmax.bf16 %v364_v2, %v1157_v42  ;;  %v362_v22 = vpop.permute.xlu0 %361 }
  0xd8   :  { %v505_v23 = vmax.bf16 %v362_v22, %v1161_v43  ;;  %v1641_v43 = vld [vmem:[#allocation2_spill] sm:$0xff] }
  0xd9   :  { %572 = vst.msk [vmem:[%s1628_s1 + $0xc4] sm:$0x3] %vm523_vm1, %v506_v4 }
  0xda   :  { %571 = vst.msk [vmem:[%s1628_s1 + $0xc0] sm:$0xf] %vm521_vm0, %v505_v23  ;;  %v368_v20 = vpop.permute.xlu1 %367 }
  0xdb   :  { %v508_v21 = vmax.bf16 %v368_v20, %v1177_v60  ;;  %v366_v0 = vpop.permute.xlu0 %365 }
  0xdc   :  { %v507_v1 = vmax.bf16 %v366_v0, %v1181_v61  ;;  %v1643_v61 = vld [vmem:[#allocation4_spill] sm:$0xff] }
  0xdd   :  { %574 = vst.msk [vmem:[%s1628_s1 + $0xcc] sm:$0x3] %vm523_vm1, %v508_v21 }
  0xde   :  { %573 = vst.msk [vmem:[%s1628_s1 + $0xc8] sm:$0xf] %vm521_vm0, %v507_v1  ;;  %v372_v42 = vpop.permute.xlu1 %371 }
  0xdf   :  { %v510_v10 = vmax.bf16 %v372_v42, %v1641_v43  ;;  %v370_v11 = vpop.permute.xlu0 %369 }
  0xe0   :  { %v509_v9 = vmax.bf16 %v370_v11, %v1642_v8 }
  0xe1   :  { %576 = vst.msk [vmem:[%s1628_s1 + $0xd4] sm:$0x3] %vm523_vm1, %v510_v10 }
  0xe2   :  { %575 = vst.msk [vmem:[%s1628_s1 + $0xd0] sm:$0xf] %vm521_vm0, %v509_v9  ;;  %v376_v60 = vpop.permute.xlu1 %375 }
  0xe3   :  { %v512_v28 = vmax.bf16 %v376_v60, %v1643_v61  ;;  %v374_v29 = vpop.permute.xlu0 %373 }
  0xe4   :  { %v511_v19 = vmax.bf16 %v374_v29, %v1644_v18 }
  0xe5   :  { %578 = vst.msk [vmem:[%s1628_s1 + $0xdc] sm:$0x3] %vm523_vm1, %v512_v28 }
  0xe6   :  { %577 = vst.msk [vmem:[%s1628_s1 + $0xd8] sm:$0xf] %vm521_vm0, %v511_v19  ;;  %v380_v3 = vpop.permute.xlu1 %379 }
  0xe7   :  { %v514_v26 = vmax.bf16 %v380_v3, %v1645_v7  ;;  %v378_v27 = vpop.permute.xlu0 %377 }
  0xe8   :  { %v513_v35 = vmax.bf16 %v378_v27, %v1646_v34 }
  0xe9   :  { %580 = vst.msk [vmem:[%s1628_s1 + $0xe4] sm:$0x3] %vm523_vm1, %v514_v26 }
  0xea   :  { %579 = vst.msk [vmem:[%s1628_s1 + $0xe0] sm:$0xf] %vm521_vm0, %v513_v35  ;;  %v384_v36 = vpop.permute.xlu1 %383 }
  0xeb   :  { %v516_v37 = vmax.bf16 %v384_v36, %v1257_v6  ;;  %v382_v16 = vpop.permute.xlu0 %381 }
  0xec   :  { %v515_v56 = vmax.bf16 %v382_v16, %v1261_v14 }
  0xed   :  { %582 = vst.msk [vmem:[%s1628_s1 + $0xec] sm:$0x3] %vm523_vm1, %v516_v37 }
  0xee   :  { %581 = vst.msk [vmem:[%s1628_s1 + $0xe8] sm:$0xf] %vm521_vm0, %v515_v56  ;;  %v388_v44 = vpop.permute.xlu1 %387 }
  0xef   :  { %v518_v45 = vmax.bf16 %v388_v44, %v1279_v32  ;;  %v386_v40 = vpop.permute.xlu0 %385 }
  0xf0   :  { %v517_v41 = vmax.bf16 %v386_v40, %v1287_v30 }
  0xf1   :  { %584 = vst.msk [vmem:[%s1628_s1 + $0xf4] sm:$0x3] %vm523_vm1, %v518_v45 }
  0xf2   :  { %583 = vst.msk [vmem:[%s1628_s1 + $0xf0] sm:$0xf] %vm521_vm0, %v517_v41  ;;  %v392_v6 = vpop.permute.xlu1 %391 }
  0xf3   :  { %v520_v14 = vmax.bf16 %v392_v6, %v1309_v5  ;;  %v390_v54 = vpop.permute.xlu0 %389 }
  0xf4   :  { %v519_v55 = vmax.bf16 %v390_v54, %v1317_v33 }
  0xf5   :  { %586 = vst.msk [vmem:[%s1628_s1 + $0xfc] sm:$0x3] %vm523_vm1, %v520_v14 }
  0xf6   :  { %585 = vst.msk [vmem:[%s1628_s1 + $0xf8] sm:$0xf] %vm521_vm0, %v519_v55 }

// kernel: fall_detection_forward.15
= control target key start
LH: loop header
LB: loop body
LE: loop exit
PB: predicated region body
PF: predicated region fallthrough
CT: control target
= control target key end

     0   :  { %s1895_s15 = smov 0   ;;  %s1897_s16 = smov 0   ;;  %s2163_s0 = inlined_call_operand.vmem [shape: bf16[384,576], index: 0, kind: input, shape index: {}]   ;;  %s2164_s1 = inlined_call_operand.vmem [shape: bf16[576,128], index: 1, kind: input, shape index: {}]   ;;  %s2165_s2 = inlined_call_operand.vmem [shape: f32[1,128], index: 2, kind: input, shape index: {}]   ;;  %s2166_s3 = inlined_call_operand.vmem [shape: f32[1,128], index: 3, kind: input, shape index: {}]   ;;  %s2167_s4 = inlined_call_operand.vmem [shape: bf16[384,128], index: 4, kind: output, shape index: {}]  }
   0x1   :  { %s1899_s17 = smov 0  }
   0x2 LB: > { %s26_s18 = sadd.s32 1, %s1864_s16  ;;  %p1385_p0 = scmp.ge.s32.totalorder %s1868_s17, 1  ;;  %s1868_s17 = sphi %s1899_s17, %s14_s17   ;;  %s1864_s16 = sphi %s1897_s16, %s2177_s16   ;;  %s1860_s15 = sphi %s1895_s15, %s2176_s15  }
   0x3   : > { %p28_p1 = scmp.ge.s32.totalorder %s26_s18, 3  ;;  %p203_p2 = scmp.lt.s32.totalorder %s1868_s17, 4 }
   0x5   : > { %s2179_s18 = smov (%p28_p1, %s26_s18), 0  ;;  %p204_p3 = pnand %p1385_p0, %p203_p2 }
   0x7   : > { %207 = sbr.rel (%p204_p3) target bundleno = 329 (0x149), region = 36 }
   0xc   : > { %v1754_v0 = vld [vmem:[%s2164_s1 + $0x78] sm:$0xff]   ;;  %v1758_v4 = vld [vmem:[%s2164_s1 + $0x70] sm:$0xff]   ;;  %v1762_v8 = vld [vmem:[%s2164_s1 + $0x68] sm:$0xff]   ;;  %s1386_s27 = sshll.u32 %s1860_s15, 4  ;;  %vm806_vm0 = vcmask 523264  }
   0xd   : > { %v1755_v1 = vld [vmem:[%s2164_s1 + $0xf8] sm:$0xff]   ;;  %1557 = vmatprep.subr.bf16.mxu0 %v1754_v0  ;;  %v1759_v5 = vld [vmem:[%s2164_s1 + $0xf0] sm:$0xff]   ;;  %v1763_v9 = vld [vmem:[%s2164_s1 + $0xe8] sm:$0xff]   ;;  %p244_p4 = scmp.lt.s32.totalorder %s1386_s27, 47 }
   0xe   : > { %v1756_v2 = vld [vmem:[%s2164_s1 + $0x38] sm:$0xff]   ;;  %1621 = vmatprep.subr.bf16.mxu1 %v1755_v1  ;;  %v1760_v6 = vld [vmem:[%s2164_s1 + $0x30] sm:$0xff]   ;;  %v1764_v10 = vld [vmem:[%s2164_s1 + $0x28] sm:$0xff]  }
   0xf   : > { %v1757_v3 = vld [vmem:[%s2164_s1 + $0xb8] sm:$0xff]   ;;  %1558 = vmatpush3.bf16.msra.mxu0 %v1756_v2  ;;  %v1761_v7 = vld [vmem:[%s2164_s1 + $0xb0] sm:$0xff]   ;;  %v1765_v11 = vld [vmem:[%s2164_s1 + $0xa8] sm:$0xff]   ;;  %s2181_s27 = smov (!%p244_p4, %s1386_s27), 47 }
  0x10   : > { %1622 = vmatpush3.bf16.msra.mxu1 %v1757_v3  ;;  %1559 = vmatprep.subr.bf16.mxu0 %v1758_v4  ;;  %v1766_v12 = vld [vmem:[%s2164_s1 + $0x60] sm:$0xff]   ;;  %v1770_v16 = vld [vmem:[%s2164_s1 + $0x58] sm:$0xff]   ;;  %v1774_v20 = vld [vmem:[%s2164_s1 + $0x50] sm:$0xff]   ;;  %s1729_s28 = smul.u32 20, %s2181_s27  ;;  %s1389_s8 = sshll.u32 %s2181_s27, 2 }
  0x11   : > { %1623 = vmatprep.subr.bf16.mxu1 %v1759_v5  ;;  %v1767_v13 = vld [vmem:[%s2164_s1 + $0xe0] sm:$0xff]   ;;  %v1771_v17 = vld [vmem:[%s2164_s1 + $0xd8] sm:$0xff]   ;;  %v1775_v21 = vld [vmem:[%s2164_s1 + $0xd0] sm:$0xff]   ;;  %s2125_s15 = scalar_lea.vmem %s2167_s4, %s1389_s8 }
  0x12   : > { %v1768_v14 = vld [vmem:[%s2164_s1 + $0x20] sm:$0xff]   ;;  %v1772_v18 = vld [vmem:[%s2164_s1 + $0x18] sm:$0xff]   ;;  %v1776_v22 = vld [vmem:[%s2164_s1 + $0x10] sm:$0xff]   ;;  %s2012_s12 = scalar_lea.vmem %s2163_s0, %s1729_s28 }
  0x13   : > { %1560 = vmatpush3.bf16.msra.mxu0 %v1760_v6  ;;  %v1769_v15 = vld [vmem:[%s2164_s1 + $0xa0] sm:$0xff]   ;;  %v1773_v19 = vld [vmem:[%s2164_s1 + $0x98] sm:$0xff]   ;;  %v1777_v23 = vld [vmem:[%s2164_s1 + $0x90] sm:$0xff]  }
  0x14   : > { %1624 = vmatpush3.bf16.msra.mxu1 %v1761_v7  ;;  %1561 = vmatprep.subr.bf16.mxu0 %v1762_v8  ;;  %v1778_v24 = vld [vmem:[%s2164_s1 + $0x48] sm:$0xff]   ;;  %v1782_v28 = vld [vmem:[%s2164_s1 + $0x40] sm:$0xff]   ;;  %v1792_v36 = vld [vmem:[%s2164_s1 + $0x118] sm:$0xff]  }
  0x15   : > { %1625 = vmatprep.subr.bf16.mxu1 %v1763_v9  ;;  %v1779_v25 = vld [vmem:[%s2164_s1 + $0xc8] sm:$0xff]   ;;  %v1783_v29 = vld [vmem:[%s2164_s1 + $0xc0] sm:$0xff]   ;;  %v1805_v42 = vld [vmem:[%s2164_s1 + $0x110] sm:$0xff]  }
  0x16   : > { %v1780_v26 = vld [vmem:[%s2164_s1 + $0x8] sm:$0xff]   ;;  %v1784_v30 = vld [vmem:[%s2164_s1] sm:$0xff]   ;;  %v1801_v43 = vld [vmem:[%s2012_s12 + $0x5c] ss:$20 sps:$4 sm:$0xff]  }
  0x17   : > { %1562 = vmatpush3.bf16.msra.mxu0 %v1764_v10  ;;  %v1781_v27 = vld [vmem:[%s2164_s1 + $0x88] sm:$0xff]   ;;  %v1785_v31 = vld [vmem:[%s2164_s1 + $0x80] sm:$0xff]   ;;  %v1806_v47 = vld [vmem:[%s2012_s12 + $0x7c] ss:$20 sps:$4 sm:$0xff]  }
  0x18   : > { %1626 = vmatpush3.bf16.msra.mxu1 %v1765_v11  ;;  %1563 = vmatprep.subr.bf16.mxu0 %v1766_v12  ;;  %v1786_v32 = vld [vmem:[%s2012_s12] ss:$20 sps:$4 sm:$0xff]   ;;  %v1788_v33 = vld [vmem:[%s2012_s12 + $0x4] ss:$20 sps:$4 sm:$0xff]   ;;  %v1789_v34 = vld [vmem:[%s2012_s12 + $0x8] ss:$20 sps:$4 sm:$0xff]  }
  0x19   : > { %1627 = vmatprep.subr.bf16.mxu1 %v1767_v13  ;;  %v1791_v35 = vld [vmem:[%s2012_s12 + $0xc] ss:$20 sps:$4 sm:$0xff]   ;;  %863 = vmatprep.mubr.bf16.mxu0 %v1788_v33  ;;  %v1795_v38 = vld [vmem:[%s2012_s12 + $0x34] ss:$20 sps:$4 sm:$0xff]   ;;  %v1798_v40 = vld [vmem:[%s2012_s12 + $0x30] ss:$20 sps:$4 sm:$0xff]  }
  0x1a   : > { %960 = vmatprep.mubr.bf16.mxu1 %v1791_v35  ;;  %v1793_v37 = vld [vmem:[%s2012_s12 + $0x2c] ss:$20 sps:$4 sm:$0xff]   ;;  %v1797_v39 = vld [vmem:[%s2012_s12 + $0x28] ss:$20 sps:$4 sm:$0xff]   ;;  %v1803_v44 = vld [vmem:[%s2012_s12 + $0x50] ss:$20 sps:$4 sm:$0xff]  }
  0x1b   : > { %1564 = vmatpush3.bf16.msra.mxu0 %v1768_v14  ;;  %v1799_v41 = vld [vmem:[%s2012_s12 + $0x54] ss:$20 sps:$4 sm:$0xff]   ;;  %v1804_v45 = vld [vmem:[%s2012_s12 + $0x58] ss:$20 sps:$4 sm:$0xff]   ;;  %v1831_v49 = vld [vmem:[%s2164_s1 + $0x100] sm:$0xff]  }
  0x1c   : > { %1628 = vmatpush3.bf16.msra.mxu1 %v1769_v15  ;;  %1565 = vmatprep.subr.bf16.mxu0 %v1770_v16  ;;  %v1818_v46 = vld [vmem:[%s2164_s1 + $0x108] sm:$0xff]   ;;  %v1808_v48 = vld [vmem:[%s2012_s12 + $0x84] ss:$20 sps:$4 sm:$0xff]   ;;  %v1811_v51 = vld [vmem:[%s2012_s12 + $0x80] ss:$20 sps:$4 sm:$0xff]  }
  0x1d   : > { %1629 = vmatprep.subr.bf16.mxu1 %v1771_v17  ;;  %v1810_v50 = vld [vmem:[%s2012_s12 + $0x78] ss:$20 sps:$4 sm:$0xff]   ;;  %v1816_v54 = vld [vmem:[%s2012_s12 + $0xa0] ss:$20 sps:$4 sm:$0xff]   ;;  %v1817_v55 = vld [vmem:[%s2012_s12 + $0xa8] ss:$20 sps:$4 sm:$0xff]  }
  0x1e   : > { %v1812_v52 = vld [vmem:[%s2012_s12 + $0xa4] ss:$20 sps:$4 sm:$0xff]   ;;  %v1814_v53 = vld [vmem:[%s2012_s12 + $0xac] ss:$20 sps:$4 sm:$0xff]   ;;  %v1821_v57 = vld [vmem:[%s2012_s12 + $0xd4] ss:$20 sps:$4 sm:$0xff]  }
  0x1f   : > { %1566 = vmatpush3.bf16.msra.mxu0 %v1772_v18  ;;  %v1819_v56 = vld [vmem:[%s2012_s12 + $0xcc] ss:$20 sps:$4 sm:$0xff]   ;;  %v1823_v58 = vld [vmem:[%s2012_s12 + $0xc8] ss:$20 sps:$4 sm:$0xff]   ;;  %v1824_v59 = vld [vmem:[%s2012_s12 + $0xd0] ss:$20 sps:$4 sm:$0xff]  }
  0x20   : > { %1630 = vmatpush3.bf16.msra.mxu1 %v1773_v19  ;;  %1567 = vmatprep.subr.bf16.mxu0 %v1774_v20  ;;  %v1825_v60 = vld [vmem:[%s2012_s12 + $0xf4] ss:$20 sps:$4 sm:$0xff]   ;;  %v1827_v61 = vld [vmem:[%s2012_s12 + $0xfc] ss:$20 sps:$4 sm:$0xff]   ;;  %v1830_v63 = vld [vmem:[%s2012_s12 + $0xf8] ss:$20 sps:$4 sm:$0xff]  }
  0x21   : > { %1631 = vmatprep.subr.bf16.mxu1 %v1775_v21  ;;  %v1829_v62 = vld [vmem:[%s2012_s12 + $0xf0] ss:$20 sps:$4 sm:$0xff]   ;;  %v1836_v2 = vld [vmem:[%s2012_s12 + $0x118] ss:$20 sps:$4 sm:$0xff]   ;;  %v1837_v3 = vld [vmem:[%s2012_s12 + $0x120] ss:$20 sps:$4 sm:$0xff]  }
  0x22   : > { %v1832_v0 = vld [vmem:[%s2012_s12 + $0x11c] ss:$20 sps:$4 sm:$0xff]   ;;  %v1834_v1 = vld [vmem:[%s2012_s12 + $0x124] ss:$20 sps:$4 sm:$0xff]   ;;  %v1842_v8 = vld [vmem:[%s2012_s12 + $0x60] ss:$20 sps:$4 sm:$0xff]  }
  0x23   : > { %1568 = vmatpush3.bf16.msra.mxu0 %v1776_v22  ;;  %v1838_v4 = vld [vmem:[%s2012_s12 + $0x10] ss:$20 sps:$4 sm:$0xff]   ;;  %v1840_v6 = vld [vmem:[%s2012_s12 + $0x38] ss:$20 sps:$4 sm:$0xff]   ;;  %v1843_v9 = vld [vmem:[%s2012_s12 + $0x100] ss:$20 sps:$4 sm:$0xff]  }
  0x24   : > { %1632 = vmatpush3.bf16.msra.mxu1 %v1777_v23  ;;  %1569 = vmatprep.subr.bf16.mxu0 %v1778_v24  ;;  %v1839_v5 = vld [vmem:[%s2012_s12 + $0xb0] ss:$20 sps:$4 sm:$0xff]   ;;  %v1841_v7 = vld [vmem:[%s2012_s12 + $0xd8] ss:$20 sps:$4 sm:$0xff]   ;;  %v1844_v10 = vld [vmem:[%s2012_s12 + $0x88] ss:$20 sps:$4 sm:$0xff]  }
  0x25   : > { %1633 = vmatprep.subr.bf16.mxu1 %v1779_v25  ;;  %v1845_v11 = vld [vmem:[%s2012_s12 + $0x128] ss:$20 sps:$4 sm:$0xff]  }
  0x27   : > { %1570 = vmatpush3.bf16.msra.mxu0 %v1780_v26 }
  0x28   : > { %1634 = vmatpush3.bf16.msra.mxu1 %v1781_v27  ;;  %1571 = vmatprep.subr.bf16.mxu0 %v1782_v28 }
  0x29   : > { %1635 = vmatprep.subr.bf16.mxu1 %v1783_v29 }
  0x2b   : > { %1572 = vmatpush3.bf16.msra.mxu0 %v1784_v30 }
  0x2c   : > { %1636 = vmatpush3.bf16.msra.mxu1 %v1785_v31  ;;  %1697 = vmatprep.subr.bf16.mxu0 %v1792_v36 }
  0x2d   : > { %1721 = vmatprep.subr.bf16.mxu1 %v1792_v36 }
  0x2e   : > { %864 = vmatmul.mubr.bf16.vlgmr.msra.gmra.mxu0 %v1786_v32 }
  0x2f   : > { %961 = vmatmul.mubr.bf16.vlgmr.msra.gmra.mxu1 %v1789_v34  ;;  %1698 = vmatpush3.bf16.msra.mxu0 %v1792_v36 }
  0x30   : > { %1725 = vmatpush3.bf16.msra.mxu1 %v1792_v36  ;;  %871 = vmatprep.mubr.bf16.mxu0 %v1793_v37 }
  0x31   : > { %968 = vmatprep.mubr.bf16.mxu1 %v1795_v38  ;;  %1699 = vmatprep.subr.bf16.mxu0 %v1805_v42 }
  0x32   : > { %1722 = vmatprep.subr.bf16.mxu1 %v1805_v42 }
  0x33   : > { %1700 = vmatpush3.bf16.msra.mxu0 %v1805_v42 }
  0x34   : > { %1726 = vmatpush3.bf16.msra.mxu1 %v1805_v42  ;;  %1701 = vmatprep.subr.bf16.mxu0 %v1818_v46 }
  0x35   : > { %1723 = vmatprep.subr.bf16.mxu1 %v1818_v46 }
  0x36   : > { %872 = vmatmul.mubr.bf16.gmra.mxu0 %v1797_v39 }
  0x37   : > { %969 = vmatmul.mubr.bf16.gmra.mxu1 %v1798_v40  ;;  %879 = vmatprep.mubr.bf16.mxu0 %v1799_v41 }
  0x38   : > { %976 = vmatprep.mubr.bf16.mxu1 %v1801_v43  ;;  %1702 = vmatpush3.bf16.msra.mxu0 %v1818_v46 }
  0x39   : > { %1727 = vmatpush3.bf16.msra.mxu1 %v1818_v46  ;;  %1703 = vmatprep.subr.bf16.mxu0 %v1831_v49 }
  0x3a   : > { %1724 = vmatprep.subr.bf16.mxu1 %v1831_v49 }
  0x3c   : > { %1704 = vmatpush3.bf16.msra.mxu0 %v1831_v49 }
  0x3d   : > { %1728 = vmatpush3.bf16.msra.mxu1 %v1831_v49 }
  0x3e   : > { %880 = vmatmul.mubr.bf16.gmra.mxu0 %v1803_v44 }
  0x3f   : > { %977 = vmatmul.mubr.bf16.gmra.mxu1 %v1804_v45  ;;  %887 = vmatprep.mubr.bf16.mxu0 %v1806_v47 }
  0x40   : > { %984 = vmatprep.mubr.bf16.mxu1 %v1808_v48 }
  0x46   : > { %888 = vmatmul.mubr.bf16.gmra.mxu0 %v1810_v50 }
  0x47   : > { %985 = vmatmul.mubr.bf16.gmra.mxu1 %v1811_v51  ;;  %895 = vmatprep.mubr.bf16.mxu0 %v1812_v52 }
  0x48   : > { %992 = vmatprep.mubr.bf16.mxu1 %v1814_v53 }
  0x4e   : > { %896 = vmatmul.mubr.bf16.gmra.mxu0 %v1816_v54 }
  0x4f   : > { %993 = vmatmul.mubr.bf16.gmra.mxu1 %v1817_v55  ;;  %903 = vmatprep.mubr.bf16.mxu0 %v1819_v56 }
  0x50   : > { %1000 = vmatprep.mubr.bf16.mxu1 %v1821_v57 }
  0x56   : > { %904 = vmatmul.mubr.bf16.gmra.mxu0 %v1823_v58 }
  0x57   : > { %1001 = vmatmul.mubr.bf16.gmra.mxu1 %v1824_v59  ;;  %911 = vmatprep.mubr.bf16.mxu0 %v1825_v60 }
  0x58   : > { %1008 = vmatprep.mubr.bf16.mxu1 %v1827_v61 }
  0x5e   : > { %912 = vmatmul.mubr.bf16.gmra.mxu0 %v1829_v62 }
  0x5f   : > { %1009 = vmatmul.mubr.bf16.gmra.mxu1 %v1830_v63  ;;  %919 = vmatprep.mubr.bf16.mxu0 %v1832_v0 }
  0x60   : > { %1016 = vmatprep.mubr.bf16.mxu1 %v1834_v1 }
  0x66   : > { %920 = vmatmul.mubr.bf16.gmra.mxu0 %v1836_v2 }
  0x67   : > { %1017 = vmatmul.mubr.bf16.gmra.mxu1 %v1837_v3  ;;  %1705 = vmatprep.mubr.msk.bf16.mxu0 %vm806_vm0, %v1838_v4 }
  0x68   : > { %1713 = vmatprep.mubr.msk.bf16.mxu1 %vm806_vm0, %v1839_v5 }
  0x6e   : > { %1706 = vmatmul.mubr.msk.bf16.vlgmr.msra.gmra.mxu0 %vm806_vm0, %v1840_v6 }
  0x6f   : > { %1714 = vmatmul.mubr.msk.bf16.vlgmr.msra.gmra.mxu1 %vm806_vm0, %v1841_v7  ;;  %1709 = vmatprep.mubr.msk.bf16.mxu0 %vm806_vm0, %v1842_v8 }
  0x70   : > { %1717 = vmatprep.mubr.msk.bf16.mxu1 %vm806_vm0, %v1843_v9 }
  0x76   : > { %1710 = vmatmul.mubr.msk.bf16.gmra.mxu0 %vm806_vm0, %v1844_v10 }
  0x77   : > { %1718 = vmatmul.mubr.msk.bf16.gmra.mxu1 %vm806_vm0, %v1845_v11 }
  0xee   : > { %v1573_v12 = vpop.f32.mrf.mxu0 }
  0xef   : > { %v1637_v13 = vpop.f32.mrf.mxu1 }
  0xf0   : > { %v1574_v14 = vpop.f32.mrf.mxu0 }
  0xf1   : > { %v1575_v15 = vadd.f32 %v1574_v14, %v1573_v12  ;;  %v1638_v16 = vpop.f32.mrf.mxu1 }
  0xf2   : > { %v1639_v17 = vadd.f32 %v1638_v16, %v1637_v13  ;;  %v1576_v18 = vpop.f32.mrf.mxu0 }
  0xf3   : > { %v1640_v19 = vpop.f32.mrf.mxu1 }
  0xf4   : > { %v1577_v20 = vpop.f32.mrf.mxu0  ;;  %v2080_v21 = vadd.f32 %v1639_v17, %v1575_v15 }
  0xf5   : > { %v1641_v22 = vpop.f32.mrf.mxu1  ;;  %v1578_v8 = vadd.f32 %v1577_v20, %v1576_v18 }
  0xf6   : > { %2168 = vst [vmem:[#allocation2_spill] sm:$0xff] %v2080_v21  ;;  %v1579_v23 = vpop.f32.mrf.mxu0  ;;  %v1642_v9 = vadd.f32 %v1641_v22, %v1640_v19 }
  0xf7   : > { %v1643_v24 = vpop.f32.mrf.mxu1 }
  0xf8   : > { %v1580_v25 = vpop.f32.mrf.mxu0 }
  0xf9   : > { %v1644_v26 = vpop.f32.mrf.mxu1  ;;  %v1581_v11 = vadd.f32 %v1580_v25, %v1579_v23 }
  0xfa   : > { %v1582_v27 = vpop.f32.mrf.mxu0  ;;  %v1645_v12 = vadd.f32 %v1644_v26, %v1643_v24 }
  0xfb   : > { %v1646_v28 = vpop.f32.mrf.mxu1 }
  0xfc   : > { %v1583_v29 = vpop.f32.mrf.mxu0 }
  0xfd   : > { %v1647_v30 = vpop.f32.mrf.mxu1  ;;  %v1584_v13 = vadd.f32 %v1583_v29, %v1582_v27 }
  0xfe   : > { %v1585_v31 = vpop.f32.mrf.mxu0  ;;  %v1648_v14 = vadd.f32 %v1647_v30, %v1646_v28 }
  0xff   : > { %v1649_v32 = vpop.f32.mrf.mxu1 }
 0x100   : > { %v1586_v33 = vpop.f32.mrf.mxu0 }
 0x101   : > { %v1650_v34 = vpop.f32.mrf.mxu1  ;;  %v1587_v16 = vadd.f32 %v1586_v33, %v1585_v31 }
 0x102   : > { %v1588_v35 = vpop.f32.mrf.mxu0  ;;  %v1651_v17 = vadd.f32 %v1650_v34, %v1649_v32  ;;  %v971_v34 = vadd.f32 %v1645_v12, %v1581_v11 }
 0x103   : > { %v1652_v36 = vpop.f32.mrf.mxu1 }
 0x104   : > { %v1589_v37 = vpop.f32.mrf.mxu0 }
 0x105   : > { %v1653_v38 = vpop.f32.mrf.mxu1  ;;  %v1590_v21 = vadd.f32 %v1589_v37, %v1588_v35  ;;  %v974_v35 = vadd.f32 %v1648_v14, %v1584_v13 }
 0x106   : > { %v1591_v39 = vpop.f32.mrf.mxu0 }
 0x107   : > { %v1655_v40 = vpop.f32.mrf.mxu1 }
 0x108   : > { %v1592_v41 = vpop.f32.mrf.mxu0 }
 0x109   : > { %v1656_v42 = vpop.f32.mrf.mxu1 }
 0x10a   : > { %v1594_v43 = vpop.f32.mrf.mxu0  ;;  %v1657_v18 = vadd.f32 %v1656_v42, %v1655_v40 }
 0x10b   : > { %v1658_v44 = vpop.f32.mrf.mxu1 }
 0x10c   : > { %v1595_v45 = vpop.f32.mrf.mxu0 }
 0x10d   : > { %v1659_v46 = vpop.f32.mrf.mxu1  ;;  %v1596_v23 = vadd.f32 %v1595_v45, %v1594_v43 }
 0x10e   : > { %v1597_v47 = vpop.f32.mrf.mxu0  ;;  %v1660_v25 = vadd.f32 %v1659_v46, %v1658_v44 }
 0x10f   : > { %v1661_v48 = vpop.f32.mrf.mxu1 }
 0x110   : > { %v1598_v49 = vpop.f32.mrf.mxu0 }
 0x111   : > { %v1662_v50 = vpop.f32.mrf.mxu1  ;;  %v1599_v24 = vadd.f32 %v1598_v49, %v1597_v47  ;;  %v2095_v47 = vadd.f32 %v1660_v25, %v1596_v23 }
 0x112   : > { %v1600_v51 = vpop.f32.mrf.mxu0  ;;  %v1663_v26 = vadd.f32 %v1662_v50, %v1661_v48 }
 0x113   : > { %v1664_v52 = vpop.f32.mrf.mxu1 }
 0x114   : > { %v1601_v53 = vpop.f32.mrf.mxu0  ;;  %v995_v50 = vadd.f32 %v1663_v26, %v1599_v24 }
 0x115   : > { %v1665_v54 = vpop.f32.mrf.mxu1  ;;  %v1602_v29 = vadd.f32 %v1601_v53, %v1600_v51 }
 0x116   : > { %v1603_v55 = vpop.f32.mrf.mxu0  ;;  %v1666_v28 = vadd.f32 %v1665_v54, %v1664_v52 }
 0x117   : > { %v1667_v56 = vpop.f32.mrf.mxu1 }
 0x118   : > { %v1604_v57 = vpop.f32.mrf.mxu0  ;;  %v998_v52 = vadd.f32 %v1666_v28, %v1602_v29 }
 0x119   : > { %v1668_v58 = vpop.f32.mrf.mxu1  ;;  %v1605_v20 = vadd.f32 %v1604_v57, %v1603_v55 }
 0x11a   : > { %v1606_v59 = vpop.f32.mrf.mxu0  ;;  %v1669_v19 = vadd.f32 %v1668_v58, %v1667_v56  ;;  %v2172_v56 = vld [vmem:[#allocation2_spill] sm:$0xff] }
 0x11b   : > { %v1670_v60 = vpop.f32.mrf.mxu1 }
 0x11c   : > { %v1607_v61 = vpop.f32.mrf.mxu0 }
 0x11d   : > { %v1671_v62 = vpop.f32.mrf.mxu1  ;;  %v1608_v30 = vadd.f32 %v1607_v61, %v1606_v59 }
 0x11e   : > { %v1609_v63 = vpop.f32.mrf.mxu0  ;;  %v1672_v31 = vadd.f32 %v1671_v62, %v1670_v60 }
 0x11f   : > { %v1673_v0 = vpop.f32.mrf.mxu1 }
 0x120   : > { %v1610_v1 = vpop.f32.mrf.mxu0  ;;  %v1006_v51 = vadd.f32 %v1672_v31, %v1608_v30 }
 0x121   : > { %v1674_v2 = vpop.f32.mrf.mxu1  ;;  %v1611_v43 = vadd.f32 %v1610_v1, %v1609_v63 }
 0x122   : > { %v2082_v3 = vpop.f32.mrf.mxu0  ;;  %v1675_v44 = vadd.f32 %v1674_v2, %v1673_v0 }
 0x123   : > { %2169 = vst [vmem:[#allocation3_spill] sm:$0xff] %v2082_v3  ;;  %v2084_v4 = vpop.f32.mrf.mxu1  ;;  %v1654_v3 = vadd.f32 %v1653_v38, %v1652_v36  ;;  %v966_v36 = vadd.f32 %v1642_v9, %v1578_v8  ;;  %v2091_v38 = vld [vmem:[%s2165_s2] ss:$0 sm:$0xff] }
 0x124   : > { %2170 = vst [vmem:[#allocation4_spill] sm:$0xff] %v2084_v4  ;;  %v1613_v5 = vpop.f32.mrf.mxu0 }
 0x125   : > { %v2086_v6 = vpop.f32.mrf.mxu1  ;;  %v2093_v42 = vadd.f32 %v1654_v3, %v1590_v21  ;;  %v2101_v21 = vld [vmem:[%s2166_s3] ss:$0 sm:$0xff] }
 0x126   : > { %2171 = vst [vmem:[#allocation5_spill] sm:$0xff] %v2086_v6  ;;  %v1615_v7 = vpop.f32.mrf.mxu0  ;;  %v1593_v6 = vadd.f32 %v1592_v41, %v1591_v39  ;;  %v1003_v39 = vadd.f32 %v1669_v19, %v1605_v20  ;;  %v979_v41 = vadd.f32 %v1651_v17, %v1587_v16 }
 0x127   : > { %v1679_v10 = vpop.f32.mrf.mxu1 }
 0x128   : > { %v1616_v15 = vpop.f32.mrf.mxu0  ;;  %v987_v40 = vadd.f32 %v1657_v18, %v1593_v6  ;;  %v1011_v6 = vadd.f32 %v1675_v44, %v1611_v43 }
 0x129   : > { %v1680_v4 = vpop.f32.mrf.mxu1  ;;  %v1617_v53 = vadd.f32 %v1616_v15, %v1615_v7 }
 0x12a   : > { %v1618_v22 = vpop.f32.mrf.mxu0  ;;  %v1681_v54 = vadd.f32 %v1680_v4, %v1679_v10  ;;  %v2173_v0 = vld [vmem:[#allocation3_spill] sm:$0xff] }
 0x12b   : > { %v1682_v27 = vpop.f32.mrf.mxu1  ;;  %v1614_v1 = vadd.f32 %v1613_v5, %v2173_v0  ;;  %v2174_v7 = vld [vmem:[#allocation4_spill] sm:$0xff] }
 0x12c   : > { %v1619_v33 = vpop.f32.mrf.mxu0  ;;  %v1019_v17 = vadd.f32 %v1681_v54, %v1617_v53 }
 0x12d   : > { %v1683_v32 = vpop.f32.mrf.mxu1  ;;  %v1620_v59 = vadd.f32 %v1619_v33, %v1618_v22  ;;  %v2175_v8 = vld [vmem:[#allocation5_spill] sm:$0xff] }
 0x12e   : > { %v1707_v37 = vpop.f32.mrf.mxu0  ;;  %v1684_v60 = vadd.f32 %v1683_v32, %v1682_v27  ;;  %v1678_v9 = vadd.f32 %v2175_v8, %v2174_v7 }
 0x12f   : > { %v1068_v45 = vadd.f32 %v1707_v37, %v971_v34  ;;  %v1715_v46 = vpop.f32.mrf.mxu1 }
 0x130   : > { %v1100_v48 = vadd.f32 %v1715_v46, %v1003_v39  ;;  %v1059_v49 = vpop.f32.mrf.mxu0  ;;  %v1022_v23 = vadd.f32 %v1684_v60, %v1620_v59  ;;  %v1014_v60 = vadd.f32 %v1678_v9, %v1614_v1 }
 0x131   : > { %v1131_v55 = vmul.f32 %v2091_v38, %v1068_v45  ;;  %v1060_v57 = vadd.f32 %v1059_v49, %v2172_v56  ;;  %v1091_v58 = vpop.f32.mrf.mxu1 }
 0x132   : > { %v1139_v61 = vmul.f32 %v2091_v38, %v1100_v48  ;;  %v1092_v62 = vadd.f32 %v1091_v58, %v995_v50  ;;  %v1708_v63 = vpop.f32.mrf.mxu0 }
 0x133   : > { %v1129_v2 = vmul.f32 %v2091_v38, %v1060_v57  ;;  %v1071_v3 = vadd.f32 %v1708_v63, %v974_v35  ;;  %v1716_v4 = vpop.f32.mrf.mxu1  ;;  %v1154_v10 = vadd.f32 %v2101_v21, %v1131_v55 }
 0x134   : > { %v1137_v11 = vmul.f32 %v2091_v38, %v1092_v62  ;;  %v1103_v12 = vadd.f32 %v1716_v4, %v1006_v51  ;;  %v1062_v13 = vpop.f32.mrf.mxu0  ;;  %v1162_v14 = vadd.f32 %v2101_v21, %v1139_v61 }
 0x135   : > { %v1132_v15 = vmul.f32 %v2091_v38, %v1071_v3  ;;  %v1063_v5 = vadd.f32 %v1062_v13, %v966_v36  ;;  %v1094_v16 = vpop.f32.mrf.mxu1  ;;  %v1152_v18 = vadd.f32 %v2101_v21, %v1129_v2  ;;  %v1170_v28 = vmax.f32 %v1154_v10, 0.0 }
 0x136   : > { %v1140_v20 = vmul.f32 %v2091_v38, %v1103_v12  ;;  %v1095_v19 = vadd.f32 %v1094_v16, %v998_v52  ;;  %v1711_v22 = vpop.f32.mrf.mxu0  ;;  %v1160_v25 = vadd.f32 %v2101_v21, %v1137_v11  ;;  %v1178_v34 = vmax.f32 %v1162_v14, 0.0 }
 0x137   : > { %v1155_v24 = vadd.f32 %v2101_v21, %v1132_v15  ;;  %v1130_v26 = vmul.f32 %v2091_v38, %v1063_v5  ;;  %v1084_v27 = vadd.f32 %v1711_v22, %v987_v40  ;;  %v1719_v29 = vpop.f32.mrf.mxu1  ;;  %v1168_v43 = vmax.f32 %v1152_v18, 0.0 }
 0x138   : > { %v1163_v30 = vadd.f32 %v2101_v21, %v1140_v20  ;;  %v1138_v31 = vmul.f32 %v2091_v38, %v1095_v19  ;;  %v1116_v33 = vadd.f32 %v1719_v29, %v1019_v17  ;;  %v1075_v32 = vpop.f32.mrf.mxu0  ;;  %v1176_v48 = vmax.f32 %v1160_v25, 0.0 }
 0x139   : > { %v1171_v35 = vmax.f32 %v1155_v24, 0.0  ;;  %v1153_v36 = vadd.f32 %v2101_v21, %v1130_v26  ;;  %v1076_v37 = vadd.f32 %v1075_v32, %v979_v41  ;;  %v1107_v39 = vpop.f32.mrf.mxu1  ;;  %v1135_v51 = vmul.f32 %v2091_v38, %v1084_v27 }
 0x13a   : > { %v1179_v40 = vmax.f32 %v1163_v30, 0.0  ;;  %v1161_v44 = vadd.f32 %v2101_v21, %v1138_v31  ;;  %v1108_v45 = vadd.f32 %v1107_v39, %v1011_v6  ;;  %v1712_v46 = vpop.f32.mrf.mxu0  ;;  %v1143_v54 = vmul.f32 %v2091_v38, %v1116_v33 }
 0x13b   : > { %v1518_v49 = vpack.c.bf16 %v1171_v35, %v1170_v28  ;;  %v1169_v50 = vmax.f32 %v1153_v36, 0.0  ;;  %v1720_v41 = vpop.f32.mrf.mxu1  ;;  %v1133_v55 = vmul.f32 %v2091_v38, %v1076_v37  ;;  %v1087_v59 = vadd.f32 %v1712_v46, %v2095_v47 }
 0x13c   : > { %v1538_v52 = vpack.c.bf16 %v1179_v40, %v1178_v34  ;;  %v1177_v53 = vmax.f32 %v1161_v44, 0.0  ;;  %v1078_v56 = vpop.f32.mrf.mxu0  ;;  %v1141_v58 = vmul.f32 %v2091_v38, %v1108_v45  ;;  %v1119_v63 = vadd.f32 %v1720_v41, %v1022_v23 }
 0x13d   : > { %1550 = vst [vmem:[%s2125_s15 + $0x8] sm:$0xff] %v1518_v49   ;;  %v1513_v57 = vpack.c.bf16 %v1169_v50, %v1168_v43  ;;  %v1110_v61 = vpop.f32.mrf.mxu1  ;;  %v1158_v0 = vadd.f32 %v2101_v21, %v1135_v51  ;;  %v1136_v2 = vmul.f32 %v2091_v38, %v1087_v59  ;;  %v1079_v3 = vadd.f32 %v1078_v56, %v2093_v42 }
 0x13e   : > { %1554 = vst [vmem:[%s2125_s15 + $0x28] sm:$0xff] %v1538_v52   ;;  %v1533_v62 = vpack.c.bf16 %v1177_v53, %v1176_v48  ;;  %v1111_v4 = vadd.f32 %v1110_v61, %v1014_v60  ;;  %v1166_v6 = vadd.f32 %v2101_v21, %v1143_v54  ;;  %v1156_v7 = vadd.f32 %v2101_v21, %v1133_v55 }
 0x13f   : > { %1514 = vst [vmem:[%s2125_s15] sm:$0xff] %v1513_v57   ;;  %v1144_v47 = vmul.f32 %v2091_v38, %v1119_v63  ;;  %v1164_v1 = vadd.f32 %v2101_v21, %v1141_v58  ;;  %v1159_v8 = vadd.f32 %v2101_v21, %v1136_v2  ;;  %v1134_v9 = vmul.f32 %v2091_v38, %v1079_v3 }
 0x140   : > { %1553 = vst [vmem:[%s2125_s15 + $0x20] sm:$0xff] %v1533_v62   ;;  %v1142_v10 = vmul.f32 %v2091_v38, %v1111_v4  ;;  %v1174_v42 = vmax.f32 %v1158_v0, 0.0  ;;  %v1182_v15 = vmax.f32 %v1166_v6, 0.0  ;;  %v1172_v5 = vmax.f32 %v1156_v7, 0.0 }
 0x141   : > { %v1167_v11 = vadd.f32 %v2101_v21, %v1144_v47  ;;  %v1175_v12 = vmax.f32 %v1159_v8, 0.0  ;;  %v1157_v13 = vadd.f32 %v2101_v21, %v1134_v9  ;;  %v1180_v17 = vmax.f32 %v1164_v1, 0.0 }
 0x142   : > { %v1165_v14 = vadd.f32 %v2101_v21, %v1142_v10 }
 0x143   : > { %v1183_v16 = vmax.f32 %v1167_v11, 0.0  ;;  %v1528_v18 = vpack.c.bf16 %v1175_v12, %v1174_v42  ;;  %v1173_v20 = vmax.f32 %v1157_v13, 0.0 }
 0x144   : > { %v1181_v19 = vmax.f32 %v1165_v14, 0.0 }
 0x145   : > { %v1548_v22 = vpack.c.bf16 %v1183_v16, %v1182_v15  ;;  %1552 = vst [vmem:[%s2125_s15 + $0x18] sm:$0xff] %v1528_v18   ;;  %v1523_v38 = vpack.c.bf16 %v1173_v20, %v1172_v5 }
 0x146   : > { %v1543_v23 = vpack.c.bf16 %v1181_v19, %v1180_v17 }
 0x147   : > { %1556 = vst [vmem:[%s2125_s15 + $0x38] sm:$0xff] %v1548_v22   ;;  %1551 = vst [vmem:[%s2125_s15 + $0x10] sm:$0xff] %v1523_v38  }
 0x148   : > { %1555 = vst [vmem:[%s2125_s15 + $0x30] sm:$0xff] %v1543_v23  }
 0x149 PF: > { %s14_s17 = sadd.s32 1, %s1868_s17   ;;  %s2176_s15 = smov %s1864_s16 }
 0x14a   : > { %p11_p5 = scmp.ge.s32.totalorder %s14_s17, 5   ;;  %s2177_s16 = smov %s2179_s18 }
 0x14c   :  { %13 = sbr.rel (!%p11_p5) target bundleno = 2 (0x2), region = 75 }

// kernel: fall_detection_forward.16
= control target key start
LH: loop header
LB: loop body
LE: loop exit
PB: predicated region body
PF: predicated region fallthrough
CT: control target
= control target key end

     0   :  { %s311_s0 = inlined_call_operand.vmem [shape: bf16[16,2,6,256], index: 0, kind: input, shape index: {}]   ;;  %s312_s1 = inlined_call_operand.vmem [shape: bf16[16,6,128], index: 1, kind: output, shape index: {}]  }
   0x1   :  { %v8_v0 = vld [vmem:[%s311_s0] sm:$0x77]  ;;  %v141_v1 = vld [vmem:[%s311_s0 + $0x8] sm:$0x77]  ;;  %v9_v2 = vld [vmem:[%s311_s0 + $0x10] sm:$0x77] }
   0x2   :  { %v41_v3 = vmax.bf16 %v141_v1, %v8_v0  ;;  %v142_v4 = vld [vmem:[%s311_s0 + $0x18] sm:$0x77]  ;;  %v10_v5 = vld [vmem:[%s311_s0 + $0x20] sm:$0x77]  ;;  %v143_v6 = vld [vmem:[%s311_s0 + $0x28] sm:$0x77] }
   0x3   :  { %v42_v7 = vmax.bf16 %v142_v4, %v9_v2  ;;  %v43_v8 = vmax.bf16 %v143_v6, %v10_v5  ;;  %v11_v9 = vld [vmem:[%s311_s0 + $0x30] sm:$0x77]  ;;  %v144_v10 = vld [vmem:[%s311_s0 + $0x38] sm:$0x77]  ;;  %v12_v11 = vld [vmem:[%s311_s0 + $0x40] sm:$0x77] }
   0x4   :  { %v73_v12 = vrot.slane %v41_v3, 4  ;;  %v44_v13 = vmax.bf16 %v144_v10, %v11_v9  ;;  %v145_v14 = vld [vmem:[%s311_s0 + $0x48] sm:$0x77]  ;;  %v13_v15 = vld [vmem:[%s311_s0 + $0x50] sm:$0x77] }
   0x5   :  { %v74_v16 = vrot.slane %v42_v7, 4  ;;  %v75_v17 = vrot.slane %v43_v8, 4  ;;  %v45_v18 = vmax.bf16 %v145_v14, %v12_v11  ;;  %v146_v19 = vld [vmem:[%s311_s0 + $0x58] sm:$0x77]  ;;  %v14_v20 = vld [vmem:[%s311_s0 + $0x60] sm:$0x77] }
   0x6   :  { %v105_v21 = vmax.bf16 %v73_v12, %v41_v3  ;;  %v76_v22 = vrot.slane %v44_v13, 4  ;;  %v46_v23 = vmax.bf16 %v146_v19, %v13_v15  ;;  %v147_v24 = vld [vmem:[%s311_s0 + $0x68] sm:$0x77]  ;;  %v15_v25 = vld [vmem:[%s311_s0 + $0x70] sm:$0x77] }
   0x7   :  { %v106_v26 = vmax.bf16 %v74_v16, %v42_v7  ;;  %v107_v27 = vmax.bf16 %v75_v17, %v43_v8  ;;  %v77_v28 = vrot.slane %v45_v18, 4  ;;  %v47_v29 = vmax.bf16 %v147_v24, %v14_v20  ;;  %v148_v30 = vld [vmem:[%s311_s0 + $0x78] sm:$0x77]  ;;  %v16_v31 = vld [vmem:[%s311_s0 + $0x80] sm:$0x77] }
   0x8   :  { %121 = vst [vmem:[%s312_s1] sm:$0x7] %v105_v21  ;;  %v108_v32 = vmax.bf16 %v76_v22, %v44_v13  ;;  %v78_v33 = vrot.slane %v46_v23, 4  ;;  %v48_v34 = vmax.bf16 %v148_v30, %v15_v25  ;;  %v149_v35 = vld [vmem:[%s311_s0 + $0x88] sm:$0x77]  ;;  %v17_v36 = vld [vmem:[%s311_s0 + $0x90] sm:$0x77] }
   0x9   :  { %122 = vst [vmem:[%s312_s1 + $0x4] sm:$0x7] %v106_v26  ;;  %123 = vst [vmem:[%s312_s1 + $0x8] sm:$0x7] %v107_v27  ;;  %v109_v37 = vmax.bf16 %v77_v28, %v45_v18  ;;  %v79_v38 = vrot.slane %v47_v29, 4  ;;  %v49_v39 = vmax.bf16 %v149_v35, %v16_v31 }
   0xa   :  { %v150_v40 = vld [vmem:[%s311_s0 + $0x98] sm:$0x77]  ;;  %v18_v41 = vld [vmem:[%s311_s0 + $0xa0] sm:$0x77]  ;;  %124 = vst [vmem:[%s312_s1 + $0xc] sm:$0x7] %v108_v32  ;;  %v110_v42 = vmax.bf16 %v78_v33, %v46_v23 }
   0xb   :  { %v80_v43 = vrot.slane %v48_v34, 4  ;;  %v50_v44 = vmax.bf16 %v150_v40, %v17_v36  ;;  %v151_v45 = vld [vmem:[%s311_s0 + $0xa8] sm:$0x77]  ;;  %v19_v46 = vld [vmem:[%s311_s0 + $0xb0] sm:$0x77]  ;;  %v111_v47 = vmax.bf16 %v79_v38, %v47_v29  ;;  %v81_v48 = vrot.slane %v49_v39, 4 }
   0xc   :  { %125 = vst [vmem:[%s312_s1 + $0x10] sm:$0x7] %v109_v37  ;;  %v51_v49 = vmax.bf16 %v151_v45, %v18_v41  ;;  %v152_v50 = vld [vmem:[%s311_s0 + $0xb8] sm:$0x77]  ;;  %v20_v51 = vld [vmem:[%s311_s0 + $0xc0] sm:$0x77] }
   0xd   :  { %126 = vst [vmem:[%s312_s1 + $0x14] sm:$0x7] %v110_v42  ;;  %v112_v52 = vmax.bf16 %v80_v43, %v48_v34  ;;  %v82_v53 = vrot.slane %v50_v44, 4  ;;  %v52_v54 = vmax.bf16 %v152_v50, %v19_v46  ;;  %v153_v55 = vld [vmem:[%s311_s0 + $0xc8] sm:$0x77]  ;;  %v113_v57 = vmax.bf16 %v81_v48, %v49_v39 }
   0xe   :  { %v21_v56 = vld [vmem:[%s311_s0 + $0xd0] sm:$0x77]  ;;  %127 = vst [vmem:[%s312_s1 + $0x18] sm:$0x7] %v111_v47  ;;  %v83_v58 = vrot.slane %v51_v49, 4  ;;  %v53_v59 = vmax.bf16 %v153_v55, %v20_v51 }
   0xf   :  { %v154_v60 = vld [vmem:[%s311_s0 + $0xd8] sm:$0x77]  ;;  %v22_v61 = vld [vmem:[%s311_s0 + $0xe0] sm:$0x77]  ;;  %128 = vst [vmem:[%s312_s1 + $0x1c] sm:$0x7] %v112_v52  ;;  %v114_v62 = vmax.bf16 %v82_v53, %v50_v44 }
  0x10   :  { %v84_v63 = vrot.slane %v52_v54, 4  ;;  %v54_v0 = vmax.bf16 %v154_v60, %v21_v56  ;;  %v155_v1 = vld [vmem:[%s311_s0 + $0xe8] sm:$0x77]  ;;  %v23_v2 = vld [vmem:[%s311_s0 + $0xf0] sm:$0x77]  ;;  %v115_v3 = vmax.bf16 %v83_v58, %v51_v49  ;;  %v85_v4 = vrot.slane %v53_v59, 4 }
  0x11   :  { %129 = vst [vmem:[%s312_s1 + $0x20] sm:$0x7] %v113_v57  ;;  %v55_v5 = vmax.bf16 %v155_v1, %v22_v61  ;;  %v156_v6 = vld [vmem:[%s311_s0 + $0xf8] sm:$0x77]  ;;  %130 = vst [vmem:[%s312_s1 + $0x24] sm:$0x7] %v114_v62 }
  0x12   :  { %v116_v7 = vmax.bf16 %v84_v63, %v52_v54  ;;  %v86_v8 = vrot.slane %v54_v0, 4  ;;  %v56_v9 = vmax.bf16 %v156_v6, %v23_v2  ;;  %131 = vst [vmem:[%s312_s1 + $0x28] sm:$0x7] %v115_v3  ;;  %v117_v10 = vmax.bf16 %v85_v4, %v53_v59 }
  0x13   :  { %v87_v11 = vrot.slane %v55_v5, 4 }
  0x14   :  { %132 = vst [vmem:[%s312_s1 + $0x2c] sm:$0x7] %v116_v7  ;;  %v118_v12 = vmax.bf16 %v86_v8, %v54_v0  ;;  %v88_v13 = vrot.slane %v56_v9, 4  ;;  %133 = vst [vmem:[%s312_s1 + $0x30] sm:$0x7] %v117_v10 }
  0x15   :  { %v119_v14 = vmax.bf16 %v87_v11, %v55_v5 }
  0x16   :  { %134 = vst [vmem:[%s312_s1 + $0x34] sm:$0x7] %v118_v12  ;;  %v120_v15 = vmax.bf16 %v88_v13, %v56_v9 }
  0x17   :  { %135 = vst [vmem:[%s312_s1 + $0x38] sm:$0x7] %v119_v14 }
  0x18   :  { %136 = vst [vmem:[%s312_s1 + $0x3c] sm:$0x7] %v120_v15 }

// kernel: fall_detection_forward.18
= control target key start
LH: loop header
LB: loop body
LE: loop exit
PB: predicated region body
PF: predicated region fallthrough
CT: control target
= control target key end

     0   :  { %vm65_vm0 = vcmask 1041408   ;;  %vm66_vm1 = vsmask.f32 1280  ;;  %vm68_vm2 = vcmask 1043458   ;;  %vm69_vm3 = vsmask.f32 3328  ;;  %s234_s0 = inlined_call_operand.vmem [shape: bf16[8,2,3,512], index: 0, kind: input, shape index: {}]   ;;  %s235_s1 = inlined_call_operand.vmem [shape: bf16[8,3,256], index: 1, kind: output, shape index: {}]  }
   0x1   :  { %v8_v0 = vld [vmem:[%s234_s0] sm:$0xff]  ;;  %v100_v1 = vld [vmem:[%s234_s0 + $0x8] sm:$0xff]  ;;  %vm67_vm4 = vmand %vm65_vm0, %vm66_vm1 }
   0x2   :  { %v25_v2 = vmax.bf16 %v100_v1, %v8_v0  ;;  %vm70_vm5 = vmand %vm68_vm2, %vm69_vm3  ;;  %v9_v3 = vld [vmem:[%s234_s0 + $0x10] sm:$0xff]  ;;  %v101_v4 = vld [vmem:[%s234_s0 + $0x18] sm:$0xff] }
   0x3   :  { %v72_v6 = vld [vmem:[%s235_s1] sm:$0xf]  ;;  %v26_v7 = vmax.bf16 %v101_v4, %v9_v3  ;;  %v102_v9 = vld [vmem:[%s234_s0 + $0x28] sm:$0xff]  ;;  %vm139_vm6 = vmor %vm70_vm5, %vm67_vm4 }
   0x4   :  { %v41_v5 = vrot.slane %v25_v2, 4  ;;  %v10_v8 = vld [vmem:[%s234_s0 + $0x20] sm:$0xff]  ;;  %v11_v12 = vld [vmem:[%s234_s0 + $0x30] sm:$0xff]  ;;  %v103_v13 = vld [vmem:[%s234_s0 + $0x38] sm:$0xff] }
   0x5   :  { %v27_v11 = vmax.bf16 %v102_v9, %v10_v8  ;;  %v42_v15 = vrot.slane %v26_v7, 4  ;;  %v28_v16 = vmax.bf16 %v103_v13, %v11_v12  ;;  %v12_v17 = vld [vmem:[%s234_s0 + $0x40] sm:$0xff]  ;;  %v104_v18 = vld [vmem:[%s234_s0 + $0x48] sm:$0xff]  ;;  %v13_v22 = vld [vmem:[%s234_s0 + $0x50] sm:$0xff] }
   0x6   :  { %v57_v14 = vmax.bf16 %v41_v5, %v25_v2  ;;  %v75_v19 = vld [vmem:[%s235_s1 + $0x4] sm:$0xf]  ;;  %v29_v21 = vmax.bf16 %v104_v18, %v12_v17  ;;  %v105_v23 = vld [vmem:[%s234_s0 + $0x58] sm:$0xff]  ;;  %v78_v26 = vld [vmem:[%s235_s1 + $0x8] sm:$0xf] }
   0x7   :  { %v43_v20 = vrot.slane %v27_v11, 4  ;;  %v58_v25 = vmax.bf16 %v42_v15, %v26_v7  ;;  %v44_v27 = vrot.slane %v28_v16, 4  ;;  %v30_v28 = vmax.bf16 %v105_v23, %v13_v22  ;;  %v14_v29 = vld [vmem:[%s234_s0 + $0x60] sm:$0xff]  ;;  %v106_v30 = vld [vmem:[%s234_s0 + $0x68] sm:$0xff]  ;;  %v15_v35 = vld [vmem:[%s234_s0 + $0x70] sm:$0xff] }
   0x8   :  { %v73_v24 = vsel %vm139_vm6, %v57_v14, %v72_v6  ;;  %v81_v32 = vld [vmem:[%s235_s1 + $0xc] sm:$0xf]  ;;  %v45_v33 = vrot.slane %v29_v21, 4  ;;  %v31_v34 = vmax.bf16 %v106_v30, %v14_v29  ;;  %v107_v36 = vld [vmem:[%s234_s0 + $0x78] sm:$0xff]  ;;  %v84_v39 = vld [vmem:[%s235_s1 + $0x10] sm:$0xf] }
   0x9   :  { %74 = vst [vmem:[%s235_s1] sm:$0xf] %v73_v24  ;;  %v59_v31 = vmax.bf16 %v43_v20, %v27_v11  ;;  %v76_v37 = vsel %vm139_vm6, %v58_v25, %v75_v19  ;;  %v60_v38 = vmax.bf16 %v44_v27, %v28_v16  ;;  %v46_v40 = vrot.slane %v30_v28, 4  ;;  %v87_v44 = vld [vmem:[%s235_s1 + $0x14] sm:$0xf]  ;;  %v90_v48 = vld [vmem:[%s235_s1 + $0x18] sm:$0xf] }
   0xa   :  { %v32_v41 = vmax.bf16 %v107_v36, %v15_v35  ;;  %77 = vst [vmem:[%s235_s1 + $0x4] sm:$0xf] %v76_v37  ;;  %v61_v43 = vmax.bf16 %v45_v33, %v29_v21  ;;  %v47_v45 = vrot.slane %v31_v34, 4  ;;  %v93_v52 = vld [vmem:[%s235_s1 + $0x1c] sm:$0xf] }
   0xb   :  { %v79_v42 = vsel %vm139_vm6, %v59_v31, %v78_v26  ;;  %v82_v46 = vsel %vm139_vm6, %v60_v38, %v81_v32  ;;  %v62_v47 = vmax.bf16 %v46_v40, %v30_v28 }
   0xc   :  { %80 = vst [vmem:[%s235_s1 + $0x8] sm:$0xf] %v79_v42  ;;  %v48_v49 = vrot.slane %v32_v41, 4  ;;  %83 = vst [vmem:[%s235_s1 + $0xc] sm:$0xf] %v82_v46  ;;  %v85_v50 = vsel %vm139_vm6, %v61_v43, %v84_v39  ;;  %v63_v51 = vmax.bf16 %v47_v45, %v31_v34 }
   0xd   :  { %86 = vst [vmem:[%s235_s1 + $0x10] sm:$0xf] %v85_v50  ;;  %v88_v53 = vsel %vm139_vm6, %v62_v47, %v87_v44 }
   0xe   :  { %v64_v54 = vmax.bf16 %v48_v49, %v32_v41  ;;  %89 = vst [vmem:[%s235_s1 + $0x14] sm:$0xf] %v88_v53  ;;  %v91_v55 = vsel %vm139_vm6, %v63_v51, %v90_v48 }
   0xf   :  { %92 = vst [vmem:[%s235_s1 + $0x18] sm:$0xf] %v91_v55 }
  0x10   :  { %v94_v56 = vsel %vm139_vm6, %v64_v54, %v93_v52 }
  0x11   :  { %95 = vst [vmem:[%s235_s1 + $0x1c] sm:$0xf] %v94_v56 }

// kernel: fall_detection_forward.17
= control target key start
LH: loop header
LB: loop body
LE: loop exit
PB: predicated region body
PF: predicated region fallthrough
CT: control target
= control target key end

     0   :  { %s3286_s1 = inlined_call_operand.vmem [shape: bf16[1152,256], index: 1, kind: input, shape index: {}]   ;;  %s3287_s0 = inlined_call_operand.vmem [shape: bf16[96,1152], index: 0, kind: input, shape index: {}]   ;;  %s3288_s2 = inlined_call_operand.vmem [shape: f32[1,256], index: 2, kind: input, shape index: {}]   ;;  %s3289_s3 = inlined_call_operand.vmem [shape: f32[1,256], index: 3, kind: input, shape index: {}]   ;;  %s3290_s4 = inlined_call_operand.vmem [shape: bf16[96,256], index: 4, kind: output, shape index: {}]  }
   0x1   :  { %v2106_v0 = vld [vmem:[%s3286_s1 + $0x74] ss:$8 sps:$4 sm:$0xff]   ;;  %v2110_v2 = vld [vmem:[%s3286_s1 + $0x70] ss:$8 sps:$4 sm:$0xff]   ;;  %v2112_v4 = vld [vmem:[%s3286_s1 + $0x64] ss:$8 sps:$4 sm:$0xff]  }
   0x2   :  { %v2108_v1 = vld [vmem:[%s3286_s1 + $0x174] ss:$8 sps:$4 sm:$0xff]   ;;  %1218 = vmatprep.subr.bf16.mxu0 %v2106_v0  ;;  %v2111_v3 = vld [vmem:[%s3286_s1 + $0x170] ss:$8 sps:$4 sm:$0xff]   ;;  %v2114_v5 = vld [vmem:[%s3286_s1 + $0x164] ss:$8 sps:$4 sm:$0xff]  }
   0x3   :  { %1311 = vmatprep.subr.bf16.mxu1 %v2108_v1  ;;  %1219 = vmatpush1.bf16.msra.mxu0 %v2110_v2  ;;  %v2116_v6 = vld [vmem:[%s3286_s1 + $0x60] ss:$8 sps:$4 sm:$0xff]   ;;  %v2118_v8 = vld [vmem:[%s3286_s1 + $0x54] ss:$8 sps:$4 sm:$0xff]   ;;  %v2122_v10 = vld [vmem:[%s3286_s1 + $0x50] ss:$8 sps:$4 sm:$0xff]  }
   0x4   :  { %1312 = vmatpush1.bf16.msra.mxu1 %v2111_v3  ;;  %1220 = vmatprep.subr.bf16.mxu0 %v2112_v4  ;;  %v2117_v7 = vld [vmem:[%s3286_s1 + $0x160] ss:$8 sps:$4 sm:$0xff]   ;;  %v2120_v9 = vld [vmem:[%s3286_s1 + $0x154] ss:$8 sps:$4 sm:$0xff]   ;;  %v2123_v11 = vld [vmem:[%s3286_s1 + $0x150] ss:$8 sps:$4 sm:$0xff]  }
   0x5   :  { %1313 = vmatprep.subr.bf16.mxu1 %v2114_v5  ;;  %v2124_v12 = vld [vmem:[%s3286_s1 + $0x44] ss:$8 sps:$4 sm:$0xff]   ;;  %v2128_v14 = vld [vmem:[%s3286_s1 + $0x40] ss:$8 sps:$4 sm:$0xff]   ;;  %v2130_v16 = vld [vmem:[%s3286_s1 + $0x34] ss:$8 sps:$4 sm:$0xff]  }
   0x6   :  { %v2126_v13 = vld [vmem:[%s3286_s1 + $0x144] ss:$8 sps:$4 sm:$0xff]   ;;  %v2129_v15 = vld [vmem:[%s3286_s1 + $0x140] ss:$8 sps:$4 sm:$0xff]   ;;  %v2132_v17 = vld [vmem:[%s3286_s1 + $0x134] ss:$8 sps:$4 sm:$0xff]  }
   0x7   :  { %1221 = vmatpush1.bf16.msra.mxu0 %v2116_v6  ;;  %v2134_v18 = vld [vmem:[%s3286_s1 + $0x30] ss:$8 sps:$4 sm:$0xff]   ;;  %v2136_v20 = vld [vmem:[%s3286_s1 + $0x24] ss:$8 sps:$4 sm:$0xff]   ;;  %v2140_v22 = vld [vmem:[%s3286_s1 + $0x20] ss:$8 sps:$4 sm:$0xff]  }
   0x8   :  { %1314 = vmatpush1.bf16.msra.mxu1 %v2117_v7  ;;  %1222 = vmatprep.subr.bf16.mxu0 %v2118_v8  ;;  %v2135_v19 = vld [vmem:[%s3286_s1 + $0x130] ss:$8 sps:$4 sm:$0xff]   ;;  %v2138_v21 = vld [vmem:[%s3286_s1 + $0x124] ss:$8 sps:$4 sm:$0xff]   ;;  %v2141_v23 = vld [vmem:[%s3286_s1 + $0x120] ss:$8 sps:$4 sm:$0xff]  }
   0x9   :  { %1315 = vmatprep.subr.bf16.mxu1 %v2120_v9  ;;  %v2142_v24 = vld [vmem:[%s3286_s1 + $0x14] ss:$8 sps:$4 sm:$0xff]   ;;  %v2146_v26 = vld [vmem:[%s3286_s1 + $0x10] ss:$8 sps:$4 sm:$0xff]   ;;  %v2148_v28 = vld [vmem:[%s3286_s1 + $0x4] ss:$8 sps:$4 sm:$0xff]  }
   0xa   :  { %v2144_v25 = vld [vmem:[%s3286_s1 + $0x114] ss:$8 sps:$4 sm:$0xff]   ;;  %v2147_v27 = vld [vmem:[%s3286_s1 + $0x110] ss:$8 sps:$4 sm:$0xff]   ;;  %v2150_v29 = vld [vmem:[%s3286_s1 + $0x104] ss:$8 sps:$4 sm:$0xff]  }
   0xb   :  { %1223 = vmatpush1.bf16.msra.mxu0 %v2122_v10  ;;  %v2152_v30 = vld [vmem:[%s3286_s1] ss:$8 sps:$4 sm:$0xff]   ;;  %v2154_v32 = vld [vmem:[%s3286_s1 + $0xf4] ss:$8 sps:$4 sm:$0xff]   ;;  %v2158_v34 = vld [vmem:[%s3286_s1 + $0xf0] ss:$8 sps:$4 sm:$0xff]  }
   0xc   :  { %1316 = vmatpush1.bf16.msra.mxu1 %v2123_v11  ;;  %1224 = vmatprep.subr.bf16.mxu0 %v2124_v12  ;;  %v2153_v31 = vld [vmem:[%s3286_s1 + $0x100] ss:$8 sps:$4 sm:$0xff]   ;;  %v2156_v33 = vld [vmem:[%s3286_s1 + $0x1f4] ss:$8 sps:$4 sm:$0xff]   ;;  %v2159_v35 = vld [vmem:[%s3286_s1 + $0x1f0] ss:$8 sps:$4 sm:$0xff]  }
   0xd   :  { %1317 = vmatprep.subr.bf16.mxu1 %v2126_v13  ;;  %v2160_v36 = vld [vmem:[%s3286_s1 + $0xe4] ss:$8 sps:$4 sm:$0xff]   ;;  %v2164_v38 = vld [vmem:[%s3286_s1 + $0xe0] ss:$8 sps:$4 sm:$0xff]   ;;  %v2166_v40 = vld [vmem:[%s3286_s1 + $0xd4] ss:$8 sps:$4 sm:$0xff]  }
   0xe   :  { %v2162_v37 = vld [vmem:[%s3286_s1 + $0x1e4] ss:$8 sps:$4 sm:$0xff]   ;;  %v2165_v39 = vld [vmem:[%s3286_s1 + $0x1e0] ss:$8 sps:$4 sm:$0xff]   ;;  %v2168_v41 = vld [vmem:[%s3286_s1 + $0x1d4] ss:$8 sps:$4 sm:$0xff]  }
   0xf   :  { %1225 = vmatpush1.bf16.msra.mxu0 %v2128_v14  ;;  %v2170_v42 = vld [vmem:[%s3286_s1 + $0xd0] ss:$8 sps:$4 sm:$0xff]   ;;  %v2172_v44 = vld [vmem:[%s3286_s1 + $0xc4] ss:$8 sps:$4 sm:$0xff]   ;;  %v2176_v46 = vld [vmem:[%s3286_s1 + $0xc0] ss:$8 sps:$4 sm:$0xff]  }
  0x10   :  { %1318 = vmatpush1.bf16.msra.mxu1 %v2129_v15  ;;  %1226 = vmatprep.subr.bf16.mxu0 %v2130_v16  ;;  %v2171_v43 = vld [vmem:[%s3286_s1 + $0x1d0] ss:$8 sps:$4 sm:$0xff]   ;;  %v2174_v45 = vld [vmem:[%s3286_s1 + $0x1c4] ss:$8 sps:$4 sm:$0xff]   ;;  %v2177_v47 = vld [vmem:[%s3286_s1 + $0x1c0] ss:$8 sps:$4 sm:$0xff]  }
  0x11   :  { %1319 = vmatprep.subr.bf16.mxu1 %v2132_v17  ;;  %v2178_v48 = vld [vmem:[%s3286_s1 + $0xb4] ss:$8 sps:$4 sm:$0xff]   ;;  %v2204_v49 = vld [vmem:[%s3287_s0 + $0x4] ss:$36 sps:$4 sm:$0xff]   ;;  %v2207_v51 = vld [vmem:[%s3287_s0 + $0xc] ss:$36 sps:$4 sm:$0xff]  }
  0x12   :  { %v2180_v50 = vld [vmem:[%s3286_s1 + $0x1b4] ss:$8 sps:$4 sm:$0xff]   ;;  %1250 = vmatprep.mubr.bf16.mxu0 %v2204_v49  ;;  %v2182_v52 = vld [vmem:[%s3286_s1 + $0xb0] ss:$8 sps:$4 sm:$0xff]   ;;  %1343 = vmatprep.mubr.bf16.mxu1 %v2207_v51  ;;  %v2184_v54 = vld [vmem:[%s3286_s1 + $0xa4] ss:$8 sps:$4 sm:$0xff]  }
  0x13   :  { %1227 = vmatpush1.bf16.msra.mxu0 %v2134_v18  ;;  %v2183_v53 = vld [vmem:[%s3286_s1 + $0x1b0] ss:$8 sps:$4 sm:$0xff]   ;;  %v2186_v55 = vld [vmem:[%s3286_s1 + $0x1a4] ss:$8 sps:$4 sm:$0xff]   ;;  %v2188_v56 = vld [vmem:[%s3286_s1 + $0xa0] ss:$8 sps:$4 sm:$0xff]  }
  0x14   :  { %1320 = vmatpush1.bf16.msra.mxu1 %v2135_v19  ;;  %1228 = vmatprep.subr.bf16.mxu0 %v2136_v20  ;;  %v2189_v57 = vld [vmem:[%s3286_s1 + $0x1a0] ss:$8 sps:$4 sm:$0xff]   ;;  %v2190_v58 = vld [vmem:[%s3286_s1 + $0x94] ss:$8 sps:$4 sm:$0xff]   ;;  %v2194_v60 = vld [vmem:[%s3286_s1 + $0x90] ss:$8 sps:$4 sm:$0xff]  }
  0x15   :  { %1321 = vmatprep.subr.bf16.mxu1 %v2138_v21  ;;  %v2192_v59 = vld [vmem:[%s3286_s1 + $0x194] ss:$8 sps:$4 sm:$0xff]   ;;  %v2195_v61 = vld [vmem:[%s3286_s1 + $0x190] ss:$8 sps:$4 sm:$0xff]   ;;  %v2196_v62 = vld [vmem:[%s3286_s1 + $0x84] ss:$8 sps:$4 sm:$0xff]  }
  0x16   :  { %v2198_v63 = vld [vmem:[%s3286_s1 + $0x184] ss:$8 sps:$4 sm:$0xff]   ;;  %v2200_v0 = vld [vmem:[%s3286_s1 + $0x80] ss:$8 sps:$4 sm:$0xff]   ;;  %v2210_v2 = vld [vmem:[%s3286_s1 + $0x274] ss:$8 sps:$4 sm:$0xff]  }
  0x17   :  { %1229 = vmatpush1.bf16.msra.mxu0 %v2140_v22  ;;  %v2201_v1 = vld [vmem:[%s3286_s1 + $0x180] ss:$8 sps:$4 sm:$0xff]   ;;  %v2213_v3 = vld [vmem:[%s3286_s1 + $0x374] ss:$8 sps:$4 sm:$0xff]   ;;  %v2208_v6 = vld [vmem:[%s3286_s1 + $0x270] ss:$8 sps:$4 sm:$0xff]  }
  0x18   :  { %1322 = vmatpush1.bf16.msra.mxu1 %v2141_v23  ;;  %1230 = vmatprep.subr.bf16.mxu0 %v2142_v24  ;;  %v2202_v4 = vld [vmem:[%s3287_s0] ss:$36 sps:$4 sm:$0xff]   ;;  %v2205_v5 = vld [vmem:[%s3287_s0 + $0x8] ss:$36 sps:$4 sm:$0xff]   ;;  %v2211_v7 = vld [vmem:[%s3286_s1 + $0x370] ss:$8 sps:$4 sm:$0xff]  }
  0x19   :  { %1323 = vmatprep.subr.bf16.mxu1 %v2144_v25  ;;  %v2216_v8 = vld [vmem:[%s3286_s1 + $0x264] ss:$8 sps:$4 sm:$0xff]   ;;  %v2240_v11 = vld [vmem:[%s3287_s0 + $0x54] ss:$36 sps:$4 sm:$0xff]   ;;  %v2214_v12 = vld [vmem:[%s3286_s1 + $0x260] ss:$8 sps:$4 sm:$0xff]  }
  0x1a   :  { %v2219_v9 = vld [vmem:[%s3286_s1 + $0x364] ss:$8 sps:$4 sm:$0xff]   ;;  %v2217_v13 = vld [vmem:[%s3286_s1 + $0x360] ss:$8 sps:$4 sm:$0xff]   ;;  %v2222_v14 = vld [vmem:[%s3286_s1 + $0x254] ss:$8 sps:$4 sm:$0xff]  }
  0x1b   :  { %1231 = vmatpush1.bf16.msra.mxu0 %v2146_v26  ;;  %v2238_v10 = vld [vmem:[%s3287_s0 + $0x4c] ss:$36 sps:$4 sm:$0xff]   ;;  %v2225_v15 = vld [vmem:[%s3286_s1 + $0x354] ss:$8 sps:$4 sm:$0xff]   ;;  %v2226_v24 = vld [vmem:[%s3286_s1 + $0x240] ss:$8 sps:$4 sm:$0xff]  }
  0x1c   :  { %1324 = vmatpush1.bf16.msra.mxu1 %v2147_v27  ;;  %1232 = vmatprep.subr.bf16.mxu0 %v2148_v28  ;;  %v2220_v16 = vld [vmem:[%s3286_s1 + $0x250] ss:$8 sps:$4 sm:$0xff]   ;;  %v2242_v18 = vld [vmem:[%s3287_s0 + $0x48] ss:$36 sps:$4 sm:$0xff]   ;;  %v2258_v23 = vld [vmem:[%s3287_s0 + $0x9c] ss:$36 sps:$4 sm:$0xff]  }
  0x1d   :  { %1325 = vmatprep.subr.bf16.mxu1 %v2150_v29  ;;  %v2223_v17 = vld [vmem:[%s3286_s1 + $0x350] ss:$8 sps:$4 sm:$0xff]   ;;  %v2228_v20 = vld [vmem:[%s3286_s1 + $0x244] ss:$8 sps:$4 sm:$0xff]   ;;  %v2229_v25 = vld [vmem:[%s3286_s1 + $0x340] ss:$8 sps:$4 sm:$0xff]  }
  0x1e   :  { %v2243_v19 = vld [vmem:[%s3287_s0 + $0x50] ss:$36 sps:$4 sm:$0xff]   ;;  %v2231_v21 = vld [vmem:[%s3286_s1 + $0x344] ss:$8 sps:$4 sm:$0xff]   ;;  %v2265_v49 = vld [vmem:[%s3286_s1 + $0x300] ss:$8 sps:$4 sm:$0xff]  }
  0x1f   :  { %1233 = vmatpush1.bf16.msra.mxu0 %v2152_v30  ;;  %v2256_v22 = vld [vmem:[%s3287_s0 + $0x94] ss:$36 sps:$4 sm:$0xff]  }
  0x20   :  { %1326 = vmatpush1.bf16.msra.mxu1 %v2153_v31  ;;  %1234 = vmatprep.subr.bf16.mxu0 %v2154_v32  ;;  %v2234_v26 = vld [vmem:[%s3286_s1 + $0x234] ss:$8 sps:$4 sm:$0xff]   ;;  %v2232_v28 = vld [vmem:[%s3286_s1 + $0x230] ss:$8 sps:$4 sm:$0xff]   ;;  %v2246_v32 = vld [vmem:[%s3286_s1 + $0x224] ss:$8 sps:$4 sm:$0xff]  }
  0x21   :  { %1327 = vmatprep.subr.bf16.mxu1 %v2156_v33  ;;  %v2237_v27 = vld [vmem:[%s3286_s1 + $0x334] ss:$8 sps:$4 sm:$0xff]   ;;  %v2235_v29 = vld [vmem:[%s3286_s1 + $0x330] ss:$8 sps:$4 sm:$0xff]   ;;  %v2249_v33 = vld [vmem:[%s3286_s1 + $0x324] ss:$8 sps:$4 sm:$0xff]  }
  0x22   :  { %v2260_v30 = vld [vmem:[%s3287_s0 + $0x90] ss:$36 sps:$4 sm:$0xff]   ;;  %v2261_v31 = vld [vmem:[%s3287_s0 + $0x98] ss:$36 sps:$4 sm:$0xff]  }
  0x23   :  { %1235 = vmatpush2.bf16.msra.mxu0 %v2158_v34  ;;  %v2274_v34 = vld [vmem:[%s3287_s0 + $0xdc] ss:$36 sps:$4 sm:$0xff]  }
  0x24   :  { %1328 = vmatpush2.bf16.msra.mxu1 %v2159_v35  ;;  %1236 = vmatprep.subr.bf16.mxu0 %v2160_v36  ;;  %v2276_v35 = vld [vmem:[%s3287_s0 + $0xe4] ss:$36 sps:$4 sm:$0xff]   ;;  %v2273_v51 = vld [vmem:[%s3286_s1 + $0x3f4] ss:$8 sps:$4 sm:$0xff]  }
  0x25   :  { %1329 = vmatprep.subr.bf16.mxu1 %v2162_v37  ;;  %v2244_v36 = vld [vmem:[%s3286_s1 + $0x220] ss:$8 sps:$4 sm:$0xff]  }
  0x26   :  { %v2247_v37 = vld [vmem:[%s3286_s1 + $0x320] ss:$8 sps:$4 sm:$0xff]  }
  0x27   :  { %1237 = vmatpush2.bf16.msra.mxu0 %v2164_v38  ;;  %v2252_v38 = vld [vmem:[%s3286_s1 + $0x214] ss:$8 sps:$4 sm:$0xff]  }
  0x28   :  { %1330 = vmatpush2.bf16.msra.mxu1 %v2165_v39  ;;  %1238 = vmatprep.subr.bf16.mxu0 %v2166_v40  ;;  %v2255_v39 = vld [vmem:[%s3286_s1 + $0x314] ss:$8 sps:$4 sm:$0xff]   ;;  %v2250_v40 = vld [vmem:[%s3286_s1 + $0x210] ss:$8 sps:$4 sm:$0xff]  }
  0x29   :  { %1331 = vmatprep.subr.bf16.mxu1 %v2168_v41  ;;  %v2253_v41 = vld [vmem:[%s3286_s1 + $0x310] ss:$8 sps:$4 sm:$0xff]  }
  0x2b   :  { %1239 = vmatpush2.bf16.msra.mxu0 %v2170_v42  ;;  %v2278_v42 = vld [vmem:[%s3287_s0 + $0xd8] ss:$36 sps:$4 sm:$0xff]  }
  0x2c   :  { %1332 = vmatpush2.bf16.msra.mxu1 %v2171_v43  ;;  %1240 = vmatprep.subr.bf16.mxu0 %v2172_v44  ;;  %v2279_v43 = vld [vmem:[%s3287_s0 + $0xe0] ss:$36 sps:$4 sm:$0xff]  }
  0x2d   :  { %1333 = vmatprep.subr.bf16.mxu1 %v2174_v45  ;;  %v2264_v44 = vld [vmem:[%s3286_s1 + $0x204] ss:$8 sps:$4 sm:$0xff]  }
  0x2e   :  { %v2267_v45 = vld [vmem:[%s3286_s1 + $0x304] ss:$8 sps:$4 sm:$0xff]  }
  0x2f   :  { %1241 = vmatpush2.bf16.msra.mxu0 %v2176_v46  ;;  %v2292_v46 = vld [vmem:[%s3287_s0 + $0x124] ss:$36 sps:$4 sm:$0xff]  }
  0x30   :  { %1334 = vmatpush2.bf16.msra.mxu1 %v2177_v47  ;;  %1242 = vmatprep.subr.bf16.mxu0 %v2178_v48  ;;  %v2294_v47 = vld [vmem:[%s3287_s0 + $0x12c] ss:$36 sps:$4 sm:$0xff]   ;;  %v2262_v48 = vld [vmem:[%s3286_s1 + $0x200] ss:$8 sps:$4 sm:$0xff]  }
  0x31   :  { %1335 = vmatprep.subr.bf16.mxu1 %v2180_v50  ;;  %v2270_v50 = vld [vmem:[%s3286_s1 + $0x2f4] ss:$8 sps:$4 sm:$0xff]  }
  0x33   :  { %1243 = vmatpush2.bf16.msra.mxu0 %v2182_v52  ;;  %v2268_v52 = vld [vmem:[%s3286_s1 + $0x2f0] ss:$8 sps:$4 sm:$0xff]  }
  0x34   :  { %1336 = vmatpush2.bf16.msra.mxu1 %v2183_v53  ;;  %1244 = vmatprep.subr.bf16.mxu0 %v2184_v54  ;;  %v2271_v53 = vld [vmem:[%s3286_s1 + $0x3f0] ss:$8 sps:$4 sm:$0xff]   ;;  %v2296_v54 = vld [vmem:[%s3287_s0 + $0x120] ss:$36 sps:$4 sm:$0xff]  }
  0x35   :  { %1337 = vmatprep.subr.bf16.mxu1 %v2186_v55  ;;  %v2297_v55 = vld [vmem:[%s3287_s0 + $0x128] ss:$36 sps:$4 sm:$0xff]  }
  0x37   :  { %1245 = vmatpush2.bf16.msra.mxu0 %v2188_v56  ;;  %v2282_v56 = vld [vmem:[%s3286_s1 + $0x2e4] ss:$8 sps:$4 sm:$0xff]  }
  0x38   :  { %1338 = vmatpush2.bf16.msra.mxu1 %v2189_v57  ;;  %1246 = vmatprep.subr.bf16.mxu0 %v2190_v58  ;;  %v2285_v57 = vld [vmem:[%s3286_s1 + $0x3e4] ss:$8 sps:$4 sm:$0xff]  }
  0x39   :  { %1339 = vmatprep.subr.bf16.mxu1 %v2192_v59  ;;  %v2310_v58 = vld [vmem:[%s3287_s0 + $0x16c] ss:$36 sps:$4 sm:$0xff]   ;;  %v2312_v59 = vld [vmem:[%s3287_s0 + $0x174] ss:$36 sps:$4 sm:$0xff]  }
  0x3b   :  { %1247 = vmatpush2.bf16.msra.mxu0 %v2194_v60  ;;  %v2280_v60 = vld [vmem:[%s3286_s1 + $0x2e0] ss:$8 sps:$4 sm:$0xff]  }
  0x3c   :  { %1340 = vmatpush2.bf16.msra.mxu1 %v2195_v61  ;;  %1248 = vmatprep.subr.bf16.mxu0 %v2196_v62  ;;  %v2283_v61 = vld [vmem:[%s3286_s1 + $0x3e0] ss:$8 sps:$4 sm:$0xff]   ;;  %v2288_v62 = vld [vmem:[%s3286_s1 + $0x2d4] ss:$8 sps:$4 sm:$0xff]  }
  0x3d   :  { %1341 = vmatprep.subr.bf16.mxu1 %v2198_v63  ;;  %v2291_v63 = vld [vmem:[%s3286_s1 + $0x3d4] ss:$8 sps:$4 sm:$0xff]  }
  0x3f   :  { %1249 = vmatpush2.bf16.msra.mxu0 %v2200_v0  ;;  %v2286_v0 = vld [vmem:[%s3286_s1 + $0x2d0] ss:$8 sps:$4 sm:$0xff]  }
  0x40   :  { %1342 = vmatpush2.bf16.msra.mxu1 %v2201_v1  ;;  %1404 = vmatprep.subr.bf16.mxu0 %v2210_v2  ;;  %v2289_v1 = vld [vmem:[%s3286_s1 + $0x3d0] ss:$8 sps:$4 sm:$0xff]   ;;  %v2314_v2 = vld [vmem:[%s3287_s0 + $0x168] ss:$36 sps:$4 sm:$0xff]  }
  0x41   :  { %1497 = vmatprep.subr.bf16.mxu1 %v2213_v3  ;;  %v2315_v3 = vld [vmem:[%s3287_s0 + $0x170] ss:$36 sps:$4 sm:$0xff]  }
  0x42   :  { %1251 = vmatmul.mubr.bf16.vlgmr.msra.gmra.mxu0 %v2202_v4  ;;  %v2300_v4 = vld [vmem:[%s3286_s1 + $0x2c4] ss:$8 sps:$4 sm:$0xff]  }
  0x43   :  { %1344 = vmatmul.mubr.bf16.vlgmr.msra.gmra.mxu1 %v2205_v5  ;;  %1405 = vmatpush1.bf16.msra.mxu0 %v2208_v6  ;;  %v2303_v5 = vld [vmem:[%s3286_s1 + $0x3c4] ss:$8 sps:$4 sm:$0xff]   ;;  %v2336_v6 = vld [vmem:[%s3287_s0 + $0x14] ss:$36 sps:$4 sm:$0xff]  }
  0x44   :  { %1498 = vmatpush1.bf16.msra.mxu1 %v2211_v7  ;;  %1406 = vmatprep.subr.bf16.mxu0 %v2216_v8  ;;  %v2339_v7 = vld [vmem:[%s3287_s0 + $0x1c] ss:$36 sps:$4 sm:$0xff]  }
  0x45   :  { %1499 = vmatprep.subr.bf16.mxu1 %v2219_v9  ;;  %1260 = vmatprep.mubr.bf16.mxu0 %v2238_v10  ;;  %v2298_v8 = vld [vmem:[%s3286_s1 + $0x2c0] ss:$8 sps:$4 sm:$0xff]   ;;  %v2306_v10 = vld [vmem:[%s3286_s1 + $0x2b4] ss:$8 sps:$4 sm:$0xff]  }
  0x46   :  { %1353 = vmatprep.mubr.bf16.mxu1 %v2240_v11  ;;  %v2301_v9 = vld [vmem:[%s3286_s1 + $0x3c0] ss:$8 sps:$4 sm:$0xff]   ;;  %v2309_v11 = vld [vmem:[%s3286_s1 + $0x3b4] ss:$8 sps:$4 sm:$0xff]  }
  0x47   :  { %1407 = vmatpush1.bf16.msra.mxu0 %v2214_v12  ;;  %v2304_v12 = vld [vmem:[%s3286_s1 + $0x2b0] ss:$8 sps:$4 sm:$0xff]  }
  0x48   :  { %1500 = vmatpush1.bf16.msra.mxu1 %v2217_v13  ;;  %1408 = vmatprep.subr.bf16.mxu0 %v2222_v14  ;;  %v2307_v13 = vld [vmem:[%s3286_s1 + $0x3b0] ss:$8 sps:$4 sm:$0xff]   ;;  %v2318_v14 = vld [vmem:[%s3286_s1 + $0x2a4] ss:$8 sps:$4 sm:$0xff]  }
  0x49   :  { %1501 = vmatprep.subr.bf16.mxu1 %v2225_v15  ;;  %v2321_v15 = vld [vmem:[%s3286_s1 + $0x3a4] ss:$8 sps:$4 sm:$0xff]  }
  0x4a   :  { %1261 = vmatmul.mubr.bf16.gmra.mxu0 %v2242_v18  ;;  %v2324_v18 = vld [vmem:[%s3286_s1 + $0x294] ss:$8 sps:$4 sm:$0xff]  }
  0x4b   :  { %1354 = vmatmul.mubr.bf16.gmra.mxu1 %v2243_v19  ;;  %1409 = vmatpush1.bf16.msra.mxu0 %v2220_v16  ;;  %v2316_v16 = vld [vmem:[%s3286_s1 + $0x2a0] ss:$8 sps:$4 sm:$0xff]   ;;  %v2327_v19 = vld [vmem:[%s3286_s1 + $0x394] ss:$8 sps:$4 sm:$0xff]  }
  0x4c   :  { %1502 = vmatpush1.bf16.msra.mxu1 %v2223_v17  ;;  %1410 = vmatprep.subr.bf16.mxu0 %v2228_v20  ;;  %v2319_v17 = vld [vmem:[%s3286_s1 + $0x3a0] ss:$8 sps:$4 sm:$0xff]   ;;  %v2322_v20 = vld [vmem:[%s3286_s1 + $0x290] ss:$8 sps:$4 sm:$0xff]  }
  0x4d   :  { %1503 = vmatprep.subr.bf16.mxu1 %v2231_v21  ;;  %1270 = vmatprep.mubr.bf16.mxu0 %v2256_v22  ;;  %v2325_v21 = vld [vmem:[%s3286_s1 + $0x390] ss:$8 sps:$4 sm:$0xff]   ;;  %v2330_v22 = vld [vmem:[%s3286_s1 + $0x284] ss:$8 sps:$4 sm:$0xff]  }
  0x4e   :  { %1363 = vmatprep.mubr.bf16.mxu1 %v2258_v23  ;;  %v2333_v23 = vld [vmem:[%s3286_s1 + $0x384] ss:$8 sps:$4 sm:$0xff]  }
  0x4f   :  { %1411 = vmatpush1.bf16.msra.mxu0 %v2226_v24  ;;  %v2328_v24 = vld [vmem:[%s3286_s1 + $0x280] ss:$8 sps:$4 sm:$0xff]  }
  0x50   :  { %1504 = vmatpush1.bf16.msra.mxu1 %v2229_v25  ;;  %1412 = vmatprep.subr.bf16.mxu0 %v2234_v26  ;;  %v2331_v25 = vld [vmem:[%s3286_s1 + $0x380] ss:$8 sps:$4 sm:$0xff]   ;;  %v2342_v26 = vld [vmem:[%s3286_s1 + $0x474] ss:$8 sps:$4 sm:$0xff]  }
  0x51   :  { %1505 = vmatprep.subr.bf16.mxu1 %v2237_v27  ;;  %v2334_v27 = vld [vmem:[%s3287_s0 + $0x10] ss:$36 sps:$4 sm:$0xff]  }
  0x52   :  { %1271 = vmatmul.mubr.bf16.gmra.mxu0 %v2260_v30  ;;  %v2345_v30 = vld [vmem:[%s3286_s1 + $0x464] ss:$8 sps:$4 sm:$0xff]  }
  0x53   :  { %1364 = vmatmul.mubr.bf16.gmra.mxu1 %v2261_v31  ;;  %1413 = vmatpush1.bf16.msra.mxu0 %v2232_v28  ;;  %v2337_v28 = vld [vmem:[%s3287_s0 + $0x18] ss:$36 sps:$4 sm:$0xff]  }
  0x54   :  { %1506 = vmatpush1.bf16.msra.mxu1 %v2235_v29  ;;  %1414 = vmatprep.subr.bf16.mxu0 %v2246_v32  ;;  %v2340_v29 = vld [vmem:[%s3286_s1 + $0x470] ss:$8 sps:$4 sm:$0xff]   ;;  %v2346_v31 = vld [vmem:[%s3287_s0 + $0x5c] ss:$36 sps:$4 sm:$0xff]   ;;  %v2348_v32 = vld [vmem:[%s3287_s0 + $0x64] ss:$36 sps:$4 sm:$0xff]  }
  0x55   :  { %1507 = vmatprep.subr.bf16.mxu1 %v2249_v33  ;;  %1280 = vmatprep.mubr.bf16.mxu0 %v2274_v34  ;;  %v2343_v33 = vld [vmem:[%s3286_s1 + $0x460] ss:$8 sps:$4 sm:$0xff]   ;;  %v2354_v34 = vld [vmem:[%s3286_s1 + $0x454] ss:$8 sps:$4 sm:$0xff]  }
  0x56   :  { %1373 = vmatprep.mubr.bf16.mxu1 %v2276_v35  ;;  %v2350_v35 = vld [vmem:[%s3287_s0 + $0x58] ss:$36 sps:$4 sm:$0xff]  }
  0x57   :  { %1415 = vmatpush1.bf16.msra.mxu0 %v2244_v36  ;;  %v2351_v36 = vld [vmem:[%s3287_s0 + $0x60] ss:$36 sps:$4 sm:$0xff]  }
  0x58   :  { %1508 = vmatpush1.bf16.msra.mxu1 %v2247_v37  ;;  %1416 = vmatprep.subr.bf16.mxu0 %v2252_v38  ;;  %v2352_v37 = vld [vmem:[%s3286_s1 + $0x450] ss:$8 sps:$4 sm:$0xff]   ;;  %v2355_v38 = vld [vmem:[%s3287_s0 + $0xa4] ss:$36 sps:$4 sm:$0xff]  }
  0x59   :  { %1509 = vmatprep.subr.bf16.mxu1 %v2255_v39  ;;  %v2357_v39 = vld [vmem:[%s3287_s0 + $0xac] ss:$36 sps:$4 sm:$0xff]  }
  0x5a   :  { %1281 = vmatmul.mubr.bf16.gmra.mxu0 %v2278_v42  ;;  %v2372_v42 = vld [vmem:[%s3286_s1 + $0x434] ss:$8 sps:$4 sm:$0xff]  }
  0x5b   :  { %1374 = vmatmul.mubr.bf16.gmra.mxu1 %v2279_v43  ;;  %1417 = vmatpush1.bf16.msra.mxu0 %v2250_v40  ;;  %v2363_v40 = vld [vmem:[%s3286_s1 + $0x444] ss:$8 sps:$4 sm:$0xff]  }
  0x5c   :  { %1510 = vmatpush1.bf16.msra.mxu1 %v2253_v41  ;;  %1418 = vmatprep.subr.bf16.mxu0 %v2264_v44  ;;  %v2361_v41 = vld [vmem:[%s3286_s1 + $0x440] ss:$8 sps:$4 sm:$0xff]  }
  0x5d   :  { %1511 = vmatprep.subr.bf16.mxu1 %v2267_v45  ;;  %1290 = vmatprep.mubr.bf16.mxu0 %v2292_v46  ;;  %v2359_v43 = vld [vmem:[%s3287_s0 + $0xa0] ss:$36 sps:$4 sm:$0xff]   ;;  %v2360_v44 = vld [vmem:[%s3287_s0 + $0xa8] ss:$36 sps:$4 sm:$0xff]   ;;  %v2366_v46 = vld [vmem:[%s3287_s0 + $0xf4] ss:$36 sps:$4 sm:$0xff]  }
  0x5e   :  { %1383 = vmatprep.mubr.bf16.mxu1 %v2294_v47  ;;  %v2364_v45 = vld [vmem:[%s3287_s0 + $0xec] ss:$36 sps:$4 sm:$0xff]  }
  0x5f   :  { %1419 = vmatpush1.bf16.msra.mxu0 %v2262_v48  ;;  %v2370_v47 = vld [vmem:[%s3286_s1 + $0x430] ss:$8 sps:$4 sm:$0xff]   ;;  %v2375_v48 = vld [vmem:[%s3286_s1 + $0x424] ss:$8 sps:$4 sm:$0xff]  }
  0x60   :  { %1512 = vmatpush1.bf16.msra.mxu1 %v2265_v49  ;;  %1420 = vmatprep.subr.bf16.mxu0 %v2270_v50  ;;  %v2373_v49 = vld [vmem:[%s3286_s1 + $0x420] ss:$8 sps:$4 sm:$0xff]   ;;  %v2384_v50 = vld [vmem:[%s3286_s1 + $0x414] ss:$8 sps:$4 sm:$0xff]  }
  0x61   :  { %1513 = vmatprep.subr.bf16.mxu1 %v2273_v51  ;;  %v2368_v51 = vld [vmem:[%s3287_s0 + $0xe8] ss:$36 sps:$4 sm:$0xff]  }
  0x62   :  { %1291 = vmatmul.mubr.bf16.gmra.mxu0 %v2296_v54  ;;  %v2378_v54 = vld [vmem:[%s3287_s0 + $0x13c] ss:$36 sps:$4 sm:$0xff]  }
  0x63   :  { %1384 = vmatmul.mubr.bf16.gmra.mxu1 %v2297_v55  ;;  %1421 = vmatpush2.bf16.msra.mxu0 %v2268_v52  ;;  %v2369_v52 = vld [vmem:[%s3287_s0 + $0xf0] ss:$36 sps:$4 sm:$0xff]  }
  0x64   :  { %1514 = vmatpush2.bf16.msra.mxu1 %v2271_v53  ;;  %1422 = vmatprep.subr.bf16.mxu0 %v2282_v56  ;;  %v2376_v53 = vld [vmem:[%s3287_s0 + $0x134] ss:$36 sps:$4 sm:$0xff]   ;;  %v2393_v56 = vld [vmem:[%s3286_s1 + $0x404] ss:$8 sps:$4 sm:$0xff]  }
  0x65   :  { %1515 = vmatprep.subr.bf16.mxu1 %v2285_v57  ;;  %1300 = vmatprep.mubr.bf16.mxu0 %v2310_v58  ;;  %v2382_v55 = vld [vmem:[%s3286_s1 + $0x410] ss:$8 sps:$4 sm:$0xff]   ;;  %v2391_v57 = vld [vmem:[%s3286_s1 + $0x400] ss:$8 sps:$4 sm:$0xff]  }
  0x66   :  { %1393 = vmatprep.mubr.bf16.mxu1 %v2312_v59  ;;  %v2380_v58 = vld [vmem:[%s3287_s0 + $0x130] ss:$36 sps:$4 sm:$0xff]   ;;  %v2381_v59 = vld [vmem:[%s3287_s0 + $0x138] ss:$36 sps:$4 sm:$0xff]  }
  0x67   :  { %1423 = vmatpush2.bf16.msra.mxu0 %v2280_v60  ;;  %v2385_v60 = vld [vmem:[%s3287_s0 + $0x17c] ss:$36 sps:$4 sm:$0xff]  }
  0x68   :  { %1516 = vmatpush2.bf16.msra.mxu1 %v2283_v61  ;;  %1424 = vmatprep.subr.bf16.mxu0 %v2288_v62  ;;  %v2387_v61 = vld [vmem:[%s3287_s0 + $0x184] ss:$36 sps:$4 sm:$0xff]   ;;  %v2389_v62 = vld [vmem:[%s3287_s0 + $0x178] ss:$36 sps:$4 sm:$0xff]  }
  0x69   :  { %1517 = vmatprep.subr.bf16.mxu1 %v2291_v63  ;;  %v2390_v63 = vld [vmem:[%s3287_s0 + $0x180] ss:$36 sps:$4 sm:$0xff]  }
  0x6a   :  { %1301 = vmatmul.mubr.bf16.gmra.mxu0 %v2314_v2  ;;  %v2395_v2 = vld [vmem:[%s3287_s0 + $0xf8] ss:$36 sps:$4 sm:$0xff]  }
  0x6b   :  { %1394 = vmatmul.mubr.bf16.gmra.mxu1 %v2315_v3  ;;  %1425 = vmatpush2.bf16.msra.mxu0 %v2286_v0  ;;  %v2400_v0 = vmov 0   ;;  %v2396_v3 = vld [vmem:[%s3287_s0 + $0x68] ss:$36 sps:$4 sm:$0xff]  }
  0x6c   :  { %1518 = vmatpush2.bf16.msra.mxu1 %v2289_v1  ;;  %1426 = vmatprep.subr.bf16.mxu0 %v2300_v4  ;;  %v2394_v1 = vld [vmem:[%s3287_s0 + $0x20] ss:$36 sps:$4 sm:$0xff]  }
  0x6d   :  { %1519 = vmatprep.subr.bf16.mxu1 %v2303_v5  ;;  %1436 = vmatprep.mubr.bf16.mxu0 %v2336_v6  ;;  %v2397_v4 = vld [vmem:[%s3287_s0 + $0x140] ss:$36 sps:$4 sm:$0xff]   ;;  %v2398_v5 = vld [vmem:[%s3287_s0 + $0xb0] ss:$36 sps:$4 sm:$0xff]   ;;  %v2399_v6 = vld [vmem:[%s3287_s0 + $0x188] ss:$36 sps:$4 sm:$0xff]  }
  0x6e   :  { %1529 = vmatprep.mubr.bf16.mxu1 %v2339_v7 }
  0x6f   :  { %1427 = vmatpush2.bf16.msra.mxu0 %v2298_v8 }
  0x70   :  { %1520 = vmatpush2.bf16.msra.mxu1 %v2301_v9  ;;  %1428 = vmatprep.subr.bf16.mxu0 %v2306_v10 }
  0x71   :  { %1521 = vmatprep.subr.bf16.mxu1 %v2309_v11 }
  0x73   :  { %1429 = vmatpush2.bf16.msra.mxu0 %v2304_v12 }
  0x74   :  { %1522 = vmatpush2.bf16.msra.mxu1 %v2307_v13  ;;  %1430 = vmatprep.subr.bf16.mxu0 %v2318_v14 }
  0x75   :  { %1523 = vmatprep.subr.bf16.mxu1 %v2321_v15 }
  0x77   :  { %1431 = vmatpush2.bf16.msra.mxu0 %v2316_v16 }
  0x78   :  { %1524 = vmatpush2.bf16.msra.mxu1 %v2319_v17  ;;  %1432 = vmatprep.subr.bf16.mxu0 %v2324_v18 }
  0x79   :  { %1525 = vmatprep.subr.bf16.mxu1 %v2327_v19 }
  0x7b   :  { %1433 = vmatpush2.bf16.msra.mxu0 %v2322_v20 }
  0x7c   :  { %1526 = vmatpush2.bf16.msra.mxu1 %v2325_v21  ;;  %1434 = vmatprep.subr.bf16.mxu0 %v2330_v22 }
  0x7d   :  { %1527 = vmatprep.subr.bf16.mxu1 %v2333_v23 }
  0x7f   :  { %1435 = vmatpush2.bf16.msra.mxu0 %v2328_v24 }
  0x80   :  { %1528 = vmatpush2.bf16.msra.mxu1 %v2331_v25  ;;  %1590 = vmatprep.subr.bf16.mxu0 %v2342_v26 }
  0x81   :  { %2089 = vmatprep.subr.bf16.mxu1 %v2342_v26 }
  0x82   :  { %1437 = vmatmul.mubr.bf16.vlgmr.msra.gmra.mxu0 %v2334_v27 }
  0x83   :  { %1530 = vmatmul.mubr.bf16.vlgmr.msra.gmra.mxu1 %v2337_v28  ;;  %1591 = vmatpush1.bf16.msra.mxu0 %v2340_v29 }
  0x84   :  { %2097 = vmatpush1.bf16.msra.mxu1 %v2340_v29  ;;  %1592 = vmatprep.subr.bf16.mxu0 %v2345_v30 }
  0x85   :  { %2090 = vmatprep.subr.bf16.mxu1 %v2345_v30  ;;  %1446 = vmatprep.mubr.bf16.mxu0 %v2346_v31 }
  0x86   :  { %1539 = vmatprep.mubr.bf16.mxu1 %v2348_v32 }
  0x87   :  { %1593 = vmatpush1.bf16.msra.mxu0 %v2343_v33 }
  0x88   :  { %2098 = vmatpush1.bf16.msra.mxu1 %v2343_v33  ;;  %1594 = vmatprep.subr.bf16.mxu0 %v2354_v34 }
  0x89   :  { %2091 = vmatprep.subr.bf16.mxu1 %v2354_v34 }
  0x8a   :  { %1447 = vmatmul.mubr.bf16.gmra.mxu0 %v2350_v35 }
  0x8b   :  { %1540 = vmatmul.mubr.bf16.gmra.mxu1 %v2351_v36  ;;  %1595 = vmatpush1.bf16.msra.mxu0 %v2352_v37 }
  0x8c   :  { %2099 = vmatpush1.bf16.msra.mxu1 %v2352_v37  ;;  %1456 = vmatprep.mubr.bf16.mxu0 %v2355_v38 }
  0x8d   :  { %1549 = vmatprep.mubr.bf16.mxu1 %v2357_v39  ;;  %1596 = vmatprep.subr.bf16.mxu0 %v2363_v40 }
  0x8e   :  { %2092 = vmatprep.subr.bf16.mxu1 %v2363_v40 }
  0x8f   :  { %1597 = vmatpush1.bf16.msra.mxu0 %v2361_v41 }
  0x90   :  { %2100 = vmatpush1.bf16.msra.mxu1 %v2361_v41  ;;  %1598 = vmatprep.subr.bf16.mxu0 %v2372_v42 }
  0x91   :  { %2093 = vmatprep.subr.bf16.mxu1 %v2372_v42 }
  0x92   :  { %1457 = vmatmul.mubr.bf16.gmra.mxu0 %v2359_v43 }
  0x93   :  { %1550 = vmatmul.mubr.bf16.gmra.mxu1 %v2360_v44  ;;  %1466 = vmatprep.mubr.bf16.mxu0 %v2364_v45 }
  0x94   :  { %1559 = vmatprep.mubr.bf16.mxu1 %v2366_v46  ;;  %1599 = vmatpush1.bf16.msra.mxu0 %v2370_v47 }
  0x95   :  { %2101 = vmatpush1.bf16.msra.mxu1 %v2370_v47  ;;  %1600 = vmatprep.subr.bf16.mxu0 %v2375_v48 }
  0x96   :  { %2094 = vmatprep.subr.bf16.mxu1 %v2375_v48 }
  0x98   :  { %1601 = vmatpush1.bf16.msra.mxu0 %v2373_v49 }
  0x99   :  { %2102 = vmatpush1.bf16.msra.mxu1 %v2373_v49  ;;  %1602 = vmatprep.subr.bf16.mxu0 %v2384_v50 }
  0x9a   :  { %2095 = vmatprep.subr.bf16.mxu1 %v2384_v50  ;;  %1467 = vmatmul.mubr.bf16.gmra.mxu0 %v2368_v51 }
  0x9b   :  { %1560 = vmatmul.mubr.bf16.gmra.mxu1 %v2369_v52  ;;  %1476 = vmatprep.mubr.bf16.mxu0 %v2376_v53 }
  0x9c   :  { %1569 = vmatprep.mubr.bf16.mxu1 %v2378_v54  ;;  %1603 = vmatpush1.bf16.msra.mxu0 %v2382_v55 }
  0x9d   :  { %2103 = vmatpush1.bf16.msra.mxu1 %v2382_v55  ;;  %1604 = vmatprep.subr.bf16.mxu0 %v2393_v56 }
  0x9e   :  { %2096 = vmatprep.subr.bf16.mxu1 %v2393_v56 }
  0xa0   :  { %1605 = vmatpush1.bf16.msra.mxu0 %v2391_v57 }
  0xa1   :  { %2104 = vmatpush1.bf16.msra.mxu1 %v2391_v57 }
  0xa2   :  { %1477 = vmatmul.mubr.bf16.gmra.mxu0 %v2380_v58 }
  0xa3   :  { %1570 = vmatmul.mubr.bf16.gmra.mxu1 %v2381_v59  ;;  %1486 = vmatprep.mubr.bf16.mxu0 %v2385_v60 }
  0xa4   :  { %1579 = vmatprep.mubr.bf16.mxu1 %v2387_v61 }
  0xaa   :  { %1487 = vmatmul.mubr.bf16.gmra.mxu0 %v2389_v62 }
  0xab   :  { %1580 = vmatmul.mubr.bf16.gmra.mxu1 %v2390_v63  ;;  %1622 = vmatprep.mubr.bf16.mxu0 %v2400_v0 }
  0xac   :  { %1652 = vmatprep.mubr.bf16.mxu1 %v2400_v0 }
  0xb2   :  { %1623 = vmatmul.mubr.bf16.vlgmr.msra.gmra.mxu0 %v2394_v1 }
  0xb3   :  { %1653 = vmatmul.mubr.bf16.vlgmr.msra.gmra.mxu1 %v2395_v2  ;;  %1632 = vmatprep.mubr.bf16.mxu0 %v2400_v0 }
  0xb4   :  { %1662 = vmatprep.mubr.bf16.mxu1 %v2400_v0 }
  0xba   :  { %1633 = vmatmul.mubr.bf16.gmra.mxu0 %v2396_v3 }
  0xbb   :  { %1663 = vmatmul.mubr.bf16.gmra.mxu1 %v2397_v4  ;;  %1642 = vmatprep.mubr.bf16.mxu0 %v2400_v0 }
  0xbc   :  { %1672 = vmatprep.mubr.bf16.mxu1 %v2400_v0 }
  0xc2   :  { %1643 = vmatmul.mubr.bf16.gmra.mxu0 %v2398_v5 }
  0xc3   :  { %1673 = vmatmul.mubr.bf16.gmra.mxu1 %v2399_v6 }
 0x102   :  { %v1252_v7 = vpop.f32.mrf.mxu0 }
 0x103   :  { %v1345_v8 = vpop.f32.mrf.mxu1 }
 0x104   :  { %v3020_v9 = vadd.f32 %v1345_v8, %v1252_v7  ;;  %v1254_v10 = vpop.f32.mrf.mxu0 }
 0x105   :  { %v1347_v11 = vpop.f32.mrf.mxu1 }
 0x106   :  { %v3022_v12 = vadd.f32 %v1347_v11, %v1254_v10  ;;  %v1256_v13 = vpop.f32.mrf.mxu0 }
 0x107   :  { %v1349_v14 = vpop.f32.mrf.mxu1 }
 0x108   :  { %v3024_v15 = vadd.f32 %v1349_v14, %v1256_v13  ;;  %v1258_v16 = vpop.f32.mrf.mxu0 }
 0x109   :  { %v1351_v17 = vpop.f32.mrf.mxu1 }
 0x10a   :  { %v3026_v18 = vadd.f32 %v1351_v17, %v1258_v16  ;;  %v1262_v19 = vpop.f32.mrf.mxu0 }
 0x10b   :  { %v1355_v20 = vpop.f32.mrf.mxu1 }
 0x10c   :  { %v3028_v21 = vadd.f32 %v1355_v20, %v1262_v19  ;;  %v1264_v22 = vpop.f32.mrf.mxu0 }
 0x10d   :  { %v1357_v23 = vpop.f32.mrf.mxu1 }
 0x10e   :  { %v3030_v24 = vadd.f32 %v1357_v23, %v1264_v22  ;;  %v1266_v25 = vpop.f32.mrf.mxu0 }
 0x10f   :  { %v1359_v26 = vpop.f32.mrf.mxu1 }
 0x110   :  { %v3032_v27 = vadd.f32 %v1359_v26, %v1266_v25  ;;  %v1268_v28 = vpop.f32.mrf.mxu0 }
 0x111   :  { %v1361_v29 = vpop.f32.mrf.mxu1 }
 0x112   :  { %v3034_v30 = vadd.f32 %v1361_v29, %v1268_v28  ;;  %v1272_v31 = vpop.f32.mrf.mxu0 }
 0x113   :  { %v1365_v32 = vpop.f32.mrf.mxu1 }
 0x114   :  { %v3036_v33 = vadd.f32 %v1365_v32, %v1272_v31  ;;  %v1274_v34 = vpop.f32.mrf.mxu0 }
 0x115   :  { %v1367_v35 = vpop.f32.mrf.mxu1 }
 0x116   :  { %v3038_v36 = vadd.f32 %v1367_v35, %v1274_v34  ;;  %v1276_v37 = vpop.f32.mrf.mxu0 }
 0x117   :  { %v1369_v38 = vpop.f32.mrf.mxu1 }
 0x118   :  { %v3040_v39 = vadd.f32 %v1369_v38, %v1276_v37  ;;  %v1278_v40 = vpop.f32.mrf.mxu0 }
 0x119   :  { %v1371_v41 = vpop.f32.mrf.mxu1 }
 0x11a   :  { %v3042_v42 = vadd.f32 %v1371_v41, %v1278_v40  ;;  %v1282_v43 = vpop.f32.mrf.mxu0 }
 0x11b   :  { %v1375_v44 = vpop.f32.mrf.mxu1 }
 0x11c   :  { %v3044_v45 = vadd.f32 %v1375_v44, %v1282_v43  ;;  %v1284_v46 = vpop.f32.mrf.mxu0 }
 0x11d   :  { %v1377_v47 = vpop.f32.mrf.mxu1 }
 0x11e   :  { %v3046_v48 = vadd.f32 %v1377_v47, %v1284_v46  ;;  %v1286_v49 = vpop.f32.mrf.mxu0 }
 0x11f   :  { %v1379_v50 = vpop.f32.mrf.mxu1 }
 0x120   :  { %v3048_v51 = vadd.f32 %v1379_v50, %v1286_v49  ;;  %v1288_v52 = vpop.f32.mrf.mxu0 }
 0x121   :  { %v1381_v53 = vpop.f32.mrf.mxu1 }
 0x122   :  { %v3050_v54 = vadd.f32 %v1381_v53, %v1288_v52  ;;  %v1292_v55 = vpop.f32.mrf.mxu0 }
 0x123   :  { %v1385_v56 = vpop.f32.mrf.mxu1 }
 0x124   :  { %v3052_v57 = vadd.f32 %v1385_v56, %v1292_v55  ;;  %v1294_v58 = vpop.f32.mrf.mxu0 }
 0x125   :  { %v1387_v59 = vpop.f32.mrf.mxu1 }
 0x126   :  { %v3054_v60 = vadd.f32 %v1387_v59, %v1294_v58  ;;  %v1296_v61 = vpop.f32.mrf.mxu0 }
 0x127   :  { %v1389_v62 = vpop.f32.mrf.mxu1 }
 0x128   :  { %v3056_v63 = vadd.f32 %v1389_v62, %v1296_v61  ;;  %v1298_v0 = vpop.f32.mrf.mxu0 }
 0x129   :  { %v1391_v1 = vpop.f32.mrf.mxu1 }
 0x12a   :  { %3291 = vst [vmem:[#allocation2_spill] sm:$0xff] %v3056_v63  ;;  %v3058_v2 = vadd.f32 %v1391_v1, %v1298_v0  ;;  %v1302_v3 = vpop.f32.mrf.mxu0  ;;  %v1685_v0 = vlaneseq }
 0x12b   :  { %v1395_v4 = vpop.f32.mrf.mxu1 }
 0x12c   :  { %3292 = vst [vmem:[#allocation3_spill] sm:$0xff] %v3058_v2  ;;  %v3060_v5 = vadd.f32 %v1395_v4, %v1302_v3  ;;  %v1304_v6 = vpop.f32.mrf.mxu0 }
 0x12d   :  { %v1397_v7 = vpop.f32.mrf.mxu1 }
 0x12e   :  { %3293 = vst [vmem:[#allocation4_spill] sm:$0xff] %v3060_v5  ;;  %v3062_v8 = vadd.f32 %v1397_v7, %v1304_v6  ;;  %v1306_v10 = vpop.f32.mrf.mxu0  ;;  %v1686_v7 = vshrl.u32 %v1685_v0, 7  ;;  %v1719_v0 = vld [vmem:[%s3289_s3] sm:$0x3] }
 0x12f   :  { %v1399_v11 = vpop.f32.mrf.mxu1 }
 0x130   :  { %3294 = vst [vmem:[#allocation5_spill] sm:$0xff] %v3062_v8  ;;  %v3064_v13 = vadd.f32 %v1399_v11, %v1306_v10  ;;  %v1308_v14 = vpop.f32.mrf.mxu0 }
 0x131   :  { %v1401_v16 = vpop.f32.mrf.mxu1 }
 0x132   :  { %3295 = vst [vmem:[#allocation6_spill] sm:$0xff] %v3064_v13  ;;  %v3066_v17 = vadd.f32 %v1401_v16, %v1308_v14 }
 0x134   :  { %3296 = vst [vmem:[#allocation7_spill] sm:$0xff] %v3066_v17 }
 0x142   :  { %v1438_v19 = vpop.f32.mrf.mxu0 }
 0x143   :  { %v1531_v20 = vpop.f32.mrf.mxu1  ;;  %v1439_v17 = vadd.f32 %v1438_v19, %v3020_v9 }
 0x144   :  { %v1440_v22 = vpop.f32.mrf.mxu0 }
 0x145   :  { %v3068_v23 = vpop.f32.mrf.mxu1 }
 0x146   :  { %v1442_v25 = vpop.f32.mrf.mxu0 }
 0x147   :  { %v3070_v26 = vpop.f32.mrf.mxu1 }
 0x148   :  { %v1444_v28 = vpop.f32.mrf.mxu0 }
 0x149   :  { %v3072_v29 = vpop.f32.mrf.mxu1 }
 0x14a   :  { %v1448_v31 = vpop.f32.mrf.mxu0 }
 0x14b   :  { %v3074_v32 = vpop.f32.mrf.mxu1  ;;  %v1449_v9 = vadd.f32 %v1448_v31, %v3028_v21 }
 0x14c   :  { %v1450_v34 = vpop.f32.mrf.mxu0 }
 0x14d   :  { %v1543_v35 = vpop.f32.mrf.mxu1  ;;  %v1451_v19 = vadd.f32 %v1450_v34, %v3030_v24 }
 0x14e   :  { %v1452_v37 = vpop.f32.mrf.mxu0 }
 0x14f   :  { %v3076_v38 = vpop.f32.mrf.mxu1  ;;  %v1453_v5 = vadd.f32 %v1452_v37, %v3032_v27 }
 0x150   :  { %v1454_v40 = vpop.f32.mrf.mxu0 }
 0x151   :  { %v1547_v41 = vpop.f32.mrf.mxu1  ;;  %v1455_v2 = vadd.f32 %v1454_v40, %v3034_v30  ;;  %v3139_v37 = vadd.f32 %v3076_v38, %v1453_v5 }
 0x152   :  { %v1458_v43 = vpop.f32.mrf.mxu0 }
 0x153   :  { %v3078_v44 = vpop.f32.mrf.mxu1 }
 0x154   :  { %v1460_v46 = vpop.f32.mrf.mxu0 }
 0x155   :  { %v3080_v47 = vpop.f32.mrf.mxu1 }
 0x156   :  { %v1462_v49 = vpop.f32.mrf.mxu0 }
 0x157   :  { %v3082_v50 = vpop.f32.mrf.mxu1  ;;  %v1463_v27 = vadd.f32 %v1462_v49, %v3040_v39 }
 0x158   :  { %v3084_v52 = vpop.f32.mrf.mxu0 }
 0x159   :  { %v3086_v53 = vpop.f32.mrf.mxu1 }
 0x15a   :  { %3297 = vst [vmem:[#allocation8_spill] sm:$0xff] %v3086_v53  ;;  %v1468_v55 = vpop.f32.mrf.mxu0  ;;  %v1687_v53 = vsub.s32 0, %v1686_v7 }
 0x15b   :  { %v3088_v56 = vpop.f32.mrf.mxu1  ;;  %v1469_v30 = vadd.f32 %v1468_v55, %v3044_v45 }
 0x15c   :  { %3298 = vst [vmem:[#allocation9_spill] sm:$0xff] %v3088_v56  ;;  %v1470_v58 = vpop.f32.mrf.mxu0  ;;  %v3120_v56 = vrot.slane %v1719_v0, %v1687_v53 }
 0x15d   :  { %v3090_v59 = vpop.f32.mrf.mxu1 }
 0x15e   :  { %3299 = vst [vmem:[#allocation10_spill] sm:$0xff] %v3090_v59  ;;  %v1472_v61 = vpop.f32.mrf.mxu0 }
 0x15f   :  { %v3092_v62 = vpop.f32.mrf.mxu1  ;;  %v1473_v39 = vadd.f32 %v1472_v61, %v3048_v51 }
 0x160   :  { %3300 = vst [vmem:[#allocation11_spill] sm:$0xff] %v3092_v62  ;;  %v1474_v1 = vpop.f32.mrf.mxu0  ;;  %v1443_v62 = vadd.f32 %v1442_v25, %v3024_v15  ;;  %v1461_v25 = vadd.f32 %v1460_v46, %v3038_v36  ;;  %v1471_v36 = vadd.f32 %v1470_v58, %v3046_v48  ;;  %v3161_v48 = vadd.f32 %v3084_v52, %v3042_v42  ;;  %v3310_v46 = vld [vmem:[#allocation5_spill] sm:$0xff] }
 0x161   :  { %v3094_v3 = vpop.f32.mrf.mxu1 }
 0x162   :  { %3301 = vst [vmem:[#allocation12_spill] sm:$0xff] %v3094_v3  ;;  %v1478_v4 = vpop.f32.mrf.mxu0  ;;  %v1683_v3 = vld [vmem:[%s3288_s2] sm:$0x3]  ;;  %v3154_v5 = vadd.f32 %v3080_v47, %v1461_v25 }
 0x163   :  { %v3096_v6 = vpop.f32.mrf.mxu1  ;;  %v3118_v63 = vrot.slane %v1683_v3, %v1687_v53  ;;  %v3306_v51 = vld [vmem:[#allocation9_spill] sm:$0xff] }
 0x164   :  { %3302 = vst [vmem:[#allocation13_spill] sm:$0xff] %v3096_v6  ;;  %v1480_v10 = vpop.f32.mrf.mxu0  ;;  %v1691_v6 = vsub.s32 1, %v1686_v7  ;;  %v1532_v7 = vadd.f32 %v1531_v20, %v1439_v17  ;;  %v3136_v20 = vadd.f32 %v1543_v35, %v1451_v19  ;;  %v1562_v38 = vadd.f32 %v3306_v51, %v1469_v30  ;;  %v3319_v51 = vld [vmem:[#allocation7_spill] sm:$0xff] }
 0x165   :  { %v3098_v11 = vpop.f32.mrf.mxu1  ;;  %v3311_v55 = vld [vmem:[#allocation10_spill] sm:$0xff] }
 0x166   :  { %3303 = vst [vmem:[#allocation14_spill] sm:$0xff] %v3098_v11  ;;  %v1482_v14 = vpop.f32.mrf.mxu0  ;;  %v1441_v11 = vadd.f32 %v1440_v22, %v3022_v12  ;;  %v1459_v12 = vadd.f32 %v1458_v43, %v3036_v33  ;;  %v3125_v21 = vrot.slane %v1719_v0, %v1691_v6  ;;  %v3134_v33 = vadd.f32 %v3074_v32, %v1449_v9 }
 0x167   :  { %v3100_v16 = vpop.f32.mrf.mxu1  ;;  %v1481_v32 = vadd.f32 %v1480_v10, %v3054_v60  ;;  %v3309_v60 = vld [vmem:[#allocation4_spill] sm:$0xff]  ;;  %v1564_v58 = vadd.f32 %v3311_v55, %v1471_v36 }
 0x168   :  { %3304 = vst [vmem:[#allocation15_spill] sm:$0xff] %v3100_v16  ;;  %v1484_v13 = vpop.f32.mrf.mxu0  ;;  %v1445_v16 = vadd.f32 %v1444_v28, %v3026_v18  ;;  %v3123_v18 = vrot.slane %v1683_v3, %v1691_v6  ;;  %v1534_v24 = vadd.f32 %v3068_v23, %v1441_v11  ;;  %v1536_v28 = vadd.f32 %v3070_v26, %v1443_v62  ;;  %v3316_v11 = vld [vmem:[#allocation6_spill] sm:$0xff] }
 0x169   :  { %v3103_v59 = vpop.f32.mrf.mxu1  ;;  %v3141_v23 = vadd.f32 %v1547_v41, %v1455_v2  ;;  %v3146_v45 = vadd.f32 %v3078_v44, %v1459_v12  ;;  %v1475_v26 = vadd.f32 %v1474_v1, %v3050_v54  ;;  %v3157_v2 = vadd.f32 %v3082_v50, %v1463_v27  ;;  %v3307_v54 = vld [vmem:[#allocation2_spill] sm:$0xff]  ;;  %v3312_v50 = vld [vmem:[#allocation11_spill] sm:$0xff]  ;;  %v3313_v42 = vld [vmem:[#allocation12_spill] sm:$0xff] }
 0x16a   :  { %3305 = vst [vmem:[#allocation16_spill] sm:$0xff] %v3103_v59  ;;  %v1488_v59 = vpop.f32.mrf.mxu0  ;;  %v1538_v17 = vadd.f32 %v3072_v29, %v1445_v16  ;;  %v1479_v29 = vadd.f32 %v1478_v4, %v3052_v57  ;;  %v1483_v41 = vadd.f32 %v1482_v14, %v3307_v54  ;;  %v3308_v57 = vld [vmem:[#allocation3_spill] sm:$0xff]  ;;  %v1566_v61 = vadd.f32 %v3312_v50, %v1473_v39 }
 0x16b   :  { %v1581_v8 = vpop.f32.mrf.mxu1  ;;  %v1485_v43 = vadd.f32 %v1484_v13, %v3308_v57  ;;  %v1489_v44 = vadd.f32 %v1488_v59, %v3309_v60  ;;  %v1568_v52 = vadd.f32 %v3313_v42, %v1475_v26  ;;  %v3314_v3 = vld [vmem:[#allocation13_spill] sm:$0xff] }
 0x16c   :  { %v1490_v15 = vpop.f32.mrf.mxu0  ;;  %v1572_v4 = vadd.f32 %v3314_v3, %v1479_v29 }
 0x16d   :  { %v1583_v22 = vpop.f32.mrf.mxu1  ;;  %v1491_v49 = vadd.f32 %v1490_v15, %v3310_v46  ;;  %v3315_v6 = vld [vmem:[#allocation14_spill] sm:$0xff]  ;;  %v3180_v27 = vadd.f32 %v1581_v8, %v1489_v44 }
 0x16e   :  { %v1492_v31 = vpop.f32.mrf.mxu0  ;;  %v1574_v10 = vadd.f32 %v3315_v6, %v1481_v32 }
 0x16f   :  { %v1585_v34 = vpop.f32.mrf.mxu1  ;;  %v1493_v13 = vadd.f32 %v1492_v31, %v3316_v11  ;;  %v3317_v12 = vld [vmem:[#allocation15_spill] sm:$0xff]  ;;  %v3182_v30 = vadd.f32 %v1583_v22, %v1491_v49 }
 0x170   :  { %v1494_v35 = vpop.f32.mrf.mxu0  ;;  %v1576_v15 = vadd.f32 %v3317_v12, %v1483_v41 }
 0x171   :  { %v3151_v40 = vpop.f32.mrf.mxu1  ;;  %v3188_v32 = vadd.f32 %v1585_v34, %v1493_v13 }
 0x172   :  { %v1624_v53 = vpop.f32.mrf.mxu0 }
 0x173   :  { %v1654_v47 = vpop.f32.mrf.mxu1  ;;  %v1625_v62 = vadd.f32 %v1624_v53, %v1532_v7  ;;  %v3318_v7 = vld [vmem:[#allocation16_spill] sm:$0xff] }
 0x174   :  { %v1655_v1 = vadd.f32 %v1654_v47, %v1562_v38  ;;  %v1626_v14 = vpop.f32.mrf.mxu0  ;;  %v3178_v25 = vadd.f32 %v3318_v7, %v1485_v43  ;;  %v3191_v38 = vadd.f32 %v1494_v35, %v3319_v51 }
 0x175   :  { %v1656_v59 = vpop.f32.mrf.mxu1  ;;  %v1695_v16 = vmul.f32 %v3118_v63, %v1625_v62  ;;  %v1627_v9 = vadd.f32 %v1626_v14, %v1534_v24 }
 0x176   :  { %v1707_v0 = vmul.f32 %v3118_v63, %v1655_v1  ;;  %v1657_v19 = vadd.f32 %v1656_v59, %v1564_v58  ;;  %v1628_v36 = vpop.f32.mrf.mxu0 }
 0x177   :  { %v1658_v39 = vpop.f32.mrf.mxu1  ;;  %v1731_v31 = vadd.f32 %v3120_v56, %v1695_v16  ;;  %v1696_v29 = vmul.f32 %v3123_v18, %v1627_v9  ;;  %v1629_v54 = vadd.f32 %v1628_v36, %v1536_v28 }
 0x178   :  { %v1743_v26 = vadd.f32 %v3120_v56, %v1707_v0  ;;  %v1708_v24 = vmul.f32 %v3123_v18, %v1657_v19  ;;  %v1659_v8 = vadd.f32 %v1658_v39, %v1566_v61  ;;  %v1630_v41 = vpop.f32.mrf.mxu0 }
 0x179   :  { %v1660_v22 = vpop.f32.mrf.mxu1  ;;  %v1755_v57 = vmax.f32 %v1731_v31, 0.0  ;;  %v1732_v60 = vadd.f32 %v3125_v21, %v1696_v29  ;;  %v1697_v46 = vmul.f32 %v3118_v63, %v1629_v54  ;;  %v1631_v53 = vadd.f32 %v1630_v41, %v1538_v17 }
 0x17a   :  { %v1767_v43 = vmax.f32 %v1743_v26, 0.0  ;;  %v1744_v44 = vadd.f32 %v3125_v21, %v1708_v24  ;;  %v1709_v49 = vmul.f32 %v3118_v63, %v1659_v8  ;;  %v1661_v34 = vadd.f32 %v1660_v22, %v1568_v52  ;;  %v1634_v47 = vpop.f32.mrf.mxu0 }
 0x17b   :  { %v1664_v55 = vpop.f32.mrf.mxu1  ;;  %v1756_v35 = vmax.f32 %v1732_v60, 0.0  ;;  %v1635_v28 = vadd.f32 %v1634_v47, %v3134_v33  ;;  %v1733_v61 = vadd.f32 %v3120_v56, %v1697_v46  ;;  %v1698_v1 = vmul.f32 %v3123_v18, %v1631_v53 }
 0x17c   :  { %v1768_v58 = vmax.f32 %v1744_v44, 0.0  ;;  %v1665_v50 = vadd.f32 %v1664_v55, %v1572_v4  ;;  %v1745_v62 = vadd.f32 %v3120_v56, %v1709_v49  ;;  %v1710_v42 = vmul.f32 %v3123_v18, %v1661_v34  ;;  %v1636_v3 = vpop.f32.mrf.mxu0 }
 0x17d   :  { %v1666_v6 = vpop.f32.mrf.mxu1  ;;  %v2077_v11 = vpack.c.bf16 %v1756_v35, %v1755_v57  ;;  %v1699_v52 = vmul.f32 %v3118_v63, %v1635_v28  ;;  %v1757_v14 = vmax.f32 %v1733_v61, 0.0  ;;  %v1734_v33 = vadd.f32 %v3125_v21, %v1698_v1 }
 0x17e   :  { %v2083_v17 = vpack.c.bf16 %v1768_v58, %v1767_v43  ;;  %v1711_v13 = vmul.f32 %v3118_v63, %v1665_v50  ;;  %v1769_v59 = vmax.f32 %v1745_v62, 0.0  ;;  %v1746_v4 = vadd.f32 %v3125_v21, %v1710_v42  ;;  %v1638_v16 = vpop.f32.mrf.mxu0 }
 0x17f   :  { %v1668_v0 = vpop.f32.mrf.mxu1  ;;  %1851 = vst [vmem:[%s3290_s4] sm:$0xff] %v2077_v11  ;;  %v1735_v9 = vadd.f32 %v3120_v56, %v1699_v52  ;;  %v1637_v12 = vadd.f32 %v1636_v3, %v3136_v20  ;;  %v1667_v7 = vadd.f32 %v1666_v6, %v1574_v10  ;;  %v1758_v36 = vmax.f32 %v1734_v33, 0.0 }
 0x180   :  { %1857 = vst [vmem:[%s3290_s4 + $0x30] sm:$0xff] %v2083_v17  ;;  %v1747_v19 = vadd.f32 %v3120_v56, %v1711_v13  ;;  %v1770_v39 = vmax.f32 %v1746_v4, 0.0  ;;  %v1639_v31 = vadd.f32 %v1638_v16, %v3139_v37  ;;  %v1669_v26 = vadd.f32 %v1668_v0, %v1576_v15  ;;  %v1640_v29 = vpop.f32.mrf.mxu0 }
 0x181   :  { %v1670_v24 = vpop.f32.mrf.mxu1  ;;  %v1759_v51 = vmax.f32 %v1735_v9, 0.0  ;;  %v1700_v8 = vmul.f32 %v3123_v18, %v1637_v12  ;;  %v1712_v41 = vmul.f32 %v3123_v18, %v1667_v7  ;;  %v2078_v22 = vpack.c.bf16 %v1758_v36, %v1757_v14 }
 0x182   :  { %v1771_v54 = vmax.f32 %v1747_v19, 0.0  ;;  %v2084_v57 = vpack.c.bf16 %v1770_v39, %v1769_v59  ;;  %v1701_v43 = vmul.f32 %v3118_v63, %v1639_v31  ;;  %v1713_v20 = vmul.f32 %v3118_v63, %v1669_v26  ;;  %v1644_v10 = vpop.f32.mrf.mxu0 }
 0x183   :  { %v1674_v60 = vpop.f32.mrf.mxu1  ;;  %v1736_v44 = vadd.f32 %v3125_v21, %v1700_v8  ;;  %v1748_v37 = vadd.f32 %v3125_v21, %v1712_v41  ;;  %v1641_v15 = vadd.f32 %v1640_v29, %v3141_v23  ;;  %v1671_v46 = vadd.f32 %v1670_v24, %v3178_v25  ;;  %1852 = vst [vmem:[%s3290_s4 + $0x8] sm:$0xff] %v2078_v22 }
 0x184   :  { %1858 = vst [vmem:[%s3290_s4 + $0x38] sm:$0xff] %v2084_v57  ;;  %v1737_v49 = vadd.f32 %v3120_v56, %v1701_v43  ;;  %v1749_v53 = vadd.f32 %v3120_v56, %v1713_v20  ;;  %v1645_v34 = vadd.f32 %v1644_v10, %v3146_v45  ;;  %v1675_v47 = vadd.f32 %v1674_v60, %v3180_v27  ;;  %v1646_v55 = vpop.f32.mrf.mxu0 }
 0x185   :  { %v1676_v23 = vpop.f32.mrf.mxu1  ;;  %v1760_v35 = vmax.f32 %v1736_v44, 0.0  ;;  %v1772_v25 = vmax.f32 %v1748_v37, 0.0  ;;  %v1702_v58 = vmul.f32 %v3123_v18, %v1641_v15  ;;  %v1714_v28 = vmul.f32 %v3123_v18, %v1671_v46 }
 0x186   :  { %v1761_v50 = vmax.f32 %v1737_v49, 0.0  ;;  %v1773_v61 = vmax.f32 %v1749_v53, 0.0  ;;  %v1703_v62 = vmul.f32 %v3118_v63, %v1645_v34  ;;  %v1715_v1 = vmul.f32 %v3118_v63, %v1675_v47  ;;  %v1648_v42 = vpop.f32.mrf.mxu0 }
 0x187   :  { %v1678_v3 = vpop.f32.mrf.mxu1  ;;  %v2079_v6 = vpack.c.bf16 %v1760_v35, %v1759_v51  ;;  %v2085_v45 = vpack.c.bf16 %v1772_v25, %v1771_v54  ;;  %v1738_v27 = vadd.f32 %v3125_v21, %v1702_v58  ;;  %v1750_v11 = vadd.f32 %v3125_v21, %v1714_v28 }
 0x188   :  { %v1739_v17 = vadd.f32 %v3120_v56, %v1703_v62  ;;  %v1751_v52 = vadd.f32 %v3120_v56, %v1715_v1  ;;  %v1647_v13 = vadd.f32 %v1646_v55, %v3154_v5  ;;  %v1677_v14 = vadd.f32 %v1676_v23, %v3182_v30  ;;  %v1650_v0 = vpop.f32.mrf.mxu0  ;;  %v3320_v5 = vld [vmem:[#allocation8_spill] sm:$0xff] }
 0x189   :  { %1853 = vst [vmem:[%s3290_s4 + $0x10] sm:$0xff] %v2079_v6  ;;  %1859 = vst [vmem:[%s3290_s4 + $0x40] sm:$0xff] %v2085_v45  ;;  %v1762_v59 = vmax.f32 %v1738_v27, 0.0  ;;  %v1774_v33 = vmax.f32 %v1750_v11, 0.0  ;;  %v1649_v4 = vadd.f32 %v1648_v42, %v3157_v2  ;;  %v1679_v16 = vadd.f32 %v1678_v3, %v3188_v32  ;;  %v1680_v9 = vpop.f32.mrf.mxu1 }
 0x18a   :  { %v1558_v19 = vadd.f32 %v3320_v5, %v3161_v48  ;;  %v1588_v30 = vadd.f32 %v3151_v40, %v3191_v38  ;;  %v1704_v12 = vmul.f32 %v3123_v18, %v1647_v13  ;;  %v1716_v7 = vmul.f32 %v3123_v18, %v1677_v14 }
 0x18b   :  { %v2080_v36 = vpack.c.bf16 %v1762_v59, %v1761_v50  ;;  %v2086_v39 = vpack.c.bf16 %v1774_v33, %v1773_v61  ;;  %v1705_v31 = vmul.f32 %v3118_v63, %v1649_v4  ;;  %v1717_v2 = vmul.f32 %v3118_v63, %v1679_v16 }
 0x18c   :  { %v1740_v32 = vadd.f32 %v3125_v21, %v1704_v12  ;;  %v1752_v26 = vadd.f32 %v3125_v21, %v1716_v7  ;;  %v1651_v29 = vadd.f32 %v1650_v0, %v1558_v19  ;;  %v1681_v24 = vadd.f32 %v1680_v9, %v1588_v30 }
 0x18d   :  { %1854 = vst [vmem:[%s3290_s4 + $0x18] sm:$0xff] %v2080_v36  ;;  %1860 = vst [vmem:[%s3290_s4 + $0x48] sm:$0xff] %v2086_v39  ;;  %v1763_v40 = vmax.f32 %v1739_v17, 0.0  ;;  %v1775_v48 = vmax.f32 %v1751_v52, 0.0  ;;  %v1741_v38 = vadd.f32 %v3120_v56, %v1705_v31  ;;  %v1753_v63 = vadd.f32 %v3120_v56, %v1717_v2 }
 0x18e   :  { %v1764_v51 = vmax.f32 %v1740_v32, 0.0  ;;  %v1776_v54 = vmax.f32 %v1752_v26, 0.0  ;;  %v1706_v8 = vmul.f32 %v3123_v18, %v1651_v29  ;;  %v1718_v41 = vmul.f32 %v3123_v18, %v1681_v24 }
 0x18f   :  { %v1765_v56 = vmax.f32 %v1741_v38, 0.0  ;;  %v1777_v10 = vmax.f32 %v1753_v63, 0.0 }
 0x190   :  { %v2081_v22 = vpack.c.bf16 %v1764_v51, %v1763_v40  ;;  %v2087_v57 = vpack.c.bf16 %v1776_v54, %v1775_v48  ;;  %v1742_v43 = vadd.f32 %v3125_v21, %v1706_v8  ;;  %v1754_v20 = vadd.f32 %v3125_v21, %v1718_v41 }
 0x192   :  { %1855 = vst [vmem:[%s3290_s4 + $0x20] sm:$0xff] %v2081_v22  ;;  %1861 = vst [vmem:[%s3290_s4 + $0x50] sm:$0xff] %v2087_v57  ;;  %v1766_v60 = vmax.f32 %v1742_v43, 0.0  ;;  %v1778_v44 = vmax.f32 %v1754_v20, 0.0 }
 0x194   :  { %v2082_v37 = vpack.c.bf16 %v1766_v60, %v1765_v56  ;;  %v2088_v18 = vpack.c.bf16 %v1778_v44, %v1777_v10 }
 0x196   :  { %1856 = vst [vmem:[%s3290_s4 + $0x28] sm:$0xff] %v2082_v37  ;;  %1862 = vst [vmem:[%s3290_s4 + $0x58] sm:$0xff] %v2088_v18 }

// kernel: fall_detection_forward.20
= control target key start
LH: loop header
LB: loop body
LE: loop exit
PB: predicated region body
PF: predicated region fallthrough
CT: control target
= control target key end

     0   :  { %v519_v22 = vmov 1966171168   ;;  %v95_v24 = vlaneseq  ;;  %s653_s1 = inlined_call_operand.vmem [shape: bf16[512,128], index: 1, kind: input, shape index: {}]   ;;  %s654_s0 = inlined_call_operand.vmem [shape: bf16[2,512], index: 0, kind: input, shape index: {}]   ;;  %s655_s2 = inlined_call_operand.vmem [shape: f32[1,128], index: 2, kind: input, shape index: {}]   ;;  %s656_s3 = inlined_call_operand.vmem [shape: f32[1,128], index: 3, kind: input, shape index: {}]   ;;  %s657_s4 = inlined_call_operand.vmem [shape: bf16[2,128], index: 4, kind: output, shape index: {}]  }
   0x1   :  { %v487_v0 = vld [vmem:[%s653_s1 + $0x78] sm:$0xff]   ;;  %v491_v4 = vld [vmem:[%s653_s1 + $0x70] sm:$0xff]   ;;  %v495_v8 = vld [vmem:[%s653_s1 + $0x68] sm:$0xff]   ;;  %v93_v23 = vunpack.c.l.s4 %v519_v22 }
   0x2   :  { %v488_v1 = vld [vmem:[%s653_s1 + $0xf8] sm:$0xff]   ;;  %442 = vmatprep.subr.bf16.mxu0 %v487_v0  ;;  %v492_v5 = vld [vmem:[%s653_s1 + $0xf0] sm:$0xff]   ;;  %v496_v9 = vld [vmem:[%s653_s1 + $0xe8] sm:$0xff]   ;;  %v96_v30 = vshrl.u32 %v95_v24, 7 }
   0x3   :  { %v489_v2 = vld [vmem:[%s653_s1 + $0x38] sm:$0xff]   ;;  %464 = vmatprep.subr.bf16.mxu1 %v488_v1  ;;  %v493_v6 = vld [vmem:[%s653_s1 + $0x30] sm:$0xff]   ;;  %v497_v10 = vld [vmem:[%s653_s1 + $0x28] sm:$0xff]   ;;  %v94_v29 = vunpack.c.0.s8 %v93_v23 }
   0x4   :  { %v490_v3 = vld [vmem:[%s653_s1 + $0xb8] sm:$0xff]   ;;  %443 = vmatpush3.bf16.msra.mxu0 %v489_v2  ;;  %v494_v7 = vld [vmem:[%s653_s1 + $0xb0] sm:$0xff]   ;;  %v498_v11 = vld [vmem:[%s653_s1 + $0xa8] sm:$0xff]  }
   0x5   :  { %465 = vmatpush3.bf16.msra.mxu1 %v490_v3  ;;  %444 = vmatprep.subr.bf16.mxu0 %v491_v4  ;;  %v499_v12 = vld [vmem:[%s653_s1 + $0x60] sm:$0xff]   ;;  %v503_v16 = vld [vmem:[%s653_s1 + $0x58] sm:$0xff]   ;;  %v507_v20 = vld [vmem:[%s653_s1 + $0x50] sm:$0xff]   ;;  %v97_v35 = vsub.s32 %v94_v29, %v96_v30 }
   0x6   :  { %466 = vmatprep.subr.bf16.mxu1 %v492_v5  ;;  %v500_v13 = vld [vmem:[%s653_s1 + $0xe0] sm:$0xff]   ;;  %v504_v17 = vld [vmem:[%s653_s1 + $0xd8] sm:$0xff]   ;;  %v508_v21 = vld [vmem:[%s653_s1 + $0xd0] sm:$0xff]  }
   0x7   :  { %v501_v14 = vld [vmem:[%s653_s1 + $0x20] sm:$0xff]   ;;  %v505_v18 = vld [vmem:[%s653_s1 + $0x18] sm:$0xff]   ;;  %v509_v25 = vld [vmem:[%s653_s1 + $0x10] sm:$0xff]  }
   0x8   :  { %445 = vmatpush3.bf16.msra.mxu0 %v493_v6  ;;  %v502_v15 = vld [vmem:[%s653_s1 + $0xa0] sm:$0xff]   ;;  %v506_v19 = vld [vmem:[%s653_s1 + $0x98] sm:$0xff]   ;;  %v510_v26 = vld [vmem:[%s653_s1 + $0x90] sm:$0xff]  }
   0x9   :  { %467 = vmatpush3.bf16.msra.mxu1 %v494_v7  ;;  %446 = vmatprep.subr.bf16.mxu0 %v495_v8  ;;  %v511_v27 = vld [vmem:[%s653_s1 + $0x48] sm:$0xff]   ;;  %v515_v33 = vld [vmem:[%s653_s1 + $0x40] sm:$0xff]  }
   0xa   :  { %468 = vmatprep.subr.bf16.mxu1 %v496_v9  ;;  %v512_v28 = vld [vmem:[%s653_s1 + $0xc8] sm:$0xff]   ;;  %v516_v34 = vld [vmem:[%s653_s1 + $0xc0] sm:$0xff]  }
   0xb   :  { %v513_v31 = vld [vmem:[%s653_s1 + $0x8] sm:$0xff]   ;;  %v517_v36 = vld [vmem:[%s653_s1] sm:$0xff]  }
   0xc   :  { %447 = vmatpush3.bf16.msra.mxu0 %v497_v10  ;;  %v514_v32 = vld [vmem:[%s653_s1 + $0x88] sm:$0xff]   ;;  %v518_v37 = vld [vmem:[%s653_s1 + $0x80] sm:$0xff]  }
   0xd   :  { %469 = vmatpush3.bf16.msra.mxu1 %v498_v11  ;;  %448 = vmatprep.subr.bf16.mxu0 %v499_v12  ;;  %v407_v38 = vld.sshfl [vmem:[%s654_s0] sm:$0x33 pattern:$0x75316420] }
   0xe   :  { %470 = vmatprep.subr.bf16.mxu1 %v500_v13  ;;  %v91_v39 = vcombine.high %v407_v38, %v407_v38  ;;  %v98_v40 = vrot.slane %v407_v38, %v97_v35  ;;  %v440_v51 = vld [vmem:[%s655_s2] ss:$0 sm:$0xff] }
   0xf   :  { %v441_v55 = vld [vmem:[%s656_s3] ss:$0 sm:$0xff] }
  0x10   :  { %449 = vmatpush3.bf16.msra.mxu0 %v501_v14  ;;  %v105_v41 = vrot.slane %v91_v39, %v97_v35  ;;  %v106_v42 = vcombine.high %v98_v40, %v98_v40 }
  0x11   :  { %471 = vmatpush3.bf16.msra.mxu1 %v502_v15  ;;  %450 = vmatprep.subr.bf16.mxu0 %v503_v16 }
  0x12   :  { %472 = vmatprep.subr.bf16.mxu1 %v504_v17  ;;  %336 = vmatprep.mubr.bf16.mxu0 %v105_v41  ;;  %v107_v43 = vcombine.high %v105_v41, %v105_v41 }
  0x14   :  { %451 = vmatpush3.bf16.msra.mxu0 %v505_v18  ;;  %376 = vmatprep.mubr.bf16.mxu1 %v107_v43 }
  0x15   :  { %473 = vmatpush3.bf16.msra.mxu1 %v506_v19  ;;  %452 = vmatprep.subr.bf16.mxu0 %v507_v20 }
  0x16   :  { %474 = vmatprep.subr.bf16.mxu1 %v508_v21 }
  0x18   :  { %453 = vmatpush3.bf16.msra.mxu0 %v509_v25 }
  0x19   :  { %475 = vmatpush3.bf16.msra.mxu1 %v510_v26  ;;  %454 = vmatprep.subr.bf16.mxu0 %v511_v27 }
  0x1a   :  { %476 = vmatprep.subr.bf16.mxu1 %v512_v28 }
  0x1c   :  { %455 = vmatpush3.bf16.msra.mxu0 %v513_v31 }
  0x1d   :  { %477 = vmatpush3.bf16.msra.mxu1 %v514_v32  ;;  %456 = vmatprep.subr.bf16.mxu0 %v515_v33 }
  0x1e   :  { %478 = vmatprep.subr.bf16.mxu1 %v516_v34 }
  0x20   :  { %457 = vmatpush3.bf16.msra.mxu0 %v517_v36 }
  0x21   :  { %479 = vmatpush3.bf16.msra.mxu1 %v518_v37 }
  0x23   :  { %337 = vmatmul.mubr.bf16.vlgmr.msra.gmra.mxu0 %v98_v40 }
  0x24   :  { %377 = vmatmul.mubr.bf16.vlgmr.msra.gmra.mxu1 %v106_v42 }
  0xe3   :  { %v458_v44 = vpop.f32.mrf.mxu0 }
  0xe4   :  { %v480_v45 = vpop.f32.mrf.mxu1 }
  0xe5   :  { %v459_v46 = vpop.f32.mrf.mxu0 }
  0xe6   :  { %v460_v47 = vadd.f32 %v459_v46, %v458_v44  ;;  %v481_v48 = vpop.f32.mrf.mxu1 }
  0xe7   :  { %v461_v49 = vpop.f32.mrf.mxu0  ;;  %v482_v50 = vadd.f32 %v481_v48, %v480_v45 }
  0xe8   :  { %v483_v52 = vpop.f32.mrf.mxu1 }
  0xe9   :  { %v462_v53 = vpop.f32.mrf.mxu0  ;;  %v379_v54 = vadd.f32 %v482_v50, %v460_v47 }
  0xea   :  { %v484_v56 = vpop.f32.mrf.mxu1 }
  0xeb   :  { %v391_v57 = vmul.f32 %v440_v51, %v379_v54 }
  0xed   :  { %v399_v58 = vadd.f32 %v441_v55, %v391_v57 }
  0xef   :  { %v400_v59 = vmax.f32 %v399_v58, 0.0 }
  0xf1   :  { %v401_v60 = vpack.c.bf16 %v400_v59, %v400_v59 }
  0xf3   :  { %402 = vst [vmem:[%s657_s4] sm:$0x1] %v401_v60 }

// kernel: fall_detection_forward.19
= control target key start
LH: loop header
LB: loop body
LE: loop exit
PB: predicated region body
PF: predicated region fallthrough
CT: control target
= control target key end

     0   :  { %s3267_s15 = smov 0   ;;  %s3269_s16 = smov 0   ;;  %s3639_s0 = inlined_call_operand.vmem [shape: bf16[2,3072], index: 0, kind: input, shape index: {}]   ;;  %s3640_s1 = inlined_call_operand.vmem [shape: bf16[3072,512], index: 1, kind: input, shape index: {}]   ;;  %s3641_s2 = inlined_call_operand.vmem [shape: f32[1,512], index: 2, kind: input, shape index: {}]   ;;  %s3642_s3 = inlined_call_operand.vmem [shape: f32[1,512], index: 3, kind: input, shape index: {}]   ;;  %s3643_s4 = inlined_call_operand.vmem [shape: bf16[2,512], index: 4, kind: output, shape index: {}]  }
   0x1   :  { %s3271_s17 = smov 0  }
   0x2 LB: > { %s26_s18 = sadd.s32 1, %s3233_s16  ;;  %p2532_p0 = scmp.ge.s32.totalorder %s3237_s17, 1  ;;  %s3237_s17 = sphi %s3271_s17, %s14_s17   ;;  %s3233_s16 = sphi %s3269_s16, %s3645_s16   ;;  %s3229_s15 = sphi %s3267_s15, %s3644_s15  }
   0x3   : > { %p27_p1 = scmp.ge.s32.totalorder %s26_s18, 3  ;;  %p228_p2 = scmp.lt.s32.totalorder %s3237_s17, 4 }
   0x5   : > { %s3647_s18 = smov (%p27_p1, %s26_s18), 0  ;;  %p229_p3 = pnand %p2532_p0, %p228_p2 }
   0x6   : > { %s2533_s19 = sshll.u32 (!%p229_p3), %s3229_s15, 3  ;;  %s2534_s20 = sshll.u32 (!%p229_p3), %s3229_s15, 7 }
   0x7   : > { %232 = sbr.rel (%p229_p3) target bundleno = 516 (0x204), region = 36  ;;  %p281_p4 = scmp.lt.s32.totalorder (!%p229_p3), %s2533_s19, 23 }
   0x8   : > { %p289_p5 = scmp.lt.s32.totalorder (!%p229_p3), %s2534_s20, 383  ;;  %p2537_p6 = scmp.ne.s32.totalorder (!%p229_p3), %s3229_s15, 0 }
   0xc   : > { %s3649_s19 = smov (!%p281_p4, %s2533_s19), 23  ;;  %s3651_s20 = smov (!%p289_p5, %s2534_s20), 383 }
   0xd   : > { %s285_s23 = scalar_lea.vmem %s3639_s0, %s3649_s19  ;;  %s2802_s24 = sshll.u32 %s3651_s20, 4 }
   0xe   : > { %s3298_s27 = scalar_lea.vmem %s3640_s1, %s2802_s24  ;;  %321 = sbr.rel (%p2537_p6) target bundleno = 21 (0x15), region = 40 }
  0x13   : > { %v3239_v0 = vmov 0.0  }
  0x14   : > { %322 = vst [vmem:[#allocation2] sm:$0xff] %v3239_v0 }
  0x15 PF: > { %v2830_v1 = vld [vmem:[%s3298_s27 + $0xe4] ss:$16 sps:$4 sm:$0xff]   ;;  %v2834_v3 = vld [vmem:[%s3298_s27 + $0xe0] ss:$16 sps:$4 sm:$0xff]   ;;  %v3240_v37 = vmov 1966171168   ;;  %v586_v39 = vlaneseq }
  0x16   : > { %v2832_v2 = vld [vmem:[%s3298_s27 + $0x2e4] ss:$16 sps:$4 sm:$0xff]   ;;  %1919 = vmatprep.subr.bf16.mxu0 %v2830_v1  ;;  %v2835_v4 = vld [vmem:[%s3298_s27 + $0x2e0] ss:$16 sps:$4 sm:$0xff]   ;;  %v584_v38 = vunpack.c.l.s4 %v3240_v37  ;;  %p2794_p7 = scmp.ne.s32.totalorder %s3229_s15, 2 }
  0x17   : > { %1960 = vmatprep.subr.bf16.mxu1 %v2832_v2  ;;  %v2836_v5 = vld [vmem:[%s3298_s27 + $0xc4] ss:$16 sps:$4 sm:$0xff]   ;;  %1920 = vmatpush1.bf16.msra.mxu0 %v2834_v3  ;;  %v2840_v7 = vld [vmem:[%s3298_s27 + $0xc0] ss:$16 sps:$4 sm:$0xff]   ;;  %v3340_v44 = vshrl.u32 %v586_v39, 7 }
  0x18   : > { %1961 = vmatpush1.bf16.msra.mxu1 %v2835_v4  ;;  %v2838_v6 = vld [vmem:[%s3298_s27 + $0x2c4] ss:$16 sps:$4 sm:$0xff]   ;;  %1921 = vmatprep.subr.bf16.mxu0 %v2836_v5  ;;  %v2841_v8 = vld [vmem:[%s3298_s27 + $0x2c0] ss:$16 sps:$4 sm:$0xff]   ;;  %v585_v43 = vunpack.c.0.s8 %v584_v38 }
  0x19   : > { %1962 = vmatprep.subr.bf16.mxu1 %v2838_v6  ;;  %v2842_v9 = vld [vmem:[%s3298_s27 + $0xa4] ss:$16 sps:$4 sm:$0xff]   ;;  %v2846_v11 = vld [vmem:[%s3298_s27 + $0xa0] ss:$16 sps:$4 sm:$0xff]  }
  0x1a   : > { %v2844_v10 = vld [vmem:[%s3298_s27 + $0x2a4] ss:$16 sps:$4 sm:$0xff]   ;;  %v2847_v12 = vld [vmem:[%s3298_s27 + $0x2a0] ss:$16 sps:$4 sm:$0xff]   ;;  %v3348_v50 = vsub.s32 %v585_v43, %v3340_v44 }
  0x1b   : > { %1922 = vmatpush1.bf16.msra.mxu0 %v2840_v7  ;;  %v2848_v13 = vld [vmem:[%s3298_s27 + $0x84] ss:$16 sps:$4 sm:$0xff]   ;;  %v2852_v15 = vld [vmem:[%s3298_s27 + $0x80] ss:$16 sps:$4 sm:$0xff]  }
  0x1c   : > { %1963 = vmatpush1.bf16.msra.mxu1 %v2841_v8  ;;  %1923 = vmatprep.subr.bf16.mxu0 %v2842_v9  ;;  %v2850_v14 = vld [vmem:[%s3298_s27 + $0x284] ss:$16 sps:$4 sm:$0xff]   ;;  %v2853_v16 = vld [vmem:[%s3298_s27 + $0x280] ss:$16 sps:$4 sm:$0xff]  }
  0x1d   : > { %1964 = vmatprep.subr.bf16.mxu1 %v2844_v10  ;;  %v2854_v17 = vld [vmem:[%s3298_s27 + $0x64] ss:$16 sps:$4 sm:$0xff]   ;;  %v2858_v19 = vld [vmem:[%s3298_s27 + $0x60] ss:$16 sps:$4 sm:$0xff]  }
  0x1e   : > { %v2856_v18 = vld [vmem:[%s3298_s27 + $0x264] ss:$16 sps:$4 sm:$0xff]   ;;  %v2859_v20 = vld [vmem:[%s3298_s27 + $0x260] ss:$16 sps:$4 sm:$0xff]  }
  0x1f   : > { %1924 = vmatpush1.bf16.msra.mxu0 %v2846_v11  ;;  %v2860_v21 = vld [vmem:[%s3298_s27 + $0x44] ss:$16 sps:$4 sm:$0xff]   ;;  %v2864_v23 = vld [vmem:[%s3298_s27 + $0x40] ss:$16 sps:$4 sm:$0xff]  }
  0x20   : > { %1965 = vmatpush1.bf16.msra.mxu1 %v2847_v12  ;;  %1925 = vmatprep.subr.bf16.mxu0 %v2848_v13  ;;  %v2862_v22 = vld [vmem:[%s3298_s27 + $0x244] ss:$16 sps:$4 sm:$0xff]   ;;  %v2865_v24 = vld [vmem:[%s3298_s27 + $0x240] ss:$16 sps:$4 sm:$0xff]  }
  0x21   : > { %1966 = vmatprep.subr.bf16.mxu1 %v2850_v14  ;;  %v2866_v25 = vld [vmem:[%s3298_s27 + $0x24] ss:$16 sps:$4 sm:$0xff]   ;;  %v2870_v27 = vld [vmem:[%s3298_s27 + $0x20] ss:$16 sps:$4 sm:$0xff]  }
  0x22   : > { %v2868_v26 = vld [vmem:[%s3298_s27 + $0x224] ss:$16 sps:$4 sm:$0xff]   ;;  %v2871_v28 = vld [vmem:[%s3298_s27 + $0x220] ss:$16 sps:$4 sm:$0xff]  }
  0x23   : > { %1926 = vmatpush1.bf16.msra.mxu0 %v2852_v15  ;;  %v2872_v29 = vld [vmem:[%s3298_s27 + $0x4] ss:$16 sps:$4 sm:$0xff]   ;;  %v2876_v31 = vld [vmem:[%s3298_s27] ss:$16 sps:$4 sm:$0xff]  }
  0x24   : > { %1967 = vmatpush1.bf16.msra.mxu1 %v2853_v16  ;;  %1927 = vmatprep.subr.bf16.mxu0 %v2854_v17  ;;  %v2874_v30 = vld [vmem:[%s3298_s27 + $0x204] ss:$16 sps:$4 sm:$0xff]   ;;  %v2877_v32 = vld [vmem:[%s3298_s27 + $0x200] ss:$16 sps:$4 sm:$0xff]  }
  0x25   : > { %1968 = vmatprep.subr.bf16.mxu1 %v2856_v18  ;;  %v2878_v33 = vld [vmem:[%s3298_s27 + $0x1e4] ss:$16 sps:$4 sm:$0xff]   ;;  %v2882_v35 = vld [vmem:[%s3298_s27 + $0x1e0] ss:$16 sps:$4 sm:$0xff]  }
  0x26   : > { %v2880_v34 = vld [vmem:[%s3298_s27 + $0x3e4] ss:$16 sps:$4 sm:$0xff]   ;;  %v2883_v36 = vld [vmem:[%s3298_s27 + $0x3e0] ss:$16 sps:$4 sm:$0xff]  }
  0x27   : > { %1928 = vmatpush1.bf16.msra.mxu0 %v2858_v19  ;;  %v2884_v40 = vld [vmem:[%s3298_s27 + $0x1c4] ss:$16 sps:$4 sm:$0xff]   ;;  %v2888_v42 = vld [vmem:[%s3298_s27 + $0x1c0] ss:$16 sps:$4 sm:$0xff]  }
  0x28   : > { %1969 = vmatpush1.bf16.msra.mxu1 %v2859_v20  ;;  %1929 = vmatprep.subr.bf16.mxu0 %v2860_v21  ;;  %v2886_v41 = vld [vmem:[%s3298_s27 + $0x3c4] ss:$16 sps:$4 sm:$0xff]   ;;  %v2889_v45 = vld [vmem:[%s3298_s27 + $0x3c0] ss:$16 sps:$4 sm:$0xff]  }
  0x29   : > { %1970 = vmatprep.subr.bf16.mxu1 %v2862_v22  ;;  %v2890_v46 = vld [vmem:[%s3298_s27 + $0x1a4] ss:$16 sps:$4 sm:$0xff]   ;;  %v2894_v48 = vld [vmem:[%s3298_s27 + $0x1a0] ss:$16 sps:$4 sm:$0xff]  }
  0x2a   : > { %v2892_v47 = vld [vmem:[%s3298_s27 + $0x3a4] ss:$16 sps:$4 sm:$0xff]   ;;  %v2895_v49 = vld [vmem:[%s3298_s27 + $0x3a0] ss:$16 sps:$4 sm:$0xff]  }
  0x2b   : > { %1930 = vmatpush1.bf16.msra.mxu0 %v2864_v23  ;;  %v2896_v51 = vld [vmem:[%s3298_s27 + $0x184] ss:$16 sps:$4 sm:$0xff]   ;;  %v2900_v54 = vld [vmem:[%s3298_s27 + $0x180] ss:$16 sps:$4 sm:$0xff]  }
  0x2c   : > { %1971 = vmatpush1.bf16.msra.mxu1 %v2865_v24  ;;  %1931 = vmatprep.subr.bf16.mxu0 %v2866_v25  ;;  %v2898_v52 = vld [vmem:[%s3298_s27 + $0x384] ss:$16 sps:$4 sm:$0xff]   ;;  %v2901_v57 = vld [vmem:[%s3298_s27 + $0x380] ss:$16 sps:$4 sm:$0xff]  }
  0x2d   : > { %1972 = vmatprep.subr.bf16.mxu1 %v2868_v26  ;;  %v324_v53 = vld [vmem:[%s285_s23] sm:$0xff] }
  0x2e   : > { %v589_v55 = vrot.slane %v324_v53, %v3348_v50  ;;  %v582_v56 = vcombine.high %v324_v53, %v324_v53  ;;  %v2902_v58 = vld [vmem:[%s3298_s27 + $0x164] ss:$16 sps:$4 sm:$0xff]   ;;  %v2906_v62 = vld [vmem:[%s3298_s27 + $0x160] ss:$16 sps:$4 sm:$0xff]  }
  0x2f   : > { %1932 = vmatpush1.bf16.msra.mxu0 %v2870_v27  ;;  %v2904_v59 = vld [vmem:[%s3298_s27 + $0x364] ss:$16 sps:$4 sm:$0xff]   ;;  %v2907_v1 = vld [vmem:[%s3298_s27 + $0x360] ss:$16 sps:$4 sm:$0xff]  }
  0x30   : > { %1973 = vmatpush1.bf16.msra.mxu1 %v2871_v28  ;;  %1933 = vmatprep.subr.bf16.mxu0 %v2872_v29  ;;  %v597_v60 = vcombine.high %v589_v55, %v589_v55  ;;  %v596_v61 = vrot.slane %v582_v56, %v3348_v50  ;;  %v2908_v2 = vld [vmem:[%s3298_s27 + $0x144] ss:$16 sps:$4 sm:$0xff]   ;;  %v2912_v5 = vld [vmem:[%s3298_s27 + $0x140] ss:$16 sps:$4 sm:$0xff]   ;;  %v3389_v15 = vrot.slane %v589_v55, %v3348_v50 }
  0x31   : > { %1974 = vmatprep.subr.bf16.mxu1 %v2874_v30  ;;  %v2910_v3 = vld [vmem:[%s3298_s27 + $0x344] ss:$16 sps:$4 sm:$0xff]   ;;  %v2913_v6 = vld [vmem:[%s3298_s27 + $0x340] ss:$16 sps:$4 sm:$0xff]  }
  0x32   : > { %v3365_v63 = vrot.slane %v597_v60, %v3348_v50  ;;  %v3368_v0 = vrot.slane %v596_v61, %v3348_v50  ;;  %v2914_v7 = vld [vmem:[%s3298_s27 + $0x124] ss:$16 sps:$4 sm:$0xff]   ;;  %v2918_v9 = vld [vmem:[%s3298_s27 + $0x120] ss:$16 sps:$4 sm:$0xff]   ;;  %v598_v13 = vcombine.high %v596_v61, %v596_v61  ;;  %v3399_v20 = vcombine.high %v3389_v15, %v3389_v15 }
  0x33   : > { %1934 = vmatpush1.bf16.msra.mxu0 %v2876_v31  ;;  %v2916_v8 = vld [vmem:[%s3298_s27 + $0x324] ss:$16 sps:$4 sm:$0xff]   ;;  %v2919_v10 = vld [vmem:[%s3298_s27 + $0x320] ss:$16 sps:$4 sm:$0xff]  }
  0x34   : > { %1975 = vmatpush1.bf16.msra.mxu1 %v2877_v32  ;;  %1935 = vmatprep.subr.bf16.mxu0 %v2878_v33  ;;  %v3375_v4 = vcombine.high %v3365_v63, %v3365_v63  ;;  %v2920_v11 = vld [vmem:[%s3298_s27 + $0x104] ss:$16 sps:$4 sm:$0xff]   ;;  %v2924_v14 = vld [vmem:[%s3298_s27 + $0x100] ss:$16 sps:$4 sm:$0xff]   ;;  %v3395_v19 = vrot.slane %v598_v13, %v3348_v50 }
  0x35   : > { %1976 = vmatprep.subr.bf16.mxu1 %v2880_v34  ;;  %1951 = vmatprep.mubr.bf16.mxu0 %v3365_v63  ;;  %v2922_v12 = vld [vmem:[%s3298_s27 + $0x304] ss:$16 sps:$4 sm:$0xff]   ;;  %v2925_v16 = vld [vmem:[%s3298_s27 + $0x300] ss:$16 sps:$4 sm:$0xff]  }
  0x36   : > { %1992 = vmatprep.mubr.bf16.mxu1 %v3375_v4  ;;  %v2928_v17 = vld [vmem:[%s3298_s27 + $0x4e4] ss:$16 sps:$4 sm:$0xff]   ;;  %v2926_v21 = vld [vmem:[%s3298_s27 + $0x4e0] ss:$16 sps:$4 sm:$0xff]   ;;  %v3407_v25 = vcombine.high %v3395_v19, %v3395_v19 }
  0x37   : > { %1936 = vmatpush2.bf16.msra.mxu0 %v2882_v35  ;;  %v2931_v18 = vld [vmem:[%s3298_s27 + $0x6e4] ss:$16 sps:$4 sm:$0xff]   ;;  %v2929_v22 = vld [vmem:[%s3298_s27 + $0x6e0] ss:$16 sps:$4 sm:$0xff]  }
  0x38   : > { %1977 = vmatpush2.bf16.msra.mxu1 %v2883_v36  ;;  %1937 = vmatprep.subr.bf16.mxu0 %v2884_v40  ;;  %v2934_v23 = vld [vmem:[%s3298_s27 + $0x4c4] ss:$16 sps:$4 sm:$0xff]   ;;  %v2932_v26 = vld [vmem:[%s3298_s27 + $0x4c0] ss:$16 sps:$4 sm:$0xff]  }
  0x39   : > { %1978 = vmatprep.subr.bf16.mxu1 %v2886_v41  ;;  %v2937_v24 = vld [vmem:[%s3298_s27 + $0x6c4] ss:$16 sps:$4 sm:$0xff]   ;;  %v2935_v27 = vld [vmem:[%s3298_s27 + $0x6c0] ss:$16 sps:$4 sm:$0xff]  }
  0x3a   : > { %v2940_v28 = vld [vmem:[%s3298_s27 + $0x4a4] ss:$16 sps:$4 sm:$0xff]   ;;  %v2938_v30 = vld [vmem:[%s3298_s27 + $0x4a0] ss:$16 sps:$4 sm:$0xff]  }
  0x3b   : > { %1938 = vmatpush2.bf16.msra.mxu0 %v2888_v42  ;;  %v2943_v29 = vld [vmem:[%s3298_s27 + $0x6a4] ss:$16 sps:$4 sm:$0xff]   ;;  %v2941_v31 = vld [vmem:[%s3298_s27 + $0x6a0] ss:$16 sps:$4 sm:$0xff]  }
  0x3c   : > { %1979 = vmatpush2.bf16.msra.mxu1 %v2889_v45  ;;  %1939 = vmatprep.subr.bf16.mxu0 %v2890_v46  ;;  %v2946_v32 = vld [vmem:[%s3298_s27 + $0x484] ss:$16 sps:$4 sm:$0xff]   ;;  %v2944_v34 = vld [vmem:[%s3298_s27 + $0x480] ss:$16 sps:$4 sm:$0xff]  }
  0x3d   : > { %1980 = vmatprep.subr.bf16.mxu1 %v2892_v47  ;;  %v2949_v33 = vld [vmem:[%s3298_s27 + $0x684] ss:$16 sps:$4 sm:$0xff]   ;;  %v2947_v35 = vld [vmem:[%s3298_s27 + $0x680] ss:$16 sps:$4 sm:$0xff]  }
  0x3e   : > { %v2952_v36 = vld [vmem:[%s3298_s27 + $0x464] ss:$16 sps:$4 sm:$0xff]   ;;  %v2950_v38 = vld [vmem:[%s3298_s27 + $0x460] ss:$16 sps:$4 sm:$0xff]  }
  0x3f   : > { %1940 = vmatpush2.bf16.msra.mxu0 %v2894_v48  ;;  %v2955_v37 = vld [vmem:[%s3298_s27 + $0x664] ss:$16 sps:$4 sm:$0xff]   ;;  %v2953_v39 = vld [vmem:[%s3298_s27 + $0x660] ss:$16 sps:$4 sm:$0xff]  }
  0x40   : > { %1981 = vmatpush2.bf16.msra.mxu1 %v2895_v49  ;;  %1941 = vmatprep.subr.bf16.mxu0 %v2896_v51  ;;  %v2958_v40 = vld [vmem:[%s3298_s27 + $0x444] ss:$16 sps:$4 sm:$0xff]   ;;  %v2956_v42 = vld [vmem:[%s3298_s27 + $0x440] ss:$16 sps:$4 sm:$0xff]  }
  0x41   : > { %1982 = vmatprep.subr.bf16.mxu1 %v2898_v52  ;;  %v2961_v41 = vld [vmem:[%s3298_s27 + $0x644] ss:$16 sps:$4 sm:$0xff]   ;;  %v2959_v43 = vld [vmem:[%s3298_s27 + $0x640] ss:$16 sps:$4 sm:$0xff]  }
  0x42   : > { %v2964_v45 = vld [vmem:[%s3298_s27 + $0x424] ss:$16 sps:$4 sm:$0xff]   ;;  %v2962_v47 = vld [vmem:[%s3298_s27 + $0x420] ss:$16 sps:$4 sm:$0xff]  }
  0x43   : > { %1942 = vmatpush2.bf16.msra.mxu0 %v2900_v54  ;;  %v2967_v46 = vld [vmem:[%s3298_s27 + $0x624] ss:$16 sps:$4 sm:$0xff]   ;;  %v2965_v48 = vld [vmem:[%s3298_s27 + $0x620] ss:$16 sps:$4 sm:$0xff]  }
  0x44   : > { %1983 = vmatpush2.bf16.msra.mxu1 %v2901_v57  ;;  %1943 = vmatprep.subr.bf16.mxu0 %v2902_v58  ;;  %v2970_v49 = vld [vmem:[%s3298_s27 + $0x404] ss:$16 sps:$4 sm:$0xff]   ;;  %v2968_v52 = vld [vmem:[%s3298_s27 + $0x400] ss:$16 sps:$4 sm:$0xff]  }
  0x45   : > { %1984 = vmatprep.subr.bf16.mxu1 %v2904_v59  ;;  %v2973_v51 = vld [vmem:[%s3298_s27 + $0x604] ss:$16 sps:$4 sm:$0xff]   ;;  %v2971_v53 = vld [vmem:[%s3298_s27 + $0x600] ss:$16 sps:$4 sm:$0xff]  }
  0x46   : > { %v2976_v54 = vld [vmem:[%s3298_s27 + $0x5e4] ss:$16 sps:$4 sm:$0xff]   ;;  %v2974_v56 = vld [vmem:[%s3298_s27 + $0x5e0] ss:$16 sps:$4 sm:$0xff]  }
  0x47   : > { %1944 = vmatpush2.bf16.msra.mxu0 %v2906_v62  ;;  %v2979_v55 = vld [vmem:[%s3298_s27 + $0x7e4] ss:$16 sps:$4 sm:$0xff]   ;;  %v2977_v57 = vld [vmem:[%s3298_s27 + $0x7e0] ss:$16 sps:$4 sm:$0xff]  }
  0x48   : > { %1985 = vmatpush2.bf16.msra.mxu1 %v2907_v1  ;;  %1945 = vmatprep.subr.bf16.mxu0 %v2908_v2  ;;  %v2982_v58 = vld [vmem:[%s3298_s27 + $0x5c4] ss:$16 sps:$4 sm:$0xff]   ;;  %v2980_v60 = vld [vmem:[%s3298_s27 + $0x5c0] ss:$16 sps:$4 sm:$0xff]  }
  0x49   : > { %1986 = vmatprep.subr.bf16.mxu1 %v2910_v3  ;;  %v2985_v59 = vld [vmem:[%s3298_s27 + $0x7c4] ss:$16 sps:$4 sm:$0xff]   ;;  %v2983_v61 = vld [vmem:[%s3298_s27 + $0x7c0] ss:$16 sps:$4 sm:$0xff]  }
  0x4a   : > { %v2988_v62 = vld [vmem:[%s3298_s27 + $0x5a4] ss:$16 sps:$4 sm:$0xff]   ;;  %v2986_v2 = vld [vmem:[%s3298_s27 + $0x5a0] ss:$16 sps:$4 sm:$0xff]  }
  0x4b   : > { %1946 = vmatpush2.bf16.msra.mxu0 %v2912_v5  ;;  %v2991_v1 = vld [vmem:[%s3298_s27 + $0x7a4] ss:$16 sps:$4 sm:$0xff]   ;;  %v2989_v3 = vld [vmem:[%s3298_s27 + $0x7a0] ss:$16 sps:$4 sm:$0xff]  }
  0x4c   : > { %1987 = vmatpush2.bf16.msra.mxu1 %v2913_v6  ;;  %1947 = vmatprep.subr.bf16.mxu0 %v2914_v7  ;;  %v2994_v5 = vld [vmem:[%s3298_s27 + $0x584] ss:$16 sps:$4 sm:$0xff]   ;;  %v2992_v7 = vld [vmem:[%s3298_s27 + $0x580] ss:$16 sps:$4 sm:$0xff]  }
  0x4d   : > { %1988 = vmatprep.subr.bf16.mxu1 %v2916_v8  ;;  %v2997_v6 = vld [vmem:[%s3298_s27 + $0x784] ss:$16 sps:$4 sm:$0xff]   ;;  %v2995_v8 = vld [vmem:[%s3298_s27 + $0x780] ss:$16 sps:$4 sm:$0xff]  }
  0x4e   : > { %v3006_v13 = vld [vmem:[%s3298_s27 + $0x544] ss:$16 sps:$4 sm:$0xff]  }
  0x4f   : > { %1948 = vmatpush2.bf16.msra.mxu0 %v2918_v9  ;;  %v3000_v9 = vld [vmem:[%s3298_s27 + $0x564] ss:$16 sps:$4 sm:$0xff]  }
  0x50   : > { %1989 = vmatpush2.bf16.msra.mxu1 %v2919_v10  ;;  %1949 = vmatprep.subr.bf16.mxu0 %v2920_v11  ;;  %v3003_v10 = vld [vmem:[%s3298_s27 + $0x764] ss:$16 sps:$4 sm:$0xff]   ;;  %v2998_v11 = vld [vmem:[%s3298_s27 + $0x560] ss:$16 sps:$4 sm:$0xff]  }
  0x51   : > { %1990 = vmatprep.subr.bf16.mxu1 %v2922_v12  ;;  %v3001_v12 = vld [vmem:[%s3298_s27 + $0x760] ss:$16 sps:$4 sm:$0xff]  }
  0x53   : > { %1950 = vmatpush2.bf16.msra.mxu0 %v2924_v14  ;;  %v3009_v14 = vld [vmem:[%s3298_s27 + $0x744] ss:$16 sps:$4 sm:$0xff]  }
  0x54   : > { %1991 = vmatpush2.bf16.msra.mxu1 %v2925_v16  ;;  %2001 = vmatprep.subr.bf16.mxu0 %v2928_v17  ;;  %v3004_v16 = vld [vmem:[%s3298_s27 + $0x540] ss:$16 sps:$4 sm:$0xff]  }
  0x55   : > { %2042 = vmatprep.subr.bf16.mxu1 %v2931_v18  ;;  %v3007_v17 = vld [vmem:[%s3298_s27 + $0x740] ss:$16 sps:$4 sm:$0xff]   ;;  %v3012_v18 = vld [vmem:[%s3298_s27 + $0x524] ss:$16 sps:$4 sm:$0xff]  }
  0x56   : > { %1952 = vmatmul.mubr.bf16.vlgmr.msra.gmra.mxu0 %v3389_v15 }
  0x57   : > { %1993 = vmatmul.mubr.bf16.vlgmr.msra.gmra.mxu1 %v3399_v20  ;;  %2002 = vmatpush1.bf16.msra.mxu0 %v2926_v21  ;;  %v3015_v21 = vld [vmem:[%s3298_s27 + $0x724] ss:$16 sps:$4 sm:$0xff]  }
  0x58   : > { %2043 = vmatpush1.bf16.msra.mxu1 %v2929_v22  ;;  %2003 = vmatprep.subr.bf16.mxu0 %v2934_v23  ;;  %v3010_v22 = vld [vmem:[%s3298_s27 + $0x520] ss:$16 sps:$4 sm:$0xff]  }
  0x59   : > { %2044 = vmatprep.subr.bf16.mxu1 %v2937_v24  ;;  %2033 = vmatprep.mubr.bf16.mxu0 %v3395_v19  ;;  %v3013_v23 = vld [vmem:[%s3298_s27 + $0x720] ss:$16 sps:$4 sm:$0xff]   ;;  %v3018_v24 = vld [vmem:[%s3298_s27 + $0x504] ss:$16 sps:$4 sm:$0xff]  }
  0x5a   : > { %2074 = vmatprep.mubr.bf16.mxu1 %v3407_v25 }
  0x5b   : > { %2004 = vmatpush1.bf16.msra.mxu0 %v2932_v26  ;;  %v3021_v26 = vld [vmem:[%s3298_s27 + $0x704] ss:$16 sps:$4 sm:$0xff]  }
  0x5c   : > { %2045 = vmatpush1.bf16.msra.mxu1 %v2935_v27  ;;  %2005 = vmatprep.subr.bf16.mxu0 %v2940_v28  ;;  %v3016_v27 = vld [vmem:[%s3298_s27 + $0x500] ss:$16 sps:$4 sm:$0xff]  }
  0x5d   : > { %2046 = vmatprep.subr.bf16.mxu1 %v2943_v29  ;;  %v3019_v28 = vld [vmem:[%s3298_s27 + $0x700] ss:$16 sps:$4 sm:$0xff]   ;;  %v3025_v29 = vld [vmem:[%s3298_s27 + $0xec] ss:$16 sps:$4 sm:$0xff]  }
  0x5f   : > { %2006 = vmatpush1.bf16.msra.mxu0 %v2938_v30  ;;  %v3028_v30 = vld [vmem:[%s3298_s27 + $0x2ec] ss:$16 sps:$4 sm:$0xff]  }
  0x60   : > { %2047 = vmatpush1.bf16.msra.mxu1 %v2941_v31  ;;  %2007 = vmatprep.subr.bf16.mxu0 %v2946_v32  ;;  %v3475_v31 = vcombine.high %v3368_v0, %v3368_v0  ;;  %v3023_v32 = vld [vmem:[%s3298_s27 + $0xe8] ss:$16 sps:$4 sm:$0xff]  }
  0x61   : > { %2048 = vmatprep.subr.bf16.mxu1 %v2949_v33  ;;  %v3026_v33 = vld [vmem:[%s3298_s27 + $0x2e8] ss:$16 sps:$4 sm:$0xff]  }
  0x63   : > { %2008 = vmatpush1.bf16.msra.mxu0 %v2944_v34  ;;  %v3031_v34 = vld [vmem:[%s3298_s27 + $0xcc] ss:$16 sps:$4 sm:$0xff]  }
  0x64   : > { %2049 = vmatpush1.bf16.msra.mxu1 %v2947_v35  ;;  %2009 = vmatprep.subr.bf16.mxu0 %v2952_v36  ;;  %v3034_v35 = vld [vmem:[%s3298_s27 + $0x2cc] ss:$16 sps:$4 sm:$0xff]   ;;  %v3029_v36 = vld [vmem:[%s3298_s27 + $0xc8] ss:$16 sps:$4 sm:$0xff]  }
  0x65   : > { %2050 = vmatprep.subr.bf16.mxu1 %v2955_v37  ;;  %v3032_v37 = vld [vmem:[%s3298_s27 + $0x2c8] ss:$16 sps:$4 sm:$0xff]  }
  0x67   : > { %2010 = vmatpush1.bf16.msra.mxu0 %v2950_v38  ;;  %v3037_v38 = vld [vmem:[%s3298_s27 + $0xac] ss:$16 sps:$4 sm:$0xff]  }
  0x68   : > { %2051 = vmatpush1.bf16.msra.mxu1 %v2953_v39  ;;  %2011 = vmatprep.subr.bf16.mxu0 %v2958_v40  ;;  %v3040_v39 = vld [vmem:[%s3298_s27 + $0x2ac] ss:$16 sps:$4 sm:$0xff]   ;;  %v3035_v40 = vld [vmem:[%s3298_s27 + $0xa8] ss:$16 sps:$4 sm:$0xff]  }
  0x69   : > { %2052 = vmatprep.subr.bf16.mxu1 %v2961_v41  ;;  %v3038_v41 = vld [vmem:[%s3298_s27 + $0x2a8] ss:$16 sps:$4 sm:$0xff]  }
  0x6b   : > { %2012 = vmatpush1.bf16.msra.mxu0 %v2956_v42  ;;  %v3043_v42 = vld [vmem:[%s3298_s27 + $0x8c] ss:$16 sps:$4 sm:$0xff]  }
  0x6c   : > { %2053 = vmatpush1.bf16.msra.mxu1 %v2959_v43  ;;  %2013 = vmatprep.subr.bf16.mxu0 %v2964_v45  ;;  %v3046_v43 = vld [vmem:[%s3298_s27 + $0x28c] ss:$16 sps:$4 sm:$0xff]   ;;  %v3041_v45 = vld [vmem:[%s3298_s27 + $0x88] ss:$16 sps:$4 sm:$0xff]  }
  0x6d   : > { %2054 = vmatprep.subr.bf16.mxu1 %v2967_v46  ;;  %v3052_v46 = vld [vmem:[%s3298_s27 + $0x26c] ss:$16 sps:$4 sm:$0xff]  }
  0x6f   : > { %2014 = vmatpush1.bf16.msra.mxu0 %v2962_v47  ;;  %v3047_v47 = vld [vmem:[%s3298_s27 + $0x68] ss:$16 sps:$4 sm:$0xff]  }
  0x70   : > { %2055 = vmatpush1.bf16.msra.mxu1 %v2965_v48  ;;  %2015 = vmatprep.subr.bf16.mxu0 %v2970_v49  ;;  %v3050_v48 = vld [vmem:[%s3298_s27 + $0x268] ss:$16 sps:$4 sm:$0xff]   ;;  %v3055_v49 = vld [vmem:[%s3298_s27 + $0x4c] ss:$16 sps:$4 sm:$0xff]  }
  0x71   : > { %2056 = vmatprep.subr.bf16.mxu1 %v2973_v51  ;;  %v3058_v51 = vld [vmem:[%s3298_s27 + $0x24c] ss:$16 sps:$4 sm:$0xff]  }
  0x73   : > { %2016 = vmatpush1.bf16.msra.mxu0 %v2968_v52  ;;  %v3053_v52 = vld [vmem:[%s3298_s27 + $0x48] ss:$16 sps:$4 sm:$0xff]  }
  0x74   : > { %2057 = vmatpush1.bf16.msra.mxu1 %v2971_v53  ;;  %2017 = vmatprep.subr.bf16.mxu0 %v2976_v54  ;;  %v3056_v53 = vld [vmem:[%s3298_s27 + $0x248] ss:$16 sps:$4 sm:$0xff]   ;;  %v3061_v54 = vld [vmem:[%s3298_s27 + $0x2c] ss:$16 sps:$4 sm:$0xff]  }
  0x75   : > { %2058 = vmatprep.subr.bf16.mxu1 %v2979_v55  ;;  %v3064_v55 = vld [vmem:[%s3298_s27 + $0x22c] ss:$16 sps:$4 sm:$0xff]  }
  0x77   : > { %2018 = vmatpush2.bf16.msra.mxu0 %v2974_v56  ;;  %v3059_v56 = vld [vmem:[%s3298_s27 + $0x28] ss:$16 sps:$4 sm:$0xff]  }
  0x78   : > { %2059 = vmatpush2.bf16.msra.mxu1 %v2977_v57  ;;  %2019 = vmatprep.subr.bf16.mxu0 %v2982_v58  ;;  %v3062_v57 = vld [vmem:[%s3298_s27 + $0x228] ss:$16 sps:$4 sm:$0xff]   ;;  %v3067_v58 = vld [vmem:[%s3298_s27 + $0xc] ss:$16 sps:$4 sm:$0xff]  }
  0x79   : > { %2060 = vmatprep.subr.bf16.mxu1 %v2985_v59  ;;  %v3070_v59 = vld [vmem:[%s3298_s27 + $0x20c] ss:$16 sps:$4 sm:$0xff]  }
  0x7b   : > { %2020 = vmatpush2.bf16.msra.mxu0 %v2980_v60  ;;  %v3065_v60 = vld [vmem:[%s3298_s27 + $0x8] ss:$16 sps:$4 sm:$0xff]  }
  0x7c   : > { %2061 = vmatpush2.bf16.msra.mxu1 %v2983_v61  ;;  %2021 = vmatprep.subr.bf16.mxu0 %v2988_v62  ;;  %v3068_v61 = vld [vmem:[%s3298_s27 + $0x208] ss:$16 sps:$4 sm:$0xff]   ;;  %v3073_v62 = vld [vmem:[%s3298_s27 + $0x1ec] ss:$16 sps:$4 sm:$0xff]  }
  0x7d   : > { %2062 = vmatprep.subr.bf16.mxu1 %v2991_v1  ;;  %v3076_v1 = vld [vmem:[%s3298_s27 + $0x3ec] ss:$16 sps:$4 sm:$0xff]  }
  0x7f   : > { %2022 = vmatpush2.bf16.msra.mxu0 %v2986_v2  ;;  %v3071_v2 = vld [vmem:[%s3298_s27 + $0x1e8] ss:$16 sps:$4 sm:$0xff]  }
  0x80   : > { %2063 = vmatpush2.bf16.msra.mxu1 %v2989_v3  ;;  %2023 = vmatprep.subr.bf16.mxu0 %v2994_v5  ;;  %v3074_v3 = vld [vmem:[%s3298_s27 + $0x3e8] ss:$16 sps:$4 sm:$0xff]   ;;  %v3079_v5 = vld [vmem:[%s3298_s27 + $0x1cc] ss:$16 sps:$4 sm:$0xff]  }
  0x81   : > { %2064 = vmatprep.subr.bf16.mxu1 %v2997_v6  ;;  %v3082_v6 = vld [vmem:[%s3298_s27 + $0x3cc] ss:$16 sps:$4 sm:$0xff]  }
  0x83   : > { %2024 = vmatpush2.bf16.msra.mxu0 %v2992_v7  ;;  %v3077_v7 = vld [vmem:[%s3298_s27 + $0x1c8] ss:$16 sps:$4 sm:$0xff]  }
  0x84   : > { %2065 = vmatpush2.bf16.msra.mxu1 %v2995_v8  ;;  %2025 = vmatprep.subr.bf16.mxu0 %v3000_v9  ;;  %v3080_v8 = vld [vmem:[%s3298_s27 + $0x3c8] ss:$16 sps:$4 sm:$0xff]   ;;  %v3085_v9 = vld [vmem:[%s3298_s27 + $0x1ac] ss:$16 sps:$4 sm:$0xff]  }
  0x85   : > { %2066 = vmatprep.subr.bf16.mxu1 %v3003_v10  ;;  %v3088_v10 = vld [vmem:[%s3298_s27 + $0x3ac] ss:$16 sps:$4 sm:$0xff]  }
  0x87   : > { %2026 = vmatpush2.bf16.msra.mxu0 %v2998_v11  ;;  %v3083_v11 = vld [vmem:[%s3298_s27 + $0x1a8] ss:$16 sps:$4 sm:$0xff]  }
  0x88   : > { %2067 = vmatpush2.bf16.msra.mxu1 %v3001_v12  ;;  %2027 = vmatprep.subr.bf16.mxu0 %v3006_v13  ;;  %v3086_v12 = vld [vmem:[%s3298_s27 + $0x3a8] ss:$16 sps:$4 sm:$0xff]   ;;  %v3091_v13 = vld [vmem:[%s3298_s27 + $0x18c] ss:$16 sps:$4 sm:$0xff]  }
  0x89   : > { %2068 = vmatprep.subr.bf16.mxu1 %v3009_v14  ;;  %v3094_v14 = vld [vmem:[%s3298_s27 + $0x38c] ss:$16 sps:$4 sm:$0xff]  }
  0x8b   : > { %2028 = vmatpush2.bf16.msra.mxu0 %v3004_v16  ;;  %v3089_v16 = vld [vmem:[%s3298_s27 + $0x188] ss:$16 sps:$4 sm:$0xff]  }
  0x8c   : > { %2069 = vmatpush2.bf16.msra.mxu1 %v3007_v17  ;;  %2029 = vmatprep.subr.bf16.mxu0 %v3012_v18  ;;  %v3092_v17 = vld [vmem:[%s3298_s27 + $0x388] ss:$16 sps:$4 sm:$0xff]   ;;  %v3097_v18 = vld [vmem:[%s3298_s27 + $0x16c] ss:$16 sps:$4 sm:$0xff]  }
  0x8d   : > { %2070 = vmatprep.subr.bf16.mxu1 %v3015_v21  ;;  %v3100_v21 = vld [vmem:[%s3298_s27 + $0x36c] ss:$16 sps:$4 sm:$0xff]  }
  0x8f   : > { %2030 = vmatpush2.bf16.msra.mxu0 %v3010_v22  ;;  %v3095_v22 = vld [vmem:[%s3298_s27 + $0x168] ss:$16 sps:$4 sm:$0xff]  }
  0x90   : > { %2071 = vmatpush2.bf16.msra.mxu1 %v3013_v23  ;;  %2031 = vmatprep.subr.bf16.mxu0 %v3018_v24  ;;  %v3098_v23 = vld [vmem:[%s3298_s27 + $0x368] ss:$16 sps:$4 sm:$0xff]   ;;  %v3103_v24 = vld [vmem:[%s3298_s27 + $0x14c] ss:$16 sps:$4 sm:$0xff]  }
  0x91   : > { %2072 = vmatprep.subr.bf16.mxu1 %v3021_v26  ;;  %v3106_v26 = vld [vmem:[%s3298_s27 + $0x34c] ss:$16 sps:$4 sm:$0xff]  }
  0x93   : > { %2032 = vmatpush2.bf16.msra.mxu0 %v3016_v27  ;;  %v3101_v27 = vld [vmem:[%s3298_s27 + $0x148] ss:$16 sps:$4 sm:$0xff]  }
  0x94   : > { %2073 = vmatpush2.bf16.msra.mxu1 %v3019_v28  ;;  %2083 = vmatprep.subr.bf16.mxu0 %v3025_v29  ;;  %v3104_v28 = vld [vmem:[%s3298_s27 + $0x348] ss:$16 sps:$4 sm:$0xff]   ;;  %v3109_v29 = vld [vmem:[%s3298_s27 + $0x12c] ss:$16 sps:$4 sm:$0xff]  }
  0x95   : > { %2124 = vmatprep.subr.bf16.mxu1 %v3028_v30  ;;  %v3112_v30 = vld [vmem:[%s3298_s27 + $0x32c] ss:$16 sps:$4 sm:$0xff]  }
  0x96   : > { %2034 = vmatmul.mubr.bf16.vlgmr.msra.gmra.mxu0 %v3368_v0 }
  0x97   : > { %2075 = vmatmul.mubr.bf16.vlgmr.msra.gmra.mxu1 %v3475_v31  ;;  %2084 = vmatpush1.bf16.msra.mxu0 %v3023_v32  ;;  %v3107_v32 = vld [vmem:[%s3298_s27 + $0x128] ss:$16 sps:$4 sm:$0xff]  }
  0x98   : > { %2125 = vmatpush1.bf16.msra.mxu1 %v3026_v33  ;;  %2085 = vmatprep.subr.bf16.mxu0 %v3031_v34  ;;  %v3110_v33 = vld [vmem:[%s3298_s27 + $0x328] ss:$16 sps:$4 sm:$0xff]   ;;  %v3115_v34 = vld [vmem:[%s3298_s27 + $0x10c] ss:$16 sps:$4 sm:$0xff]  }
  0x99   : > { %2126 = vmatprep.subr.bf16.mxu1 %v3034_v35  ;;  %2115 = vmatprep.mubr.bf16.mxu0 %v3365_v63  ;;  %v3044_v63 = vld [vmem:[%s3298_s27 + $0x288] ss:$16 sps:$4 sm:$0xff]   ;;  %v3118_v35 = vld [vmem:[%s3298_s27 + $0x30c] ss:$16 sps:$4 sm:$0xff]  }
  0x9a   : > { %2156 = vmatprep.mubr.bf16.mxu1 %v3375_v4  ;;  %v3049_v4 = vld [vmem:[%s3298_s27 + $0x6c] ss:$16 sps:$4 sm:$0xff]  }
  0x9b   : > { %2086 = vmatpush1.bf16.msra.mxu0 %v3029_v36  ;;  %v3113_v36 = vld [vmem:[%s3298_s27 + $0x108] ss:$16 sps:$4 sm:$0xff]  }
  0x9c   : > { %2127 = vmatpush1.bf16.msra.mxu1 %v3032_v37  ;;  %2087 = vmatprep.subr.bf16.mxu0 %v3037_v38  ;;  %v3116_v37 = vld [vmem:[%s3298_s27 + $0x308] ss:$16 sps:$4 sm:$0xff]   ;;  %v3121_v38 = vld [vmem:[%s3298_s27 + $0x4ec] ss:$16 sps:$4 sm:$0xff]  }
  0x9d   : > { %2128 = vmatprep.subr.bf16.mxu1 %v3040_v39  ;;  %v3124_v39 = vld [vmem:[%s3298_s27 + $0x6ec] ss:$16 sps:$4 sm:$0xff]  }
  0x9f   : > { %2088 = vmatpush1.bf16.msra.mxu0 %v3035_v40  ;;  %v3119_v40 = vld [vmem:[%s3298_s27 + $0x4e8] ss:$16 sps:$4 sm:$0xff]  }
  0xa0   : > { %2129 = vmatpush1.bf16.msra.mxu1 %v3038_v41  ;;  %2089 = vmatprep.subr.bf16.mxu0 %v3043_v42  ;;  %v3122_v41 = vld [vmem:[%s3298_s27 + $0x6e8] ss:$16 sps:$4 sm:$0xff]   ;;  %v3127_v42 = vld [vmem:[%s3298_s27 + $0x4cc] ss:$16 sps:$4 sm:$0xff]  }
  0xa1   : > { %2130 = vmatprep.subr.bf16.mxu1 %v3046_v43  ;;  %v3130_v43 = vld [vmem:[%s3298_s27 + $0x6cc] ss:$16 sps:$4 sm:$0xff]  }
  0xa3   : > { %2090 = vmatpush1.bf16.msra.mxu0 %v3041_v45  ;;  %v3125_v45 = vld [vmem:[%s3298_s27 + $0x4c8] ss:$16 sps:$4 sm:$0xff]  }
  0xa4   : > { %2131 = vmatpush1.bf16.msra.mxu1 %v3044_v63  ;;  %2091 = vmatprep.subr.bf16.mxu0 %v3049_v4  ;;  %v3128_v63 = vld [vmem:[%s3298_s27 + $0x6c8] ss:$16 sps:$4 sm:$0xff]   ;;  %v3133_v4 = vld [vmem:[%s3298_s27 + $0x4ac] ss:$16 sps:$4 sm:$0xff]  }
  0xa5   : > { %2132 = vmatprep.subr.bf16.mxu1 %v3052_v46  ;;  %v3136_v46 = vld [vmem:[%s3298_s27 + $0x6ac] ss:$16 sps:$4 sm:$0xff]  }
  0xa7   : > { %2092 = vmatpush1.bf16.msra.mxu0 %v3047_v47  ;;  %v3139_v47 = vld [vmem:[%s3298_s27 + $0x48c] ss:$16 sps:$4 sm:$0xff]  }
  0xa8   : > { %2133 = vmatpush1.bf16.msra.mxu1 %v3050_v48  ;;  %2093 = vmatprep.subr.bf16.mxu0 %v3055_v49  ;;  %v3142_v48 = vld [vmem:[%s3298_s27 + $0x68c] ss:$16 sps:$4 sm:$0xff]   ;;  %v3137_v49 = vld [vmem:[%s3298_s27 + $0x488] ss:$16 sps:$4 sm:$0xff]  }
  0xa9   : > { %2134 = vmatprep.subr.bf16.mxu1 %v3058_v51  ;;  %v3148_v51 = vld [vmem:[%s3298_s27 + $0x66c] ss:$16 sps:$4 sm:$0xff]  }
  0xab   : > { %2094 = vmatpush1.bf16.msra.mxu0 %v3053_v52  ;;  %v3143_v52 = vld [vmem:[%s3298_s27 + $0x468] ss:$16 sps:$4 sm:$0xff]  }
  0xac   : > { %2135 = vmatpush1.bf16.msra.mxu1 %v3056_v53  ;;  %2095 = vmatprep.subr.bf16.mxu0 %v3061_v54  ;;  %v3146_v53 = vld [vmem:[%s3298_s27 + $0x668] ss:$16 sps:$4 sm:$0xff]   ;;  %v3151_v54 = vld [vmem:[%s3298_s27 + $0x44c] ss:$16 sps:$4 sm:$0xff]  }
  0xad   : > { %2136 = vmatprep.subr.bf16.mxu1 %v3064_v55  ;;  %v3154_v55 = vld [vmem:[%s3298_s27 + $0x64c] ss:$16 sps:$4 sm:$0xff]  }
  0xaf   : > { %2096 = vmatpush1.bf16.msra.mxu0 %v3059_v56  ;;  %v3149_v56 = vld [vmem:[%s3298_s27 + $0x448] ss:$16 sps:$4 sm:$0xff]  }
  0xb0   : > { %2137 = vmatpush1.bf16.msra.mxu1 %v3062_v57  ;;  %2097 = vmatprep.subr.bf16.mxu0 %v3067_v58  ;;  %v3152_v57 = vld [vmem:[%s3298_s27 + $0x648] ss:$16 sps:$4 sm:$0xff]   ;;  %v3157_v58 = vld [vmem:[%s3298_s27 + $0x42c] ss:$16 sps:$4 sm:$0xff]  }
  0xb1   : > { %2138 = vmatprep.subr.bf16.mxu1 %v3070_v59  ;;  %v3160_v59 = vld [vmem:[%s3298_s27 + $0x62c] ss:$16 sps:$4 sm:$0xff]  }
  0xb3   : > { %2098 = vmatpush1.bf16.msra.mxu0 %v3065_v60  ;;  %v3155_v60 = vld [vmem:[%s3298_s27 + $0x428] ss:$16 sps:$4 sm:$0xff]  }
  0xb4   : > { %2139 = vmatpush1.bf16.msra.mxu1 %v3068_v61  ;;  %2099 = vmatprep.subr.bf16.mxu0 %v3073_v62  ;;  %v3158_v61 = vld [vmem:[%s3298_s27 + $0x628] ss:$16 sps:$4 sm:$0xff]   ;;  %v3163_v62 = vld [vmem:[%s3298_s27 + $0x40c] ss:$16 sps:$4 sm:$0xff]  }
  0xb5   : > { %2140 = vmatprep.subr.bf16.mxu1 %v3076_v1  ;;  %v3166_v1 = vld [vmem:[%s3298_s27 + $0x60c] ss:$16 sps:$4 sm:$0xff]  }
  0xb7   : > { %2100 = vmatpush2.bf16.msra.mxu0 %v3071_v2  ;;  %v3161_v2 = vld [vmem:[%s3298_s27 + $0x408] ss:$16 sps:$4 sm:$0xff]  }
  0xb8   : > { %2141 = vmatpush2.bf16.msra.mxu1 %v3074_v3  ;;  %2101 = vmatprep.subr.bf16.mxu0 %v3079_v5  ;;  %v3164_v3 = vld [vmem:[%s3298_s27 + $0x608] ss:$16 sps:$4 sm:$0xff]   ;;  %v3169_v5 = vld [vmem:[%s3298_s27 + $0x5ec] ss:$16 sps:$4 sm:$0xff]  }
  0xb9   : > { %2142 = vmatprep.subr.bf16.mxu1 %v3082_v6  ;;  %v3172_v6 = vld [vmem:[%s3298_s27 + $0x7ec] ss:$16 sps:$4 sm:$0xff]  }
  0xbb   : > { %2102 = vmatpush2.bf16.msra.mxu0 %v3077_v7  ;;  %v3167_v7 = vld [vmem:[%s3298_s27 + $0x5e8] ss:$16 sps:$4 sm:$0xff]  }
  0xbc   : > { %2143 = vmatpush2.bf16.msra.mxu1 %v3080_v8  ;;  %2103 = vmatprep.subr.bf16.mxu0 %v3085_v9  ;;  %v3170_v8 = vld [vmem:[%s3298_s27 + $0x7e8] ss:$16 sps:$4 sm:$0xff]   ;;  %v3175_v9 = vld [vmem:[%s3298_s27 + $0x5cc] ss:$16 sps:$4 sm:$0xff]  }
  0xbd   : > { %2144 = vmatprep.subr.bf16.mxu1 %v3088_v10  ;;  %v3178_v10 = vld [vmem:[%s3298_s27 + $0x7cc] ss:$16 sps:$4 sm:$0xff]  }
  0xbf   : > { %2104 = vmatpush2.bf16.msra.mxu0 %v3083_v11  ;;  %v3173_v11 = vld [vmem:[%s3298_s27 + $0x5c8] ss:$16 sps:$4 sm:$0xff]  }
  0xc0   : > { %2145 = vmatpush2.bf16.msra.mxu1 %v3086_v12  ;;  %2105 = vmatprep.subr.bf16.mxu0 %v3091_v13  ;;  %v3176_v12 = vld [vmem:[%s3298_s27 + $0x7c8] ss:$16 sps:$4 sm:$0xff]   ;;  %v3181_v13 = vld [vmem:[%s3298_s27 + $0x5ac] ss:$16 sps:$4 sm:$0xff]  }
  0xc1   : > { %2146 = vmatprep.subr.bf16.mxu1 %v3094_v14  ;;  %v3184_v14 = vld [vmem:[%s3298_s27 + $0x7ac] ss:$16 sps:$4 sm:$0xff]  }
  0xc3   : > { %2106 = vmatpush2.bf16.msra.mxu0 %v3089_v16  ;;  %v3179_v16 = vld [vmem:[%s3298_s27 + $0x5a8] ss:$16 sps:$4 sm:$0xff]  }
  0xc4   : > { %2147 = vmatpush2.bf16.msra.mxu1 %v3092_v17  ;;  %2107 = vmatprep.subr.bf16.mxu0 %v3097_v18  ;;  %v3182_v17 = vld [vmem:[%s3298_s27 + $0x7a8] ss:$16 sps:$4 sm:$0xff]   ;;  %v3187_v18 = vld [vmem:[%s3298_s27 + $0x58c] ss:$16 sps:$4 sm:$0xff]  }
  0xc5   : > { %2148 = vmatprep.subr.bf16.mxu1 %v3100_v21  ;;  %v3190_v21 = vld [vmem:[%s3298_s27 + $0x78c] ss:$16 sps:$4 sm:$0xff]  }
  0xc7   : > { %2108 = vmatpush2.bf16.msra.mxu0 %v3095_v22  ;;  %v3185_v22 = vld [vmem:[%s3298_s27 + $0x588] ss:$16 sps:$4 sm:$0xff]  }
  0xc8   : > { %2149 = vmatpush2.bf16.msra.mxu1 %v3098_v23  ;;  %2109 = vmatprep.subr.bf16.mxu0 %v3103_v24  ;;  %v3188_v23 = vld [vmem:[%s3298_s27 + $0x788] ss:$16 sps:$4 sm:$0xff]   ;;  %v3193_v24 = vld [vmem:[%s3298_s27 + $0x56c] ss:$16 sps:$4 sm:$0xff]  }
  0xc9   : > { %2150 = vmatprep.subr.bf16.mxu1 %v3106_v26  ;;  %v3196_v26 = vld [vmem:[%s3298_s27 + $0x76c] ss:$16 sps:$4 sm:$0xff]  }
  0xcb   : > { %2110 = vmatpush2.bf16.msra.mxu0 %v3101_v27  ;;  %v3191_v27 = vld [vmem:[%s3298_s27 + $0x568] ss:$16 sps:$4 sm:$0xff]  }
  0xcc   : > { %2151 = vmatpush2.bf16.msra.mxu1 %v3104_v28  ;;  %2111 = vmatprep.subr.bf16.mxu0 %v3109_v29  ;;  %v3194_v28 = vld [vmem:[%s3298_s27 + $0x768] ss:$16 sps:$4 sm:$0xff]   ;;  %v3199_v29 = vld [vmem:[%s3298_s27 + $0x54c] ss:$16 sps:$4 sm:$0xff]  }
  0xcd   : > { %2152 = vmatprep.subr.bf16.mxu1 %v3112_v30  ;;  %v3202_v30 = vld [vmem:[%s3298_s27 + $0x74c] ss:$16 sps:$4 sm:$0xff]  }
  0xcf   : > { %2112 = vmatpush2.bf16.msra.mxu0 %v3107_v32  ;;  %v3197_v32 = vld [vmem:[%s3298_s27 + $0x548] ss:$16 sps:$4 sm:$0xff]  }
  0xd0   : > { %2153 = vmatpush2.bf16.msra.mxu1 %v3110_v33  ;;  %2113 = vmatprep.subr.bf16.mxu0 %v3115_v34  ;;  %v3200_v33 = vld [vmem:[%s3298_s27 + $0x748] ss:$16 sps:$4 sm:$0xff]   ;;  %v3205_v34 = vld [vmem:[%s3298_s27 + $0x52c] ss:$16 sps:$4 sm:$0xff]  }
  0xd1   : > { %2154 = vmatprep.subr.bf16.mxu1 %v3118_v35  ;;  %v3208_v35 = vld [vmem:[%s3298_s27 + $0x72c] ss:$16 sps:$4 sm:$0xff]  }
  0xd3   : > { %2114 = vmatpush2.bf16.msra.mxu0 %v3113_v36  ;;  %v3203_v36 = vld [vmem:[%s3298_s27 + $0x528] ss:$16 sps:$4 sm:$0xff]  }
  0xd4   : > { %2155 = vmatpush2.bf16.msra.mxu1 %v3116_v37  ;;  %2165 = vmatprep.subr.bf16.mxu0 %v3121_v38  ;;  %v3206_v37 = vld [vmem:[%s3298_s27 + $0x728] ss:$16 sps:$4 sm:$0xff]   ;;  %v3211_v38 = vld [vmem:[%s3298_s27 + $0x50c] ss:$16 sps:$4 sm:$0xff]  }
  0xd5   : > { %2206 = vmatprep.subr.bf16.mxu1 %v3124_v39  ;;  %v3214_v39 = vld [vmem:[%s3298_s27 + $0x70c] ss:$16 sps:$4 sm:$0xff]  }
  0xd6   : > { %2116 = vmatmul.mubr.bf16.vlgmr.msra.gmra.mxu0 %v3389_v15  ;;  %v3131_v15 = vld [vmem:[%s3298_s27 + $0x4a8] ss:$16 sps:$4 sm:$0xff]  }
  0xd7   : > { %2157 = vmatmul.mubr.bf16.vlgmr.msra.gmra.mxu1 %v3399_v20  ;;  %2166 = vmatpush1.bf16.msra.mxu0 %v3119_v40  ;;  %v3134_v20 = vld [vmem:[%s3298_s27 + $0x6a8] ss:$16 sps:$4 sm:$0xff]  }
  0xd8   : > { %2207 = vmatpush1.bf16.msra.mxu1 %v3122_v41  ;;  %2167 = vmatprep.subr.bf16.mxu0 %v3127_v42  ;;  %v3209_v40 = vld [vmem:[%s3298_s27 + $0x508] ss:$16 sps:$4 sm:$0xff]  }
  0xd9   : > { %2208 = vmatprep.subr.bf16.mxu1 %v3130_v43  ;;  %2197 = vmatprep.mubr.bf16.mxu0 %v3395_v19  ;;  %v3140_v19 = vld [vmem:[%s3298_s27 + $0x688] ss:$16 sps:$4 sm:$0xff]  }
  0xda   : > { %2238 = vmatprep.mubr.bf16.mxu1 %v3407_v25  ;;  %v3145_v25 = vld [vmem:[%s3298_s27 + $0x46c] ss:$16 sps:$4 sm:$0xff]   ;;  %v3212_v41 = vld [vmem:[%s3298_s27 + $0x708] ss:$16 sps:$4 sm:$0xff]  }
  0xdb   : > { %2168 = vmatpush1.bf16.msra.mxu0 %v3125_v45 }
  0xdc   : > { %2209 = vmatpush1.bf16.msra.mxu1 %v3128_v63  ;;  %2169 = vmatprep.subr.bf16.mxu0 %v3133_v4 }
  0xdd   : > { %2210 = vmatprep.subr.bf16.mxu1 %v3136_v46 }
  0xdf   : > { %2170 = vmatpush1.bf16.msra.mxu0 %v3131_v15 }
  0xe0   : > { %2211 = vmatpush1.bf16.msra.mxu1 %v3134_v20  ;;  %2171 = vmatprep.subr.bf16.mxu0 %v3139_v47 }
  0xe1   : > { %2212 = vmatprep.subr.bf16.mxu1 %v3142_v48 }
  0xe3   : > { %2172 = vmatpush1.bf16.msra.mxu0 %v3137_v49 }
  0xe4   : > { %2213 = vmatpush1.bf16.msra.mxu1 %v3140_v19  ;;  %2173 = vmatprep.subr.bf16.mxu0 %v3145_v25 }
  0xe5   : > { %2214 = vmatprep.subr.bf16.mxu1 %v3148_v51 }
  0xe7   : > { %2174 = vmatpush1.bf16.msra.mxu0 %v3143_v52 }
  0xe8   : > { %2215 = vmatpush1.bf16.msra.mxu1 %v3146_v53  ;;  %2175 = vmatprep.subr.bf16.mxu0 %v3151_v54 }
  0xe9   : > { %2216 = vmatprep.subr.bf16.mxu1 %v3154_v55 }
  0xeb   : > { %2176 = vmatpush1.bf16.msra.mxu0 %v3149_v56 }
  0xec   : > { %2217 = vmatpush1.bf16.msra.mxu1 %v3152_v57  ;;  %2177 = vmatprep.subr.bf16.mxu0 %v3157_v58 }
  0xed   : > { %2218 = vmatprep.subr.bf16.mxu1 %v3160_v59 }
  0xef   : > { %2178 = vmatpush1.bf16.msra.mxu0 %v3155_v60 }
  0xf0   : > { %2219 = vmatpush1.bf16.msra.mxu1 %v3158_v61  ;;  %2179 = vmatprep.subr.bf16.mxu0 %v3163_v62 }
  0xf1   : > { %2220 = vmatprep.subr.bf16.mxu1 %v3166_v1 }
  0xf3   : > { %2180 = vmatpush1.bf16.msra.mxu0 %v3161_v2 }
  0xf4   : > { %2221 = vmatpush1.bf16.msra.mxu1 %v3164_v3  ;;  %2181 = vmatprep.subr.bf16.mxu0 %v3169_v5 }
  0xf5   : > { %2222 = vmatprep.subr.bf16.mxu1 %v3172_v6 }
  0xf7   : > { %2182 = vmatpush2.bf16.msra.mxu0 %v3167_v7  ;;  %v3241_v7 = vmov 1983009808  }
  0xf8   : > { %2223 = vmatpush2.bf16.msra.mxu1 %v3170_v8  ;;  %2183 = vmatprep.subr.bf16.mxu0 %v3175_v9  ;;  %v2254_v8 = vunpack.c.l.s4 %v3241_v7 }
  0xf9   : > { %2224 = vmatprep.subr.bf16.mxu1 %v3178_v10 }
  0xfb   : > { %2184 = vmatpush2.bf16.msra.mxu0 %v3173_v11  ;;  %v2255_v11 = vunpack.c.0.s8 %v2254_v8 }
  0xfc   : > { %2225 = vmatpush2.bf16.msra.mxu1 %v3176_v12  ;;  %2185 = vmatprep.subr.bf16.mxu0 %v3181_v13 }
  0xfd   : > { %2226 = vmatprep.subr.bf16.mxu1 %v3184_v14 }
  0xff   : > { %2186 = vmatpush2.bf16.msra.mxu0 %v3179_v16 }
 0x100   : > { %2227 = vmatpush2.bf16.msra.mxu1 %v3182_v17  ;;  %2187 = vmatprep.subr.bf16.mxu0 %v3187_v18 }
 0x101   : > { %2228 = vmatprep.subr.bf16.mxu1 %v3190_v21 }
 0x103   : > { %2188 = vmatpush2.bf16.msra.mxu0 %v3185_v22  ;;  %v2258_v22 = vsub.s32 %v2255_v11, %v3340_v44 }
 0x104   : > { %2229 = vmatpush2.bf16.msra.mxu1 %v3188_v23  ;;  %2189 = vmatprep.subr.bf16.mxu0 %v3193_v24 }
 0x105   : > { %2230 = vmatprep.subr.bf16.mxu1 %v3196_v26 }
 0x107   : > { %2190 = vmatpush2.bf16.msra.mxu0 %v3191_v27 }
 0x108   : > { %2231 = vmatpush2.bf16.msra.mxu1 %v3194_v28  ;;  %2191 = vmatprep.subr.bf16.mxu0 %v3199_v29 }
 0x109   : > { %2232 = vmatprep.subr.bf16.mxu1 %v3202_v30 }
 0x10b   : > { %2192 = vmatpush2.bf16.msra.mxu0 %v3197_v32  ;;  %v323_v32 = vld [vmem:[#allocation2] sm:$0xff] }
 0x10c   : > { %2233 = vmatpush2.bf16.msra.mxu1 %v3200_v33  ;;  %2193 = vmatprep.subr.bf16.mxu0 %v3205_v34 }
 0x10d   : > { %2234 = vmatprep.subr.bf16.mxu1 %v3208_v35 }
 0x10f   : > { %2194 = vmatpush2.bf16.msra.mxu0 %v3203_v36 }
 0x110   : > { %2235 = vmatpush2.bf16.msra.mxu1 %v3206_v37  ;;  %2195 = vmatprep.subr.bf16.mxu0 %v3211_v38 }
 0x111   : > { %2236 = vmatprep.subr.bf16.mxu1 %v3214_v39 }
 0x113   : > { %2196 = vmatpush2.bf16.msra.mxu0 %v3209_v40 }
 0x114   : > { %2237 = vmatpush2.bf16.msra.mxu1 %v3212_v41 }
 0x116   : > { %v1953_v42 = vpop.f32.mrf.mxu0  ;;  %2198 = vmatmul.mubr.bf16.vlgmr.msra.gmra.mxu0 %v3368_v0 }
 0x117   : > { %v1994_v43 = vpop.f32.mrf.mxu1  ;;  %2239 = vmatmul.mubr.bf16.vlgmr.msra.gmra.mxu1 %v3475_v31 }
 0x118   : > { %v1995_v45 = vadd.f32 %v1994_v43, %v1953_v42  ;;  %v1955_v63 = vpop.f32.mrf.mxu0 }
 0x119   : > { %v1996_v4 = vpop.f32.mrf.mxu1 }
 0x11a   : > { %v1997_v46 = vadd.f32 %v1996_v4, %v1955_v63  ;;  %v1957_v15 = vpop.f32.mrf.mxu0 }
 0x11b   : > { %v1998_v20 = vpop.f32.mrf.mxu1 }
 0x11c   : > { %v1958_v47 = vpop.f32.mrf.mxu0 }
 0x11d   : > { %v1999_v48 = vpop.f32.mrf.mxu1 }
 0x156   : > { %v2035_v49 = vpop.f32.mrf.mxu0 }
 0x157   : > { %v2076_v19 = vpop.f32.mrf.mxu1  ;;  %v2036_v25 = vadd.f32 %v2035_v49, %v1995_v45 }
 0x158   : > { %v2037_v51 = vpop.f32.mrf.mxu0 }
 0x159   : > { %v2078_v52 = vpop.f32.mrf.mxu1  ;;  %v2077_v53 = vadd.f32 %v2076_v19, %v2036_v25  ;;  %v2038_v54 = vadd.f32 %v2037_v51, %v1997_v46 }
 0x15a   : > { %v2039_v55 = vpop.f32.mrf.mxu0 }
 0x15b   : > { %v2080_v56 = vpop.f32.mrf.mxu1  ;;  %v2079_v0 = vadd.f32 %v2078_v52, %v2038_v54 }
 0x15c   : > { %v2040_v57 = vpop.f32.mrf.mxu0 }
 0x15d   : > { %v2081_v31 = vpop.f32.mrf.mxu1  ;;  %v2251_v58 = vcombine.low %v2077_v53, %v2079_v0 }
 0x15f   : > { %v2259_v29 = vrot.slane %v2251_v58, %v2258_v22 }
 0x196   : > { %v2117_v59 = vpop.f32.mrf.mxu0 }
 0x197   : > { %v2158_v60 = vpop.f32.mrf.mxu1 }
 0x198   : > { %v2159_v61 = vadd.f32 %v2158_v60, %v2117_v59  ;;  %v2119_v62 = vpop.f32.mrf.mxu0 }
 0x199   : > { %v2160_v1 = vpop.f32.mrf.mxu1 }
 0x19a   : > { %v2121_v2 = vpop.f32.mrf.mxu0  ;;  %v2161_v12 = vadd.f32 %v2160_v1, %v2119_v62 }
 0x19b   : > { %v2162_v3 = vpop.f32.mrf.mxu1 }
 0x19c   : > { %v2122_v5 = vpop.f32.mrf.mxu0 }
 0x19d   : > { %v2163_v6 = vpop.f32.mrf.mxu1 }
 0x1d6   : > { %v2199_v9 = vpop.f32.mrf.mxu0 }
 0x1d7   : > { %v2240_v10 = vpop.f32.mrf.mxu1  ;;  %v2200_v13 = vadd.f32 %v2199_v9, %v2159_v61 }
 0x1d8   : > { %v2201_v14 = vpop.f32.mrf.mxu0 }
 0x1d9   : > { %v2242_v16 = vpop.f32.mrf.mxu1  ;;  %v2202_v17 = vadd.f32 %v2201_v14, %v2161_v12  ;;  %v2241_v23 = vadd.f32 %v2240_v10, %v2200_v13 }
 0x1da   : > { %v2203_v18 = vpop.f32.mrf.mxu0 }
 0x1db   : > { %v2244_v21 = vpop.f32.mrf.mxu1  ;;  %v2243_v24 = vadd.f32 %v2242_v16, %v2202_v17 }
 0x1dc   : > { %v2204_v26 = vpop.f32.mrf.mxu0 }
 0x1dd   : > { %v2245_v27 = vpop.f32.mrf.mxu1  ;;  %v2252_v28 = vcombine.low %v2241_v23, %v2243_v24 }
 0x1df   : > { %v2266_v30 = vrot.slane %v2252_v28, %v2258_v22 }
 0x1e1   : > { %v2267_v33 = vcombine.low %v2259_v29, %v2266_v30  ;;  %2274 = sbr.rel (%p2794_p7) target bundleno = 516 (0x204), region = 44 }
 0x1e3   : > { %v2269_v34 = vadd.f32 %v2267_v33, %v323_v32 }
 0x1e5   : > { %2270 = vst [vmem:[#allocation2] sm:$0xff] %v2269_v34 }
 0x1e6   : > { %v2276_v35 = vld [vmem:[%s3641_s2] sm:$0xf]  ;;  %v2280_v36 = vsub.s32 0, %v3340_v44  ;;  %v2284_v37 = vsub.s32 1, %v3340_v44  ;;  %v2288_v38 = vsub.s32 2, %v3340_v44  ;;  %v2292_v39 = vsub.s32 3, %v3340_v44 }
 0x1e7   : > { %v2313_v40 = vld [vmem:[%s3642_s3] sm:$0xf] }
 0x1e8   : > { %v2281_v41 = vrot.slane %v2276_v35, %v2280_v36  ;;  %v2285_v42 = vrot.slane %v2276_v35, %v2284_v37  ;;  %v2289_v43 = vrot.slane %v2276_v35, %v2288_v38  ;;  %v2318_v45 = vrot.slane %v2313_v40, %v2280_v36 }
 0x1e9   : > { %v2293_v63 = vrot.slane %v2276_v35, %v2292_v39  ;;  %v2322_v4 = vrot.slane %v2313_v40, %v2284_v37  ;;  %v2326_v46 = vrot.slane %v2313_v40, %v2288_v38  ;;  %v2330_v15 = vrot.slane %v2313_v40, %v2292_v39 }
 0x1ea   : > { %v2294_v20 = vcombine.low %v2281_v41, %v2285_v42 }
 0x1eb   : > { %v2295_v47 = vcombine.low %v2289_v43, %v2293_v63  ;;  %v2331_v48 = vcombine.low %v2318_v45, %v2322_v4  ;;  %v2332_v49 = vcombine.low %v2326_v46, %v2330_v15 }
 0x1ec   : > { %v2302_v19 = vrot.slane %v2294_v20, %v2258_v22  ;;  %v2275_v52 = vld [vmem:[#allocation2] sm:$0xff] }
 0x1ed   : > { %v2309_v25 = vrot.slane %v2295_v47, %v2258_v22  ;;  %v2339_v51 = vrot.slane %v2331_v48, %v2258_v22  ;;  %v2346_v44 = vrot.slane %v2332_v49, %v2258_v22 }
 0x1ef   : > { %v2310_v53 = vcombine.low %v2302_v19, %v2309_v25  ;;  %v2347_v54 = vcombine.low %v2339_v51, %v2346_v44 }
 0x1f1   : > { %v2312_v55 = vmul.f32 %v2310_v53, %v2275_v52 }
 0x1f3   : > { %v2349_v56 = vadd.f32 %v2347_v54, %v2312_v55 }
 0x1f5   : > { %v2350_v0 = vmax.f32 %v2349_v56, 0.0 }
 0x1f7   : > { %v2352_v57 = vcombine.high %v2350_v0, %v2350_v0  ;;  %v2359_v31 = vrot.slane %v2350_v0, %v2258_v22 }
 0x1f9   : > { %v2366_v58 = vrot.slane %v2352_v57, %v2258_v22  ;;  %v2367_v59 = vcombine.high %v2359_v31, %v2359_v31 }
 0x1fb   : > { %v2368_v60 = vcombine.high %v2366_v58, %v2366_v58  ;;  %v2795_v61 = vpack.c.bf16 %v2367_v59, %v2359_v31 }
 0x1fd   : > { %v2796_v62 = vpack.c.bf16 %v2368_v60, %v2366_v58  ;;  %v2389_v1 = vrot.slane %v2795_v61, %v3348_v50 }
 0x1ff   : > { %v2396_v2 = vrot.slane %v2796_v62, %v3348_v50 }
 0x201   : > { %v2397_v3 = vcombine.low %v2389_v1, %v2396_v2 }
 0x203   : > { %2797 = vst.sshfl [vmem:[%s3643_s4] sm:$0x55 pattern:$0x73625140] %v2397_v3 }
 0x204 PF: > { %s14_s17 = sadd.s32 1, %s3237_s17   ;;  %s3644_s15 = smov %s3233_s16 }
 0x205   : > { %p11_p8 = scmp.ge.s32.totalorder %s14_s17, 5   ;;  %s3645_s16 = smov %s3647_s18 }
 0x207   :  { %13 = sbr.rel (!%p11_p8) target bundleno = 2 (0x2), region = 83 }

// kernel: fall_detection_forward.21
= control target key start
LH: loop header
LB: loop body
LE: loop exit
PB: predicated region body
PF: predicated region fallthrough
CT: control target
= control target key end

     0   :  { %v228_v1 = vmov 0.0   ;;  %vm229_vm0 = vmmov 0   ;;  %s292_s0 = inlined_call_operand.vmem [shape: bf16[2,128], index: 0, kind: input, shape index: {}]   ;;  %s293_s1 = inlined_call_operand.vmem [shape: bf16[128,2], index: 1, kind: input, shape index: {}]   ;;  %s294_s2 = inlined_call_operand.vmem [shape: f32[1,2], index: 2, kind: input, shape index: {}]   ;;  %s295_s3 = inlined_call_operand.vmem [shape: f32[1,2], index: 3, kind: input, shape index: {}]   ;;  %s296_s4 = inlined_call_operand.hbm [shape: f32[2,2], index: 4, kind: output, shape index: {}]  }
   0x1   :  { %v198_v0 = vld [vmem:[%s293_s1 + $0x38] sm:$0xff]   ;;  %175 = vmatprep.subr.bf16.mxu0 %v228_v1  ;;  %v199_v2 = vld [vmem:[%s293_s1 + $0x30] sm:$0xff]   ;;  %191 = vmatprep.mubr.msk.bf16.mxu0 %vm229_vm0, %v228_v1  ;;  %v200_v3 = vld [vmem:[%s293_s1 + $0x28] sm:$0xff]  }
   0x2   :  { %176 = vmatpush3.bf16.msra.mxu0 %v198_v0 }
   0x3   :  { %177 = vmatprep.subr.bf16.mxu0 %v228_v1 }
   0x6   :  { %178 = vmatpush3.bf16.msra.mxu0 %v199_v2 }
   0x7   :  { %179 = vmatprep.subr.bf16.mxu0 %v228_v1 }
   0x8   :  { %9 = vsyncpa [#allocation3], 0  ;;  %v201_v4 = vld [vmem:[%s293_s1 + $0x20] sm:$0xff]   ;;  %v202_v5 = vld [vmem:[%s293_s1 + $0x18] sm:$0xff]   ;;  %s230_s11 = smov [#allocation2]   ;;  %vm140_vm1 = vcmask 9216  }
   0x9   :  { %v203_v6 = vld [vmem:[%s293_s1 + $0x10] sm:$0xff]   ;;  %v204_v7 = vld [vmem:[%s293_s1 + $0x8] sm:$0xff]   ;;  %v205_v8 = vld [vmem:[%s293_s1] sm:$0xff]   ;;  %s148_s12 = sshll.u32 %s230_s11, 4  ;;  %s149_s12 = int_to_ptr.vmem [resolvable:$true] %s148_s12 }
   0xa   :  { %180 = vmatpush3.bf16.msra.mxu0 %v200_v3  ;;  %v19_v9 = vld [vmem:[%s292_s0] sm:$0x1]  ;;  %s206_s0 = scalar_lea.vmem %s149_s12, 32  ;;  %p211_p1 = scmp.lt.s32.totalorder %s149_s12, %s149_s12 }
   0xb   :  { %181 = vmatprep.subr.bf16.mxu0 %v228_v1  ;;  %v164_v10 = vld [vmem:[%s294_s2] ss:$0 sm:$0xff]  ;;  %p207_p0 = scmp.ne.s32.totalorder %s149_s12, %s206_s0  ;;  %p212_p2 = scmp.lt.s32.totalorder %s206_s0, %s206_s0 }
   0xc   :  { %v165_v12 = vld [vmem:[%s295_s3] ss:$0 sm:$0xff] }
   0xd   :  { %p213_p3 = por %p212_p2, %p211_p1 }
   0xe   :  { %182 = vmatpush3.bf16.msra.mxu0 %v201_v4 }
   0xf   :  { %183 = vmatprep.subr.bf16.mxu0 %v228_v1  ;;  %p214_p4 = pnand %p213_p3, %p207_p0 }
  0x12   :  { %184 = vmatpush3.bf16.msra.mxu0 %v202_v5 }
  0x13   :  { %185 = vmatprep.subr.bf16.mxu0 %v228_v1 }
  0x16   :  { %186 = vmatpush3.bf16.msra.mxu0 %v203_v6 }
  0x17   :  { %187 = vmatprep.subr.bf16.mxu0 %v228_v1 }
  0x1a   :  { %188 = vmatpush3.bf16.msra.mxu0 %v204_v7 }
  0x1b   :  { %189 = vmatprep.subr.bf16.mxu0 %v228_v1 }
  0x1e   :  { %190 = vmatpush3.bf16.msra.mxu0 %v205_v8 }
  0x21   :  { %192 = vmatmul.mubr.bf16.vlgmr.msra.gmra.mxu0 %v19_v9 }
  0xe1   :  { %v118_v11 = vpop.f32.mrf.mxu0 }
  0xe2   :  { %v131_v13 = vmul.f32 %v164_v10, %v118_v11 }
  0xe3   :  { %v193_v14 = vpop.f32.mrf.mxu0 }
  0xe4   :  { %v139_v15 = vadd.f32 %v165_v12, %v131_v13 }
  0xe5   :  { %v121_v16 = vpop.f32.mrf.mxu0 }
  0xe6   :  { %141 = vst.msk [vmem:[#allocation2] sm:$0x3] %vm140_vm1, %v139_v15 }
  0xe7   :  { %v194_v17 = vpop.f32.mrf.mxu0 }
  0xe8   :  { %217 = shalt.err (!%p214_p4)
}
  0xe9   :  { %151 = dma.vmem_to_hbm [thread:$0]  %s149_s12, 32, %s296_s4, [#allocation3]  }
  0xea   :  { %226 = dma.done.wait [#allocation3], 32  }
  0xeb   :  { %227 = vsyncadd [#allocation3], 4294967264 }
  0xec   :  { %155 = vsyncpa [#allocation3], 1 }

</bundles_post_ra>
